<compile_context>
chip_gen: v7x
topology: tpu7x:2x2x1
jax: 0.10.0
libtpu: 0.0.40
codegen_flags: <defaults>
</compile_context>

<pallas_src>
import jax
import jax.numpy as jnp
from jax.experimental import pallas as pl
from jax.experimental.pallas import tpu as pltpu


def _round_up(x, m):
    return ((x + m - 1) // m) * m


# ----------------------------------------------------------------------------
# Pallas kernels
# ----------------------------------------------------------------------------

def _conv_mm_relu_kernel(x_ref, w_ref, b_ref, o_ref):
    # x: (tm, K) im2col patch tile, w: (K, Cout), b: (1, Cout)
    acc = jnp.dot(x_ref[...], w_ref[...], preferred_element_type=jnp.float32)
    o_ref[...] = jnp.maximum(acc + b_ref[...], 0.0)


_CONV_ROW_TILE = 1024


def conv_gemm_relu(patches, w, b):
    """Row-tiled GEMM + bias + ReLU.  patches: (M, K) f32, w: (Kpad, Cout) f32."""
    m, k = patches.shape
    kp, cout = w.shape
    if kp != k:                                   # lane-align K (e.g. 576 -> 640)
        patches = jnp.pad(patches, ((0, 0), (0, kp - k)))
    tm = min(_CONV_ROW_TILE, _round_up(m, 8))
    m_pad = _round_up(m, tm)
    if m_pad != m:
        patches = jnp.pad(patches, ((0, m_pad - m), (0, 0)))
    out = pl.pallas_call(
        _conv_mm_relu_kernel,
        out_shape=jax.ShapeDtypeStruct((m_pad, cout), jnp.float32),
        grid_spec=pltpu.PrefetchScalarGridSpec(
            num_scalar_prefetch=0,
            grid=(m_pad // tm,),
            in_specs=[
                pl.BlockSpec((tm, kp), lambda i: (i, 0)),
                pl.BlockSpec((kp, cout), lambda i: (0, 0)),
                pl.BlockSpec((1, cout), lambda i: (0, 0)),
            ],
            out_specs=pl.BlockSpec((tm, cout), lambda i: (i, 0)),
        ),
        compiler_params=pltpu.CompilerParams(
            dimension_semantics=("parallel",)),
    )(patches, w, b.reshape(1, cout))
    return out[:m]


def _dueling_heads_kernel(f_ref, w1_ref, b1_ref, w2_ref, b2_ref, q_ref):
    # f: (tr, 3200) bf16, w1: (3200, 1024) bf16 = [val1 | adv1],
    # w2: (1024, 1+A) bf16 block-diag([val2, adv2]), biases f32.
    f = f_ref[...]
    h = jnp.dot(f, w1_ref[...], preferred_element_type=jnp.float32)
    h = jnp.maximum(h + b1_ref[...], 0.0)                           # (tr, 1024)
    o2 = jnp.dot(h.astype(jnp.bfloat16), w2_ref[...],
                 preferred_element_type=jnp.float32) + b2_ref[...]  # (tr, 1+A)
    val = o2[:, 0:1]
    adv = o2[:, 1:]
    adv_ave = jnp.mean(adv, axis=1, keepdims=True)
    q_ref[...] = adv + val - adv_ave


_HEAD_ROW_TILE = 256


def dueling_heads(feat, w1, b1, w2, b2):
    """feat: (N, 3200) bf16 -> q: (N, A) f32 (fused val/adv dueling heads)."""
    n, k = feat.shape
    na = w2.shape[1] - 1
    tr = min(_HEAD_ROW_TILE, _round_up(n, 8))     # sublane-aligned row tile
    n_pad = _round_up(n, tr)
    if n_pad != n:
        feat = jnp.pad(feat, ((0, n_pad - n), (0, 0)))
    out = pl.pallas_call(
        _dueling_heads_kernel,
        out_shape=jax.ShapeDtypeStruct((n_pad, na), jnp.float32),
        grid_spec=pltpu.PrefetchScalarGridSpec(
            num_scalar_prefetch=0,
            grid=(n_pad // tr,),
            in_specs=[
                pl.BlockSpec((tr, k), lambda i: (i, 0)),
                pl.BlockSpec(w1.shape, lambda i: (0, 0)),
                pl.BlockSpec(b1.shape, lambda i: (0, 0)),
                pl.BlockSpec(w2.shape, lambda i: (0, 0)),
                pl.BlockSpec(b2.shape, lambda i: (0, 0)),
            ],
            out_specs=pl.BlockSpec((tr, na), lambda i: (i, 0)),
        ),
        compiler_params=pltpu.CompilerParams(
            dimension_semantics=("parallel",),
            vmem_limit_bytes=48 * 1024 * 1024),   # < 64 MiB v7x physical VMEM
    )(feat, w1, b1, w2, b2)
    return out[:n]


# ----------------------------------------------------------------------------
# Glue: NHWC im2col (layout plumbing, no compute)
# ----------------------------------------------------------------------------

def im2col_nhwc(x, kh, kw, stride):
    """x: (N, H, W, C) -> (N*Hout*Wout, kh*kw*C) patches, row order (kh, kw, c)."""
    n, h, w, c = x.shape
    hout = (h - kh) // stride + 1
    wout = (w - kw) // stride + 1
    cols = []
    for i in range(kh):
        for j in range(kw):
            cols.append(x[:, i:i + stride * hout:stride,
                             j:j + stride * wout:stride, :])      # (N,Hout,Wout,C)
    patches = jnp.stack(cols, axis=3)                             # (N,Hout,Wout,kh*kw,C)
    return patches.reshape(n * hout * wout, kh * kw * c), hout, wout


# ----------------------------------------------------------------------------
# Deterministic parameter construction
# ----------------------------------------------------------------------------

K_FEAT = 3136          # 64 * 7 * 7
K_PAD = 3200           # 25 * 128 (lane-aligned K for the head GEMM)


def make_conv_params(key, cout, cin, kh, kw):
    kw_key, kb_key = jax.random.split(key)
    fan_in = cin * kh * kw
    bound = 1.0 / (fan_in ** 0.5)
    w = jax.random.uniform(kw_key, (cout, cin, kh, kw), jnp.float32, -bound, bound)
    b = jax.random.uniform(kb_key, (cout,), jnp.float32, -bound, bound)
    # PyTorch (Cout, Cin, kh, kw) -> NHWC im2col GEMM weight (kh*kw*Cin, Cout),
    # with K zero-padded to a multiple of 128 for lane-aligned MXU passes.
    w_mat = jnp.transpose(w, (2, 3, 1, 0)).reshape(kh * kw * cin, cout)
    k_pad = _round_up(kh * kw * cin, 128)
    if k_pad != kh * kw * cin:
        w_mat = jnp.pad(w_mat, ((0, k_pad - kh * kw * cin), (0, 0)))
    return w_mat, b


def make_noisy_linear_params(key, in_features, out_features, noisy_std=0.5):
    """Training-mode effective NoisyLinear params, PyTorch layout (out, in)."""
    k_mu_w, k_mu_b, k_eps_w, k_eps_b = jax.random.split(key, 4)
    bound = 1.0 / (in_features ** 0.5)
    mu_w = jax.random.uniform(k_mu_w, (out_features, in_features), jnp.float32,
                              -bound, bound)
    mu_b = jax.random.uniform(k_mu_b, (out_features,), jnp.float32, -bound, bound)
    sigma = noisy_std / (in_features ** 0.5)
    eps_w = jax.random.normal(k_eps_w, (out_features, in_features), jnp.float32)
    eps_b = jax.random.normal(k_eps_b, (out_features,), jnp.float32)
    return mu_w + sigma * eps_w, mu_b + sigma * eps_b


def _chw_rows_to_hwc_rows(w_out_in):
    """Permute layer-1 input columns from NCHW flatten (c,h,w) to NHWC (h,w,c)."""
    out = w_out_in.shape[0]
    w = w_out_in.reshape(out, 64, 7, 7).transpose(0, 2, 3, 1)
    return w.reshape(out, K_FEAT)


def init_params(key, num_actions):
    keys = jax.random.split(key, 7)
    p = {}
    c1w, c1b = make_conv_params(keys[0], 32, 4, 8, 8)
    # Fold the forward's x/255 scaling into the first conv's GEMM weight
    # (bias unchanged) -> no elementwise pass over the input at runtime.
    p["conv1_w"], p["conv1_b"] = c1w * (1.0 / 255.0), c1b
    p["conv2_w"], p["conv2_b"] = make_conv_params(keys[1], 64, 32, 4, 4)
    p["conv3_w"], p["conv3_b"] = make_conv_params(keys[2], 64, 64, 3, 3)

    wv1, bv1 = make_noisy_linear_params(keys[3], K_FEAT, 512)
    wv2, bv2 = make_noisy_linear_params(keys[4], 512, 1)
    wa1, ba1 = make_noisy_linear_params(keys[5], K_FEAT, 512)
    wa2, ba2 = make_noisy_linear_params(keys[6], 512, num_actions)

    # Layer-1 fusion: [val1 | adv1] -> (3136, 1024), rows permuted to NHWC
    # flatten order, K zero-padded to 3200, stored bf16.
    wv1 = _chw_rows_to_hwc_rows(wv1)
    wa1 = _chw_rows_to_hwc_rows(wa1)
    w1 = jnp.concatenate([wv1.T, wa1.T], axis=1)                  # (3136, 1024)
    w1 = jnp.pad(w1, ((0, K_PAD - K_FEAT), (0, 0)))
    p["head_w1"] = w1.astype(jnp.bfloat16)
    p["head_b1"] = jnp.concatenate([bv1, ba1]).reshape(1, 1024)

    # Layer-2 fusion: block-diagonal (1024, 1+A) so one GEMM emits [val | adv].
    w2 = jnp.zeros((1024, 1 + num_actions), jnp.float32)
    w2 = w2.at[:512, 0:1].set(wv2.T)
    w2 = w2.at[512:, 1:].set(wa2.T)
    p["head_w2"] = w2.astype(jnp.bfloat16)
    p["head_b2"] = jnp.concatenate([bv2, ba2]).reshape(1, 1 + num_actions)
    return p


# ----------------------------------------------------------------------------
# Forward pass
# ----------------------------------------------------------------------------

def dueling_q_forward(params, x):
    """x: (N, 4, 84, 84) float32 in [0, 255] (NCHW, like PyTorch)."""
    n = x.shape[0]
    h = jnp.transpose(x.astype(jnp.float32), (0, 2, 3, 1))        # NCHW -> NHWC once
    # (the /255 normalization is folded into conv1_w at init)

    # Conv2d(4, 32, 8, stride=4) + ReLU
    patches, ho, wo = im2col_nhwc(h, 8, 8, 4)
    y = conv_gemm_relu(patches, params["conv1_w"], params["conv1_b"])
    h = y.reshape(n, ho, wo, 32)                                  # stays NHWC

    # Conv2d(32, 64, 4, stride=2) + ReLU
    patches, ho, wo = im2col_nhwc(h, 4, 4, 2)
    y = conv_gemm_relu(patches, params["conv2_w"], params["conv2_b"])
    h = y.reshape(n, ho, wo, 64)

    # Conv2d(64, 64, 3, stride=1) + ReLU
    patches, ho, wo = im2col_nhwc(h, 3, 3, 1)
    y = conv_gemm_relu(patches, params["conv3_w"], params["conv3_b"])

    # NHWC flatten is free; head weight rows were pre-permuted to match.
    feat = y.reshape(n, ho * wo * 64).astype(jnp.bfloat16)
    feat = jnp.pad(feat, ((0, 0), (0, K_PAD - K_FEAT)))           # K -> 3200

    # Fused dueling heads: val, adv, and adv + val - mean(adv)
    return dueling_heads(feat, params["head_w1"], params["head_b1"],
                         params["head_w2"], params["head_b2"])


# ----------------------------------------------------------------------------
# Main
# ----------------------------------------------------------------------------

if __name__ == "__main__":
    num_actions = 6          # e.g. Atari Pong action space
    batch = 2

    key = jax.random.PRNGKey(0)
    k_params, k_x = jax.random.split(key)

    params = init_params(k_params, num_actions)
    # Atari frame stack: (N, 4, 84, 84), uint8-like values in [0, 255]
    x = jax.random.uniform(k_x, (batch, 4, 84, 84), jnp.float32, 0.0, 255.0)

    q = jax.jit(dueling_q_forward)(params, x)
    q = jax.block_until_ready(q)

    assert q.shape == (batch, num_actions), q.shape
    assert q.dtype == jnp.float32
    assert bool(jnp.all(jnp.isfinite(q)))
    print("KERNEL_OK")
</pallas_src>

<mosaic_0001>
module attributes {stable_mosaic.version = 11 : i64} {
  func.func @_conv_mm_relu_kernel(%arg0: i32, %arg1: memref<800x256xf32, #tpu.memory_space<vmem>>, %arg2: memref<256x32xf32, #tpu.memory_space<vmem>>, %arg3: memref<1x32xf32, #tpu.memory_space<vmem>>, %arg4: memref<800x32xf32, #tpu.memory_space<vmem>>) attributes {dimension_semantics = [#tpu.dimension_semantics<parallel>], iteration_bounds = array<i64: 1>, scalar_prefetch = 0 : i64, scratch_operands = 0 : i64, tpu.core_type = #tpu.core_type<tc>, window_params = [{transform_indices = @transform_0, window_bounds = array<i64: 800, 256>}, {pipeline_mode = #tpu.pipeline_mode<synchronous>, transform_indices = @transform_1, window_bounds = array<i64: 256, 32>}, {pipeline_mode = #tpu.pipeline_mode<synchronous>, transform_indices = @transform_2, window_bounds = array<i64: 1, 32>}, {transform_indices = @transform_3, window_bounds = array<i64: 800, 32>}]} {
    %c0 = arith.constant 0 : index
    %c0_0 = arith.constant 0 : index
    %0 = vector.load %arg1[%c0, %c0_0] : memref<800x256xf32, #tpu.memory_space<vmem>>, vector<800x256xf32>
    %c0_1 = arith.constant 0 : index
    %c0_2 = arith.constant 0 : index
    %1 = vector.load %arg2[%c0_1, %c0_2] : memref<256x32xf32, #tpu.memory_space<vmem>>, vector<256x32xf32>
    %cst = arith.constant dense<0.000000e+00> : vector<800x32xf32>
    %2 = tpu.matmul %0, %1, %cst {dimension_numbers = #tpu.dot_dimension_numbers<[1], [0], [0], [1], [0, 0, 1, 1], [], []>} : vector<800x256xf32>, vector<256x32xf32>, vector<800x32xf32> -> vector<800x32xf32>
    %c0_3 = arith.constant 0 : index
    %c0_4 = arith.constant 0 : index
    %3 = vector.load %arg3[%c0_3, %c0_4] : memref<1x32xf32, #tpu.memory_space<vmem>>, vector<1x32xf32>
    %4 = vector.broadcast %3 : vector<1x32xf32> to vector<800x32xf32>
    %5 = arith.addf %2, %4 : vector<800x32xf32>
    %cst_5 = arith.constant 0.000000e+00 : f32
    %6 = vector.broadcast %cst_5 : f32 to vector<800x32xf32>
    %7 = arith.maximumf %5, %6 : vector<800x32xf32>
    %c0_6 = arith.constant 0 : index
    %c0_7 = arith.constant 0 : index
    %8 = vector.load %arg4[%c0_6, %c0_7] : memref<800x32xf32, #tpu.memory_space<vmem>>, vector<800x32xf32>
    tpu.vector_store %arg4[%c0_6, %c0_7], %7 {strides = array<i32>} : memref<800x32xf32, #tpu.memory_space<vmem>>, vector<800x32xf32>,
    return
  }
  func.func @transform_0(%arg0: i32) -> (i32, i32) {
    %c0_i32 = arith.constant 0 : i32
    %c0_i32_0 = arith.constant 0 : i32
    return %arg0, %c0_i32 : i32, i32
  }
  func.func @transform_1(%arg0: i32) -> (i32, i32) {
    %c0_i32 = arith.constant 0 : i32
    %c0_i32_0 = arith.constant 0 : i32
    %c0_i32_1 = arith.constant 0 : i32
    return %c0_i32, %c0_i32_0 : i32, i32
  }
  func.func @transform_2(%arg0: i32) -> (i32, i32) {
    %c0_i32 = arith.constant 0 : i32
    %c0_i32_0 = arith.constant 0 : i32
    %c0_i32_1 = arith.constant 0 : i32
    return %c0_i32, %c0_i32_0 : i32, i32
  }
  func.func @transform_3(%arg0: i32) -> (i32, i32) {
    %c0_i32 = arith.constant 0 : i32
    %c0_i32_0 = arith.constant 0 : i32
    return %arg0, %c0_i32 : i32, i32
  }
}

module attributes {stable_mosaic.version = 11 : i64} {
  func.func @_conv_mm_relu_kernel(%arg0: i32, %arg1: memref<168x512xf32, #tpu.memory_space<vmem>>, %arg2: memref<512x64xf32, #tpu.memory_space<vmem>>, %arg3: memref<1x64xf32, #tpu.memory_space<vmem>>, %arg4: memref<168x64xf32, #tpu.memory_space<vmem>>) attributes {dimension_semantics = [#tpu.dimension_semantics<parallel>], iteration_bounds = array<i64: 1>, scalar_prefetch = 0 : i64, scratch_operands = 0 : i64, tpu.core_type = #tpu.core_type<tc>, window_params = [{transform_indices = @transform_0, window_bounds = array<i64: 168, 512>}, {pipeline_mode = #tpu.pipeline_mode<synchronous>, transform_indices = @transform_1, window_bounds = array<i64: 512, 64>}, {pipeline_mode = #tpu.pipeline_mode<synchronous>, transform_indices = @transform_2, window_bounds = array<i64: 1, 64>}, {transform_indices = @transform_3, window_bounds = array<i64: 168, 64>}]} {
    %c0 = arith.constant 0 : index
    %c0_0 = arith.constant 0 : index
    %0 = vector.load %arg1[%c0, %c0_0] : memref<168x512xf32, #tpu.memory_space<vmem>>, vector<168x512xf32>
    %c0_1 = arith.constant 0 : index
    %c0_2 = arith.constant 0 : index
    %1 = vector.load %arg2[%c0_1, %c0_2] : memref<512x64xf32, #tpu.memory_space<vmem>>, vector<512x64xf32>
    %cst = arith.constant dense<0.000000e+00> : vector<168x64xf32>
    %2 = tpu.matmul %0, %1, %cst {dimension_numbers = #tpu.dot_dimension_numbers<[1], [0], [0], [1], [0, 0, 1, 1], [], []>} : vector<168x512xf32>, vector<512x64xf32>, vector<168x64xf32> -> vector<168x64xf32>
    %c0_3 = arith.constant 0 : index
    %c0_4 = arith.constant 0 : index
    %3 = vector.load %arg3[%c0_3, %c0_4] : memref<1x64xf32, #tpu.memory_space<vmem>>, vector<1x64xf32>
    %4 = vector.broadcast %3 : vector<1x64xf32> to vector<168x64xf32>
    %5 = arith.addf %2, %4 : vector<168x64xf32>
    %cst_5 = arith.constant 0.000000e+00 : f32
    %6 = vector.broadcast %cst_5 : f32 to vector<168x64xf32>
    %7 = arith.maximumf %5, %6 : vector<168x64xf32>
    %c0_6 = arith.constant 0 : index
    %c0_7 = arith.constant 0 : index
    %8 = vector.load %arg4[%c0_6, %c0_7] : memref<168x64xf32, #tpu.memory_space<vmem>>, vector<168x64xf32>
    tpu.vector_store %arg4[%c0_6, %c0_7], %7 {strides = array<i32>} : memref<168x64xf32, #tpu.memory_space<vmem>>, vector<168x64xf32>,
    return
  }
  func.func @transform_0(%arg0: i32) -> (i32, i32) {
    %c0_i32 = arith.constant 0 : i32
    %c0_i32_0 = arith.constant 0 : i32
    return %arg0, %c0_i32 : i32, i32
  }
  func.func @transform_1(%arg0: i32) -> (i32, i32) {
    %c0_i32 = arith.constant 0 : i32
    %c0_i32_0 = arith.constant 0 : i32
    %c0_i32_1 = arith.constant 0 : i32
    return %c0_i32, %c0_i32_0 : i32, i32
  }
  func.func @transform_2(%arg0: i32) -> (i32, i32) {
    %c0_i32 = arith.constant 0 : i32
    %c0_i32_0 = arith.constant 0 : i32
    %c0_i32_1 = arith.constant 0 : i32
    return %c0_i32, %c0_i32_0 : i32, i32
  }
  func.func @transform_3(%arg0: i32) -> (i32, i32) {
    %c0_i32 = arith.constant 0 : i32
    %c0_i32_0 = arith.constant 0 : i32
    return %arg0, %c0_i32 : i32, i32
  }
}

module attributes {stable_mosaic.version = 11 : i64} {
  func.func @_conv_mm_relu_kernel(%arg0: i32, %arg1: memref<104x640xf32, #tpu.memory_space<vmem>>, %arg2: memref<640x64xf32, #tpu.memory_space<vmem>>, %arg3: memref<1x64xf32, #tpu.memory_space<vmem>>, %arg4: memref<104x64xf32, #tpu.memory_space<vmem>>) attributes {dimension_semantics = [#tpu.dimension_semantics<parallel>], iteration_bounds = array<i64: 1>, scalar_prefetch = 0 : i64, scratch_operands = 0 : i64, tpu.core_type = #tpu.core_type<tc>, window_params = [{transform_indices = @transform_0, window_bounds = array<i64: 104, 640>}, {pipeline_mode = #tpu.pipeline_mode<synchronous>, transform_indices = @transform_1, window_bounds = array<i64: 640, 64>}, {pipeline_mode = #tpu.pipeline_mode<synchronous>, transform_indices = @transform_2, window_bounds = array<i64: 1, 64>}, {transform_indices = @transform_3, window_bounds = array<i64: 104, 64>}]} {
    %c0 = arith.constant 0 : index
    %c0_0 = arith.constant 0 : index
    %0 = vector.load %arg1[%c0, %c0_0] : memref<104x640xf32, #tpu.memory_space<vmem>>, vector<104x640xf32>
    %c0_1 = arith.constant 0 : index
    %c0_2 = arith.constant 0 : index
    %1 = vector.load %arg2[%c0_1, %c0_2] : memref<640x64xf32, #tpu.memory_space<vmem>>, vector<640x64xf32>
    %cst = arith.constant dense<0.000000e+00> : vector<104x64xf32>
    %2 = tpu.matmul %0, %1, %cst {dimension_numbers = #tpu.dot_dimension_numbers<[1], [0], [0], [1], [0, 0, 1, 1], [], []>} : vector<104x640xf32>, vector<640x64xf32>, vector<104x64xf32> -> vector<104x64xf32>
    %c0_3 = arith.constant 0 : index
    %c0_4 = arith.constant 0 : index
    %3 = vector.load %arg3[%c0_3, %c0_4] : memref<1x64xf32, #tpu.memory_space<vmem>>, vector<1x64xf32>
    %4 = vector.broadcast %3 : vector<1x64xf32> to vector<104x64xf32>
    %5 = arith.addf %2, %4 : vector<104x64xf32>
    %cst_5 = arith.constant 0.000000e+00 : f32
    %6 = vector.broadcast %cst_5 : f32 to vector<104x64xf32>
    %7 = arith.maximumf %5, %6 : vector<104x64xf32>
    %c0_6 = arith.constant 0 : index
    %c0_7 = arith.constant 0 : index
    %8 = vector.load %arg4[%c0_6, %c0_7] : memref<104x64xf32, #tpu.memory_space<vmem>>, vector<104x64xf32>
    tpu.vector_store %arg4[%c0_6, %c0_7], %7 {strides = array<i32>} : memref<104x64xf32, #tpu.memory_space<vmem>>, vector<104x64xf32>,
    return
  }
  func.func @transform_0(%arg0: i32) -> (i32, i32) {
    %c0_i32 = arith.constant 0 : i32
    %c0_i32_0 = arith.constant 0 : i32
    return %arg0, %c0_i32 : i32, i32
  }
  func.func @transform_1(%arg0: i32) -> (i32, i32) {
    %c0_i32 = arith.constant 0 : i32
    %c0_i32_0 = arith.constant 0 : i32
    %c0_i32_1 = arith.constant 0 : i32
    return %c0_i32, %c0_i32_0 : i32, i32
  }
  func.func @transform_2(%arg0: i32) -> (i32, i32) {
    %c0_i32 = arith.constant 0 : i32
    %c0_i32_0 = arith.constant 0 : i32
    %c0_i32_1 = arith.constant 0 : i32
    return %c0_i32, %c0_i32_0 : i32, i32
  }
  func.func @transform_3(%arg0: i32) -> (i32, i32) {
    %c0_i32 = arith.constant 0 : i32
    %c0_i32_0 = arith.constant 0 : i32
    return %arg0, %c0_i32 : i32, i32
  }
}

module attributes {stable_mosaic.version = 11 : i64} {
  func.func @_dueling_heads_kernel(%arg0: i32, %arg1: memref<8x3200xbf16, #tpu.memory_space<vmem>>, %arg2: memref<3200x1024xbf16, #tpu.memory_space<vmem>>, %arg3: memref<1x1024xf32, #tpu.memory_space<vmem>>, %arg4: memref<1024x7xbf16, #tpu.memory_space<vmem>>, %arg5: memref<1x7xf32, #tpu.memory_space<vmem>>, %arg6: memref<8x6xf32, #tpu.memory_space<vmem>>) attributes {dimension_semantics = [#tpu.dimension_semantics<parallel>], iteration_bounds = array<i64: 1>, scalar_prefetch = 0 : i64, scratch_operands = 0 : i64, tpu.core_type = #tpu.core_type<tc>, window_params = [{transform_indices = @transform_0, window_bounds = array<i64: 8, 3200>}, {pipeline_mode = #tpu.pipeline_mode<synchronous>, transform_indices = @transform_1, window_bounds = array<i64: 3200, 1024>}, {pipeline_mode = #tpu.pipeline_mode<synchronous>, transform_indices = @transform_2, window_bounds = array<i64: 1, 1024>}, {pipeline_mode = #tpu.pipeline_mode<synchronous>, transform_indices = @transform_3, window_bounds = array<i64: 1024, 7>}, {pipeline_mode = #tpu.pipeline_mode<synchronous>, transform_indices = @transform_4, window_bounds = array<i64: 1, 7>}, {transform_indices = @transform_5, window_bounds = array<i64: 8, 6>}]} {
    %c0 = arith.constant 0 : index
    %c0_0 = arith.constant 0 : index
    %0 = vector.load %arg1[%c0, %c0_0] : memref<8x3200xbf16, #tpu.memory_space<vmem>>, vector<8x3200xbf16>
    %c0_1 = arith.constant 0 : index
    %c0_2 = arith.constant 0 : index
    %1 = vector.load %arg2[%c0_1, %c0_2] : memref<3200x1024xbf16, #tpu.memory_space<vmem>>, vector<3200x1024xbf16>
    %cst = arith.constant dense<0.000000e+00> : vector<8x1024xf32>
    %2 = tpu.matmul %0, %1, %cst {dimension_numbers = #tpu.dot_dimension_numbers<[1], [0], [0], [1], [0, 0, 1, 1], [], []>} : vector<8x3200xbf16>, vector<3200x1024xbf16>, vector<8x1024xf32> -> vector<8x1024xf32>
    %c0_3 = arith.constant 0 : index
    %c0_4 = arith.constant 0 : index
    %3 = vector.load %arg3[%c0_3, %c0_4] : memref<1x1024xf32, #tpu.memory_space<vmem>>, vector<1x1024xf32>
    %4 = vector.broadcast %3 : vector<1x1024xf32> to vector<8x1024xf32>
    %5 = arith.addf %2, %4 : vector<8x1024xf32>
    %cst_5 = arith.constant 0.000000e+00 : f32
    %6 = vector.broadcast %cst_5 : f32 to vector<8x1024xf32>
    %7 = arith.maximumf %5, %6 : vector<8x1024xf32>
    %8 = arith.truncf %7 : vector<8x1024xf32> to vector<8x1024xbf16>
    %c0_6 = arith.constant 0 : index
    %c0_7 = arith.constant 0 : index
    %9 = vector.load %arg4[%c0_6, %c0_7] : memref<1024x7xbf16, #tpu.memory_space<vmem>>, vector<1024x7xbf16>
    %cst_8 = arith.constant dense<0.000000e+00> : vector<8x7xf32>
    %10 = tpu.matmul %8, %9, %cst_8 {dimension_numbers = #tpu.dot_dimension_numbers<[1], [0], [0], [1], [0, 0, 1, 1], [], []>} : vector<8x1024xbf16>, vector<1024x7xbf16>, vector<8x7xf32> -> vector<8x7xf32>
    %c0_9 = arith.constant 0 : index
    %c0_10 = arith.constant 0 : index
    %11 = vector.load %arg5[%c0_9, %c0_10] : memref<1x7xf32, #tpu.memory_space<vmem>>, vector<1x7xf32>
    %12 = vector.broadcast %11 : vector<1x7xf32> to vector<8x7xf32>
    %13 = arith.addf %10, %12 : vector<8x7xf32>
    %14 = vector.extract_strided_slice %13 {offsets = [0, 0], sizes = [8, 1], strides = [1, 1]} : vector<8x7xf32> to vector<8x1xf32>
    %15 = vector.extract_strided_slice %13 {offsets = [0, 1], sizes = [8, 6], strides = [1, 1]} : vector<8x7xf32> to vector<8x6xf32>
    %cst_11 = arith.constant dense<0.000000e+00> : vector<8xf32>
    %16 = vector.multi_reduction <add>, %15, %cst_11 [1] : vector<8x6xf32> to vector<8xf32>
    %17 = vector.shape_cast %16 : vector<8xf32> to vector<8x1xf32>
    %cst_12 = arith.constant 6.000000e+00 : f32
    %18 = vector.broadcast %cst_12 : f32 to vector<8x1xf32>
    %19 = arith.divf %17, %18 : vector<8x1xf32>
    %20 = vector.broadcast %14 : vector<8x1xf32> to vector<8x6xf32>
    %21 = arith.addf %15, %20 : vector<8x6xf32>
    %22 = vector.broadcast %19 : vector<8x1xf32> to vector<8x6xf32>
    %23 = arith.subf %21, %22 : vector<8x6xf32>
    %c0_13 = arith.constant 0 : index
    %c0_14 = arith.constant 0 : index
    %24 = vector.load %arg6[%c0_13, %c0_14] : memref<8x6xf32, #tpu.memory_space<vmem>>, vector<8x6xf32>
    tpu.vector_store %arg6[%c0_13, %c0_14], %23 {strides = array<i32>} : memref<8x6xf32, #tpu.memory_space<vmem>>, vector<8x6xf32>,
    return
  }
  func.func @transform_0(%arg0: i32) -> (i32, i32) {
    %c0_i32 = arith.constant 0 : i32
    %c0_i32_0 = arith.constant 0 : i32
    return %arg0, %c0_i32 : i32, i32
  }
  func.func @transform_1(%arg0: i32) -> (i32, i32) {
    %c0_i32 = arith.constant 0 : i32
    %c0_i32_0 = arith.constant 0 : i32
    %c0_i32_1 = arith.constant 0 : i32
    return %c0_i32, %c0_i32_0 : i32, i32
  }
  func.func @transform_2(%arg0: i32) -> (i32, i32) {
    %c0_i32 = arith.constant 0 : i32
    %c0_i32_0 = arith.constant 0 : i32
    %c0_i32_1 = arith.constant 0 : i32
    return %c0_i32, %c0_i32_0 : i32, i32
  }
  func.func @transform_3(%arg0: i32) -> (i32, i32) {
    %c0_i32 = arith.constant 0 : i32
    %c0_i32_0 = arith.constant 0 : i32
    %c0_i32_1 = arith.constant 0 : i32
    return %c0_i32, %c0_i32_0 : i32, i32
  }
  func.func @transform_4(%arg0: i32) -> (i32, i32) {
    %c0_i32 = arith.constant 0 : i32
    %c0_i32_0 = arith.constant 0 : i32
    %c0_i32_1 = arith.constant 0 : i32
    return %c0_i32, %c0_i32_0 : i32, i32
  }
  func.func @transform_5(%arg0: i32) -> (i32, i32) {
    %c0_i32 = arith.constant 0 : i32
    %c0_i32_0 = arith.constant 0 : i32
    return %arg0, %c0_i32 : i32, i32
  }
}

</mosaic_0001>

<bundles_post_ra>
// kernel: dueling_q_forward.4
= control target key start
LH: loop header
LB: loop body
LE: loop exit
PB: predicated region body
PF: predicated region fallthrough
CT: control target
= control target key end

     0   :  { %v1105_v0 = vmov 0.0|0.0   ;;  %vm918_vm0 = vcmask 261120   ;;  %s2359_s1 = inlined_call_operand.vmem [shape: f32[256,32], index: 1, kind: input, shape index: {}]   ;;  %s2360_s0 = inlined_call_operand.vmem [shape: f32[800,256], index: 0, kind: input, shape index: {}]   ;;  %s2361_s2 = inlined_call_operand.vmem [shape: f32[1,32], index: 2, kind: input, shape index: {}]   ;;  %s2362_s3 = inlined_call_operand.vmem [shape: f32[800,32], index: 3, kind: output, shape index: {}]  }
   0x1   :  { %1024 = vmatprep.subr.bf16.mxu0 %v1105_v0  ;;  %1072 = vmatprep.subr.bf16.mxu1 %v1105_v0  ;;  %v214_v1 = vld [vmem:[%s2359_s1] sm:$0xff]  ;;  %v215_v2 = vld [vmem:[%s2359_s1 + $0x8] sm:$0xff]  ;;  %v216_v3 = vld [vmem:[%s2359_s1 + $0x10] sm:$0xff] }
   0x2   :  { %v1025_v4 = vpack.c.bf16 %v215_v2, %v214_v1  ;;  %v217_v5 = vld [vmem:[%s2359_s1 + $0x18] sm:$0xff]  ;;  %v218_v7 = vld [vmem:[%s2359_s1 + $0x20] sm:$0xff]  ;;  %v219_v8 = vld [vmem:[%s2359_s1 + $0x28] sm:$0xff] }
   0x3   :  { %v1028_v6 = vpack.c.bf16 %v217_v5, %v216_v3  ;;  %v1031_v9 = vpack.c.bf16 %v219_v8, %v218_v7  ;;  %v220_v10 = vld [vmem:[%s2359_s1 + $0x30] sm:$0xff]  ;;  %v221_v11 = vld [vmem:[%s2359_s1 + $0x38] sm:$0xff]  ;;  %v15_v12 = vld [vmem:[%s2360_s0 + $0x8] sm:$0xff] }
   0x4   :  { %1026 = vmatpush1.bf16.msra.mxu0 %v1025_v4  ;;  %1088 = vmatpush1.bf16.msra.mxu1 %v1025_v4  ;;  %v1034_v13 = vpack.c.bf16 %v221_v11, %v220_v10  ;;  %v115_v14 = vld [vmem:[%s2360_s0 + $0x328] sm:$0xff]  ;;  %v222_v15 = vld [vmem:[%s2359_s1 + $0x40] sm:$0xff]  ;;  %v224_v18 = vld [vmem:[%s2359_s1 + $0x50] sm:$0xff] }
   0x5   :  { %1027 = vmatprep.subr.bf16.mxu0 %v1105_v0  ;;  %1073 = vmatprep.subr.bf16.mxu1 %v1105_v0  ;;  %v223_v16 = vld [vmem:[%s2359_s1 + $0x48] sm:$0xff]  ;;  %v225_v19 = vld [vmem:[%s2359_s1 + $0x58] sm:$0xff]  ;;  %v226_v21 = vld [vmem:[%s2359_s1 + $0x60] sm:$0xff] }
   0x6   :  { %317 = vmatprep.mubr.f32.mxu0 %v15_v12  ;;  %567 = vmatprep.mubr.f32.mxu1 %v115_v14  ;;  %v1037_v17 = vpack.c.bf16 %v223_v16, %v222_v15  ;;  %v1040_v20 = vpack.c.bf16 %v225_v19, %v224_v18  ;;  %v227_v22 = vld [vmem:[%s2359_s1 + $0x68] sm:$0xff]  ;;  %v228_v24 = vld [vmem:[%s2359_s1 + $0x70] sm:$0xff]  ;;  %v229_v25 = vld [vmem:[%s2359_s1 + $0x78] sm:$0xff] }
   0x7   :  { %v1043_v23 = vpack.c.bf16 %v227_v22, %v226_v21  ;;  %v1046_v26 = vpack.c.bf16 %v229_v25, %v228_v24  ;;  %v230_v27 = vld [vmem:[%s2359_s1 + $0x80] sm:$0xff]  ;;  %v231_v28 = vld [vmem:[%s2359_s1 + $0x88] sm:$0xff]  ;;  %v232_v30 = vld [vmem:[%s2359_s1 + $0x90] sm:$0xff] }
   0x8   :  { %1029 = vmatpush1.bf16.msra.mxu0 %v1028_v6  ;;  %1089 = vmatpush1.bf16.msra.mxu1 %v1028_v6  ;;  %v1049_v29 = vpack.c.bf16 %v231_v28, %v230_v27  ;;  %v233_v31 = vld [vmem:[%s2359_s1 + $0x98] sm:$0xff]  ;;  %v234_v33 = vld [vmem:[%s2359_s1 + $0xa0] sm:$0xff]  ;;  %v235_v34 = vld [vmem:[%s2359_s1 + $0xa8] sm:$0xff] }
   0x9   :  { %1030 = vmatprep.subr.bf16.mxu0 %v1105_v0  ;;  %1074 = vmatprep.subr.bf16.mxu1 %v1105_v0  ;;  %v1052_v32 = vpack.c.bf16 %v233_v31, %v232_v30  ;;  %v1055_v35 = vpack.c.bf16 %v235_v34, %v234_v33  ;;  %v236_v36 = vld [vmem:[%s2359_s1 + $0xb0] sm:$0xff]  ;;  %v237_v37 = vld [vmem:[%s2359_s1 + $0xb8] sm:$0xff]  ;;  %v238_v39 = vld [vmem:[%s2359_s1 + $0xc0] sm:$0xff] }
   0xa   :  { %v1058_v38 = vpack.c.bf16 %v237_v37, %v236_v36  ;;  %v239_v40 = vld [vmem:[%s2359_s1 + $0xc8] sm:$0xff]  ;;  %v240_v42 = vld [vmem:[%s2359_s1 + $0xd0] sm:$0xff]  ;;  %v241_v43 = vld [vmem:[%s2359_s1 + $0xd8] sm:$0xff] }
   0xb   :  { %v1061_v41 = vpack.c.bf16 %v239_v40, %v238_v39  ;;  %v1064_v44 = vpack.c.bf16 %v241_v43, %v240_v42  ;;  %v242_v45 = vld [vmem:[%s2359_s1 + $0xe0] sm:$0xff]  ;;  %v243_v46 = vld [vmem:[%s2359_s1 + $0xe8] sm:$0xff]  ;;  %v244_v48 = vld [vmem:[%s2359_s1 + $0xf0] sm:$0xff] }
   0xc   :  { %1032 = vmatpush1.bf16.msra.mxu0 %v1031_v9  ;;  %1090 = vmatpush1.bf16.msra.mxu1 %v1031_v9  ;;  %v1067_v47 = vpack.c.bf16 %v243_v46, %v242_v45  ;;  %v245_v49 = vld [vmem:[%s2359_s1 + $0xf8] sm:$0xff]  ;;  %v14_v51 = vld [vmem:[%s2360_s0] sm:$0xff]  ;;  %v16_v55 = vld [vmem:[%s2360_s0 + $0x10] sm:$0xff] }
   0xd   :  { %1033 = vmatprep.subr.bf16.mxu0 %v1105_v0  ;;  %1075 = vmatprep.subr.bf16.mxu1 %v1105_v0  ;;  %v1070_v50 = vpack.c.bf16 %v245_v49, %v244_v48  ;;  %v114_v52 = vld [vmem:[%s2360_s0 + $0x320] sm:$0xff]  ;;  %v17_v53 = vld [vmem:[%s2360_s0 + $0x18] sm:$0xff]  ;;  %v116_v56 = vld [vmem:[%s2360_s0 + $0x330] sm:$0xff] }
   0xe   :  { %v117_v54 = vld [vmem:[%s2360_s0 + $0x338] sm:$0xff]  ;;  %v19_v57 = vld [vmem:[%s2360_s0 + $0x28] sm:$0xff]  ;;  %v18_v59 = vld [vmem:[%s2360_s0 + $0x20] sm:$0xff] }
   0xf   :  { %v119_v58 = vld [vmem:[%s2360_s0 + $0x348] sm:$0xff]  ;;  %v118_v60 = vld [vmem:[%s2360_s0 + $0x340] sm:$0xff]  ;;  %v21_v61 = vld [vmem:[%s2360_s0 + $0x38] sm:$0xff] }
  0x10   :  { %1035 = vmatpush1.bf16.msra.mxu0 %v1034_v13  ;;  %1091 = vmatpush1.bf16.msra.mxu1 %v1034_v13  ;;  %v121_v62 = vld [vmem:[%s2360_s0 + $0x358] sm:$0xff]  ;;  %v20_v63 = vld [vmem:[%s2360_s0 + $0x30] sm:$0xff]  ;;  %v23_v1 = vld [vmem:[%s2360_s0 + $0x48] sm:$0xff] }
  0x11   :  { %1036 = vmatprep.subr.bf16.mxu0 %v1105_v0  ;;  %1076 = vmatprep.subr.bf16.mxu1 %v1105_v0  ;;  %v123_v2 = vld [vmem:[%s2360_s0 + $0x368] sm:$0xff]  ;;  %v22_v3 = vld [vmem:[%s2360_s0 + $0x40] sm:$0xff]  ;;  %v25_v5 = vld [vmem:[%s2360_s0 + $0x58] sm:$0xff] }
  0x12   :  { %v122_v4 = vld [vmem:[%s2360_s0 + $0x360] sm:$0xff]  ;;  %v125_v6 = vld [vmem:[%s2360_s0 + $0x378] sm:$0xff]  ;;  %v24_v7 = vld [vmem:[%s2360_s0 + $0x50] sm:$0xff] }
  0x13   :  { %v124_v8 = vld [vmem:[%s2360_s0 + $0x370] sm:$0xff]  ;;  %v27_v9 = vld [vmem:[%s2360_s0 + $0x68] sm:$0xff]  ;;  %v26_v11 = vld [vmem:[%s2360_s0 + $0x60] sm:$0xff] }
  0x14   :  { %1038 = vmatpush1.bf16.msra.mxu0 %v1037_v17  ;;  %1092 = vmatpush1.bf16.msra.mxu1 %v1037_v17  ;;  %v127_v10 = vld [vmem:[%s2360_s0 + $0x388] sm:$0xff]  ;;  %v126_v12 = vld [vmem:[%s2360_s0 + $0x380] sm:$0xff]  ;;  %v29_v13 = vld [vmem:[%s2360_s0 + $0x78] sm:$0xff] }
  0x15   :  { %1039 = vmatprep.subr.bf16.mxu0 %v1105_v0  ;;  %1077 = vmatprep.subr.bf16.mxu1 %v1105_v0  ;;  %v129_v14 = vld [vmem:[%s2360_s0 + $0x398] sm:$0xff]  ;;  %v28_v15 = vld [vmem:[%s2360_s0 + $0x70] sm:$0xff]  ;;  %v31_v17 = vld [vmem:[%s2360_s0 + $0x88] sm:$0xff] }
  0x16   :  { %v128_v16 = vld [vmem:[%s2360_s0 + $0x390] sm:$0xff]  ;;  %v131_v18 = vld [vmem:[%s2360_s0 + $0x3a8] sm:$0xff]  ;;  %v30_v19 = vld [vmem:[%s2360_s0 + $0x80] sm:$0xff] }
  0x17   :  { %v33_v21 = vld [vmem:[%s2360_s0 + $0x98] sm:$0xff]  ;;  %v132_v24 = vld [vmem:[%s2360_s0 + $0x3b0] sm:$0xff]  ;;  %v35_v25 = vld [vmem:[%s2360_s0 + $0xa8] sm:$0xff] }
  0x18   :  { %1041 = vmatpush1.bf16.msra.mxu0 %v1040_v20  ;;  %1093 = vmatpush1.bf16.msra.mxu1 %v1040_v20  ;;  %v130_v20 = vld [vmem:[%s2360_s0 + $0x3a0] sm:$0xff]  ;;  %v133_v22 = vld [vmem:[%s2360_s0 + $0x3b8] sm:$0xff]  ;;  %v36_v31 = vld [vmem:[%s2360_s0 + $0xb0] sm:$0xff] }
  0x19   :  { %1042 = vmatprep.subr.bf16.mxu0 %v1105_v0  ;;  %1078 = vmatprep.subr.bf16.mxu1 %v1105_v0  ;;  %v34_v27 = vld [vmem:[%s2360_s0 + $0xa0] sm:$0xff]  ;;  %v137_v30 = vld [vmem:[%s2360_s0 + $0x3d8] sm:$0xff]  ;;  %v39_v33 = vld [vmem:[%s2360_s0 + $0xc8] sm:$0xff] }
  0x1a   :  { %v134_v28 = vld [vmem:[%s2360_s0 + $0x3c0] sm:$0xff]  ;;  %v139_v34 = vld [vmem:[%s2360_s0 + $0x3e8] sm:$0xff]  ;;  %v41_v37 = vld [vmem:[%s2360_s0 + $0xd8] sm:$0xff] }
  0x1b   :  { %v138_v36 = vld [vmem:[%s2360_s0 + $0x3e0] sm:$0xff]  ;;  %v40_v39 = vld [vmem:[%s2360_s0 + $0xd0] sm:$0xff]  ;;  %v143_v42 = vld [vmem:[%s2360_s0 + $0x408] sm:$0xff] }
  0x1c   :  { %1044 = vmatpush1.bf16.msra.mxu0 %v1043_v23  ;;  %1094 = vmatpush1.bf16.msra.mxu1 %v1043_v23  ;;  %v32_v23 = vld [vmem:[%s2360_s0 + $0x90] sm:$0xff]  ;;  %v42_v43 = vld [vmem:[%s2360_s0 + $0xe0] sm:$0xff]  ;;  %v45_v45 = vld [vmem:[%s2360_s0 + $0xf8] sm:$0xff] }
  0x1d   :  { %1045 = vmatprep.subr.bf16.mxu0 %v1105_v0  ;;  %1079 = vmatprep.subr.bf16.mxu1 %v1105_v0  ;;  %v140_v40 = vld [vmem:[%s2360_s0 + $0x3f0] sm:$0xff]  ;;  %v145_v46 = vld [vmem:[%s2360_s0 + $0x418] sm:$0xff]  ;;  %v47_v49 = vld [vmem:[%s2360_s0 + $0x108] sm:$0xff] }
  0x1e   :  { %v144_v48 = vld [vmem:[%s2360_s0 + $0x410] sm:$0xff] }
  0x20   :  { %1047 = vmatpush1.bf16.msra.mxu0 %v1046_v26  ;;  %1095 = vmatpush1.bf16.msra.mxu1 %v1046_v26  ;;  %v135_v26 = vld [vmem:[%s2360_s0 + $0x3c8] sm:$0xff] }
  0x21   :  { %1048 = vmatprep.subr.bf16.mxu0 %v1105_v0  ;;  %1080 = vmatprep.subr.bf16.mxu1 %v1105_v0 }
  0x24   :  { %1050 = vmatpush1.bf16.msra.mxu0 %v1049_v29  ;;  %1096 = vmatpush1.bf16.msra.mxu1 %v1049_v29  ;;  %v37_v29 = vld [vmem:[%s2360_s0 + $0xb8] sm:$0xff] }
  0x25   :  { %1051 = vmatprep.subr.bf16.mxu0 %v1105_v0  ;;  %1081 = vmatprep.subr.bf16.mxu1 %v1105_v0 }
  0x28   :  { %1053 = vmatpush1.bf16.msra.mxu0 %v1052_v32  ;;  %1097 = vmatpush1.bf16.msra.mxu1 %v1052_v32  ;;  %v136_v32 = vld [vmem:[%s2360_s0 + $0x3d0] sm:$0xff] }
  0x29   :  { %1054 = vmatprep.subr.bf16.mxu0 %v1105_v0  ;;  %1082 = vmatprep.subr.bf16.mxu1 %v1105_v0 }
  0x2c   :  { %1056 = vmatpush1.bf16.msra.mxu0 %v1055_v35  ;;  %1098 = vmatpush1.bf16.msra.mxu1 %v1055_v35  ;;  %v38_v35 = vld [vmem:[%s2360_s0 + $0xc0] sm:$0xff] }
  0x2d   :  { %1057 = vmatprep.subr.bf16.mxu0 %v1105_v0  ;;  %1083 = vmatprep.subr.bf16.mxu1 %v1105_v0 }
  0x30   :  { %1059 = vmatpush1.bf16.msra.mxu0 %v1058_v38  ;;  %1099 = vmatpush1.bf16.msra.mxu1 %v1058_v38  ;;  %v141_v38 = vld [vmem:[%s2360_s0 + $0x3f8] sm:$0xff] }
  0x31   :  { %1060 = vmatprep.subr.bf16.mxu0 %v1105_v0  ;;  %1084 = vmatprep.subr.bf16.mxu1 %v1105_v0 }
  0x34   :  { %1062 = vmatpush1.bf16.msra.mxu0 %v1061_v41  ;;  %1100 = vmatpush1.bf16.msra.mxu1 %v1061_v41  ;;  %v43_v41 = vld [vmem:[%s2360_s0 + $0xe8] sm:$0xff] }
  0x35   :  { %1063 = vmatprep.subr.bf16.mxu0 %v1105_v0  ;;  %1085 = vmatprep.subr.bf16.mxu1 %v1105_v0 }
  0x38   :  { %1065 = vmatpush1.bf16.msra.mxu0 %v1064_v44  ;;  %1101 = vmatpush1.bf16.msra.mxu1 %v1064_v44  ;;  %v142_v44 = vld [vmem:[%s2360_s0 + $0x400] sm:$0xff] }
  0x39   :  { %1066 = vmatprep.subr.bf16.mxu0 %v1105_v0  ;;  %1086 = vmatprep.subr.bf16.mxu1 %v1105_v0 }
  0x3c   :  { %1068 = vmatpush1.bf16.msra.mxu0 %v1067_v47  ;;  %1102 = vmatpush1.bf16.msra.mxu1 %v1067_v47  ;;  %v44_v47 = vld [vmem:[%s2360_s0 + $0xf0] sm:$0xff] }
  0x3d   :  { %1069 = vmatprep.subr.bf16.mxu0 %v1105_v0  ;;  %1087 = vmatprep.subr.bf16.mxu1 %v1105_v0  ;;  %v120_v0 = vld [vmem:[%s2360_s0 + $0x350] sm:$0xff] }
  0x40   :  { %1071 = vmatpush1.bf16.msra.mxu0 %v1070_v50  ;;  %1103 = vmatpush1.bf16.msra.mxu1 %v1070_v50  ;;  %v147_v50 = vld [vmem:[%s2360_s0 + $0x428] sm:$0xff] }
  0x43   :  { %318 = vmatmul.mubr.f32.vlgmr.msra.gmra.mrb[0].mxu0 %v14_v51  ;;  %568 = vmatmul.mubr.f32.vlgmr.msra.gmra.mrb[0].mxu1 %v114_v52  ;;  %v46_v51 = vld [vmem:[%s2360_s0 + $0x100] sm:$0xff] }
  0x44   :  { %322 = vmatprep.mubr.f32.mxu0 %v17_v53  ;;  %572 = vmatprep.mubr.f32.mxu1 %v117_v54  ;;  %v146_v52 = vld [vmem:[%s2360_s0 + $0x420] sm:$0xff]  ;;  %v49_v53 = vld [vmem:[%s2360_s0 + $0x118] sm:$0xff] }
  0x45   :  { %v149_v54 = vld [vmem:[%s2360_s0 + $0x438] sm:$0xff] }
  0x47   :  { %323 = vmatmul.mubr.f32.gmra.mrb[2].mxu0 %v16_v55  ;;  %573 = vmatmul.mubr.f32.gmra.mrb[2].mxu1 %v116_v56  ;;  %v48_v55 = vld [vmem:[%s2360_s0 + $0x110] sm:$0xff] }
  0x48   :  { %327 = vmatprep.mubr.f32.mxu0 %v19_v57  ;;  %577 = vmatprep.mubr.f32.mxu1 %v119_v58  ;;  %v148_v56 = vld [vmem:[%s2360_s0 + $0x430] sm:$0xff]  ;;  %v51_v57 = vld [vmem:[%s2360_s0 + $0x128] sm:$0xff] }
  0x49   :  { %v151_v58 = vld [vmem:[%s2360_s0 + $0x448] sm:$0xff] }
  0x4b   :  { %328 = vmatmul.mubr.f32.gmra.mrb[4].mxu0 %v18_v59  ;;  %578 = vmatmul.mubr.f32.gmra.mrb[4].mxu1 %v118_v60  ;;  %v50_v59 = vld [vmem:[%s2360_s0 + $0x120] sm:$0xff] }
  0x4c   :  { %332 = vmatprep.mubr.f32.mxu0 %v21_v61  ;;  %582 = vmatprep.mubr.f32.mxu1 %v121_v62  ;;  %v150_v60 = vld [vmem:[%s2360_s0 + $0x440] sm:$0xff]  ;;  %v53_v61 = vld [vmem:[%s2360_s0 + $0x138] sm:$0xff] }
  0x4d   :  { %v153_v62 = vld [vmem:[%s2360_s0 + $0x458] sm:$0xff] }
  0x4f   :  { %333 = vmatmul.mubr.f32.gmra.mrb[6].mxu0 %v20_v63  ;;  %583 = vmatmul.mubr.f32.gmra.mrb[6].mxu1 %v120_v0  ;;  %v52_v63 = vld [vmem:[%s2360_s0 + $0x130] sm:$0xff] }
  0x50   :  { %337 = vmatprep.mubr.f32.mxu0 %v23_v1  ;;  %587 = vmatprep.mubr.f32.mxu1 %v123_v2  ;;  %v152_v0 = vld [vmem:[%s2360_s0 + $0x450] sm:$0xff]  ;;  %v55_v1 = vld [vmem:[%s2360_s0 + $0x148] sm:$0xff] }
  0x51   :  { %v155_v2 = vld [vmem:[%s2360_s0 + $0x468] sm:$0xff] }
  0x53   :  { %338 = vmatmul.mubr.f32.gmra.mrb[8].mxu0 %v22_v3  ;;  %588 = vmatmul.mubr.f32.gmra.mrb[8].mxu1 %v122_v4  ;;  %v54_v3 = vld [vmem:[%s2360_s0 + $0x140] sm:$0xff] }
  0x54   :  { %342 = vmatprep.mubr.f32.mxu0 %v25_v5  ;;  %592 = vmatprep.mubr.f32.mxu1 %v125_v6  ;;  %v154_v4 = vld [vmem:[%s2360_s0 + $0x460] sm:$0xff]  ;;  %v57_v5 = vld [vmem:[%s2360_s0 + $0x158] sm:$0xff] }
  0x55   :  { %v157_v6 = vld [vmem:[%s2360_s0 + $0x478] sm:$0xff] }
  0x57   :  { %343 = vmatmul.mubr.f32.gmra.mrb[10].mxu0 %v24_v7  ;;  %593 = vmatmul.mubr.f32.gmra.mrb[10].mxu1 %v124_v8  ;;  %v56_v7 = vld [vmem:[%s2360_s0 + $0x150] sm:$0xff] }
  0x58   :  { %347 = vmatprep.mubr.f32.mxu0 %v27_v9  ;;  %597 = vmatprep.mubr.f32.mxu1 %v127_v10  ;;  %v156_v8 = vld [vmem:[%s2360_s0 + $0x470] sm:$0xff]  ;;  %v59_v9 = vld [vmem:[%s2360_s0 + $0x168] sm:$0xff] }
  0x59   :  { %v159_v10 = vld [vmem:[%s2360_s0 + $0x488] sm:$0xff] }
  0x5b   :  { %348 = vmatmul.mubr.f32.gmra.mrb[12].mxu0 %v26_v11  ;;  %598 = vmatmul.mubr.f32.gmra.mrb[12].mxu1 %v126_v12  ;;  %v58_v11 = vld [vmem:[%s2360_s0 + $0x160] sm:$0xff] }
  0x5c   :  { %352 = vmatprep.mubr.f32.mxu0 %v29_v13  ;;  %602 = vmatprep.mubr.f32.mxu1 %v129_v14  ;;  %v158_v12 = vld [vmem:[%s2360_s0 + $0x480] sm:$0xff]  ;;  %v61_v13 = vld [vmem:[%s2360_s0 + $0x178] sm:$0xff] }
  0x5d   :  { %v161_v14 = vld [vmem:[%s2360_s0 + $0x498] sm:$0xff] }
  0x5f   :  { %353 = vmatmul.mubr.f32.gmra.mrb[14].mxu0 %v28_v15  ;;  %603 = vmatmul.mubr.f32.gmra.mrb[14].mxu1 %v128_v16  ;;  %v60_v15 = vld [vmem:[%s2360_s0 + $0x170] sm:$0xff] }
  0x60   :  { %357 = vmatprep.mubr.f32.mxu0 %v31_v17  ;;  %607 = vmatprep.mubr.f32.mxu1 %v131_v18  ;;  %v160_v16 = vld [vmem:[%s2360_s0 + $0x490] sm:$0xff]  ;;  %v63_v17 = vld [vmem:[%s2360_s0 + $0x188] sm:$0xff] }
  0x61   :  { %v163_v18 = vld [vmem:[%s2360_s0 + $0x4a8] sm:$0xff] }
  0x63   :  { %358 = vmatmul.mubr.f32.gmra.mrb[16].mxu0 %v30_v19  ;;  %608 = vmatmul.mubr.f32.gmra.mrb[16].mxu1 %v130_v20  ;;  %v62_v19 = vld [vmem:[%s2360_s0 + $0x180] sm:$0xff] }
  0x64   :  { %362 = vmatprep.mubr.f32.mxu0 %v33_v21  ;;  %612 = vmatprep.mubr.f32.mxu1 %v133_v22  ;;  %v162_v20 = vld [vmem:[%s2360_s0 + $0x4a0] sm:$0xff]  ;;  %v65_v21 = vld [vmem:[%s2360_s0 + $0x198] sm:$0xff] }
  0x65   :  { %v165_v22 = vld [vmem:[%s2360_s0 + $0x4b8] sm:$0xff] }
  0x67   :  { %363 = vmatmul.mubr.f32.gmra.mrb[18].mxu0 %v32_v23  ;;  %613 = vmatmul.mubr.f32.gmra.mrb[18].mxu1 %v132_v24  ;;  %v64_v23 = vld [vmem:[%s2360_s0 + $0x190] sm:$0xff] }
  0x68   :  { %367 = vmatprep.mubr.f32.mxu0 %v35_v25  ;;  %617 = vmatprep.mubr.f32.mxu1 %v135_v26  ;;  %v164_v24 = vld [vmem:[%s2360_s0 + $0x4b0] sm:$0xff]  ;;  %v67_v25 = vld [vmem:[%s2360_s0 + $0x1a8] sm:$0xff] }
  0x69   :  { %v167_v26 = vld [vmem:[%s2360_s0 + $0x4c8] sm:$0xff] }
  0x6b   :  { %368 = vmatmul.mubr.f32.gmra.mrb[20].mxu0 %v34_v27  ;;  %618 = vmatmul.mubr.f32.gmra.mrb[20].mxu1 %v134_v28  ;;  %v66_v27 = vld [vmem:[%s2360_s0 + $0x1a0] sm:$0xff] }
  0x6c   :  { %372 = vmatprep.mubr.f32.mxu0 %v37_v29  ;;  %622 = vmatprep.mubr.f32.mxu1 %v137_v30  ;;  %v166_v28 = vld [vmem:[%s2360_s0 + $0x4c0] sm:$0xff]  ;;  %v69_v29 = vld [vmem:[%s2360_s0 + $0x1b8] sm:$0xff] }
  0x6d   :  { %v169_v30 = vld [vmem:[%s2360_s0 + $0x4d8] sm:$0xff] }
  0x6f   :  { %373 = vmatmul.mubr.f32.gmra.mrb[22].mxu0 %v36_v31  ;;  %623 = vmatmul.mubr.f32.gmra.mrb[22].mxu1 %v136_v32  ;;  %v68_v31 = vld [vmem:[%s2360_s0 + $0x1b0] sm:$0xff] }
  0x70   :  { %377 = vmatprep.mubr.f32.mxu0 %v39_v33  ;;  %627 = vmatprep.mubr.f32.mxu1 %v139_v34  ;;  %v168_v32 = vld [vmem:[%s2360_s0 + $0x4d0] sm:$0xff]  ;;  %v71_v33 = vld [vmem:[%s2360_s0 + $0x1c8] sm:$0xff] }
  0x71   :  { %v171_v34 = vld [vmem:[%s2360_s0 + $0x4e8] sm:$0xff] }
  0x73   :  { %378 = vmatmul.mubr.f32.gmra.mrb[24].mxu0 %v38_v35  ;;  %628 = vmatmul.mubr.f32.gmra.mrb[24].mxu1 %v138_v36  ;;  %v70_v35 = vld [vmem:[%s2360_s0 + $0x1c0] sm:$0xff] }
  0x74   :  { %382 = vmatprep.mubr.f32.mxu0 %v41_v37  ;;  %632 = vmatprep.mubr.f32.mxu1 %v141_v38  ;;  %v170_v36 = vld [vmem:[%s2360_s0 + $0x4e0] sm:$0xff]  ;;  %v73_v37 = vld [vmem:[%s2360_s0 + $0x1d8] sm:$0xff] }
  0x75   :  { %v173_v38 = vld [vmem:[%s2360_s0 + $0x4f8] sm:$0xff] }
  0x77   :  { %383 = vmatmul.mubr.f32.gmra.mrb[26].mxu0 %v40_v39  ;;  %633 = vmatmul.mubr.f32.gmra.mrb[26].mxu1 %v140_v40  ;;  %v72_v39 = vld [vmem:[%s2360_s0 + $0x1d0] sm:$0xff] }
  0x78   :  { %387 = vmatprep.mubr.f32.mxu0 %v43_v41  ;;  %637 = vmatprep.mubr.f32.mxu1 %v143_v42  ;;  %v172_v40 = vld [vmem:[%s2360_s0 + $0x4f0] sm:$0xff]  ;;  %v75_v41 = vld [vmem:[%s2360_s0 + $0x1e8] sm:$0xff] }
  0x79   :  { %v175_v42 = vld [vmem:[%s2360_s0 + $0x508] sm:$0xff] }
  0x7b   :  { %388 = vmatmul.mubr.f32.gmra.mrb[28].mxu0 %v42_v43  ;;  %638 = vmatmul.mubr.f32.gmra.mrb[28].mxu1 %v142_v44  ;;  %v74_v43 = vld [vmem:[%s2360_s0 + $0x1e0] sm:$0xff] }
  0x7c   :  { %392 = vmatprep.mubr.f32.mxu0 %v45_v45  ;;  %642 = vmatprep.mubr.f32.mxu1 %v145_v46  ;;  %v174_v44 = vld [vmem:[%s2360_s0 + $0x500] sm:$0xff]  ;;  %v77_v45 = vld [vmem:[%s2360_s0 + $0x1f8] sm:$0xff] }
  0x7d   :  { %v177_v46 = vld [vmem:[%s2360_s0 + $0x518] sm:$0xff] }
  0x7f   :  { %393 = vmatmul.mubr.f32.gmra.mrb[30].mxu0 %v44_v47  ;;  %643 = vmatmul.mubr.f32.gmra.mrb[30].mxu1 %v144_v48  ;;  %v76_v47 = vld [vmem:[%s2360_s0 + $0x1f0] sm:$0xff] }
  0x80   :  { %397 = vmatprep.mubr.f32.mxu0 %v47_v49  ;;  %647 = vmatprep.mubr.f32.mxu1 %v147_v50  ;;  %v176_v48 = vld [vmem:[%s2360_s0 + $0x510] sm:$0xff]  ;;  %v79_v49 = vld [vmem:[%s2360_s0 + $0x208] sm:$0xff] }
  0x81   :  { %v179_v50 = vld [vmem:[%s2360_s0 + $0x528] sm:$0xff] }
  0x83   :  { %398 = vmatmul.mubr.f32.gmra.mrb[32].mxu0 %v46_v51  ;;  %648 = vmatmul.mubr.f32.gmra.mrb[32].mxu1 %v146_v52  ;;  %v78_v51 = vld [vmem:[%s2360_s0 + $0x200] sm:$0xff] }
  0x84   :  { %402 = vmatprep.mubr.f32.mxu0 %v49_v53  ;;  %652 = vmatprep.mubr.f32.mxu1 %v149_v54  ;;  %v178_v52 = vld [vmem:[%s2360_s0 + $0x520] sm:$0xff]  ;;  %v81_v53 = vld [vmem:[%s2360_s0 + $0x218] sm:$0xff] }
  0x85   :  { %v181_v54 = vld [vmem:[%s2360_s0 + $0x538] sm:$0xff] }
  0x87   :  { %403 = vmatmul.mubr.f32.gmra.mrb[34].mxu0 %v48_v55  ;;  %653 = vmatmul.mubr.f32.gmra.mrb[34].mxu1 %v148_v56  ;;  %v80_v55 = vld [vmem:[%s2360_s0 + $0x210] sm:$0xff] }
  0x88   :  { %407 = vmatprep.mubr.f32.mxu0 %v51_v57  ;;  %657 = vmatprep.mubr.f32.mxu1 %v151_v58  ;;  %v180_v56 = vld [vmem:[%s2360_s0 + $0x530] sm:$0xff]  ;;  %v83_v57 = vld [vmem:[%s2360_s0 + $0x228] sm:$0xff] }
  0x89   :  { %v183_v58 = vld [vmem:[%s2360_s0 + $0x548] sm:$0xff] }
  0x8b   :  { %408 = vmatmul.mubr.f32.gmra.mrb[36].mxu0 %v50_v59  ;;  %658 = vmatmul.mubr.f32.gmra.mrb[36].mxu1 %v150_v60  ;;  %v82_v59 = vld [vmem:[%s2360_s0 + $0x220] sm:$0xff] }
  0x8c   :  { %412 = vmatprep.mubr.f32.mxu0 %v53_v61  ;;  %662 = vmatprep.mubr.f32.mxu1 %v153_v62  ;;  %v182_v60 = vld [vmem:[%s2360_s0 + $0x540] sm:$0xff]  ;;  %v85_v61 = vld [vmem:[%s2360_s0 + $0x238] sm:$0xff] }
  0x8d   :  { %v185_v62 = vld [vmem:[%s2360_s0 + $0x558] sm:$0xff] }
  0x8f   :  { %413 = vmatmul.mubr.f32.gmra.mrb[38].mxu0 %v52_v63  ;;  %663 = vmatmul.mubr.f32.gmra.mrb[38].mxu1 %v152_v0  ;;  %v84_v63 = vld [vmem:[%s2360_s0 + $0x230] sm:$0xff] }
  0x90   :  { %417 = vmatprep.mubr.f32.mxu0 %v55_v1  ;;  %667 = vmatprep.mubr.f32.mxu1 %v155_v2  ;;  %v184_v0 = vld [vmem:[%s2360_s0 + $0x550] sm:$0xff]  ;;  %v87_v1 = vld [vmem:[%s2360_s0 + $0x248] sm:$0xff] }
  0x91   :  { %v187_v2 = vld [vmem:[%s2360_s0 + $0x568] sm:$0xff] }
  0x93   :  { %418 = vmatmul.mubr.f32.gmra.mrb[40].mxu0 %v54_v3  ;;  %668 = vmatmul.mubr.f32.gmra.mrb[40].mxu1 %v154_v4  ;;  %v86_v3 = vld [vmem:[%s2360_s0 + $0x240] sm:$0xff] }
  0x94   :  { %422 = vmatprep.mubr.f32.mxu0 %v57_v5  ;;  %672 = vmatprep.mubr.f32.mxu1 %v157_v6  ;;  %v186_v4 = vld [vmem:[%s2360_s0 + $0x560] sm:$0xff]  ;;  %v89_v5 = vld [vmem:[%s2360_s0 + $0x258] sm:$0xff] }
  0x95   :  { %v189_v6 = vld [vmem:[%s2360_s0 + $0x578] sm:$0xff] }
  0x97   :  { %423 = vmatmul.mubr.f32.gmra.mrb[42].mxu0 %v56_v7  ;;  %673 = vmatmul.mubr.f32.gmra.mrb[42].mxu1 %v156_v8  ;;  %v88_v7 = vld [vmem:[%s2360_s0 + $0x250] sm:$0xff] }
  0x98   :  { %427 = vmatprep.mubr.f32.mxu0 %v59_v9  ;;  %677 = vmatprep.mubr.f32.mxu1 %v159_v10  ;;  %v188_v8 = vld [vmem:[%s2360_s0 + $0x570] sm:$0xff]  ;;  %v91_v9 = vld [vmem:[%s2360_s0 + $0x268] sm:$0xff] }
  0x99   :  { %v191_v10 = vld [vmem:[%s2360_s0 + $0x588] sm:$0xff] }
  0x9b   :  { %428 = vmatmul.mubr.f32.gmra.mrb[44].mxu0 %v58_v11  ;;  %678 = vmatmul.mubr.f32.gmra.mrb[44].mxu1 %v158_v12  ;;  %v90_v11 = vld [vmem:[%s2360_s0 + $0x260] sm:$0xff] }
  0x9c   :  { %432 = vmatprep.mubr.f32.mxu0 %v61_v13  ;;  %682 = vmatprep.mubr.f32.mxu1 %v161_v14  ;;  %v190_v12 = vld [vmem:[%s2360_s0 + $0x580] sm:$0xff]  ;;  %v93_v13 = vld [vmem:[%s2360_s0 + $0x278] sm:$0xff] }
  0x9d   :  { %v193_v14 = vld [vmem:[%s2360_s0 + $0x598] sm:$0xff] }
  0x9f   :  { %433 = vmatmul.mubr.f32.gmra.mrb[46].mxu0 %v60_v15  ;;  %683 = vmatmul.mubr.f32.gmra.mrb[46].mxu1 %v160_v16  ;;  %v92_v15 = vld [vmem:[%s2360_s0 + $0x270] sm:$0xff] }
  0xa0   :  { %437 = vmatprep.mubr.f32.mxu0 %v63_v17  ;;  %687 = vmatprep.mubr.f32.mxu1 %v163_v18  ;;  %v192_v16 = vld [vmem:[%s2360_s0 + $0x590] sm:$0xff]  ;;  %v95_v17 = vld [vmem:[%s2360_s0 + $0x288] sm:$0xff] }
  0xa1   :  { %v195_v18 = vld [vmem:[%s2360_s0 + $0x5a8] sm:$0xff] }
  0xa3   :  { %438 = vmatmul.mubr.f32.gmra.mrb[48].mxu0 %v62_v19  ;;  %688 = vmatmul.mubr.f32.gmra.mrb[48].mxu1 %v162_v20  ;;  %v94_v19 = vld [vmem:[%s2360_s0 + $0x280] sm:$0xff] }
  0xa4   :  { %442 = vmatprep.mubr.f32.mxu0 %v65_v21  ;;  %692 = vmatprep.mubr.f32.mxu1 %v165_v22  ;;  %v194_v20 = vld [vmem:[%s2360_s0 + $0x5a0] sm:$0xff]  ;;  %v97_v21 = vld [vmem:[%s2360_s0 + $0x298] sm:$0xff] }
  0xa5   :  { %v197_v22 = vld [vmem:[%s2360_s0 + $0x5b8] sm:$0xff] }
  0xa7   :  { %443 = vmatmul.mubr.f32.gmra.mrb[50].mxu0 %v64_v23  ;;  %693 = vmatmul.mubr.f32.gmra.mrb[50].mxu1 %v164_v24  ;;  %v96_v23 = vld [vmem:[%s2360_s0 + $0x290] sm:$0xff] }
  0xa8   :  { %447 = vmatprep.mubr.f32.mxu0 %v67_v25  ;;  %697 = vmatprep.mubr.f32.mxu1 %v167_v26  ;;  %v196_v24 = vld [vmem:[%s2360_s0 + $0x5b0] sm:$0xff]  ;;  %v99_v25 = vld [vmem:[%s2360_s0 + $0x2a8] sm:$0xff] }
  0xa9   :  { %v199_v26 = vld [vmem:[%s2360_s0 + $0x5c8] sm:$0xff] }
  0xab   :  { %448 = vmatmul.mubr.f32.gmra.mrb[52].mxu0 %v66_v27  ;;  %698 = vmatmul.mubr.f32.gmra.mrb[52].mxu1 %v166_v28  ;;  %v98_v27 = vld [vmem:[%s2360_s0 + $0x2a0] sm:$0xff] }
  0xac   :  { %452 = vmatprep.mubr.f32.mxu0 %v69_v29  ;;  %702 = vmatprep.mubr.f32.mxu1 %v169_v30  ;;  %v198_v28 = vld [vmem:[%s2360_s0 + $0x5c0] sm:$0xff]  ;;  %v101_v29 = vld [vmem:[%s2360_s0 + $0x2b8] sm:$0xff] }
  0xad   :  { %v201_v30 = vld [vmem:[%s2360_s0 + $0x5d8] sm:$0xff] }
  0xaf   :  { %453 = vmatmul.mubr.f32.gmra.mrb[54].mxu0 %v68_v31  ;;  %703 = vmatmul.mubr.f32.gmra.mrb[54].mxu1 %v168_v32  ;;  %v100_v31 = vld [vmem:[%s2360_s0 + $0x2b0] sm:$0xff] }
  0xb0   :  { %457 = vmatprep.mubr.f32.mxu0 %v71_v33  ;;  %707 = vmatprep.mubr.f32.mxu1 %v171_v34  ;;  %v200_v32 = vld [vmem:[%s2360_s0 + $0x5d0] sm:$0xff]  ;;  %v103_v33 = vld [vmem:[%s2360_s0 + $0x2c8] sm:$0xff] }
  0xb1   :  { %v203_v34 = vld [vmem:[%s2360_s0 + $0x5e8] sm:$0xff] }
  0xb3   :  { %458 = vmatmul.mubr.f32.gmra.mrb[56].mxu0 %v70_v35  ;;  %708 = vmatmul.mubr.f32.gmra.mrb[56].mxu1 %v170_v36  ;;  %v102_v35 = vld [vmem:[%s2360_s0 + $0x2c0] sm:$0xff] }
  0xb4   :  { %462 = vmatprep.mubr.f32.mxu0 %v73_v37  ;;  %712 = vmatprep.mubr.f32.mxu1 %v173_v38  ;;  %v202_v36 = vld [vmem:[%s2360_s0 + $0x5e0] sm:$0xff]  ;;  %v105_v37 = vld [vmem:[%s2360_s0 + $0x2d8] sm:$0xff] }
  0xb5   :  { %v205_v38 = vld [vmem:[%s2360_s0 + $0x5f8] sm:$0xff] }
  0xb7   :  { %463 = vmatmul.mubr.f32.gmra.mrb[58].mxu0 %v72_v39  ;;  %713 = vmatmul.mubr.f32.gmra.mrb[58].mxu1 %v172_v40  ;;  %v104_v39 = vld [vmem:[%s2360_s0 + $0x2d0] sm:$0xff] }
  0xb8   :  { %467 = vmatprep.mubr.f32.mxu0 %v75_v41  ;;  %717 = vmatprep.mubr.f32.mxu1 %v175_v42  ;;  %v204_v40 = vld [vmem:[%s2360_s0 + $0x5f0] sm:$0xff]  ;;  %v107_v41 = vld [vmem:[%s2360_s0 + $0x2e8] sm:$0xff] }
  0xb9   :  { %v207_v42 = vld [vmem:[%s2360_s0 + $0x608] sm:$0xff] }
  0xbb   :  { %468 = vmatmul.mubr.f32.gmra.mrb[60].mxu0 %v74_v43  ;;  %718 = vmatmul.mubr.f32.gmra.mrb[60].mxu1 %v174_v44  ;;  %v106_v43 = vld [vmem:[%s2360_s0 + $0x2e0] sm:$0xff] }
  0xbc   :  { %472 = vmatprep.mubr.f32.mxu0 %v77_v45  ;;  %722 = vmatprep.mubr.f32.mxu1 %v177_v46  ;;  %v206_v44 = vld [vmem:[%s2360_s0 + $0x600] sm:$0xff]  ;;  %v109_v45 = vld [vmem:[%s2360_s0 + $0x2f8] sm:$0xff] }
  0xbd   :  { %v209_v46 = vld [vmem:[%s2360_s0 + $0x618] sm:$0xff] }
  0xbf   :  { %473 = vmatmul.mubr.f32.gmra.mrb[62].mxu0 %v76_v47  ;;  %723 = vmatmul.mubr.f32.gmra.mrb[62].mxu1 %v176_v48  ;;  %v108_v47 = vld [vmem:[%s2360_s0 + $0x2f0] sm:$0xff] }
  0xc0   :  { %477 = vmatprep.mubr.f32.mxu0 %v79_v49  ;;  %727 = vmatprep.mubr.f32.mxu1 %v179_v50  ;;  %v208_v48 = vld [vmem:[%s2360_s0 + $0x610] sm:$0xff]  ;;  %v111_v49 = vld [vmem:[%s2360_s0 + $0x308] sm:$0xff] }
  0xc1   :  { %v211_v50 = vld [vmem:[%s2360_s0 + $0x628] sm:$0xff] }
  0xc3   :  { %478 = vmatmul.mubr.f32.gmra.mrb[64].mxu0 %v78_v51  ;;  %728 = vmatmul.mubr.f32.gmra.mrb[64].mxu1 %v178_v52  ;;  %v110_v51 = vld [vmem:[%s2360_s0 + $0x300] sm:$0xff] }
  0xc4   :  { %482 = vmatprep.mubr.f32.mxu0 %v81_v53  ;;  %732 = vmatprep.mubr.f32.mxu1 %v181_v54  ;;  %v210_v52 = vld [vmem:[%s2360_s0 + $0x620] sm:$0xff]  ;;  %v113_v53 = vld [vmem:[%s2360_s0 + $0x318] sm:$0xff] }
  0xc5   :  { %v213_v54 = vld [vmem:[%s2360_s0 + $0x638] sm:$0xff] }
  0xc7   :  { %483 = vmatmul.mubr.f32.gmra.mrb[66].mxu0 %v80_v55  ;;  %733 = vmatmul.mubr.f32.gmra.mrb[66].mxu1 %v180_v56  ;;  %v112_v55 = vld [vmem:[%s2360_s0 + $0x310] sm:$0xff] }
  0xc8   :  { %487 = vmatprep.mubr.f32.mxu0 %v83_v57  ;;  %737 = vmatprep.mubr.f32.mxu1 %v183_v58  ;;  %v212_v56 = vld [vmem:[%s2360_s0 + $0x630] sm:$0xff]  ;;  %v1857_v57 = vld [vmem:[%s2361_s2] ss:$0 sm:$0xff] }
  0xcb   :  { %488 = vmatmul.mubr.f32.gmra.mrb[68].mxu0 %v82_v59  ;;  %738 = vmatmul.mubr.f32.gmra.mrb[68].mxu1 %v182_v60 }
  0xcc   :  { %492 = vmatprep.mubr.f32.mxu0 %v85_v61  ;;  %742 = vmatprep.mubr.f32.mxu1 %v185_v62 }
  0xcf   :  { %493 = vmatmul.mubr.f32.gmra.mrb[70].mxu0 %v84_v63  ;;  %743 = vmatmul.mubr.f32.gmra.mrb[70].mxu1 %v184_v0 }
  0xd0   :  { %497 = vmatprep.mubr.f32.mxu0 %v87_v1  ;;  %747 = vmatprep.mubr.f32.mxu1 %v187_v2 }
  0xd3   :  { %498 = vmatmul.mubr.f32.gmra.mrb[72].mxu0 %v86_v3  ;;  %748 = vmatmul.mubr.f32.gmra.mrb[72].mxu1 %v186_v4 }
  0xd4   :  { %502 = vmatprep.mubr.f32.mxu0 %v89_v5  ;;  %752 = vmatprep.mubr.f32.mxu1 %v189_v6 }
  0xd7   :  { %503 = vmatmul.mubr.f32.gmra.mrb[74].mxu0 %v88_v7  ;;  %753 = vmatmul.mubr.f32.gmra.mrb[74].mxu1 %v188_v8 }
  0xd8   :  { %507 = vmatprep.mubr.f32.mxu0 %v91_v9  ;;  %757 = vmatprep.mubr.f32.mxu1 %v191_v10 }
  0xdb   :  { %508 = vmatmul.mubr.f32.gmra.mrb[76].mxu0 %v90_v11  ;;  %758 = vmatmul.mubr.f32.gmra.mrb[76].mxu1 %v190_v12 }
  0xdc   :  { %512 = vmatprep.mubr.f32.mxu0 %v93_v13  ;;  %762 = vmatprep.mubr.f32.mxu1 %v193_v14 }
  0xdf   :  { %513 = vmatmul.mubr.f32.gmra.mrb[78].mxu0 %v92_v15  ;;  %763 = vmatmul.mubr.f32.gmra.mrb[78].mxu1 %v192_v16 }
  0xe0   :  { %517 = vmatprep.mubr.f32.mxu0 %v95_v17  ;;  %767 = vmatprep.mubr.f32.mxu1 %v195_v18 }
  0xe3   :  { %518 = vmatmul.mubr.f32.gmra.mrb[80].mxu0 %v94_v19  ;;  %768 = vmatmul.mubr.f32.gmra.mrb[80].mxu1 %v194_v20 }
  0xe4   :  { %522 = vmatprep.mubr.f32.mxu0 %v97_v21  ;;  %772 = vmatprep.mubr.f32.mxu1 %v197_v22 }
  0xe7   :  { %523 = vmatmul.mubr.f32.gmra.mrb[82].mxu0 %v96_v23  ;;  %773 = vmatmul.mubr.f32.gmra.mrb[82].mxu1 %v196_v24 }
  0xe8   :  { %527 = vmatprep.mubr.f32.mxu0 %v99_v25  ;;  %777 = vmatprep.mubr.f32.mxu1 %v199_v26 }
  0xeb   :  { %528 = vmatmul.mubr.f32.gmra.mrb[84].mxu0 %v98_v27  ;;  %778 = vmatmul.mubr.f32.gmra.mrb[84].mxu1 %v198_v28 }
  0xec   :  { %532 = vmatprep.mubr.f32.mxu0 %v101_v29  ;;  %782 = vmatprep.mubr.f32.mxu1 %v201_v30 }
  0xef   :  { %533 = vmatmul.mubr.f32.gmra.mrb[86].mxu0 %v100_v31  ;;  %783 = vmatmul.mubr.f32.gmra.mrb[86].mxu1 %v200_v32 }
  0xf0   :  { %537 = vmatprep.mubr.f32.mxu0 %v103_v33  ;;  %787 = vmatprep.mubr.f32.mxu1 %v203_v34 }
  0xf3   :  { %538 = vmatmul.mubr.f32.gmra.mrb[88].mxu0 %v102_v35  ;;  %788 = vmatmul.mubr.f32.gmra.mrb[88].mxu1 %v202_v36 }
  0xf4   :  { %542 = vmatprep.mubr.f32.mxu0 %v105_v37  ;;  %792 = vmatprep.mubr.f32.mxu1 %v205_v38 }
  0xf7   :  { %543 = vmatmul.mubr.f32.gmra.mrb[90].mxu0 %v104_v39  ;;  %793 = vmatmul.mubr.f32.gmra.mrb[90].mxu1 %v204_v40 }
  0xf8   :  { %547 = vmatprep.mubr.f32.mxu0 %v107_v41  ;;  %797 = vmatprep.mubr.f32.mxu1 %v207_v42 }
  0xfb   :  { %548 = vmatmul.mubr.f32.gmra.mrb[92].mxu0 %v106_v43  ;;  %798 = vmatmul.mubr.f32.gmra.mrb[92].mxu1 %v206_v44 }
  0xfc   :  { %552 = vmatprep.mubr.f32.mxu0 %v109_v45  ;;  %802 = vmatprep.mubr.f32.mxu1 %v209_v46 }
  0xff   :  { %553 = vmatmul.mubr.f32.gmra.mrb[94].mxu0 %v108_v47  ;;  %803 = vmatmul.mubr.f32.gmra.mrb[94].mxu1 %v208_v48 }
 0x100   :  { %557 = vmatprep.mubr.f32.mxu0 %v111_v49  ;;  %807 = vmatprep.mubr.f32.mxu1 %v211_v50 }
 0x103   :  { %558 = vmatmul.mubr.f32.gmra.mrb[96].mxu0 %v110_v51  ;;  %808 = vmatmul.mubr.f32.gmra.mrb[96].mxu1 %v210_v52 }
 0x104   :  { %562 = vmatprep.mubr.f32.mxu0 %v113_v53  ;;  %812 = vmatprep.mubr.f32.mxu1 %v213_v54 }
 0x107   :  { %563 = vmatmul.mubr.f32.gmra.mrb[98].mxu0 %v112_v55  ;;  %813 = vmatmul.mubr.f32.gmra.mrb[98].mxu1 %v212_v56 }
 0x116   :  { %v319_v58 = vpop.f32.mrb[0].mxu0  ;;  %v569_v59 = vpop.f32.mrb[0].mxu1 }
 0x117   :  { %v320_v60 = vadd.f32 %v1857_v57, %v319_v58  ;;  %v570_v61 = vadd.f32 %v1857_v57, %v569_v59  ;;  %v321_v62 = vpop.f32.mrb[1].mxu0  ;;  %v571_v63 = vpop.f32.mrb[1].mxu1 }
 0x119   :  { %v818_v0 = vmax.f32 %v320_v60, 0.0  ;;  %v868_v1 = vmax.f32 %v570_v61, 0.0 }
 0x11a   :  { %v324_v2 = vpop.f32.mrb[2].mxu0  ;;  %v574_v3 = vpop.f32.mrb[2].mxu1 }
 0x11b   :  { %919 = vst.msk [vmem:[%s2362_s3] sm:$0xff] %vm918_vm0, %v818_v0  ;;  %969 = vst.msk [vmem:[%s2362_s3 + $0x190] sm:$0xff] %vm918_vm0, %v868_v1  ;;  %v325_v4 = vadd.f32 %v1857_v57, %v324_v2  ;;  %v575_v5 = vadd.f32 %v1857_v57, %v574_v3  ;;  %v326_v6 = vpop.f32.mrb[3].mxu0  ;;  %v576_v7 = vpop.f32.mrb[3].mxu1 }
 0x11d   :  { %v819_v8 = vmax.f32 %v325_v4, 0.0  ;;  %v869_v9 = vmax.f32 %v575_v5, 0.0 }
 0x11e   :  { %v329_v10 = vpop.f32.mrb[4].mxu0  ;;  %v579_v11 = vpop.f32.mrb[4].mxu1 }
 0x11f   :  { %920 = vst.msk [vmem:[%s2362_s3 + $0x8] sm:$0xff] %vm918_vm0, %v819_v8  ;;  %970 = vst.msk [vmem:[%s2362_s3 + $0x198] sm:$0xff] %vm918_vm0, %v869_v9  ;;  %v330_v12 = vadd.f32 %v1857_v57, %v329_v10  ;;  %v580_v13 = vadd.f32 %v1857_v57, %v579_v11  ;;  %v331_v14 = vpop.f32.mrb[5].mxu0  ;;  %v581_v15 = vpop.f32.mrb[5].mxu1 }
 0x121   :  { %v820_v16 = vmax.f32 %v330_v12, 0.0  ;;  %v870_v17 = vmax.f32 %v580_v13, 0.0 }
 0x122   :  { %v334_v18 = vpop.f32.mrb[6].mxu0  ;;  %v584_v19 = vpop.f32.mrb[6].mxu1 }
 0x123   :  { %921 = vst.msk [vmem:[%s2362_s3 + $0x10] sm:$0xff] %vm918_vm0, %v820_v16  ;;  %971 = vst.msk [vmem:[%s2362_s3 + $0x1a0] sm:$0xff] %vm918_vm0, %v870_v17  ;;  %v335_v20 = vadd.f32 %v1857_v57, %v334_v18  ;;  %v585_v21 = vadd.f32 %v1857_v57, %v584_v19  ;;  %v336_v22 = vpop.f32.mrb[7].mxu0  ;;  %v586_v23 = vpop.f32.mrb[7].mxu1 }
 0x125   :  { %v821_v24 = vmax.f32 %v335_v20, 0.0  ;;  %v871_v25 = vmax.f32 %v585_v21, 0.0 }
 0x126   :  { %v339_v26 = vpop.f32.mrb[8].mxu0  ;;  %v589_v27 = vpop.f32.mrb[8].mxu1 }
 0x127   :  { %922 = vst.msk [vmem:[%s2362_s3 + $0x18] sm:$0xff] %vm918_vm0, %v821_v24  ;;  %972 = vst.msk [vmem:[%s2362_s3 + $0x1a8] sm:$0xff] %vm918_vm0, %v871_v25  ;;  %v340_v28 = vadd.f32 %v1857_v57, %v339_v26  ;;  %v590_v29 = vadd.f32 %v1857_v57, %v589_v27  ;;  %v341_v30 = vpop.f32.mrb[9].mxu0  ;;  %v591_v31 = vpop.f32.mrb[9].mxu1 }
 0x129   :  { %v822_v32 = vmax.f32 %v340_v28, 0.0  ;;  %v872_v33 = vmax.f32 %v590_v29, 0.0 }
 0x12a   :  { %v344_v34 = vpop.f32.mrb[10].mxu0  ;;  %v594_v35 = vpop.f32.mrb[10].mxu1 }
 0x12b   :  { %923 = vst.msk [vmem:[%s2362_s3 + $0x20] sm:$0xff] %vm918_vm0, %v822_v32  ;;  %973 = vst.msk [vmem:[%s2362_s3 + $0x1b0] sm:$0xff] %vm918_vm0, %v872_v33  ;;  %v345_v36 = vadd.f32 %v1857_v57, %v344_v34  ;;  %v595_v37 = vadd.f32 %v1857_v57, %v594_v35  ;;  %v346_v38 = vpop.f32.mrb[11].mxu0  ;;  %v596_v39 = vpop.f32.mrb[11].mxu1 }
 0x12d   :  { %v823_v40 = vmax.f32 %v345_v36, 0.0  ;;  %v873_v41 = vmax.f32 %v595_v37, 0.0 }
 0x12e   :  { %v349_v42 = vpop.f32.mrb[12].mxu0  ;;  %v599_v43 = vpop.f32.mrb[12].mxu1 }
 0x12f   :  { %924 = vst.msk [vmem:[%s2362_s3 + $0x28] sm:$0xff] %vm918_vm0, %v823_v40  ;;  %974 = vst.msk [vmem:[%s2362_s3 + $0x1b8] sm:$0xff] %vm918_vm0, %v873_v41  ;;  %v350_v44 = vadd.f32 %v1857_v57, %v349_v42  ;;  %v600_v45 = vadd.f32 %v1857_v57, %v599_v43  ;;  %v351_v46 = vpop.f32.mrb[13].mxu0  ;;  %v601_v47 = vpop.f32.mrb[13].mxu1 }
 0x131   :  { %v824_v48 = vmax.f32 %v350_v44, 0.0  ;;  %v874_v49 = vmax.f32 %v600_v45, 0.0 }
 0x132   :  { %v354_v50 = vpop.f32.mrb[14].mxu0  ;;  %v604_v51 = vpop.f32.mrb[14].mxu1 }
 0x133   :  { %925 = vst.msk [vmem:[%s2362_s3 + $0x30] sm:$0xff] %vm918_vm0, %v824_v48  ;;  %975 = vst.msk [vmem:[%s2362_s3 + $0x1c0] sm:$0xff] %vm918_vm0, %v874_v49  ;;  %v355_v52 = vadd.f32 %v1857_v57, %v354_v50  ;;  %v605_v53 = vadd.f32 %v1857_v57, %v604_v51  ;;  %v356_v54 = vpop.f32.mrb[15].mxu0  ;;  %v606_v55 = vpop.f32.mrb[15].mxu1 }
 0x135   :  { %v825_v56 = vmax.f32 %v355_v52, 0.0  ;;  %v875_v58 = vmax.f32 %v605_v53, 0.0 }
 0x136   :  { %v359_v59 = vpop.f32.mrb[16].mxu0  ;;  %v609_v60 = vpop.f32.mrb[16].mxu1 }
 0x137   :  { %926 = vst.msk [vmem:[%s2362_s3 + $0x38] sm:$0xff] %vm918_vm0, %v825_v56  ;;  %976 = vst.msk [vmem:[%s2362_s3 + $0x1c8] sm:$0xff] %vm918_vm0, %v875_v58  ;;  %v360_v61 = vadd.f32 %v1857_v57, %v359_v59  ;;  %v610_v62 = vadd.f32 %v1857_v57, %v609_v60  ;;  %v361_v63 = vpop.f32.mrb[17].mxu0  ;;  %v611_v0 = vpop.f32.mrb[17].mxu1 }
 0x139   :  { %v826_v1 = vmax.f32 %v360_v61, 0.0  ;;  %v876_v2 = vmax.f32 %v610_v62, 0.0 }
 0x13a   :  { %v364_v3 = vpop.f32.mrb[18].mxu0  ;;  %v614_v4 = vpop.f32.mrb[18].mxu1 }
 0x13b   :  { %927 = vst.msk [vmem:[%s2362_s3 + $0x40] sm:$0xff] %vm918_vm0, %v826_v1  ;;  %977 = vst.msk [vmem:[%s2362_s3 + $0x1d0] sm:$0xff] %vm918_vm0, %v876_v2  ;;  %v365_v5 = vadd.f32 %v1857_v57, %v364_v3  ;;  %v615_v6 = vadd.f32 %v1857_v57, %v614_v4  ;;  %v366_v7 = vpop.f32.mrb[19].mxu0  ;;  %v616_v8 = vpop.f32.mrb[19].mxu1 }
 0x13d   :  { %v827_v9 = vmax.f32 %v365_v5, 0.0  ;;  %v877_v10 = vmax.f32 %v615_v6, 0.0 }
 0x13e   :  { %v369_v11 = vpop.f32.mrb[20].mxu0  ;;  %v619_v12 = vpop.f32.mrb[20].mxu1 }
 0x13f   :  { %928 = vst.msk [vmem:[%s2362_s3 + $0x48] sm:$0xff] %vm918_vm0, %v827_v9  ;;  %978 = vst.msk [vmem:[%s2362_s3 + $0x1d8] sm:$0xff] %vm918_vm0, %v877_v10  ;;  %v370_v13 = vadd.f32 %v1857_v57, %v369_v11  ;;  %v620_v14 = vadd.f32 %v1857_v57, %v619_v12  ;;  %v371_v15 = vpop.f32.mrb[21].mxu0  ;;  %v621_v16 = vpop.f32.mrb[21].mxu1 }
 0x141   :  { %v828_v17 = vmax.f32 %v370_v13, 0.0  ;;  %v878_v18 = vmax.f32 %v620_v14, 0.0 }
 0x142   :  { %v374_v19 = vpop.f32.mrb[22].mxu0  ;;  %v624_v20 = vpop.f32.mrb[22].mxu1 }
 0x143   :  { %929 = vst.msk [vmem:[%s2362_s3 + $0x50] sm:$0xff] %vm918_vm0, %v828_v17  ;;  %979 = vst.msk [vmem:[%s2362_s3 + $0x1e0] sm:$0xff] %vm918_vm0, %v878_v18  ;;  %v375_v21 = vadd.f32 %v1857_v57, %v374_v19  ;;  %v625_v22 = vadd.f32 %v1857_v57, %v624_v20  ;;  %v376_v23 = vpop.f32.mrb[23].mxu0  ;;  %v626_v24 = vpop.f32.mrb[23].mxu1 }
 0x145   :  { %v829_v25 = vmax.f32 %v375_v21, 0.0  ;;  %v879_v26 = vmax.f32 %v625_v22, 0.0 }
 0x146   :  { %v379_v27 = vpop.f32.mrb[24].mxu0  ;;  %v629_v28 = vpop.f32.mrb[24].mxu1 }
 0x147   :  { %930 = vst.msk [vmem:[%s2362_s3 + $0x58] sm:$0xff] %vm918_vm0, %v829_v25  ;;  %980 = vst.msk [vmem:[%s2362_s3 + $0x1e8] sm:$0xff] %vm918_vm0, %v879_v26  ;;  %v380_v29 = vadd.f32 %v1857_v57, %v379_v27  ;;  %v630_v30 = vadd.f32 %v1857_v57, %v629_v28  ;;  %v381_v31 = vpop.f32.mrb[25].mxu0  ;;  %v631_v32 = vpop.f32.mrb[25].mxu1 }
 0x149   :  { %v830_v33 = vmax.f32 %v380_v29, 0.0  ;;  %v880_v34 = vmax.f32 %v630_v30, 0.0 }
 0x14a   :  { %v384_v35 = vpop.f32.mrb[26].mxu0  ;;  %v634_v36 = vpop.f32.mrb[26].mxu1 }
 0x14b   :  { %931 = vst.msk [vmem:[%s2362_s3 + $0x60] sm:$0xff] %vm918_vm0, %v830_v33  ;;  %981 = vst.msk [vmem:[%s2362_s3 + $0x1f0] sm:$0xff] %vm918_vm0, %v880_v34  ;;  %v385_v37 = vadd.f32 %v1857_v57, %v384_v35  ;;  %v635_v38 = vadd.f32 %v1857_v57, %v634_v36  ;;  %v386_v39 = vpop.f32.mrb[27].mxu0  ;;  %v636_v40 = vpop.f32.mrb[27].mxu1 }
 0x14d   :  { %v831_v41 = vmax.f32 %v385_v37, 0.0  ;;  %v881_v42 = vmax.f32 %v635_v38, 0.0 }
 0x14e   :  { %v389_v43 = vpop.f32.mrb[28].mxu0  ;;  %v639_v44 = vpop.f32.mrb[28].mxu1 }
 0x14f   :  { %932 = vst.msk [vmem:[%s2362_s3 + $0x68] sm:$0xff] %vm918_vm0, %v831_v41  ;;  %982 = vst.msk [vmem:[%s2362_s3 + $0x1f8] sm:$0xff] %vm918_vm0, %v881_v42  ;;  %v390_v45 = vadd.f32 %v1857_v57, %v389_v43  ;;  %v640_v46 = vadd.f32 %v1857_v57, %v639_v44  ;;  %v391_v47 = vpop.f32.mrb[29].mxu0  ;;  %v641_v48 = vpop.f32.mrb[29].mxu1 }
 0x151   :  { %v832_v49 = vmax.f32 %v390_v45, 0.0  ;;  %v882_v50 = vmax.f32 %v640_v46, 0.0 }
 0x152   :  { %v394_v51 = vpop.f32.mrb[30].mxu0  ;;  %v644_v52 = vpop.f32.mrb[30].mxu1 }
 0x153   :  { %933 = vst.msk [vmem:[%s2362_s3 + $0x70] sm:$0xff] %vm918_vm0, %v832_v49  ;;  %983 = vst.msk [vmem:[%s2362_s3 + $0x200] sm:$0xff] %vm918_vm0, %v882_v50  ;;  %v395_v53 = vadd.f32 %v1857_v57, %v394_v51  ;;  %v645_v54 = vadd.f32 %v1857_v57, %v644_v52  ;;  %v396_v55 = vpop.f32.mrb[31].mxu0  ;;  %v646_v56 = vpop.f32.mrb[31].mxu1 }
 0x155   :  { %v833_v58 = vmax.f32 %v395_v53, 0.0  ;;  %v883_v59 = vmax.f32 %v645_v54, 0.0 }
 0x156   :  { %v399_v60 = vpop.f32.mrb[32].mxu0  ;;  %v649_v61 = vpop.f32.mrb[32].mxu1 }
 0x157   :  { %934 = vst.msk [vmem:[%s2362_s3 + $0x78] sm:$0xff] %vm918_vm0, %v833_v58  ;;  %984 = vst.msk [vmem:[%s2362_s3 + $0x208] sm:$0xff] %vm918_vm0, %v883_v59  ;;  %v400_v62 = vadd.f32 %v1857_v57, %v399_v60  ;;  %v650_v63 = vadd.f32 %v1857_v57, %v649_v61  ;;  %v401_v0 = vpop.f32.mrb[33].mxu0  ;;  %v651_v1 = vpop.f32.mrb[33].mxu1 }
 0x159   :  { %v834_v2 = vmax.f32 %v400_v62, 0.0  ;;  %v884_v3 = vmax.f32 %v650_v63, 0.0 }
 0x15a   :  { %v404_v4 = vpop.f32.mrb[34].mxu0  ;;  %v654_v5 = vpop.f32.mrb[34].mxu1 }
 0x15b   :  { %935 = vst.msk [vmem:[%s2362_s3 + $0x80] sm:$0xff] %vm918_vm0, %v834_v2  ;;  %985 = vst.msk [vmem:[%s2362_s3 + $0x210] sm:$0xff] %vm918_vm0, %v884_v3  ;;  %v405_v6 = vadd.f32 %v1857_v57, %v404_v4  ;;  %v655_v7 = vadd.f32 %v1857_v57, %v654_v5  ;;  %v406_v8 = vpop.f32.mrb[35].mxu0  ;;  %v656_v9 = vpop.f32.mrb[35].mxu1 }
 0x15d   :  { %v835_v10 = vmax.f32 %v405_v6, 0.0  ;;  %v885_v11 = vmax.f32 %v655_v7, 0.0 }
 0x15e   :  { %v409_v12 = vpop.f32.mrb[36].mxu0  ;;  %v659_v13 = vpop.f32.mrb[36].mxu1 }
 0x15f   :  { %936 = vst.msk [vmem:[%s2362_s3 + $0x88] sm:$0xff] %vm918_vm0, %v835_v10  ;;  %986 = vst.msk [vmem:[%s2362_s3 + $0x218] sm:$0xff] %vm918_vm0, %v885_v11  ;;  %v410_v14 = vadd.f32 %v1857_v57, %v409_v12  ;;  %v660_v15 = vadd.f32 %v1857_v57, %v659_v13  ;;  %v411_v16 = vpop.f32.mrb[37].mxu0  ;;  %v661_v17 = vpop.f32.mrb[37].mxu1 }
 0x161   :  { %v836_v18 = vmax.f32 %v410_v14, 0.0  ;;  %v886_v19 = vmax.f32 %v660_v15, 0.0 }
 0x162   :  { %v414_v20 = vpop.f32.mrb[38].mxu0  ;;  %v664_v21 = vpop.f32.mrb[38].mxu1 }
 0x163   :  { %937 = vst.msk [vmem:[%s2362_s3 + $0x90] sm:$0xff] %vm918_vm0, %v836_v18  ;;  %987 = vst.msk [vmem:[%s2362_s3 + $0x220] sm:$0xff] %vm918_vm0, %v886_v19  ;;  %v415_v22 = vadd.f32 %v1857_v57, %v414_v20  ;;  %v665_v23 = vadd.f32 %v1857_v57, %v664_v21  ;;  %v416_v24 = vpop.f32.mrb[39].mxu0  ;;  %v666_v25 = vpop.f32.mrb[39].mxu1 }
 0x165   :  { %v837_v26 = vmax.f32 %v415_v22, 0.0  ;;  %v887_v27 = vmax.f32 %v665_v23, 0.0 }
 0x166   :  { %v419_v28 = vpop.f32.mrb[40].mxu0  ;;  %v669_v29 = vpop.f32.mrb[40].mxu1 }
 0x167   :  { %938 = vst.msk [vmem:[%s2362_s3 + $0x98] sm:$0xff] %vm918_vm0, %v837_v26  ;;  %988 = vst.msk [vmem:[%s2362_s3 + $0x228] sm:$0xff] %vm918_vm0, %v887_v27  ;;  %v420_v30 = vadd.f32 %v1857_v57, %v419_v28  ;;  %v670_v31 = vadd.f32 %v1857_v57, %v669_v29  ;;  %v421_v32 = vpop.f32.mrb[41].mxu0  ;;  %v671_v33 = vpop.f32.mrb[41].mxu1 }
 0x169   :  { %v838_v34 = vmax.f32 %v420_v30, 0.0  ;;  %v888_v35 = vmax.f32 %v670_v31, 0.0 }
 0x16a   :  { %v424_v36 = vpop.f32.mrb[42].mxu0  ;;  %v674_v37 = vpop.f32.mrb[42].mxu1 }
 0x16b   :  { %939 = vst.msk [vmem:[%s2362_s3 + $0xa0] sm:$0xff] %vm918_vm0, %v838_v34  ;;  %989 = vst.msk [vmem:[%s2362_s3 + $0x230] sm:$0xff] %vm918_vm0, %v888_v35  ;;  %v425_v38 = vadd.f32 %v1857_v57, %v424_v36  ;;  %v675_v39 = vadd.f32 %v1857_v57, %v674_v37  ;;  %v426_v40 = vpop.f32.mrb[43].mxu0  ;;  %v676_v41 = vpop.f32.mrb[43].mxu1 }
 0x16d   :  { %v839_v42 = vmax.f32 %v425_v38, 0.0  ;;  %v889_v43 = vmax.f32 %v675_v39, 0.0 }
 0x16e   :  { %v429_v44 = vpop.f32.mrb[44].mxu0  ;;  %v679_v45 = vpop.f32.mrb[44].mxu1 }
 0x16f   :  { %940 = vst.msk [vmem:[%s2362_s3 + $0xa8] sm:$0xff] %vm918_vm0, %v839_v42  ;;  %990 = vst.msk [vmem:[%s2362_s3 + $0x238] sm:$0xff] %vm918_vm0, %v889_v43  ;;  %v430_v46 = vadd.f32 %v1857_v57, %v429_v44  ;;  %v680_v47 = vadd.f32 %v1857_v57, %v679_v45  ;;  %v431_v48 = vpop.f32.mrb[45].mxu0  ;;  %v681_v49 = vpop.f32.mrb[45].mxu1 }
 0x171   :  { %v840_v50 = vmax.f32 %v430_v46, 0.0  ;;  %v890_v51 = vmax.f32 %v680_v47, 0.0 }
 0x172   :  { %v434_v52 = vpop.f32.mrb[46].mxu0  ;;  %v684_v53 = vpop.f32.mrb[46].mxu1 }
 0x173   :  { %941 = vst.msk [vmem:[%s2362_s3 + $0xb0] sm:$0xff] %vm918_vm0, %v840_v50  ;;  %991 = vst.msk [vmem:[%s2362_s3 + $0x240] sm:$0xff] %vm918_vm0, %v890_v51  ;;  %v435_v54 = vadd.f32 %v1857_v57, %v434_v52  ;;  %v685_v55 = vadd.f32 %v1857_v57, %v684_v53  ;;  %v436_v56 = vpop.f32.mrb[47].mxu0  ;;  %v686_v58 = vpop.f32.mrb[47].mxu1 }
 0x175   :  { %v841_v59 = vmax.f32 %v435_v54, 0.0  ;;  %v891_v60 = vmax.f32 %v685_v55, 0.0 }
 0x176   :  { %v439_v61 = vpop.f32.mrb[48].mxu0  ;;  %v689_v62 = vpop.f32.mrb[48].mxu1 }
 0x177   :  { %942 = vst.msk [vmem:[%s2362_s3 + $0xb8] sm:$0xff] %vm918_vm0, %v841_v59  ;;  %992 = vst.msk [vmem:[%s2362_s3 + $0x248] sm:$0xff] %vm918_vm0, %v891_v60  ;;  %v440_v63 = vadd.f32 %v1857_v57, %v439_v61  ;;  %v690_v0 = vadd.f32 %v1857_v57, %v689_v62  ;;  %v441_v1 = vpop.f32.mrb[49].mxu0  ;;  %v691_v2 = vpop.f32.mrb[49].mxu1 }
 0x179   :  { %v842_v3 = vmax.f32 %v440_v63, 0.0  ;;  %v892_v4 = vmax.f32 %v690_v0, 0.0 }
 0x17a   :  { %v444_v5 = vpop.f32.mrb[50].mxu0  ;;  %v694_v6 = vpop.f32.mrb[50].mxu1 }
 0x17b   :  { %943 = vst.msk [vmem:[%s2362_s3 + $0xc0] sm:$0xff] %vm918_vm0, %v842_v3  ;;  %993 = vst.msk [vmem:[%s2362_s3 + $0x250] sm:$0xff] %vm918_vm0, %v892_v4  ;;  %v445_v7 = vadd.f32 %v1857_v57, %v444_v5  ;;  %v695_v8 = vadd.f32 %v1857_v57, %v694_v6  ;;  %v446_v9 = vpop.f32.mrb[51].mxu0  ;;  %v696_v10 = vpop.f32.mrb[51].mxu1 }
 0x17d   :  { %v843_v11 = vmax.f32 %v445_v7, 0.0  ;;  %v893_v12 = vmax.f32 %v695_v8, 0.0 }
 0x17e   :  { %v449_v13 = vpop.f32.mrb[52].mxu0  ;;  %v699_v14 = vpop.f32.mrb[52].mxu1 }
 0x17f   :  { %944 = vst.msk [vmem:[%s2362_s3 + $0xc8] sm:$0xff] %vm918_vm0, %v843_v11  ;;  %994 = vst.msk [vmem:[%s2362_s3 + $0x258] sm:$0xff] %vm918_vm0, %v893_v12  ;;  %v450_v15 = vadd.f32 %v1857_v57, %v449_v13  ;;  %v700_v16 = vadd.f32 %v1857_v57, %v699_v14  ;;  %v451_v17 = vpop.f32.mrb[53].mxu0  ;;  %v701_v18 = vpop.f32.mrb[53].mxu1 }
 0x181   :  { %v844_v19 = vmax.f32 %v450_v15, 0.0  ;;  %v894_v20 = vmax.f32 %v700_v16, 0.0 }
 0x182   :  { %v454_v21 = vpop.f32.mrb[54].mxu0  ;;  %v704_v22 = vpop.f32.mrb[54].mxu1 }
 0x183   :  { %945 = vst.msk [vmem:[%s2362_s3 + $0xd0] sm:$0xff] %vm918_vm0, %v844_v19  ;;  %995 = vst.msk [vmem:[%s2362_s3 + $0x260] sm:$0xff] %vm918_vm0, %v894_v20  ;;  %v455_v23 = vadd.f32 %v1857_v57, %v454_v21  ;;  %v705_v24 = vadd.f32 %v1857_v57, %v704_v22  ;;  %v456_v25 = vpop.f32.mrb[55].mxu0  ;;  %v706_v26 = vpop.f32.mrb[55].mxu1 }
 0x185   :  { %v845_v27 = vmax.f32 %v455_v23, 0.0  ;;  %v895_v28 = vmax.f32 %v705_v24, 0.0 }
 0x186   :  { %v459_v29 = vpop.f32.mrb[56].mxu0  ;;  %v709_v30 = vpop.f32.mrb[56].mxu1 }
 0x187   :  { %946 = vst.msk [vmem:[%s2362_s3 + $0xd8] sm:$0xff] %vm918_vm0, %v845_v27  ;;  %996 = vst.msk [vmem:[%s2362_s3 + $0x268] sm:$0xff] %vm918_vm0, %v895_v28  ;;  %v460_v31 = vadd.f32 %v1857_v57, %v459_v29  ;;  %v710_v32 = vadd.f32 %v1857_v57, %v709_v30  ;;  %v461_v33 = vpop.f32.mrb[57].mxu0  ;;  %v711_v34 = vpop.f32.mrb[57].mxu1 }
 0x189   :  { %v846_v35 = vmax.f32 %v460_v31, 0.0  ;;  %v896_v36 = vmax.f32 %v710_v32, 0.0 }
 0x18a   :  { %v464_v37 = vpop.f32.mrb[58].mxu0  ;;  %v714_v38 = vpop.f32.mrb[58].mxu1 }
 0x18b   :  { %947 = vst.msk [vmem:[%s2362_s3 + $0xe0] sm:$0xff] %vm918_vm0, %v846_v35  ;;  %997 = vst.msk [vmem:[%s2362_s3 + $0x270] sm:$0xff] %vm918_vm0, %v896_v36  ;;  %v465_v39 = vadd.f32 %v1857_v57, %v464_v37  ;;  %v715_v40 = vadd.f32 %v1857_v57, %v714_v38  ;;  %v466_v41 = vpop.f32.mrb[59].mxu0  ;;  %v716_v42 = vpop.f32.mrb[59].mxu1 }
 0x18d   :  { %v847_v43 = vmax.f32 %v465_v39, 0.0  ;;  %v897_v44 = vmax.f32 %v715_v40, 0.0 }
 0x18e   :  { %v469_v45 = vpop.f32.mrb[60].mxu0  ;;  %v719_v46 = vpop.f32.mrb[60].mxu1 }
 0x18f   :  { %948 = vst.msk [vmem:[%s2362_s3 + $0xe8] sm:$0xff] %vm918_vm0, %v847_v43  ;;  %998 = vst.msk [vmem:[%s2362_s3 + $0x278] sm:$0xff] %vm918_vm0, %v897_v44  ;;  %v470_v47 = vadd.f32 %v1857_v57, %v469_v45  ;;  %v720_v48 = vadd.f32 %v1857_v57, %v719_v46  ;;  %v471_v49 = vpop.f32.mrb[61].mxu0  ;;  %v721_v50 = vpop.f32.mrb[61].mxu1 }
 0x191   :  { %v848_v51 = vmax.f32 %v470_v47, 0.0  ;;  %v898_v52 = vmax.f32 %v720_v48, 0.0 }
 0x192   :  { %v474_v53 = vpop.f32.mrb[62].mxu0  ;;  %v724_v54 = vpop.f32.mrb[62].mxu1 }
 0x193   :  { %949 = vst.msk [vmem:[%s2362_s3 + $0xf0] sm:$0xff] %vm918_vm0, %v848_v51  ;;  %999 = vst.msk [vmem:[%s2362_s3 + $0x280] sm:$0xff] %vm918_vm0, %v898_v52  ;;  %v475_v55 = vadd.f32 %v1857_v57, %v474_v53  ;;  %v725_v56 = vadd.f32 %v1857_v57, %v724_v54  ;;  %v476_v58 = vpop.f32.mrb[63].mxu0  ;;  %v726_v59 = vpop.f32.mrb[63].mxu1 }
 0x195   :  { %v849_v60 = vmax.f32 %v475_v55, 0.0  ;;  %v899_v61 = vmax.f32 %v725_v56, 0.0 }
 0x196   :  { %v479_v62 = vpop.f32.mrb[64].mxu0  ;;  %v729_v63 = vpop.f32.mrb[64].mxu1 }
 0x197   :  { %950 = vst.msk [vmem:[%s2362_s3 + $0xf8] sm:$0xff] %vm918_vm0, %v849_v60  ;;  %1000 = vst.msk [vmem:[%s2362_s3 + $0x288] sm:$0xff] %vm918_vm0, %v899_v61  ;;  %v480_v0 = vadd.f32 %v1857_v57, %v479_v62  ;;  %v730_v1 = vadd.f32 %v1857_v57, %v729_v63  ;;  %v481_v2 = vpop.f32.mrb[65].mxu0  ;;  %v731_v3 = vpop.f32.mrb[65].mxu1 }
 0x199   :  { %v850_v4 = vmax.f32 %v480_v0, 0.0  ;;  %v900_v5 = vmax.f32 %v730_v1, 0.0 }
 0x19a   :  { %v484_v6 = vpop.f32.mrb[66].mxu0  ;;  %v734_v7 = vpop.f32.mrb[66].mxu1 }
 0x19b   :  { %951 = vst.msk [vmem:[%s2362_s3 + $0x100] sm:$0xff] %vm918_vm0, %v850_v4  ;;  %1001 = vst.msk [vmem:[%s2362_s3 + $0x290] sm:$0xff] %vm918_vm0, %v900_v5  ;;  %v485_v8 = vadd.f32 %v1857_v57, %v484_v6  ;;  %v735_v9 = vadd.f32 %v1857_v57, %v734_v7  ;;  %v486_v10 = vpop.f32.mrb[67].mxu0  ;;  %v736_v11 = vpop.f32.mrb[67].mxu1 }
 0x19d   :  { %v851_v12 = vmax.f32 %v485_v8, 0.0  ;;  %v901_v13 = vmax.f32 %v735_v9, 0.0 }
 0x19e   :  { %v489_v14 = vpop.f32.mrb[68].mxu0  ;;  %v739_v15 = vpop.f32.mrb[68].mxu1 }
 0x19f   :  { %952 = vst.msk [vmem:[%s2362_s3 + $0x108] sm:$0xff] %vm918_vm0, %v851_v12  ;;  %1002 = vst.msk [vmem:[%s2362_s3 + $0x298] sm:$0xff] %vm918_vm0, %v901_v13  ;;  %v490_v16 = vadd.f32 %v1857_v57, %v489_v14  ;;  %v740_v17 = vadd.f32 %v1857_v57, %v739_v15  ;;  %v491_v18 = vpop.f32.mrb[69].mxu0  ;;  %v741_v19 = vpop.f32.mrb[69].mxu1 }
 0x1a1   :  { %v852_v20 = vmax.f32 %v490_v16, 0.0  ;;  %v902_v21 = vmax.f32 %v740_v17, 0.0 }
 0x1a2   :  { %v494_v22 = vpop.f32.mrb[70].mxu0  ;;  %v744_v23 = vpop.f32.mrb[70].mxu1 }
 0x1a3   :  { %953 = vst.msk [vmem:[%s2362_s3 + $0x110] sm:$0xff] %vm918_vm0, %v852_v20  ;;  %1003 = vst.msk [vmem:[%s2362_s3 + $0x2a0] sm:$0xff] %vm918_vm0, %v902_v21  ;;  %v495_v24 = vadd.f32 %v1857_v57, %v494_v22  ;;  %v745_v25 = vadd.f32 %v1857_v57, %v744_v23  ;;  %v496_v26 = vpop.f32.mrb[71].mxu0  ;;  %v746_v27 = vpop.f32.mrb[71].mxu1 }
 0x1a5   :  { %v853_v28 = vmax.f32 %v495_v24, 0.0  ;;  %v903_v29 = vmax.f32 %v745_v25, 0.0 }
 0x1a6   :  { %v499_v30 = vpop.f32.mrb[72].mxu0  ;;  %v749_v31 = vpop.f32.mrb[72].mxu1 }
 0x1a7   :  { %954 = vst.msk [vmem:[%s2362_s3 + $0x118] sm:$0xff] %vm918_vm0, %v853_v28  ;;  %1004 = vst.msk [vmem:[%s2362_s3 + $0x2a8] sm:$0xff] %vm918_vm0, %v903_v29  ;;  %v500_v32 = vadd.f32 %v1857_v57, %v499_v30  ;;  %v750_v33 = vadd.f32 %v1857_v57, %v749_v31  ;;  %v501_v34 = vpop.f32.mrb[73].mxu0  ;;  %v751_v35 = vpop.f32.mrb[73].mxu1 }
 0x1a9   :  { %v854_v36 = vmax.f32 %v500_v32, 0.0  ;;  %v904_v37 = vmax.f32 %v750_v33, 0.0 }
 0x1aa   :  { %v504_v38 = vpop.f32.mrb[74].mxu0  ;;  %v754_v39 = vpop.f32.mrb[74].mxu1 }
 0x1ab   :  { %955 = vst.msk [vmem:[%s2362_s3 + $0x120] sm:$0xff] %vm918_vm0, %v854_v36  ;;  %1005 = vst.msk [vmem:[%s2362_s3 + $0x2b0] sm:$0xff] %vm918_vm0, %v904_v37  ;;  %v505_v40 = vadd.f32 %v1857_v57, %v504_v38  ;;  %v755_v41 = vadd.f32 %v1857_v57, %v754_v39  ;;  %v506_v42 = vpop.f32.mrb[75].mxu0  ;;  %v756_v43 = vpop.f32.mrb[75].mxu1 }
 0x1ad   :  { %v855_v44 = vmax.f32 %v505_v40, 0.0  ;;  %v905_v45 = vmax.f32 %v755_v41, 0.0 }
 0x1ae   :  { %v509_v46 = vpop.f32.mrb[76].mxu0  ;;  %v759_v47 = vpop.f32.mrb[76].mxu1 }
 0x1af   :  { %956 = vst.msk [vmem:[%s2362_s3 + $0x128] sm:$0xff] %vm918_vm0, %v855_v44  ;;  %1006 = vst.msk [vmem:[%s2362_s3 + $0x2b8] sm:$0xff] %vm918_vm0, %v905_v45  ;;  %v510_v48 = vadd.f32 %v1857_v57, %v509_v46  ;;  %v760_v49 = vadd.f32 %v1857_v57, %v759_v47  ;;  %v511_v50 = vpop.f32.mrb[77].mxu0  ;;  %v761_v51 = vpop.f32.mrb[77].mxu1 }
 0x1b1   :  { %v856_v52 = vmax.f32 %v510_v48, 0.0  ;;  %v906_v53 = vmax.f32 %v760_v49, 0.0 }
 0x1b2   :  { %v514_v54 = vpop.f32.mrb[78].mxu0  ;;  %v764_v55 = vpop.f32.mrb[78].mxu1 }
 0x1b3   :  { %957 = vst.msk [vmem:[%s2362_s3 + $0x130] sm:$0xff] %vm918_vm0, %v856_v52  ;;  %1007 = vst.msk [vmem:[%s2362_s3 + $0x2c0] sm:$0xff] %vm918_vm0, %v906_v53  ;;  %v515_v56 = vadd.f32 %v1857_v57, %v514_v54  ;;  %v765_v58 = vadd.f32 %v1857_v57, %v764_v55  ;;  %v516_v59 = vpop.f32.mrb[79].mxu0  ;;  %v766_v60 = vpop.f32.mrb[79].mxu1 }
 0x1b5   :  { %v857_v61 = vmax.f32 %v515_v56, 0.0  ;;  %v907_v62 = vmax.f32 %v765_v58, 0.0 }
 0x1b6   :  { %v519_v63 = vpop.f32.mrb[80].mxu0  ;;  %v769_v0 = vpop.f32.mrb[80].mxu1 }
 0x1b7   :  { %958 = vst.msk [vmem:[%s2362_s3 + $0x138] sm:$0xff] %vm918_vm0, %v857_v61  ;;  %1008 = vst.msk [vmem:[%s2362_s3 + $0x2c8] sm:$0xff] %vm918_vm0, %v907_v62  ;;  %v520_v1 = vadd.f32 %v1857_v57, %v519_v63  ;;  %v770_v2 = vadd.f32 %v1857_v57, %v769_v0  ;;  %v521_v3 = vpop.f32.mrb[81].mxu0  ;;  %v771_v4 = vpop.f32.mrb[81].mxu1 }
 0x1b9   :  { %v858_v5 = vmax.f32 %v520_v1, 0.0  ;;  %v908_v6 = vmax.f32 %v770_v2, 0.0 }
 0x1ba   :  { %v524_v7 = vpop.f32.mrb[82].mxu0  ;;  %v774_v8 = vpop.f32.mrb[82].mxu1 }
 0x1bb   :  { %959 = vst.msk [vmem:[%s2362_s3 + $0x140] sm:$0xff] %vm918_vm0, %v858_v5  ;;  %1009 = vst.msk [vmem:[%s2362_s3 + $0x2d0] sm:$0xff] %vm918_vm0, %v908_v6  ;;  %v525_v9 = vadd.f32 %v1857_v57, %v524_v7  ;;  %v775_v10 = vadd.f32 %v1857_v57, %v774_v8  ;;  %v526_v11 = vpop.f32.mrb[83].mxu0  ;;  %v776_v12 = vpop.f32.mrb[83].mxu1 }
 0x1bd   :  { %v859_v13 = vmax.f32 %v525_v9, 0.0  ;;  %v909_v14 = vmax.f32 %v775_v10, 0.0 }
 0x1be   :  { %v529_v15 = vpop.f32.mrb[84].mxu0  ;;  %v779_v16 = vpop.f32.mrb[84].mxu1 }
 0x1bf   :  { %960 = vst.msk [vmem:[%s2362_s3 + $0x148] sm:$0xff] %vm918_vm0, %v859_v13  ;;  %1010 = vst.msk [vmem:[%s2362_s3 + $0x2d8] sm:$0xff] %vm918_vm0, %v909_v14  ;;  %v530_v17 = vadd.f32 %v1857_v57, %v529_v15  ;;  %v780_v18 = vadd.f32 %v1857_v57, %v779_v16  ;;  %v531_v19 = vpop.f32.mrb[85].mxu0  ;;  %v781_v20 = vpop.f32.mrb[85].mxu1 }
 0x1c1   :  { %v860_v21 = vmax.f32 %v530_v17, 0.0  ;;  %v910_v22 = vmax.f32 %v780_v18, 0.0 }
 0x1c2   :  { %v534_v23 = vpop.f32.mrb[86].mxu0  ;;  %v784_v24 = vpop.f32.mrb[86].mxu1 }
 0x1c3   :  { %961 = vst.msk [vmem:[%s2362_s3 + $0x150] sm:$0xff] %vm918_vm0, %v860_v21  ;;  %1011 = vst.msk [vmem:[%s2362_s3 + $0x2e0] sm:$0xff] %vm918_vm0, %v910_v22  ;;  %v535_v25 = vadd.f32 %v1857_v57, %v534_v23  ;;  %v785_v26 = vadd.f32 %v1857_v57, %v784_v24  ;;  %v536_v27 = vpop.f32.mrb[87].mxu0  ;;  %v786_v28 = vpop.f32.mrb[87].mxu1 }
 0x1c5   :  { %v861_v29 = vmax.f32 %v535_v25, 0.0  ;;  %v911_v30 = vmax.f32 %v785_v26, 0.0 }
 0x1c6   :  { %v539_v31 = vpop.f32.mrb[88].mxu0  ;;  %v789_v32 = vpop.f32.mrb[88].mxu1 }
 0x1c7   :  { %962 = vst.msk [vmem:[%s2362_s3 + $0x158] sm:$0xff] %vm918_vm0, %v861_v29  ;;  %1012 = vst.msk [vmem:[%s2362_s3 + $0x2e8] sm:$0xff] %vm918_vm0, %v911_v30  ;;  %v540_v33 = vadd.f32 %v1857_v57, %v539_v31  ;;  %v790_v34 = vadd.f32 %v1857_v57, %v789_v32  ;;  %v541_v35 = vpop.f32.mrb[89].mxu0  ;;  %v791_v36 = vpop.f32.mrb[89].mxu1 }
 0x1c9   :  { %v862_v37 = vmax.f32 %v540_v33, 0.0  ;;  %v912_v38 = vmax.f32 %v790_v34, 0.0 }
 0x1ca   :  { %v544_v39 = vpop.f32.mrb[90].mxu0  ;;  %v794_v40 = vpop.f32.mrb[90].mxu1 }
 0x1cb   :  { %963 = vst.msk [vmem:[%s2362_s3 + $0x160] sm:$0xff] %vm918_vm0, %v862_v37  ;;  %1013 = vst.msk [vmem:[%s2362_s3 + $0x2f0] sm:$0xff] %vm918_vm0, %v912_v38  ;;  %v545_v41 = vadd.f32 %v1857_v57, %v544_v39  ;;  %v795_v42 = vadd.f32 %v1857_v57, %v794_v40  ;;  %v546_v43 = vpop.f32.mrb[91].mxu0  ;;  %v796_v44 = vpop.f32.mrb[91].mxu1 }
 0x1cd   :  { %v863_v45 = vmax.f32 %v545_v41, 0.0  ;;  %v913_v46 = vmax.f32 %v795_v42, 0.0 }
 0x1ce   :  { %v549_v47 = vpop.f32.mrb[92].mxu0  ;;  %v799_v48 = vpop.f32.mrb[92].mxu1 }
 0x1cf   :  { %964 = vst.msk [vmem:[%s2362_s3 + $0x168] sm:$0xff] %vm918_vm0, %v863_v45  ;;  %1014 = vst.msk [vmem:[%s2362_s3 + $0x2f8] sm:$0xff] %vm918_vm0, %v913_v46  ;;  %v550_v49 = vadd.f32 %v1857_v57, %v549_v47  ;;  %v800_v50 = vadd.f32 %v1857_v57, %v799_v48  ;;  %v551_v51 = vpop.f32.mrb[93].mxu0  ;;  %v801_v52 = vpop.f32.mrb[93].mxu1 }
 0x1d1   :  { %v864_v53 = vmax.f32 %v550_v49, 0.0  ;;  %v914_v54 = vmax.f32 %v800_v50, 0.0 }
 0x1d2   :  { %v554_v55 = vpop.f32.mrb[94].mxu0  ;;  %v804_v56 = vpop.f32.mrb[94].mxu1 }
 0x1d3   :  { %965 = vst.msk [vmem:[%s2362_s3 + $0x170] sm:$0xff] %vm918_vm0, %v864_v53  ;;  %1015 = vst.msk [vmem:[%s2362_s3 + $0x300] sm:$0xff] %vm918_vm0, %v914_v54  ;;  %v555_v58 = vadd.f32 %v1857_v57, %v554_v55  ;;  %v805_v59 = vadd.f32 %v1857_v57, %v804_v56  ;;  %v556_v60 = vpop.f32.mrb[95].mxu0  ;;  %v806_v61 = vpop.f32.mrb[95].mxu1 }
 0x1d5   :  { %v865_v62 = vmax.f32 %v555_v58, 0.0  ;;  %v915_v63 = vmax.f32 %v805_v59, 0.0 }
 0x1d6   :  { %v559_v0 = vpop.f32.mrb[96].mxu0  ;;  %v809_v1 = vpop.f32.mrb[96].mxu1 }
 0x1d7   :  { %966 = vst.msk [vmem:[%s2362_s3 + $0x178] sm:$0xff] %vm918_vm0, %v865_v62  ;;  %1016 = vst.msk [vmem:[%s2362_s3 + $0x308] sm:$0xff] %vm918_vm0, %v915_v63  ;;  %v560_v2 = vadd.f32 %v1857_v57, %v559_v0  ;;  %v810_v3 = vadd.f32 %v1857_v57, %v809_v1  ;;  %v561_v4 = vpop.f32.mrb[97].mxu0  ;;  %v811_v5 = vpop.f32.mrb[97].mxu1 }
 0x1d9   :  { %v866_v6 = vmax.f32 %v560_v2, 0.0  ;;  %v916_v7 = vmax.f32 %v810_v3, 0.0 }
 0x1da   :  { %v564_v8 = vpop.f32.mrb[98].mxu0  ;;  %v814_v9 = vpop.f32.mrb[98].mxu1 }
 0x1db   :  { %967 = vst.msk [vmem:[%s2362_s3 + $0x180] sm:$0xff] %vm918_vm0, %v866_v6  ;;  %1017 = vst.msk [vmem:[%s2362_s3 + $0x310] sm:$0xff] %vm918_vm0, %v916_v7  ;;  %v565_v10 = vadd.f32 %v1857_v57, %v564_v8  ;;  %v815_v11 = vadd.f32 %v1857_v57, %v814_v9  ;;  %v566_v12 = vpop.f32.mrb[99].mxu0  ;;  %v816_v13 = vpop.f32.mrb[99].mxu1 }
 0x1dd   :  { %v867_v14 = vmax.f32 %v565_v10, 0.0  ;;  %v917_v15 = vmax.f32 %v815_v11, 0.0 }
 0x1df   :  { %968 = vst.msk [vmem:[%s2362_s3 + $0x188] sm:$0xff] %vm918_vm0, %v867_v14  ;;  %1018 = vst.msk [vmem:[%s2362_s3 + $0x318] sm:$0xff] %vm918_vm0, %v917_v15 }

// kernel: dueling_q_forward.5
= control target key start
LH: loop header
LB: loop body
LE: loop exit
PB: predicated region body
PF: predicated region fallthrough
CT: control target
= control target key end

     0   :  { %v696_v0 = vmov 0.0|0.0   ;;  %vm530_vm0 = vcmask 523264   ;;  %s1303_s1 = inlined_call_operand.vmem [shape: f32[512,64], index: 1, kind: input, shape index: {}]   ;;  %s1304_s0 = inlined_call_operand.vmem [shape: f32[168,512], index: 0, kind: input, shape index: {}]   ;;  %s1305_s2 = inlined_call_operand.vmem [shape: f32[1,64], index: 2, kind: input, shape index: {}]   ;;  %s1306_s3 = inlined_call_operand.vmem [shape: f32[168,64], index: 3, kind: output, shape index: {}]  }
   0x1   :  { %557 = vmatprep.subr.bf16.mxu1 %v696_v0  ;;  %v98_v1 = vld [vmem:[%s1303_s1] sm:$0xff]  ;;  %v99_v2 = vld [vmem:[%s1303_s1 + $0x8] sm:$0xff]  ;;  %605 = vmatprep.subr.bf16.mxu0 %v696_v0  ;;  %v100_v6 = vld [vmem:[%s1303_s1 + $0x10] sm:$0xff] }
   0x2   :  { %v130_v3 = vld [vmem:[%s1303_s1 + $0x100] sm:$0xff]  ;;  %v558_v4 = vpack.c.bf16 %v99_v2, %v98_v1  ;;  %v131_v5 = vld [vmem:[%s1303_s1 + $0x108] sm:$0xff]  ;;  %v101_v7 = vld [vmem:[%s1303_s1 + $0x18] sm:$0xff] }
   0x3   :  { %v606_v8 = vpack.c.bf16 %v131_v5, %v130_v3  ;;  %v132_v9 = vld [vmem:[%s1303_s1 + $0x110] sm:$0xff]  ;;  %v133_v10 = vld [vmem:[%s1303_s1 + $0x118] sm:$0xff]  ;;  %v561_v11 = vpack.c.bf16 %v101_v7, %v100_v6  ;;  %v102_v13 = vld [vmem:[%s1303_s1 + $0x20] sm:$0xff] }
   0x4   :  { %559 = vmatpush1.bf16.msra.mxu1 %v558_v4  ;;  %v609_v12 = vpack.c.bf16 %v133_v10, %v132_v9  ;;  %v103_v14 = vld [vmem:[%s1303_s1 + $0x28] sm:$0xff]  ;;  %v134_v15 = vld [vmem:[%s1303_s1 + $0x120] sm:$0xff]  ;;  %v104_v19 = vld [vmem:[%s1303_s1 + $0x30] sm:$0xff] }
   0x5   :  { %607 = vmatpush1.bf16.msra.mxu0 %v606_v8  ;;  %560 = vmatprep.subr.bf16.mxu1 %v696_v0  ;;  %v135_v16 = vld [vmem:[%s1303_s1 + $0x128] sm:$0xff]  ;;  %v564_v17 = vpack.c.bf16 %v103_v14, %v102_v13  ;;  %v105_v20 = vld [vmem:[%s1303_s1 + $0x38] sm:$0xff]  ;;  %v136_v21 = vld [vmem:[%s1303_s1 + $0x130] sm:$0xff] }
   0x6   :  { %608 = vmatprep.subr.bf16.mxu0 %v696_v0  ;;  %v612_v18 = vpack.c.bf16 %v135_v16, %v134_v15  ;;  %v137_v22 = vld [vmem:[%s1303_s1 + $0x138] sm:$0xff]  ;;  %v567_v23 = vpack.c.bf16 %v105_v20, %v104_v19  ;;  %v106_v25 = vld [vmem:[%s1303_s1 + $0x40] sm:$0xff]  ;;  %v107_v26 = vld [vmem:[%s1303_s1 + $0x48] sm:$0xff] }
   0x7   :  { %v615_v24 = vpack.c.bf16 %v137_v22, %v136_v21  ;;  %v138_v27 = vld [vmem:[%s1303_s1 + $0x140] sm:$0xff]  ;;  %v139_v28 = vld [vmem:[%s1303_s1 + $0x148] sm:$0xff]  ;;  %v570_v29 = vpack.c.bf16 %v107_v26, %v106_v25  ;;  %v108_v31 = vld [vmem:[%s1303_s1 + $0x50] sm:$0xff] }
   0x8   :  { %562 = vmatpush1.bf16.msra.mxu1 %v561_v11  ;;  %v618_v30 = vpack.c.bf16 %v139_v28, %v138_v27  ;;  %v109_v32 = vld [vmem:[%s1303_s1 + $0x58] sm:$0xff]  ;;  %v140_v33 = vld [vmem:[%s1303_s1 + $0x150] sm:$0xff]  ;;  %v110_v37 = vld [vmem:[%s1303_s1 + $0x60] sm:$0xff] }
   0x9   :  { %610 = vmatpush1.bf16.msra.mxu0 %v609_v12  ;;  %563 = vmatprep.subr.bf16.mxu1 %v696_v0  ;;  %v141_v34 = vld [vmem:[%s1303_s1 + $0x158] sm:$0xff]  ;;  %v573_v35 = vpack.c.bf16 %v109_v32, %v108_v31  ;;  %v111_v38 = vld [vmem:[%s1303_s1 + $0x68] sm:$0xff]  ;;  %v142_v39 = vld [vmem:[%s1303_s1 + $0x160] sm:$0xff] }
   0xa   :  { %611 = vmatprep.subr.bf16.mxu0 %v696_v0  ;;  %v621_v36 = vpack.c.bf16 %v141_v34, %v140_v33  ;;  %v143_v40 = vld [vmem:[%s1303_s1 + $0x168] sm:$0xff]  ;;  %v17_v42 = vld [vmem:[%s1304_s0 + $0x18] sm:$0xff]  ;;  %v576_v43 = vpack.c.bf16 %v111_v38, %v110_v37  ;;  %v112_v45 = vld [vmem:[%s1303_s1 + $0x70] sm:$0xff] }
   0xb   :  { %v15_v41 = vld [vmem:[%s1304_s0 + $0x8] sm:$0xff]  ;;  %403 = vmatprep.mubr.f32.mxu0 %v17_v42  ;;  %v624_v44 = vpack.c.bf16 %v143_v40, %v142_v39  ;;  %v113_v46 = vld [vmem:[%s1303_s1 + $0x78] sm:$0xff]  ;;  %v144_v47 = vld [vmem:[%s1303_s1 + $0x170] sm:$0xff] }
   0xc   :  { %565 = vmatpush1.bf16.msra.mxu1 %v564_v17  ;;  %233 = vmatprep.mubr.f32.mxu1 %v15_v41  ;;  %v145_v48 = vld [vmem:[%s1303_s1 + $0x178] sm:$0xff]  ;;  %v579_v49 = vpack.c.bf16 %v113_v46, %v112_v45  ;;  %v114_v51 = vld [vmem:[%s1303_s1 + $0x80] sm:$0xff]  ;;  %v115_v52 = vld [vmem:[%s1303_s1 + $0x88] sm:$0xff] }
   0xd   :  { %613 = vmatpush1.bf16.msra.mxu0 %v612_v18  ;;  %566 = vmatprep.subr.bf16.mxu1 %v696_v0  ;;  %v627_v50 = vpack.c.bf16 %v145_v48, %v144_v47  ;;  %v146_v53 = vld [vmem:[%s1303_s1 + $0x180] sm:$0xff]  ;;  %v147_v54 = vld [vmem:[%s1303_s1 + $0x188] sm:$0xff]  ;;  %v582_v55 = vpack.c.bf16 %v115_v52, %v114_v51  ;;  %v116_v57 = vld [vmem:[%s1303_s1 + $0x90] sm:$0xff] }
   0xe   :  { %614 = vmatprep.subr.bf16.mxu0 %v696_v0  ;;  %v630_v56 = vpack.c.bf16 %v147_v54, %v146_v53  ;;  %v117_v58 = vld [vmem:[%s1303_s1 + $0x98] sm:$0xff]  ;;  %v148_v59 = vld [vmem:[%s1303_s1 + $0x190] sm:$0xff]  ;;  %v118_v63 = vld [vmem:[%s1303_s1 + $0xa0] sm:$0xff] }
   0xf   :  { %v149_v60 = vld [vmem:[%s1303_s1 + $0x198] sm:$0xff]  ;;  %v585_v61 = vpack.c.bf16 %v117_v58, %v116_v57  ;;  %v119_v1 = vld [vmem:[%s1303_s1 + $0xa8] sm:$0xff]  ;;  %v150_v2 = vld [vmem:[%s1303_s1 + $0x1a0] sm:$0xff] }
  0x10   :  { %568 = vmatpush1.bf16.msra.mxu1 %v567_v23  ;;  %v633_v62 = vpack.c.bf16 %v149_v60, %v148_v59  ;;  %v151_v3 = vld [vmem:[%s1303_s1 + $0x1a8] sm:$0xff]  ;;  %v588_v4 = vpack.c.bf16 %v119_v1, %v118_v63  ;;  %v120_v6 = vld [vmem:[%s1303_s1 + $0xb0] sm:$0xff]  ;;  %v121_v7 = vld [vmem:[%s1303_s1 + $0xb8] sm:$0xff] }
  0x11   :  { %616 = vmatpush1.bf16.msra.mxu0 %v615_v24  ;;  %569 = vmatprep.subr.bf16.mxu1 %v696_v0  ;;  %v636_v5 = vpack.c.bf16 %v151_v3, %v150_v2  ;;  %v152_v8 = vld [vmem:[%s1303_s1 + $0x1b0] sm:$0xff]  ;;  %v153_v9 = vld [vmem:[%s1303_s1 + $0x1b8] sm:$0xff]  ;;  %v591_v10 = vpack.c.bf16 %v121_v7, %v120_v6  ;;  %v122_v12 = vld [vmem:[%s1303_s1 + $0xc0] sm:$0xff] }
  0x12   :  { %617 = vmatprep.subr.bf16.mxu0 %v696_v0  ;;  %v639_v11 = vpack.c.bf16 %v153_v9, %v152_v8  ;;  %v123_v13 = vld [vmem:[%s1303_s1 + $0xc8] sm:$0xff]  ;;  %v154_v14 = vld [vmem:[%s1303_s1 + $0x1c0] sm:$0xff]  ;;  %v124_v18 = vld [vmem:[%s1303_s1 + $0xd0] sm:$0xff] }
  0x13   :  { %v155_v15 = vld [vmem:[%s1303_s1 + $0x1c8] sm:$0xff]  ;;  %v594_v16 = vpack.c.bf16 %v123_v13, %v122_v12  ;;  %v125_v19 = vld [vmem:[%s1303_s1 + $0xd8] sm:$0xff]  ;;  %v156_v20 = vld [vmem:[%s1303_s1 + $0x1d0] sm:$0xff] }
  0x14   :  { %571 = vmatpush1.bf16.msra.mxu1 %v570_v29  ;;  %v642_v17 = vpack.c.bf16 %v155_v15, %v154_v14  ;;  %v157_v21 = vld [vmem:[%s1303_s1 + $0x1d8] sm:$0xff]  ;;  %v597_v22 = vpack.c.bf16 %v125_v19, %v124_v18  ;;  %v126_v24 = vld [vmem:[%s1303_s1 + $0xe0] sm:$0xff]  ;;  %v127_v25 = vld [vmem:[%s1303_s1 + $0xe8] sm:$0xff] }
  0x15   :  { %619 = vmatpush1.bf16.msra.mxu0 %v618_v30  ;;  %572 = vmatprep.subr.bf16.mxu1 %v696_v0  ;;  %v645_v23 = vpack.c.bf16 %v157_v21, %v156_v20  ;;  %v158_v26 = vld [vmem:[%s1303_s1 + $0x1e0] sm:$0xff]  ;;  %v159_v27 = vld [vmem:[%s1303_s1 + $0x1e8] sm:$0xff]  ;;  %v600_v28 = vpack.c.bf16 %v127_v25, %v126_v24  ;;  %v128_v30 = vld [vmem:[%s1303_s1 + $0xf0] sm:$0xff] }
  0x16   :  { %620 = vmatprep.subr.bf16.mxu0 %v696_v0  ;;  %v648_v29 = vpack.c.bf16 %v159_v27, %v158_v26  ;;  %v129_v31 = vld [vmem:[%s1303_s1 + $0xf8] sm:$0xff]  ;;  %v160_v32 = vld [vmem:[%s1303_s1 + $0x1f0] sm:$0xff]  ;;  %v19_v38 = vld [vmem:[%s1304_s0 + $0x28] sm:$0xff] }
  0x17   :  { %v161_v33 = vld [vmem:[%s1303_s1 + $0x1f8] sm:$0xff]  ;;  %v603_v34 = vpack.c.bf16 %v129_v31, %v128_v30  ;;  %v16_v37 = vld [vmem:[%s1304_s0 + $0x10] sm:$0xff]  ;;  %v23_v41 = vld [vmem:[%s1304_s0 + $0x48] sm:$0xff] }
  0x18   :  { %574 = vmatpush1.bf16.msra.mxu1 %v573_v35  ;;  %v651_v35 = vpack.c.bf16 %v161_v33, %v160_v32  ;;  %v21_v39 = vld [vmem:[%s1304_s0 + $0x38] sm:$0xff]  ;;  %v20_v40 = vld [vmem:[%s1304_s0 + $0x30] sm:$0xff]  ;;  %v27_v45 = vld [vmem:[%s1304_s0 + $0x68] sm:$0xff] }
  0x19   :  { %622 = vmatpush1.bf16.msra.mxu0 %v621_v36  ;;  %575 = vmatprep.subr.bf16.mxu1 %v696_v0  ;;  %v14_v36 = vld [vmem:[%s1304_s0] sm:$0xff]  ;;  %v25_v42 = vld [vmem:[%s1304_s0 + $0x58] sm:$0xff]  ;;  %v28_v48 = vld [vmem:[%s1304_s0 + $0x70] sm:$0xff] }
  0x1a   :  { %623 = vmatprep.subr.bf16.mxu0 %v696_v0  ;;  %v29_v46 = vld [vmem:[%s1304_s0 + $0x78] sm:$0xff]  ;;  %v26_v47 = vld [vmem:[%s1304_s0 + $0x60] sm:$0xff]  ;;  %v32_v52 = vld [vmem:[%s1304_s0 + $0x90] sm:$0xff] }
  0x1b   :  { %v30_v51 = vld [vmem:[%s1304_s0 + $0x80] sm:$0xff]  ;;  %v35_v53 = vld [vmem:[%s1304_s0 + $0xa8] sm:$0xff]  ;;  %v37_v54 = vld [vmem:[%s1304_s0 + $0xb8] sm:$0xff] }
  0x1c   :  { %577 = vmatpush1.bf16.msra.mxu1 %v576_v43  ;;  %v22_v43 = vld [vmem:[%s1304_s0 + $0x40] sm:$0xff]  ;;  %v39_v57 = vld [vmem:[%s1304_s0 + $0xc8] sm:$0xff]  ;;  %v41_v58 = vld [vmem:[%s1304_s0 + $0xd8] sm:$0xff] }
  0x1d   :  { %625 = vmatpush1.bf16.msra.mxu0 %v624_v44  ;;  %578 = vmatprep.subr.bf16.mxu1 %v696_v0  ;;  %v24_v44 = vld [vmem:[%s1304_s0 + $0x50] sm:$0xff]  ;;  %v38_v59 = vld [vmem:[%s1304_s0 + $0xc0] sm:$0xff]  ;;  %v47_v2 = vld [vmem:[%s1304_s0 + $0x108] sm:$0xff] }
  0x1e   :  { %626 = vmatprep.subr.bf16.mxu0 %v696_v0  ;;  %v40_v60 = vld [vmem:[%s1304_s0 + $0xd0] sm:$0xff]  ;;  %v42_v63 = vld [vmem:[%s1304_s0 + $0xe0] sm:$0xff]  ;;  %v49_v3 = vld [vmem:[%s1304_s0 + $0x118] sm:$0xff] }
  0x1f   :  { %v44_v1 = vld [vmem:[%s1304_s0 + $0xf0] sm:$0xff]  ;;  %v51_v6 = vld [vmem:[%s1304_s0 + $0x128] sm:$0xff]  ;;  %v53_v7 = vld [vmem:[%s1304_s0 + $0x138] sm:$0xff] }
  0x20   :  { %580 = vmatpush1.bf16.msra.mxu1 %v579_v49  ;;  %v31_v49 = vld [vmem:[%s1304_s0 + $0x88] sm:$0xff]  ;;  %v50_v8 = vld [vmem:[%s1304_s0 + $0x120] sm:$0xff]  ;;  %v52_v9 = vld [vmem:[%s1304_s0 + $0x130] sm:$0xff] }
  0x21   :  { %628 = vmatpush1.bf16.msra.mxu0 %v627_v50  ;;  %581 = vmatprep.subr.bf16.mxu1 %v696_v0  ;;  %v33_v50 = vld [vmem:[%s1304_s0 + $0x98] sm:$0xff]  ;;  %v54_v12 = vld [vmem:[%s1304_s0 + $0x140] sm:$0xff]  ;;  %v56_v13 = vld [vmem:[%s1304_s0 + $0x150] sm:$0xff] }
  0x22   :  { %629 = vmatprep.subr.bf16.mxu0 %v696_v0  ;;  %v59_v14 = vld [vmem:[%s1304_s0 + $0x168] sm:$0xff]  ;;  %v61_v15 = vld [vmem:[%s1304_s0 + $0x178] sm:$0xff]  ;;  %v62_v20 = vld [vmem:[%s1304_s0 + $0x180] sm:$0xff] }
  0x23   :  { %v63_v18 = vld [vmem:[%s1304_s0 + $0x188] sm:$0xff]  ;;  %v65_v19 = vld [vmem:[%s1304_s0 + $0x198] sm:$0xff]  ;;  %v64_v21 = vld [vmem:[%s1304_s0 + $0x190] sm:$0xff] }
  0x24   :  { %583 = vmatpush1.bf16.msra.mxu1 %v582_v55  ;;  %v34_v55 = vld [vmem:[%s1304_s0 + $0xa0] sm:$0xff]  ;;  %v68_v25 = vld [vmem:[%s1304_s0 + $0x1b0] sm:$0xff]  ;;  %v71_v26 = vld [vmem:[%s1304_s0 + $0x1c8] sm:$0xff] }
  0x25   :  { %631 = vmatpush1.bf16.msra.mxu0 %v630_v56  ;;  %584 = vmatprep.subr.bf16.mxu1 %v696_v0  ;;  %v36_v56 = vld [vmem:[%s1304_s0 + $0xb0] sm:$0xff]  ;;  %v66_v24 = vld [vmem:[%s1304_s0 + $0x1a0] sm:$0xff]  ;;  %v73_v27 = vld [vmem:[%s1304_s0 + $0x1d8] sm:$0xff] }
  0x26   :  { %632 = vmatprep.subr.bf16.mxu0 %v696_v0  ;;  %v75_v30 = vld [vmem:[%s1304_s0 + $0x1e8] sm:$0xff]  ;;  %v77_v31 = vld [vmem:[%s1304_s0 + $0x1f8] sm:$0xff]  ;;  %v74_v32 = vld [vmem:[%s1304_s0 + $0x1e0] sm:$0xff] }
  0x27   :  { %v76_v33 = vld [vmem:[%s1304_s0 + $0x1f0] sm:$0xff] }
  0x28   :  { %586 = vmatpush1.bf16.msra.mxu1 %v585_v61  ;;  %v43_v61 = vld [vmem:[%s1304_s0 + $0xe8] sm:$0xff] }
  0x29   :  { %634 = vmatpush1.bf16.msra.mxu0 %v633_v62  ;;  %587 = vmatprep.subr.bf16.mxu1 %v696_v0  ;;  %v45_v62 = vld [vmem:[%s1304_s0 + $0xf8] sm:$0xff] }
  0x2a   :  { %635 = vmatprep.subr.bf16.mxu0 %v696_v0 }
  0x2c   :  { %589 = vmatpush1.bf16.msra.mxu1 %v588_v4  ;;  %v46_v4 = vld [vmem:[%s1304_s0 + $0x100] sm:$0xff] }
  0x2d   :  { %637 = vmatpush1.bf16.msra.mxu0 %v636_v5  ;;  %590 = vmatprep.subr.bf16.mxu1 %v696_v0  ;;  %v48_v5 = vld [vmem:[%s1304_s0 + $0x110] sm:$0xff] }
  0x2e   :  { %638 = vmatprep.subr.bf16.mxu0 %v696_v0 }
  0x30   :  { %592 = vmatpush1.bf16.msra.mxu1 %v591_v10  ;;  %v55_v10 = vld [vmem:[%s1304_s0 + $0x148] sm:$0xff] }
  0x31   :  { %640 = vmatpush1.bf16.msra.mxu0 %v639_v11  ;;  %593 = vmatprep.subr.bf16.mxu1 %v696_v0  ;;  %v57_v11 = vld [vmem:[%s1304_s0 + $0x158] sm:$0xff] }
  0x32   :  { %641 = vmatprep.subr.bf16.mxu0 %v696_v0 }
  0x34   :  { %595 = vmatpush1.bf16.msra.mxu1 %v594_v16  ;;  %v58_v16 = vld [vmem:[%s1304_s0 + $0x160] sm:$0xff] }
  0x35   :  { %643 = vmatpush1.bf16.msra.mxu0 %v642_v17  ;;  %596 = vmatprep.subr.bf16.mxu1 %v696_v0  ;;  %v60_v17 = vld [vmem:[%s1304_s0 + $0x170] sm:$0xff] }
  0x36   :  { %644 = vmatprep.subr.bf16.mxu0 %v696_v0 }
  0x38   :  { %598 = vmatpush1.bf16.msra.mxu1 %v597_v22  ;;  %v67_v22 = vld [vmem:[%s1304_s0 + $0x1a8] sm:$0xff] }
  0x39   :  { %646 = vmatpush1.bf16.msra.mxu0 %v645_v23  ;;  %599 = vmatprep.subr.bf16.mxu1 %v696_v0  ;;  %v69_v23 = vld [vmem:[%s1304_s0 + $0x1b8] sm:$0xff] }
  0x3a   :  { %647 = vmatprep.subr.bf16.mxu0 %v696_v0 }
  0x3c   :  { %601 = vmatpush1.bf16.msra.mxu1 %v600_v28  ;;  %v70_v28 = vld [vmem:[%s1304_s0 + $0x1c0] sm:$0xff] }
  0x3d   :  { %649 = vmatpush1.bf16.msra.mxu0 %v648_v29  ;;  %602 = vmatprep.subr.bf16.mxu1 %v696_v0  ;;  %v72_v29 = vld [vmem:[%s1304_s0 + $0x1d0] sm:$0xff] }
  0x3e   :  { %650 = vmatprep.subr.bf16.mxu0 %v696_v0  ;;  %v18_v0 = vld [vmem:[%s1304_s0 + $0x20] sm:$0xff] }
  0x40   :  { %604 = vmatpush1.bf16.msra.mxu1 %v603_v34  ;;  %v79_v34 = vld [vmem:[%s1304_s0 + $0x208] sm:$0xff] }
  0x41   :  { %652 = vmatpush1.bf16.msra.mxu0 %v651_v35  ;;  %v81_v35 = vld [vmem:[%s1304_s0 + $0x218] sm:$0xff] }
  0x43   :  { %234 = vmatmul.mubr.f32.vlgmr.msra.gmra.mrb[0].mxu1 %v14_v36  ;;  %v78_v36 = vld [vmem:[%s1304_s0 + $0x200] sm:$0xff] }
  0x44   :  { %404 = vmatmul.mubr.f32.vlgmr.msra.gmra.mrb[0].mxu0 %v16_v37  ;;  %238 = vmatprep.mubr.f32.mxu1 %v19_v38  ;;  %v80_v37 = vld [vmem:[%s1304_s0 + $0x210] sm:$0xff]  ;;  %v83_v38 = vld [vmem:[%s1304_s0 + $0x228] sm:$0xff] }
  0x45   :  { %408 = vmatprep.mubr.f32.mxu0 %v21_v39  ;;  %v85_v39 = vld [vmem:[%s1304_s0 + $0x238] sm:$0xff] }
  0x47   :  { %239 = vmatmul.mubr.f32.gmra.mrb[2].mxu1 %v18_v0  ;;  %v82_v0 = vld [vmem:[%s1304_s0 + $0x220] sm:$0xff] }
  0x48   :  { %409 = vmatmul.mubr.f32.gmra.mrb[2].mxu0 %v20_v40  ;;  %243 = vmatprep.mubr.f32.mxu1 %v23_v41  ;;  %v84_v40 = vld [vmem:[%s1304_s0 + $0x230] sm:$0xff]  ;;  %v87_v41 = vld [vmem:[%s1304_s0 + $0x248] sm:$0xff] }
  0x49   :  { %413 = vmatprep.mubr.f32.mxu0 %v25_v42  ;;  %v89_v42 = vld [vmem:[%s1304_s0 + $0x258] sm:$0xff] }
  0x4b   :  { %244 = vmatmul.mubr.f32.gmra.mrb[4].mxu1 %v22_v43  ;;  %v86_v43 = vld [vmem:[%s1304_s0 + $0x240] sm:$0xff] }
  0x4c   :  { %414 = vmatmul.mubr.f32.gmra.mrb[4].mxu0 %v24_v44  ;;  %248 = vmatprep.mubr.f32.mxu1 %v27_v45  ;;  %v88_v44 = vld [vmem:[%s1304_s0 + $0x250] sm:$0xff]  ;;  %v91_v45 = vld [vmem:[%s1304_s0 + $0x268] sm:$0xff] }
  0x4d   :  { %418 = vmatprep.mubr.f32.mxu0 %v29_v46  ;;  %v93_v46 = vld [vmem:[%s1304_s0 + $0x278] sm:$0xff] }
  0x4f   :  { %249 = vmatmul.mubr.f32.gmra.mrb[6].mxu1 %v26_v47  ;;  %v90_v47 = vld [vmem:[%s1304_s0 + $0x260] sm:$0xff] }
  0x50   :  { %419 = vmatmul.mubr.f32.gmra.mrb[6].mxu0 %v28_v48  ;;  %253 = vmatprep.mubr.f32.mxu1 %v31_v49  ;;  %v92_v48 = vld [vmem:[%s1304_s0 + $0x270] sm:$0xff]  ;;  %v95_v49 = vld [vmem:[%s1304_s0 + $0x288] sm:$0xff] }
  0x51   :  { %423 = vmatprep.mubr.f32.mxu0 %v33_v50  ;;  %v97_v50 = vld [vmem:[%s1304_s0 + $0x298] sm:$0xff] }
  0x53   :  { %254 = vmatmul.mubr.f32.gmra.mrb[8].mxu1 %v30_v51  ;;  %v94_v51 = vld [vmem:[%s1304_s0 + $0x280] sm:$0xff] }
  0x54   :  { %424 = vmatmul.mubr.f32.gmra.mrb[8].mxu0 %v32_v52  ;;  %258 = vmatprep.mubr.f32.mxu1 %v35_v53  ;;  %v96_v52 = vld [vmem:[%s1304_s0 + $0x290] sm:$0xff]  ;;  %v1196_v53 = vld [vmem:[%s1305_s2] ss:$0 sm:$0xff] }
  0x55   :  { %428 = vmatprep.mubr.f32.mxu0 %v37_v54 }
  0x57   :  { %259 = vmatmul.mubr.f32.gmra.mrb[10].mxu1 %v34_v55 }
  0x58   :  { %429 = vmatmul.mubr.f32.gmra.mrb[10].mxu0 %v36_v56  ;;  %263 = vmatprep.mubr.f32.mxu1 %v39_v57 }
  0x59   :  { %433 = vmatprep.mubr.f32.mxu0 %v41_v58 }
  0x5b   :  { %264 = vmatmul.mubr.f32.gmra.mrb[12].mxu1 %v38_v59 }
  0x5c   :  { %434 = vmatmul.mubr.f32.gmra.mrb[12].mxu0 %v40_v60  ;;  %268 = vmatprep.mubr.f32.mxu1 %v43_v61 }
  0x5d   :  { %438 = vmatprep.mubr.f32.mxu0 %v45_v62 }
  0x5f   :  { %269 = vmatmul.mubr.f32.gmra.mrb[14].mxu1 %v42_v63 }
  0x60   :  { %439 = vmatmul.mubr.f32.gmra.mrb[14].mxu0 %v44_v1  ;;  %273 = vmatprep.mubr.f32.mxu1 %v47_v2 }
  0x61   :  { %443 = vmatprep.mubr.f32.mxu0 %v49_v3 }
  0x63   :  { %274 = vmatmul.mubr.f32.gmra.mrb[16].mxu1 %v46_v4 }
  0x64   :  { %444 = vmatmul.mubr.f32.gmra.mrb[16].mxu0 %v48_v5  ;;  %278 = vmatprep.mubr.f32.mxu1 %v51_v6 }
  0x65   :  { %448 = vmatprep.mubr.f32.mxu0 %v53_v7 }
  0x67   :  { %279 = vmatmul.mubr.f32.gmra.mrb[18].mxu1 %v50_v8 }
  0x68   :  { %449 = vmatmul.mubr.f32.gmra.mrb[18].mxu0 %v52_v9  ;;  %283 = vmatprep.mubr.f32.mxu1 %v55_v10 }
  0x69   :  { %453 = vmatprep.mubr.f32.mxu0 %v57_v11 }
  0x6b   :  { %284 = vmatmul.mubr.f32.gmra.mrb[20].mxu1 %v54_v12 }
  0x6c   :  { %454 = vmatmul.mubr.f32.gmra.mrb[20].mxu0 %v56_v13  ;;  %288 = vmatprep.mubr.f32.mxu1 %v59_v14 }
  0x6d   :  { %458 = vmatprep.mubr.f32.mxu0 %v61_v15 }
  0x6f   :  { %289 = vmatmul.mubr.f32.gmra.mrb[22].mxu1 %v58_v16 }
  0x70   :  { %459 = vmatmul.mubr.f32.gmra.mrb[22].mxu0 %v60_v17  ;;  %293 = vmatprep.mubr.f32.mxu1 %v63_v18 }
  0x71   :  { %463 = vmatprep.mubr.f32.mxu0 %v65_v19 }
  0x73   :  { %294 = vmatmul.mubr.f32.gmra.mrb[24].mxu1 %v62_v20 }
  0x74   :  { %464 = vmatmul.mubr.f32.gmra.mrb[24].mxu0 %v64_v21  ;;  %298 = vmatprep.mubr.f32.mxu1 %v67_v22 }
  0x75   :  { %468 = vmatprep.mubr.f32.mxu0 %v69_v23 }
  0x77   :  { %299 = vmatmul.mubr.f32.gmra.mrb[26].mxu1 %v66_v24 }
  0x78   :  { %469 = vmatmul.mubr.f32.gmra.mrb[26].mxu0 %v68_v25  ;;  %303 = vmatprep.mubr.f32.mxu1 %v71_v26 }
  0x79   :  { %473 = vmatprep.mubr.f32.mxu0 %v73_v27 }
  0x7b   :  { %304 = vmatmul.mubr.f32.gmra.mrb[28].mxu1 %v70_v28 }
  0x7c   :  { %474 = vmatmul.mubr.f32.gmra.mrb[28].mxu0 %v72_v29  ;;  %308 = vmatprep.mubr.f32.mxu1 %v75_v30 }
  0x7d   :  { %478 = vmatprep.mubr.f32.mxu0 %v77_v31 }
  0x7f   :  { %309 = vmatmul.mubr.f32.gmra.mrb[30].mxu1 %v74_v32 }
  0x80   :  { %479 = vmatmul.mubr.f32.gmra.mrb[30].mxu0 %v76_v33  ;;  %313 = vmatprep.mubr.f32.mxu1 %v79_v34 }
  0x81   :  { %483 = vmatprep.mubr.f32.mxu0 %v81_v35 }
  0x83   :  { %314 = vmatmul.mubr.f32.gmra.mrb[32].mxu1 %v78_v36 }
  0x84   :  { %484 = vmatmul.mubr.f32.gmra.mrb[32].mxu0 %v80_v37  ;;  %318 = vmatprep.mubr.f32.mxu1 %v83_v38 }
  0x85   :  { %488 = vmatprep.mubr.f32.mxu0 %v85_v39 }
  0x87   :  { %319 = vmatmul.mubr.f32.gmra.mrb[34].mxu1 %v82_v0 }
  0x88   :  { %489 = vmatmul.mubr.f32.gmra.mrb[34].mxu0 %v84_v40  ;;  %323 = vmatprep.mubr.f32.mxu1 %v87_v41 }
  0x89   :  { %493 = vmatprep.mubr.f32.mxu0 %v89_v42 }
  0x8b   :  { %324 = vmatmul.mubr.f32.gmra.mrb[36].mxu1 %v86_v43 }
  0x8c   :  { %494 = vmatmul.mubr.f32.gmra.mrb[36].mxu0 %v88_v44  ;;  %328 = vmatprep.mubr.f32.mxu1 %v91_v45 }
  0x8d   :  { %498 = vmatprep.mubr.f32.mxu0 %v93_v46 }
  0x8f   :  { %329 = vmatmul.mubr.f32.gmra.mrb[38].mxu1 %v90_v47 }
  0x90   :  { %499 = vmatmul.mubr.f32.gmra.mrb[38].mxu0 %v92_v48  ;;  %333 = vmatprep.mubr.f32.mxu1 %v95_v49 }
  0x91   :  { %503 = vmatprep.mubr.f32.mxu0 %v97_v50 }
  0x93   :  { %334 = vmatmul.mubr.f32.gmra.mrb[40].mxu1 %v94_v51 }
  0x94   :  { %504 = vmatmul.mubr.f32.gmra.mrb[40].mxu0 %v96_v52 }
 0x116   :  { %v235_v54 = vpop.f32.mrb[0].mxu1 }
 0x117   :  { %v236_v55 = vadd.f32 %v1196_v53, %v235_v54  ;;  %v237_v56 = vpop.f32.mrb[1].mxu1  ;;  %v405_v57 = vpop.f32.mrb[0].mxu0 }
 0x118   :  { %v407_v58 = vpop.f32.mrb[1].mxu0 }
 0x119   :  { %v406_v59 = vadd.f32 %v405_v57, %v236_v55 }
 0x11a   :  { %v240_v60 = vpop.f32.mrb[2].mxu1 }
 0x11b   :  { %v509_v61 = vmax.f32 %v406_v59, 0.0  ;;  %v241_v62 = vadd.f32 %v1196_v53, %v240_v60  ;;  %v242_v63 = vpop.f32.mrb[3].mxu1  ;;  %v410_v1 = vpop.f32.mrb[2].mxu0 }
 0x11c   :  { %v412_v2 = vpop.f32.mrb[3].mxu0 }
 0x11d   :  { %531 = vst.msk [vmem:[%s1306_s3] sm:$0xff] %vm530_vm0, %v509_v61  ;;  %v411_v3 = vadd.f32 %v410_v1, %v241_v62 }
 0x11e   :  { %v245_v4 = vpop.f32.mrb[4].mxu1 }
 0x11f   :  { %v510_v5 = vmax.f32 %v411_v3, 0.0  ;;  %v246_v6 = vadd.f32 %v1196_v53, %v245_v4  ;;  %v247_v7 = vpop.f32.mrb[5].mxu1  ;;  %v415_v8 = vpop.f32.mrb[4].mxu0 }
 0x120   :  { %v417_v9 = vpop.f32.mrb[5].mxu0 }
 0x121   :  { %532 = vst.msk [vmem:[%s1306_s3 + $0x8] sm:$0xff] %vm530_vm0, %v510_v5  ;;  %v416_v10 = vadd.f32 %v415_v8, %v246_v6 }
 0x122   :  { %v250_v11 = vpop.f32.mrb[6].mxu1 }
 0x123   :  { %v511_v12 = vmax.f32 %v416_v10, 0.0  ;;  %v251_v13 = vadd.f32 %v1196_v53, %v250_v11  ;;  %v252_v14 = vpop.f32.mrb[7].mxu1  ;;  %v420_v15 = vpop.f32.mrb[6].mxu0 }
 0x124   :  { %v422_v16 = vpop.f32.mrb[7].mxu0 }
 0x125   :  { %533 = vst.msk [vmem:[%s1306_s3 + $0x10] sm:$0xff] %vm530_vm0, %v511_v12  ;;  %v421_v17 = vadd.f32 %v420_v15, %v251_v13 }
 0x126   :  { %v255_v18 = vpop.f32.mrb[8].mxu1 }
 0x127   :  { %v512_v19 = vmax.f32 %v421_v17, 0.0  ;;  %v256_v20 = vadd.f32 %v1196_v53, %v255_v18  ;;  %v257_v21 = vpop.f32.mrb[9].mxu1  ;;  %v425_v22 = vpop.f32.mrb[8].mxu0 }
 0x128   :  { %v427_v23 = vpop.f32.mrb[9].mxu0 }
 0x129   :  { %534 = vst.msk [vmem:[%s1306_s3 + $0x18] sm:$0xff] %vm530_vm0, %v512_v19  ;;  %v426_v24 = vadd.f32 %v425_v22, %v256_v20 }
 0x12a   :  { %v260_v25 = vpop.f32.mrb[10].mxu1 }
 0x12b   :  { %v513_v26 = vmax.f32 %v426_v24, 0.0  ;;  %v261_v27 = vadd.f32 %v1196_v53, %v260_v25  ;;  %v262_v28 = vpop.f32.mrb[11].mxu1  ;;  %v430_v29 = vpop.f32.mrb[10].mxu0 }
 0x12c   :  { %v432_v30 = vpop.f32.mrb[11].mxu0 }
 0x12d   :  { %535 = vst.msk [vmem:[%s1306_s3 + $0x20] sm:$0xff] %vm530_vm0, %v513_v26  ;;  %v431_v31 = vadd.f32 %v430_v29, %v261_v27 }
 0x12e   :  { %v265_v32 = vpop.f32.mrb[12].mxu1 }
 0x12f   :  { %v514_v33 = vmax.f32 %v431_v31, 0.0  ;;  %v266_v34 = vadd.f32 %v1196_v53, %v265_v32  ;;  %v267_v35 = vpop.f32.mrb[13].mxu1  ;;  %v435_v36 = vpop.f32.mrb[12].mxu0 }
 0x130   :  { %v437_v37 = vpop.f32.mrb[13].mxu0 }
 0x131   :  { %536 = vst.msk [vmem:[%s1306_s3 + $0x28] sm:$0xff] %vm530_vm0, %v514_v33  ;;  %v436_v38 = vadd.f32 %v435_v36, %v266_v34 }
 0x132   :  { %v270_v39 = vpop.f32.mrb[14].mxu1 }
 0x133   :  { %v515_v0 = vmax.f32 %v436_v38, 0.0  ;;  %v271_v40 = vadd.f32 %v1196_v53, %v270_v39  ;;  %v272_v41 = vpop.f32.mrb[15].mxu1  ;;  %v440_v42 = vpop.f32.mrb[14].mxu0 }
 0x134   :  { %v442_v43 = vpop.f32.mrb[15].mxu0 }
 0x135   :  { %537 = vst.msk [vmem:[%s1306_s3 + $0x30] sm:$0xff] %vm530_vm0, %v515_v0  ;;  %v441_v44 = vadd.f32 %v440_v42, %v271_v40 }
 0x136   :  { %v275_v45 = vpop.f32.mrb[16].mxu1 }
 0x137   :  { %v516_v46 = vmax.f32 %v441_v44, 0.0  ;;  %v276_v47 = vadd.f32 %v1196_v53, %v275_v45  ;;  %v277_v48 = vpop.f32.mrb[17].mxu1  ;;  %v445_v49 = vpop.f32.mrb[16].mxu0 }
 0x138   :  { %v447_v50 = vpop.f32.mrb[17].mxu0 }
 0x139   :  { %538 = vst.msk [vmem:[%s1306_s3 + $0x38] sm:$0xff] %vm530_vm0, %v516_v46  ;;  %v446_v51 = vadd.f32 %v445_v49, %v276_v47 }
 0x13a   :  { %v280_v52 = vpop.f32.mrb[18].mxu1 }
 0x13b   :  { %v517_v54 = vmax.f32 %v446_v51, 0.0  ;;  %v281_v55 = vadd.f32 %v1196_v53, %v280_v52  ;;  %v282_v56 = vpop.f32.mrb[19].mxu1  ;;  %v450_v57 = vpop.f32.mrb[18].mxu0 }
 0x13c   :  { %v452_v58 = vpop.f32.mrb[19].mxu0 }
 0x13d   :  { %539 = vst.msk [vmem:[%s1306_s3 + $0x40] sm:$0xff] %vm530_vm0, %v517_v54  ;;  %v451_v59 = vadd.f32 %v450_v57, %v281_v55 }
 0x13e   :  { %v285_v60 = vpop.f32.mrb[20].mxu1 }
 0x13f   :  { %v518_v61 = vmax.f32 %v451_v59, 0.0  ;;  %v286_v62 = vadd.f32 %v1196_v53, %v285_v60  ;;  %v287_v63 = vpop.f32.mrb[21].mxu1  ;;  %v455_v1 = vpop.f32.mrb[20].mxu0 }
 0x140   :  { %v457_v2 = vpop.f32.mrb[21].mxu0 }
 0x141   :  { %540 = vst.msk [vmem:[%s1306_s3 + $0x48] sm:$0xff] %vm530_vm0, %v518_v61  ;;  %v456_v3 = vadd.f32 %v455_v1, %v286_v62 }
 0x142   :  { %v290_v4 = vpop.f32.mrb[22].mxu1 }
 0x143   :  { %v519_v5 = vmax.f32 %v456_v3, 0.0  ;;  %v291_v6 = vadd.f32 %v1196_v53, %v290_v4  ;;  %v292_v7 = vpop.f32.mrb[23].mxu1  ;;  %v460_v8 = vpop.f32.mrb[22].mxu0 }
 0x144   :  { %v462_v9 = vpop.f32.mrb[23].mxu0 }
 0x145   :  { %541 = vst.msk [vmem:[%s1306_s3 + $0x50] sm:$0xff] %vm530_vm0, %v519_v5  ;;  %v461_v10 = vadd.f32 %v460_v8, %v291_v6 }
 0x146   :  { %v295_v11 = vpop.f32.mrb[24].mxu1 }
 0x147   :  { %v520_v12 = vmax.f32 %v461_v10, 0.0  ;;  %v296_v13 = vadd.f32 %v1196_v53, %v295_v11  ;;  %v297_v14 = vpop.f32.mrb[25].mxu1  ;;  %v465_v15 = vpop.f32.mrb[24].mxu0 }
 0x148   :  { %v467_v16 = vpop.f32.mrb[25].mxu0 }
 0x149   :  { %542 = vst.msk [vmem:[%s1306_s3 + $0x58] sm:$0xff] %vm530_vm0, %v520_v12  ;;  %v466_v17 = vadd.f32 %v465_v15, %v296_v13 }
 0x14a   :  { %v300_v18 = vpop.f32.mrb[26].mxu1 }
 0x14b   :  { %v521_v19 = vmax.f32 %v466_v17, 0.0  ;;  %v301_v20 = vadd.f32 %v1196_v53, %v300_v18  ;;  %v302_v21 = vpop.f32.mrb[27].mxu1  ;;  %v470_v22 = vpop.f32.mrb[26].mxu0 }
 0x14c   :  { %v472_v23 = vpop.f32.mrb[27].mxu0 }
 0x14d   :  { %543 = vst.msk [vmem:[%s1306_s3 + $0x60] sm:$0xff] %vm530_vm0, %v521_v19  ;;  %v471_v24 = vadd.f32 %v470_v22, %v301_v20 }
 0x14e   :  { %v305_v25 = vpop.f32.mrb[28].mxu1 }
 0x14f   :  { %v522_v26 = vmax.f32 %v471_v24, 0.0  ;;  %v306_v27 = vadd.f32 %v1196_v53, %v305_v25  ;;  %v307_v28 = vpop.f32.mrb[29].mxu1  ;;  %v475_v29 = vpop.f32.mrb[28].mxu0 }
 0x150   :  { %v477_v30 = vpop.f32.mrb[29].mxu0 }
 0x151   :  { %544 = vst.msk [vmem:[%s1306_s3 + $0x68] sm:$0xff] %vm530_vm0, %v522_v26  ;;  %v476_v31 = vadd.f32 %v475_v29, %v306_v27 }
 0x152   :  { %v310_v32 = vpop.f32.mrb[30].mxu1 }
 0x153   :  { %v523_v33 = vmax.f32 %v476_v31, 0.0  ;;  %v311_v34 = vadd.f32 %v1196_v53, %v310_v32  ;;  %v312_v35 = vpop.f32.mrb[31].mxu1  ;;  %v480_v36 = vpop.f32.mrb[30].mxu0 }
 0x154   :  { %v482_v37 = vpop.f32.mrb[31].mxu0 }
 0x155   :  { %545 = vst.msk [vmem:[%s1306_s3 + $0x70] sm:$0xff] %vm530_vm0, %v523_v33  ;;  %v481_v38 = vadd.f32 %v480_v36, %v311_v34 }
 0x156   :  { %v315_v39 = vpop.f32.mrb[32].mxu1 }
 0x157   :  { %v524_v0 = vmax.f32 %v481_v38, 0.0  ;;  %v316_v40 = vadd.f32 %v1196_v53, %v315_v39  ;;  %v317_v41 = vpop.f32.mrb[33].mxu1  ;;  %v485_v42 = vpop.f32.mrb[32].mxu0 }
 0x158   :  { %v487_v43 = vpop.f32.mrb[33].mxu0 }
 0x159   :  { %546 = vst.msk [vmem:[%s1306_s3 + $0x78] sm:$0xff] %vm530_vm0, %v524_v0  ;;  %v486_v44 = vadd.f32 %v485_v42, %v316_v40 }
 0x15a   :  { %v320_v45 = vpop.f32.mrb[34].mxu1 }
 0x15b   :  { %v525_v46 = vmax.f32 %v486_v44, 0.0  ;;  %v321_v47 = vadd.f32 %v1196_v53, %v320_v45  ;;  %v322_v48 = vpop.f32.mrb[35].mxu1  ;;  %v490_v49 = vpop.f32.mrb[34].mxu0 }
 0x15c   :  { %v492_v50 = vpop.f32.mrb[35].mxu0 }
 0x15d   :  { %547 = vst.msk [vmem:[%s1306_s3 + $0x80] sm:$0xff] %vm530_vm0, %v525_v46  ;;  %v491_v51 = vadd.f32 %v490_v49, %v321_v47 }
 0x15e   :  { %v325_v52 = vpop.f32.mrb[36].mxu1 }
 0x15f   :  { %v526_v54 = vmax.f32 %v491_v51, 0.0  ;;  %v326_v55 = vadd.f32 %v1196_v53, %v325_v52  ;;  %v327_v56 = vpop.f32.mrb[37].mxu1  ;;  %v495_v57 = vpop.f32.mrb[36].mxu0 }
 0x160   :  { %v497_v58 = vpop.f32.mrb[37].mxu0 }
 0x161   :  { %548 = vst.msk [vmem:[%s1306_s3 + $0x88] sm:$0xff] %vm530_vm0, %v526_v54  ;;  %v496_v59 = vadd.f32 %v495_v57, %v326_v55 }
 0x162   :  { %v330_v60 = vpop.f32.mrb[38].mxu1 }
 0x163   :  { %v527_v61 = vmax.f32 %v496_v59, 0.0  ;;  %v331_v62 = vadd.f32 %v1196_v53, %v330_v60  ;;  %v332_v63 = vpop.f32.mrb[39].mxu1  ;;  %v500_v1 = vpop.f32.mrb[38].mxu0 }
 0x164   :  { %v502_v2 = vpop.f32.mrb[39].mxu0 }
 0x165   :  { %549 = vst.msk [vmem:[%s1306_s3 + $0x90] sm:$0xff] %vm530_vm0, %v527_v61  ;;  %v501_v3 = vadd.f32 %v500_v1, %v331_v62 }
 0x166   :  { %v335_v4 = vpop.f32.mrb[40].mxu1 }
 0x167   :  { %v528_v5 = vmax.f32 %v501_v3, 0.0  ;;  %v336_v6 = vadd.f32 %v1196_v53, %v335_v4  ;;  %v337_v7 = vpop.f32.mrb[41].mxu1  ;;  %v505_v8 = vpop.f32.mrb[40].mxu0 }
 0x168   :  { %v507_v9 = vpop.f32.mrb[41].mxu0 }
 0x169   :  { %550 = vst.msk [vmem:[%s1306_s3 + $0x98] sm:$0xff] %vm530_vm0, %v528_v5  ;;  %v506_v10 = vadd.f32 %v505_v8, %v336_v6 }
 0x16b   :  { %v529_v11 = vmax.f32 %v506_v10, 0.0 }
 0x16d   :  { %551 = vst.msk [vmem:[%s1306_s3 + $0xa0] sm:$0xff] %vm530_vm0, %v529_v11 }

// kernel: dueling_q_forward.6
= control target key start
LH: loop header
LB: loop body
LE: loop exit
PB: predicated region body
PF: predicated region fallthrough
CT: control target
= control target key end

     0   :  { %vm938_vm0 = vmmov 0   ;;  %vm569_vm1 = vcmask 523264   ;;  %s1515_s1 = inlined_call_operand.vmem [shape: f32[640,64], index: 1, kind: input, shape index: {}]   ;;  %s1516_s0 = inlined_call_operand.vmem [shape: f32[104,640], index: 0, kind: input, shape index: {}]   ;;  %s1517_s2 = inlined_call_operand.vmem [shape: f32[1,64], index: 2, kind: input, shape index: {}]   ;;  %s1518_s3 = inlined_call_operand.vmem [shape: f32[104,64], index: 3, kind: output, shape index: {}]  }
   0x1   :  { %v95_v0 = vld [vmem:[%s1515_s1 + $0x80] sm:$0xff]  ;;  %v96_v1 = vld [vmem:[%s1515_s1 + $0x88] sm:$0xff]  ;;  %v97_v11 = vld [vmem:[%s1515_s1 + $0x90] sm:$0xff] }
   0x2   :  { %v127_v2 = vld [vmem:[%s1515_s1 + $0x180] sm:$0xff]  ;;  %v830_v3 = vpack.c.bf16 %v96_v1, %v95_v0  ;;  %v128_v4 = vld [vmem:[%s1515_s1 + $0x188] sm:$0xff]  ;;  %v98_v13 = vld [vmem:[%s1515_s1 + $0x98] sm:$0xff] }
   0x3   :  { %v79_v5 = vld [vmem:[%s1515_s1] sm:$0xff]  ;;  %v80_v6 = vld [vmem:[%s1515_s1 + $0x8] sm:$0xff]  ;;  %v862_v7 = vpack.c.bf16 %v128_v4, %v127_v2  ;;  %v129_v14 = vld [vmem:[%s1515_s1 + $0x190] sm:$0xff]  ;;  %v834_v16 = vpack.c.bf16 %v98_v13, %v97_v11 }
   0x4   :  { %v832_v8 = vpack.c.bf16 %v80_v6, %v79_v5  ;;  %v111_v9 = vld [vmem:[%s1515_s1 + $0x100] sm:$0xff]  ;;  %v112_v10 = vld [vmem:[%s1515_s1 + $0x108] sm:$0xff]  ;;  %831 = vmatprep.subr.bf16.mxu0 %v830_v3  ;;  %v130_v15 = vld [vmem:[%s1515_s1 + $0x198] sm:$0xff] }
   0x5   :  { %v864_v12 = vpack.c.bf16 %v112_v10, %v111_v9  ;;  %863 = vmatprep.subr.bf16.mxu1 %v862_v7  ;;  %v866_v17 = vpack.c.bf16 %v130_v15, %v129_v14  ;;  %v81_v18 = vld [vmem:[%s1515_s1 + $0x10] sm:$0xff]  ;;  %v82_v19 = vld [vmem:[%s1515_s1 + $0x18] sm:$0xff]  ;;  %v99_v23 = vld [vmem:[%s1515_s1 + $0xa0] sm:$0xff] }
   0x6   :  { %833 = vmatpush3.bf16.msra.mxu0 %v832_v8  ;;  %v113_v20 = vld [vmem:[%s1515_s1 + $0x110] sm:$0xff]  ;;  %v836_v21 = vpack.c.bf16 %v82_v19, %v81_v18  ;;  %v114_v22 = vld [vmem:[%s1515_s1 + $0x118] sm:$0xff]  ;;  %v100_v24 = vld [vmem:[%s1515_s1 + $0xa8] sm:$0xff] }
   0x7   :  { %865 = vmatpush3.bf16.msra.mxu1 %v864_v12  ;;  %835 = vmatprep.subr.bf16.mxu0 %v834_v16  ;;  %v868_v25 = vpack.c.bf16 %v114_v22, %v113_v20  ;;  %v838_v26 = vpack.c.bf16 %v100_v24, %v99_v23  ;;  %v131_v27 = vld [vmem:[%s1515_s1 + $0x1a0] sm:$0xff]  ;;  %v132_v28 = vld [vmem:[%s1515_s1 + $0x1a8] sm:$0xff]  ;;  %v101_v35 = vld [vmem:[%s1515_s1 + $0xb0] sm:$0xff] }
   0x8   :  { %867 = vmatprep.subr.bf16.mxu1 %v866_v17  ;;  %v83_v29 = vld [vmem:[%s1515_s1 + $0x20] sm:$0xff]  ;;  %v870_v30 = vpack.c.bf16 %v132_v28, %v131_v27  ;;  %v84_v31 = vld [vmem:[%s1515_s1 + $0x28] sm:$0xff]  ;;  %v102_v36 = vld [vmem:[%s1515_s1 + $0xb8] sm:$0xff] }
   0x9   :  { %v115_v32 = vld [vmem:[%s1515_s1 + $0x120] sm:$0xff]  ;;  %v116_v33 = vld [vmem:[%s1515_s1 + $0x128] sm:$0xff]  ;;  %v840_v34 = vpack.c.bf16 %v84_v31, %v83_v29  ;;  %v133_v37 = vld [vmem:[%s1515_s1 + $0x1b0] sm:$0xff]  ;;  %v842_v39 = vpack.c.bf16 %v102_v36, %v101_v35 }
   0xa   :  { %837 = vmatpush3.bf16.msra.mxu0 %v836_v21  ;;  %v872_v38 = vpack.c.bf16 %v116_v33, %v115_v32  ;;  %v134_v40 = vld [vmem:[%s1515_s1 + $0x1b8] sm:$0xff]  ;;  %v85_v41 = vld [vmem:[%s1515_s1 + $0x30] sm:$0xff]  ;;  %v103_v46 = vld [vmem:[%s1515_s1 + $0xc0] sm:$0xff] }
   0xb   :  { %869 = vmatpush3.bf16.msra.mxu1 %v868_v25  ;;  %839 = vmatprep.subr.bf16.mxu0 %v838_v26  ;;  %v86_v42 = vld [vmem:[%s1515_s1 + $0x38] sm:$0xff]  ;;  %v874_v43 = vpack.c.bf16 %v134_v40, %v133_v37  ;;  %v117_v44 = vld [vmem:[%s1515_s1 + $0x130] sm:$0xff]  ;;  %v104_v47 = vld [vmem:[%s1515_s1 + $0xc8] sm:$0xff] }
   0xc   :  { %871 = vmatprep.subr.bf16.mxu1 %v870_v30  ;;  %v118_v45 = vld [vmem:[%s1515_s1 + $0x138] sm:$0xff]  ;;  %v135_v48 = vld [vmem:[%s1515_s1 + $0x1c0] sm:$0xff]  ;;  %v136_v49 = vld [vmem:[%s1515_s1 + $0x1c8] sm:$0xff]  ;;  %v844_v50 = vpack.c.bf16 %v86_v42, %v85_v41  ;;  %v846_v52 = vpack.c.bf16 %v104_v47, %v103_v46 }
   0xd   :  { %v876_v51 = vpack.c.bf16 %v118_v45, %v117_v44  ;;  %v87_v53 = vld [vmem:[%s1515_s1 + $0x40] sm:$0xff]  ;;  %v88_v54 = vld [vmem:[%s1515_s1 + $0x48] sm:$0xff]  ;;  %v878_v56 = vpack.c.bf16 %v136_v49, %v135_v48  ;;  %v105_v58 = vld [vmem:[%s1515_s1 + $0xd0] sm:$0xff] }
   0xe   :  { %841 = vmatpush3.bf16.msra.mxu0 %v840_v34  ;;  %v119_v55 = vld [vmem:[%s1515_s1 + $0x140] sm:$0xff]  ;;  %v120_v57 = vld [vmem:[%s1515_s1 + $0x148] sm:$0xff]  ;;  %v106_v59 = vld [vmem:[%s1515_s1 + $0xd8] sm:$0xff]  ;;  %v848_v62 = vpack.c.bf16 %v88_v54, %v87_v53 }
   0xf   :  { %873 = vmatpush3.bf16.msra.mxu1 %v872_v38  ;;  %843 = vmatprep.subr.bf16.mxu0 %v842_v39  ;;  %v137_v60 = vld [vmem:[%s1515_s1 + $0x1d0] sm:$0xff]  ;;  %v138_v61 = vld [vmem:[%s1515_s1 + $0x1d8] sm:$0xff]  ;;  %v880_v63 = vpack.c.bf16 %v120_v57, %v119_v55  ;;  %v850_v0 = vpack.c.bf16 %v106_v59, %v105_v58  ;;  %v107_v6 = vld [vmem:[%s1515_s1 + $0xe0] sm:$0xff]  ;;  %v937_v39 = vmov 0.0|0.0  }
  0x10   :  { %875 = vmatprep.subr.bf16.mxu1 %v874_v43  ;;  %v89_v1 = vld [vmem:[%s1515_s1 + $0x50] sm:$0xff]  ;;  %v90_v2 = vld [vmem:[%s1515_s1 + $0x58] sm:$0xff]  ;;  %v882_v4 = vpack.c.bf16 %v138_v61, %v137_v60  ;;  %v108_v7 = vld [vmem:[%s1515_s1 + $0xe8] sm:$0xff] }
  0x11   :  { %v121_v3 = vld [vmem:[%s1515_s1 + $0x150] sm:$0xff]  ;;  %v122_v5 = vld [vmem:[%s1515_s1 + $0x158] sm:$0xff]  ;;  %v139_v8 = vld [vmem:[%s1515_s1 + $0x1e0] sm:$0xff]  ;;  %v852_v10 = vpack.c.bf16 %v90_v2, %v89_v1  ;;  %v854_v14 = vpack.c.bf16 %v108_v7, %v107_v6 }
  0x12   :  { %845 = vmatpush3.bf16.msra.mxu0 %v844_v50  ;;  %v140_v9 = vld [vmem:[%s1515_s1 + $0x1e8] sm:$0xff]  ;;  %v91_v11 = vld [vmem:[%s1515_s1 + $0x60] sm:$0xff]  ;;  %v884_v13 = vpack.c.bf16 %v122_v5, %v121_v3  ;;  %v17_v17 = vld [vmem:[%s1516_s0 + $0x18] sm:$0xff] }
  0x13   :  { %877 = vmatpush3.bf16.msra.mxu1 %v876_v51  ;;  %847 = vmatprep.subr.bf16.mxu0 %v846_v52  ;;  %v92_v12 = vld [vmem:[%s1515_s1 + $0x68] sm:$0xff]  ;;  %v123_v15 = vld [vmem:[%s1515_s1 + $0x160] sm:$0xff]  ;;  %v886_v18 = vpack.c.bf16 %v140_v9, %v139_v8  ;;  %v109_v20 = vld [vmem:[%s1515_s1 + $0xf0] sm:$0xff] }
  0x14   :  { %879 = vmatprep.subr.bf16.mxu1 %v878_v56  ;;  %v15_v16 = vld [vmem:[%s1516_s0 + $0x8] sm:$0xff]  ;;  %v110_v21 = vld [vmem:[%s1515_s1 + $0xf8] sm:$0xff]  ;;  %v141_v22 = vld [vmem:[%s1515_s1 + $0x1f0] sm:$0xff]  ;;  %360 = vmatprep.mubr.f32.mxu1 %v17_v17  ;;  %v856_v24 = vpack.c.bf16 %v92_v12, %v91_v11 }
  0x15   :  { %v124_v19 = vld [vmem:[%s1515_s1 + $0x168] sm:$0xff]  ;;  %230 = vmatprep.mubr.f32.mxu0 %v15_v16  ;;  %v142_v23 = vld [vmem:[%s1515_s1 + $0x1f8] sm:$0xff]  ;;  %v858_v26 = vpack.c.bf16 %v110_v21, %v109_v20  ;;  %v93_v27 = vld [vmem:[%s1515_s1 + $0x70] sm:$0xff] }
  0x16   :  { %849 = vmatpush3.bf16.msra.mxu0 %v848_v62  ;;  %v888_v25 = vpack.c.bf16 %v124_v19, %v123_v15  ;;  %v94_v28 = vld [vmem:[%s1515_s1 + $0x78] sm:$0xff]  ;;  %v890_v29 = vpack.c.bf16 %v142_v23, %v141_v22  ;;  %v125_v30 = vld [vmem:[%s1515_s1 + $0x170] sm:$0xff]  ;;  %v143_v34 = vld [vmem:[%s1515_s1 + $0x200] sm:$0xff] }
  0x17   :  { %881 = vmatpush3.bf16.msra.mxu1 %v880_v63  ;;  %851 = vmatprep.subr.bf16.mxu0 %v850_v0  ;;  %v126_v31 = vld [vmem:[%s1515_s1 + $0x178] sm:$0xff]  ;;  %v860_v32 = vpack.c.bf16 %v94_v28, %v93_v27  ;;  %v144_v35 = vld [vmem:[%s1515_s1 + $0x208] sm:$0xff]  ;;  %v14_v36 = vld [vmem:[%s1516_s0] sm:$0xff] }
  0x18   :  { %883 = vmatprep.subr.bf16.mxu1 %v882_v4  ;;  %v892_v33 = vpack.c.bf16 %v126_v31, %v125_v30  ;;  %v895_v37 = vpack.c.bf16 %v144_v35, %v143_v34  ;;  %v16_v38 = vld [vmem:[%s1516_s0 + $0x10] sm:$0xff]  ;;  %v22_v41 = vld [vmem:[%s1516_s0 + $0x40] sm:$0xff]  ;;  %v146_v43 = vld [vmem:[%s1515_s1 + $0x218] sm:$0xff] }
  0x19   :  { %v20_v40 = vld [vmem:[%s1516_s0 + $0x30] sm:$0xff]  ;;  %v19_v44 = vld [vmem:[%s1516_s0 + $0x28] sm:$0xff]  ;;  %v21_v45 = vld [vmem:[%s1516_s0 + $0x38] sm:$0xff] }
  0x1a   :  { %853 = vmatpush3.bf16.msra.mxu0 %v852_v10  ;;  %v145_v42 = vld [vmem:[%s1515_s1 + $0x210] sm:$0xff]  ;;  %v25_v46 = vld [vmem:[%s1516_s0 + $0x58] sm:$0xff]  ;;  %v27_v48 = vld [vmem:[%s1516_s0 + $0x68] sm:$0xff] }
  0x1b   :  { %885 = vmatpush3.bf16.msra.mxu1 %v884_v13  ;;  %855 = vmatprep.subr.bf16.mxu0 %v854_v14  ;;  %v898_v47 = vpack.c.bf16 %v146_v43, %v145_v42  ;;  %v147_v49 = vld [vmem:[%s1515_s1 + $0x220] sm:$0xff]  ;;  %v148_v50 = vld [vmem:[%s1515_s1 + $0x228] sm:$0xff]  ;;  %v24_v51 = vld [vmem:[%s1516_s0 + $0x50] sm:$0xff] }
  0x1c   :  { %887 = vmatprep.subr.bf16.mxu1 %v886_v18  ;;  %v26_v52 = vld [vmem:[%s1516_s0 + $0x60] sm:$0xff]  ;;  %v901_v54 = vpack.c.bf16 %v148_v50, %v147_v49  ;;  %v32_v55 = vld [vmem:[%s1516_s0 + $0x90] sm:$0xff]  ;;  %v150_v57 = vld [vmem:[%s1515_s1 + $0x238] sm:$0xff] }
  0x1d   :  { %v30_v53 = vld [vmem:[%s1516_s0 + $0x80] sm:$0xff]  ;;  %v149_v56 = vld [vmem:[%s1515_s1 + $0x230] sm:$0xff]  ;;  %v29_v58 = vld [vmem:[%s1516_s0 + $0x78] sm:$0xff] }
  0x1e   :  { %857 = vmatpush3.bf16.msra.mxu0 %v856_v24  ;;  %v31_v59 = vld [vmem:[%s1516_s0 + $0x88] sm:$0xff]  ;;  %v904_v61 = vpack.c.bf16 %v150_v57, %v149_v56  ;;  %v37_v62 = vld [vmem:[%s1516_s0 + $0xb8] sm:$0xff]  ;;  %v151_v63 = vld [vmem:[%s1515_s1 + $0x240] sm:$0xff] }
  0x1f   :  { %889 = vmatpush3.bf16.msra.mxu1 %v888_v25  ;;  %859 = vmatprep.subr.bf16.mxu0 %v858_v26  ;;  %v35_v60 = vld [vmem:[%s1516_s0 + $0xa8] sm:$0xff]  ;;  %v34_v1 = vld [vmem:[%s1516_s0 + $0xa0] sm:$0xff]  ;;  %v36_v2 = vld [vmem:[%s1516_s0 + $0xb0] sm:$0xff] }
  0x20   :  { %891 = vmatprep.subr.bf16.mxu1 %v890_v29  ;;  %v152_v0 = vld [vmem:[%s1515_s1 + $0x248] sm:$0xff]  ;;  %v40_v3 = vld [vmem:[%s1516_s0 + $0xd0] sm:$0xff]  ;;  %v42_v5 = vld [vmem:[%s1516_s0 + $0xe0] sm:$0xff] }
  0x21   :  { %v907_v4 = vpack.c.bf16 %v152_v0, %v151_v63  ;;  %v153_v6 = vld [vmem:[%s1515_s1 + $0x250] sm:$0xff]  ;;  %v154_v7 = vld [vmem:[%s1515_s1 + $0x258] sm:$0xff]  ;;  %v39_v8 = vld [vmem:[%s1516_s0 + $0xc8] sm:$0xff] }
  0x22   :  { %861 = vmatpush3.bf16.msra.mxu0 %v860_v32  ;;  %v41_v9 = vld [vmem:[%s1516_s0 + $0xd8] sm:$0xff]  ;;  %v910_v11 = vpack.c.bf16 %v154_v7, %v153_v6  ;;  %v47_v12 = vld [vmem:[%s1516_s0 + $0x108] sm:$0xff]  ;;  %v155_v13 = vld [vmem:[%s1515_s1 + $0x260] sm:$0xff] }
  0x23   :  { %893 = vmatpush3.bf16.msra.mxu1 %v892_v33  ;;  %894 = vmatprep.subr.bf16.mxu0 %v937_v39  ;;  %v45_v10 = vld [vmem:[%s1516_s0 + $0xf8] sm:$0xff]  ;;  %v156_v14 = vld [vmem:[%s1515_s1 + $0x268] sm:$0xff]  ;;  %v44_v15 = vld [vmem:[%s1516_s0 + $0xf0] sm:$0xff] }
  0x24   :  { %918 = vmatprep.subr.bf16.mxu1 %v937_v39  ;;  %v46_v16 = vld [vmem:[%s1516_s0 + $0x100] sm:$0xff]  ;;  %v913_v18 = vpack.c.bf16 %v156_v14, %v155_v13  ;;  %v52_v19 = vld [vmem:[%s1516_s0 + $0x130] sm:$0xff]  ;;  %v158_v21 = vld [vmem:[%s1515_s1 + $0x278] sm:$0xff] }
  0x25   :  { %231 = vmatmul.mubr.f32.vlgmr.msra.gmra.mrb[0].mxu0 %v14_v36  ;;  %v50_v17 = vld [vmem:[%s1516_s0 + $0x120] sm:$0xff]  ;;  %v157_v20 = vld [vmem:[%s1515_s1 + $0x270] sm:$0xff]  ;;  %v49_v22 = vld [vmem:[%s1516_s0 + $0x118] sm:$0xff] }
  0x26   :  { %361 = vmatmul.mubr.f32.vlgmr.msra.gmra.mrb[0].mxu1 %v16_v38  ;;  %896 = vmatpush3.bf16.msra.mxu0 %v895_v37  ;;  %v51_v23 = vld [vmem:[%s1516_s0 + $0x128] sm:$0xff]  ;;  %v916_v25 = vpack.c.bf16 %v158_v21, %v157_v20  ;;  %v57_v26 = vld [vmem:[%s1516_s0 + $0x158] sm:$0xff]  ;;  %v54_v27 = vld [vmem:[%s1516_s0 + $0x140] sm:$0xff] }
  0x27   :  { %235 = vmatprep.mubr.f32.mxu0 %v20_v40  ;;  %365 = vmatprep.mubr.f32.mxu1 %v22_v41  ;;  %v55_v24 = vld [vmem:[%s1516_s0 + $0x148] sm:$0xff]  ;;  %v56_v28 = vld [vmem:[%s1516_s0 + $0x150] sm:$0xff]  ;;  %v62_v30 = vld [vmem:[%s1516_s0 + $0x180] sm:$0xff] }
  0x28   :  { %926 = vmatpush3.bf16.msra.mxu1 %v895_v37  ;;  %897 = vmatprep.subr.bf16.mxu0 %v937_v39  ;;  %v60_v29 = vld [vmem:[%s1516_s0 + $0x170] sm:$0xff]  ;;  %v59_v31 = vld [vmem:[%s1516_s0 + $0x168] sm:$0xff]  ;;  %v61_v32 = vld [vmem:[%s1516_s0 + $0x178] sm:$0xff] }
  0x29   :  { %236 = vmatmul.mubr.f32.gmra.mrb[2].mxu0 %v19_v44  ;;  %919 = vmatprep.subr.bf16.mxu1 %v937_v39  ;;  %v65_v33 = vld [vmem:[%s1516_s0 + $0x198] sm:$0xff]  ;;  %v67_v34 = vld [vmem:[%s1516_s0 + $0x1a8] sm:$0xff]  ;;  %v64_v35 = vld [vmem:[%s1516_s0 + $0x190] sm:$0xff] }
  0x2a   :  { %366 = vmatmul.mubr.f32.gmra.mrb[2].mxu1 %v21_v45  ;;  %240 = vmatprep.mubr.f32.mxu0 %v25_v46  ;;  %v66_v36 = vld [vmem:[%s1516_s0 + $0x1a0] sm:$0xff]  ;;  %v72_v38 = vld [vmem:[%s1516_s0 + $0x1d0] sm:$0xff]  ;;  %v71_v40 = vld [vmem:[%s1516_s0 + $0x1c8] sm:$0xff]  ;;  %v939_v45 = vmov 0.0  }
  0x2b   :  { %370 = vmatprep.mubr.f32.mxu1 %v27_v48  ;;  %899 = vmatpush3.bf16.msra.mxu0 %v898_v47  ;;  %v70_v37 = vld [vmem:[%s1516_s0 + $0x1c0] sm:$0xff]  ;;  %v75_v41 = vld [vmem:[%s1516_s0 + $0x1e8] sm:$0xff]  ;;  %v77_v42 = vld [vmem:[%s1516_s0 + $0x1f8] sm:$0xff] }
  0x2c   :  { %927 = vmatpush3.bf16.msra.mxu1 %v898_v47  ;;  %900 = vmatprep.subr.bf16.mxu0 %v937_v39  ;;  %v74_v43 = vld [vmem:[%s1516_s0 + $0x1e0] sm:$0xff]  ;;  %v76_v44 = vld [vmem:[%s1516_s0 + $0x1f0] sm:$0xff]  ;;  %v53_v47 = vld [vmem:[%s1516_s0 + $0x138] sm:$0xff] }
  0x2d   :  { %241 = vmatmul.mubr.f32.gmra.mrb[4].mxu0 %v24_v51  ;;  %920 = vmatprep.subr.bf16.mxu1 %v937_v39  ;;  %v18_v46 = vld [vmem:[%s1516_s0 + $0x20] sm:$0xff]  ;;  %v23_v48 = vld [vmem:[%s1516_s0 + $0x48] sm:$0xff]  ;;  %v28_v50 = vld [vmem:[%s1516_s0 + $0x70] sm:$0xff] }
  0x2e   :  { %371 = vmatmul.mubr.f32.gmra.mrb[4].mxu1 %v26_v52  ;;  %245 = vmatprep.mubr.f32.mxu0 %v30_v53  ;;  %v58_v49 = vld [vmem:[%s1516_s0 + $0x160] sm:$0xff]  ;;  %v63_v51 = vld [vmem:[%s1516_s0 + $0x188] sm:$0xff]  ;;  %v33_v52 = vld [vmem:[%s1516_s0 + $0x98] sm:$0xff] }
  0x2f   :  { %375 = vmatprep.mubr.f32.mxu1 %v32_v55  ;;  %902 = vmatpush3.bf16.msra.mxu0 %v901_v54  ;;  %v68_v53 = vld [vmem:[%s1516_s0 + $0x1b0] sm:$0xff]  ;;  %v73_v55 = vld [vmem:[%s1516_s0 + $0x1d8] sm:$0xff]  ;;  %v43_v56 = vld [vmem:[%s1516_s0 + $0xe8] sm:$0xff] }
  0x30   :  { %928 = vmatpush3.bf16.msra.mxu1 %v901_v54  ;;  %903 = vmatprep.subr.bf16.mxu0 %v937_v39  ;;  %v38_v54 = vld [vmem:[%s1516_s0 + $0xc0] sm:$0xff] }
  0x31   :  { %246 = vmatmul.mubr.f32.gmra.mrb[6].mxu0 %v29_v58  ;;  %921 = vmatprep.subr.bf16.mxu1 %v937_v39  ;;  %v78_v57 = vld [vmem:[%s1516_s0 + $0x200] sm:$0xff]  ;;  %v48_v58 = vld [vmem:[%s1516_s0 + $0x110] sm:$0xff] }
  0x32   :  { %376 = vmatmul.mubr.f32.gmra.mrb[6].mxu1 %v31_v59  ;;  %250 = vmatprep.mubr.f32.mxu0 %v35_v60  ;;  %v1427_v60 = vld [vmem:[%s1517_s2] ss:$0 sm:$0xff] }
  0x33   :  { %380 = vmatprep.mubr.f32.mxu1 %v37_v62  ;;  %905 = vmatpush3.bf16.msra.mxu0 %v904_v61 }
  0x34   :  { %929 = vmatpush3.bf16.msra.mxu1 %v904_v61  ;;  %906 = vmatprep.subr.bf16.mxu0 %v937_v39 }
  0x35   :  { %251 = vmatmul.mubr.f32.gmra.mrb[8].mxu0 %v34_v1  ;;  %922 = vmatprep.subr.bf16.mxu1 %v937_v39 }
  0x36   :  { %381 = vmatmul.mubr.f32.gmra.mrb[8].mxu1 %v36_v2  ;;  %255 = vmatprep.mubr.f32.mxu0 %v40_v3 }
  0x37   :  { %385 = vmatprep.mubr.f32.mxu1 %v42_v5  ;;  %908 = vmatpush3.bf16.msra.mxu0 %v907_v4 }
  0x38   :  { %930 = vmatpush3.bf16.msra.mxu1 %v907_v4  ;;  %909 = vmatprep.subr.bf16.mxu0 %v937_v39 }
  0x39   :  { %256 = vmatmul.mubr.f32.gmra.mrb[10].mxu0 %v39_v8  ;;  %923 = vmatprep.subr.bf16.mxu1 %v937_v39 }
  0x3a   :  { %386 = vmatmul.mubr.f32.gmra.mrb[10].mxu1 %v41_v9  ;;  %260 = vmatprep.mubr.f32.mxu0 %v45_v10 }
  0x3b   :  { %390 = vmatprep.mubr.f32.mxu1 %v47_v12  ;;  %911 = vmatpush3.bf16.msra.mxu0 %v910_v11 }
  0x3c   :  { %931 = vmatpush3.bf16.msra.mxu1 %v910_v11  ;;  %912 = vmatprep.subr.bf16.mxu0 %v937_v39 }
  0x3d   :  { %261 = vmatmul.mubr.f32.gmra.mrb[12].mxu0 %v44_v15  ;;  %924 = vmatprep.subr.bf16.mxu1 %v937_v39 }
  0x3e   :  { %391 = vmatmul.mubr.f32.gmra.mrb[12].mxu1 %v46_v16  ;;  %265 = vmatprep.mubr.f32.mxu0 %v50_v17 }
  0x3f   :  { %395 = vmatprep.mubr.f32.mxu1 %v52_v19  ;;  %914 = vmatpush3.bf16.msra.mxu0 %v913_v18 }
  0x40   :  { %932 = vmatpush3.bf16.msra.mxu1 %v913_v18  ;;  %915 = vmatprep.subr.bf16.mxu0 %v937_v39 }
  0x41   :  { %266 = vmatmul.mubr.f32.gmra.mrb[14].mxu0 %v49_v22  ;;  %925 = vmatprep.subr.bf16.mxu1 %v937_v39  ;;  %v69_v39 = vld [vmem:[%s1516_s0 + $0x1b8] sm:$0xff] }
  0x42   :  { %396 = vmatmul.mubr.f32.gmra.mrb[14].mxu1 %v51_v23  ;;  %270 = vmatprep.mubr.f32.mxu0 %v55_v24 }
  0x43   :  { %400 = vmatprep.mubr.f32.mxu1 %v57_v26  ;;  %917 = vmatpush3.bf16.msra.mxu0 %v916_v25 }
  0x44   :  { %933 = vmatpush3.bf16.msra.mxu1 %v916_v25 }
  0x45   :  { %271 = vmatmul.mubr.f32.gmra.mrb[16].mxu0 %v54_v27 }
  0x46   :  { %401 = vmatmul.mubr.f32.gmra.mrb[16].mxu1 %v56_v28  ;;  %275 = vmatprep.mubr.f32.mxu0 %v60_v29 }
  0x47   :  { %405 = vmatprep.mubr.f32.mxu1 %v62_v30 }
  0x49   :  { %276 = vmatmul.mubr.f32.gmra.mrb[18].mxu0 %v59_v31 }
  0x4a   :  { %406 = vmatmul.mubr.f32.gmra.mrb[18].mxu1 %v61_v32  ;;  %280 = vmatprep.mubr.f32.mxu0 %v65_v33 }
  0x4b   :  { %410 = vmatprep.mubr.f32.mxu1 %v67_v34 }
  0x4d   :  { %281 = vmatmul.mubr.f32.gmra.mrb[20].mxu0 %v64_v35 }
  0x4e   :  { %411 = vmatmul.mubr.f32.gmra.mrb[20].mxu1 %v66_v36  ;;  %285 = vmatprep.mubr.f32.mxu0 %v70_v37 }
  0x4f   :  { %415 = vmatprep.mubr.f32.mxu1 %v72_v38 }
  0x51   :  { %286 = vmatmul.mubr.f32.gmra.mrb[22].mxu0 %v69_v39 }
  0x52   :  { %416 = vmatmul.mubr.f32.gmra.mrb[22].mxu1 %v71_v40  ;;  %290 = vmatprep.mubr.f32.mxu0 %v75_v41 }
  0x53   :  { %420 = vmatprep.mubr.f32.mxu1 %v77_v42 }
  0x55   :  { %291 = vmatmul.mubr.f32.gmra.mrb[24].mxu0 %v74_v43 }
  0x56   :  { %421 = vmatmul.mubr.f32.gmra.mrb[24].mxu1 %v76_v44  ;;  %791 = vmatprep.mubr.msk.f32.mxu0 %vm938_vm0, %v939_v45 }
  0x57   :  { %812 = vmatprep.mubr.msk.f32.mxu1 %vm938_vm0, %v939_v45 }
  0x59   :  { %792 = vmatmul.mubr.f32.vlgmr.msra.gmra.mrb[26].mxu0 %v18_v46 }
  0x5a   :  { %813 = vmatmul.mubr.f32.vlgmr.msra.gmra.mrb[26].mxu1 %v53_v47  ;;  %794 = vmatprep.mubr.msk.f32.mxu0 %vm938_vm0, %v939_v45 }
  0x5b   :  { %815 = vmatprep.mubr.msk.f32.mxu1 %vm938_vm0, %v939_v45 }
  0x5d   :  { %795 = vmatmul.mubr.f32.gmra.mrb[28].mxu0 %v23_v48 }
  0x5e   :  { %816 = vmatmul.mubr.f32.gmra.mrb[28].mxu1 %v58_v49  ;;  %797 = vmatprep.mubr.msk.f32.mxu0 %vm938_vm0, %v939_v45 }
  0x5f   :  { %818 = vmatprep.mubr.msk.f32.mxu1 %vm938_vm0, %v939_v45 }
  0x61   :  { %798 = vmatmul.mubr.f32.gmra.mrb[30].mxu0 %v28_v50 }
  0x62   :  { %819 = vmatmul.mubr.f32.gmra.mrb[30].mxu1 %v63_v51  ;;  %800 = vmatprep.mubr.msk.f32.mxu0 %vm938_vm0, %v939_v45 }
  0x63   :  { %821 = vmatprep.mubr.msk.f32.mxu1 %vm938_vm0, %v939_v45 }
  0x65   :  { %801 = vmatmul.mubr.f32.gmra.mrb[32].mxu0 %v33_v52 }
  0x66   :  { %822 = vmatmul.mubr.f32.gmra.mrb[32].mxu1 %v68_v53  ;;  %803 = vmatprep.mubr.msk.f32.mxu0 %vm938_vm0, %v939_v45 }
  0x67   :  { %824 = vmatprep.mubr.msk.f32.mxu1 %vm938_vm0, %v939_v45 }
  0x69   :  { %804 = vmatmul.mubr.f32.gmra.mrb[34].mxu0 %v38_v54 }
  0x6a   :  { %825 = vmatmul.mubr.f32.gmra.mrb[34].mxu1 %v73_v55  ;;  %806 = vmatprep.mubr.msk.f32.mxu0 %vm938_vm0, %v939_v45 }
  0x6b   :  { %827 = vmatprep.mubr.msk.f32.mxu1 %vm938_vm0, %v939_v45 }
  0x6d   :  { %807 = vmatmul.mubr.f32.gmra.mrb[36].mxu0 %v43_v56 }
  0x6e   :  { %828 = vmatmul.mubr.f32.gmra.mrb[36].mxu1 %v78_v57  ;;  %809 = vmatprep.mubr.msk.f32.mxu0 %vm938_vm0, %v939_v45 }
  0x71   :  { %810 = vmatmul.mubr.f32.gmra.mrb[38].mxu0 %v48_v58 }
  0xf8   :  { %v620_v59 = vpop.f32.mrb[0].mxu0 }
  0xf9   :  { %v621_v61 = vpop.f32.mrb[1].mxu0  ;;  %v691_v62 = vpop.f32.mrb[0].mxu1 }
  0xfa   :  { %v622_v63 = vadd.f32 %v621_v61, %v620_v59  ;;  %v692_v0 = vpop.f32.mrb[1].mxu1 }
  0xfb   :  { %v693_v1 = vadd.f32 %v692_v0, %v691_v62 }
  0xfc   :  { %v233_v2 = vadd.f32 %v622_v63, %v1427_v60  ;;  %v623_v3 = vpop.f32.mrb[2].mxu0 }
  0xfd   :  { %v624_v4 = vpop.f32.mrb[3].mxu0  ;;  %v694_v5 = vpop.f32.mrb[2].mxu1 }
  0xfe   :  { %v625_v6 = vadd.f32 %v624_v4, %v623_v3  ;;  %v695_v7 = vpop.f32.mrb[3].mxu1  ;;  %v1430_v8 = vadd.f32 %v693_v1, %v233_v2 }
  0xff   :  { %v696_v9 = vadd.f32 %v695_v7, %v694_v5 }
 0x100   :  { %v238_v10 = vadd.f32 %v625_v6, %v1427_v60  ;;  %v626_v11 = vpop.f32.mrb[4].mxu0 }
 0x101   :  { %v627_v12 = vpop.f32.mrb[5].mxu0  ;;  %v697_v13 = vpop.f32.mrb[4].mxu1 }
 0x102   :  { %v628_v14 = vadd.f32 %v627_v12, %v626_v11  ;;  %v698_v15 = vpop.f32.mrb[5].mxu1  ;;  %v1433_v16 = vadd.f32 %v696_v9, %v238_v10 }
 0x103   :  { %v699_v17 = vadd.f32 %v698_v15, %v697_v13 }
 0x104   :  { %v243_v18 = vadd.f32 %v628_v14, %v1427_v60  ;;  %v629_v19 = vpop.f32.mrb[6].mxu0 }
 0x105   :  { %v630_v20 = vpop.f32.mrb[7].mxu0  ;;  %v700_v21 = vpop.f32.mrb[6].mxu1 }
 0x106   :  { %v631_v22 = vadd.f32 %v630_v20, %v629_v19  ;;  %v701_v23 = vpop.f32.mrb[7].mxu1  ;;  %v1436_v24 = vadd.f32 %v699_v17, %v243_v18 }
 0x107   :  { %v702_v25 = vadd.f32 %v701_v23, %v700_v21 }
 0x108   :  { %v248_v26 = vadd.f32 %v631_v22, %v1427_v60  ;;  %v632_v27 = vpop.f32.mrb[8].mxu0 }
 0x109   :  { %v633_v28 = vpop.f32.mrb[9].mxu0  ;;  %v703_v29 = vpop.f32.mrb[8].mxu1 }
 0x10a   :  { %v634_v30 = vadd.f32 %v633_v28, %v632_v27  ;;  %v704_v31 = vpop.f32.mrb[9].mxu1  ;;  %v1439_v32 = vadd.f32 %v702_v25, %v248_v26 }
 0x10b   :  { %v705_v33 = vadd.f32 %v704_v31, %v703_v29 }
 0x10c   :  { %v253_v34 = vadd.f32 %v634_v30, %v1427_v60  ;;  %v635_v35 = vpop.f32.mrb[10].mxu0 }
 0x10d   :  { %v636_v36 = vpop.f32.mrb[11].mxu0  ;;  %v706_v37 = vpop.f32.mrb[10].mxu1 }
 0x10e   :  { %v637_v38 = vadd.f32 %v636_v36, %v635_v35  ;;  %v707_v39 = vpop.f32.mrb[11].mxu1  ;;  %v1442_v40 = vadd.f32 %v705_v33, %v253_v34 }
 0x10f   :  { %v708_v41 = vadd.f32 %v707_v39, %v706_v37 }
 0x110   :  { %v258_v42 = vadd.f32 %v637_v38, %v1427_v60  ;;  %v638_v43 = vpop.f32.mrb[12].mxu0 }
 0x111   :  { %v639_v44 = vpop.f32.mrb[13].mxu0  ;;  %v709_v45 = vpop.f32.mrb[12].mxu1 }
 0x112   :  { %v640_v46 = vadd.f32 %v639_v44, %v638_v43  ;;  %v710_v47 = vpop.f32.mrb[13].mxu1  ;;  %v1445_v48 = vadd.f32 %v708_v41, %v258_v42 }
 0x113   :  { %v711_v49 = vadd.f32 %v710_v47, %v709_v45 }
 0x114   :  { %v263_v50 = vadd.f32 %v640_v46, %v1427_v60  ;;  %v641_v51 = vpop.f32.mrb[14].mxu0 }
 0x115   :  { %v642_v52 = vpop.f32.mrb[15].mxu0  ;;  %v712_v53 = vpop.f32.mrb[14].mxu1 }
 0x116   :  { %v643_v54 = vadd.f32 %v642_v52, %v641_v51  ;;  %v713_v55 = vpop.f32.mrb[15].mxu1  ;;  %v1448_v56 = vadd.f32 %v711_v49, %v263_v50 }
 0x117   :  { %v714_v57 = vadd.f32 %v713_v55, %v712_v53 }
 0x118   :  { %v268_v58 = vadd.f32 %v643_v54, %v1427_v60  ;;  %v644_v59 = vpop.f32.mrb[16].mxu0 }
 0x119   :  { %v645_v61 = vpop.f32.mrb[17].mxu0  ;;  %v715_v62 = vpop.f32.mrb[16].mxu1 }
 0x11a   :  { %v646_v63 = vadd.f32 %v645_v61, %v644_v59  ;;  %v716_v0 = vpop.f32.mrb[17].mxu1  ;;  %v398_v1 = vadd.f32 %v714_v57, %v268_v58 }
 0x11b   :  { %v717_v2 = vadd.f32 %v716_v0, %v715_v62 }
 0x11c   :  { %v273_v3 = vadd.f32 %v646_v63, %v1427_v60  ;;  %v647_v4 = vpop.f32.mrb[18].mxu0 }
 0x11d   :  { %v648_v5 = vpop.f32.mrb[19].mxu0  ;;  %v718_v6 = vpop.f32.mrb[18].mxu1 }
 0x11e   :  { %v649_v7 = vadd.f32 %v648_v5, %v647_v4  ;;  %v719_v9 = vpop.f32.mrb[19].mxu1  ;;  %v403_v10 = vadd.f32 %v717_v2, %v273_v3 }
 0x11f   :  { %v720_v11 = vadd.f32 %v719_v9, %v718_v6 }
 0x120   :  { %v278_v12 = vadd.f32 %v649_v7, %v1427_v60  ;;  %v650_v13 = vpop.f32.mrb[20].mxu0 }
 0x121   :  { %v651_v14 = vpop.f32.mrb[21].mxu0  ;;  %v721_v15 = vpop.f32.mrb[20].mxu1 }
 0x122   :  { %v652_v17 = vadd.f32 %v651_v14, %v650_v13  ;;  %v722_v18 = vpop.f32.mrb[21].mxu1  ;;  %v408_v19 = vadd.f32 %v720_v11, %v278_v12 }
 0x123   :  { %v723_v20 = vadd.f32 %v722_v18, %v721_v15 }
 0x124   :  { %v283_v21 = vadd.f32 %v652_v17, %v1427_v60  ;;  %v653_v22 = vpop.f32.mrb[22].mxu0 }
 0x125   :  { %v654_v23 = vpop.f32.mrb[23].mxu0  ;;  %v724_v25 = vpop.f32.mrb[22].mxu1 }
 0x126   :  { %v655_v26 = vadd.f32 %v654_v23, %v653_v22  ;;  %v725_v27 = vpop.f32.mrb[23].mxu1  ;;  %v413_v28 = vadd.f32 %v723_v20, %v283_v21 }
 0x127   :  { %v726_v29 = vadd.f32 %v725_v27, %v724_v25 }
 0x128   :  { %v288_v30 = vadd.f32 %v655_v26, %v1427_v60  ;;  %v656_v31 = vpop.f32.mrb[24].mxu0 }
 0x129   :  { %v657_v33 = vpop.f32.mrb[25].mxu0  ;;  %v727_v34 = vpop.f32.mrb[24].mxu1 }
 0x12a   :  { %v658_v35 = vadd.f32 %v657_v33, %v656_v31  ;;  %v728_v36 = vpop.f32.mrb[25].mxu1  ;;  %v418_v37 = vadd.f32 %v726_v29, %v288_v30 }
 0x12b   :  { %v729_v38 = vadd.f32 %v728_v36, %v727_v34 }
 0x12c   :  { %v293_v39 = vadd.f32 %v658_v35, %v1427_v60  ;;  %v492_v41 = vpop.f32.mrb[26].mxu0 }
 0x12d   :  { %v493_v42 = vadd.f32 %v492_v41, %v1430_v8  ;;  %v527_v43 = vpop.f32.mrb[26].mxu1  ;;  %v793_v44 = vpop.f32.mrb[27].mxu0 }
 0x12e   :  { %v528_v45 = vadd.f32 %v527_v43, %v398_v1  ;;  %v814_v46 = vpop.f32.mrb[27].mxu1  ;;  %v423_v47 = vadd.f32 %v729_v38, %v293_v39 }
 0x12f   :  { %v556_v49 = vmax.f32 %v493_v42, 0.0 }
 0x130   :  { %v563_v50 = vmax.f32 %v528_v45, 0.0  ;;  %v497_v51 = vpop.f32.mrb[28].mxu0 }
 0x131   :  { %570 = vst.msk [vmem:[%s1518_s3] sm:$0xff] %vm569_vm1, %v556_v49  ;;  %v498_v52 = vadd.f32 %v497_v51, %v1433_v16  ;;  %v532_v60 = vpop.f32.mrb[28].mxu1  ;;  %v796_v53 = vpop.f32.mrb[29].mxu0 }
 0x132   :  { %577 = vst.msk [vmem:[%s1518_s3 + $0x38] sm:$0xff] %vm569_vm1, %v563_v50  ;;  %v533_v8 = vadd.f32 %v532_v60, %v403_v10  ;;  %v817_v54 = vpop.f32.mrb[29].mxu1 }
 0x133   :  { %v557_v55 = vmax.f32 %v498_v52, 0.0 }
 0x134   :  { %v564_v57 = vmax.f32 %v533_v8, 0.0  ;;  %v502_v58 = vpop.f32.mrb[30].mxu0 }
 0x135   :  { %571 = vst.msk [vmem:[%s1518_s3 + $0x8] sm:$0xff] %vm569_vm1, %v557_v55  ;;  %v503_v59 = vadd.f32 %v502_v58, %v1436_v24  ;;  %v537_v16 = vpop.f32.mrb[30].mxu1  ;;  %v799_v61 = vpop.f32.mrb[31].mxu0 }
 0x136   :  { %578 = vst.msk [vmem:[%s1518_s3 + $0x40] sm:$0xff] %vm569_vm1, %v564_v57  ;;  %v538_v62 = vadd.f32 %v537_v16, %v408_v19  ;;  %v820_v63 = vpop.f32.mrb[31].mxu1 }
 0x137   :  { %v558_v0 = vmax.f32 %v503_v59, 0.0 }
 0x138   :  { %v565_v1 = vmax.f32 %v538_v62, 0.0  ;;  %v507_v2 = vpop.f32.mrb[32].mxu0 }
 0x139   :  { %572 = vst.msk [vmem:[%s1518_s3 + $0x10] sm:$0xff] %vm569_vm1, %v558_v0  ;;  %v508_v3 = vadd.f32 %v507_v2, %v1439_v32  ;;  %v542_v24 = vpop.f32.mrb[32].mxu1  ;;  %v802_v4 = vpop.f32.mrb[33].mxu0 }
 0x13a   :  { %579 = vst.msk [vmem:[%s1518_s3 + $0x48] sm:$0xff] %vm569_vm1, %v565_v1  ;;  %v543_v5 = vadd.f32 %v542_v24, %v413_v28  ;;  %v823_v6 = vpop.f32.mrb[33].mxu1 }
 0x13b   :  { %v559_v7 = vmax.f32 %v508_v3, 0.0 }
 0x13c   :  { %v566_v9 = vmax.f32 %v543_v5, 0.0  ;;  %v512_v10 = vpop.f32.mrb[34].mxu0 }
 0x13d   :  { %573 = vst.msk [vmem:[%s1518_s3 + $0x18] sm:$0xff] %vm569_vm1, %v559_v7  ;;  %v513_v11 = vadd.f32 %v512_v10, %v1442_v40  ;;  %v547_v32 = vpop.f32.mrb[34].mxu1  ;;  %v805_v12 = vpop.f32.mrb[35].mxu0 }
 0x13e   :  { %580 = vst.msk [vmem:[%s1518_s3 + $0x50] sm:$0xff] %vm569_vm1, %v566_v9  ;;  %v548_v13 = vadd.f32 %v547_v32, %v418_v37  ;;  %v826_v14 = vpop.f32.mrb[35].mxu1 }
 0x13f   :  { %v560_v15 = vmax.f32 %v513_v11, 0.0 }
 0x140   :  { %v567_v17 = vmax.f32 %v548_v13, 0.0  ;;  %v517_v18 = vpop.f32.mrb[36].mxu0 }
 0x141   :  { %574 = vst.msk [vmem:[%s1518_s3 + $0x20] sm:$0xff] %vm569_vm1, %v560_v15  ;;  %v518_v19 = vadd.f32 %v517_v18, %v1445_v48  ;;  %v552_v40 = vpop.f32.mrb[36].mxu1  ;;  %v808_v20 = vpop.f32.mrb[37].mxu0 }
 0x142   :  { %581 = vst.msk [vmem:[%s1518_s3 + $0x58] sm:$0xff] %vm569_vm1, %v567_v17  ;;  %v553_v21 = vadd.f32 %v552_v40, %v423_v47  ;;  %v829_v22 = vpop.f32.mrb[37].mxu1 }
 0x143   :  { %v561_v23 = vmax.f32 %v518_v19, 0.0 }
 0x144   :  { %v568_v25 = vmax.f32 %v553_v21, 0.0  ;;  %v522_v26 = vpop.f32.mrb[38].mxu0 }
 0x145   :  { %575 = vst.msk [vmem:[%s1518_s3 + $0x28] sm:$0xff] %vm569_vm1, %v561_v23  ;;  %v523_v27 = vadd.f32 %v522_v26, %v1448_v56  ;;  %v811_v48 = vpop.f32.mrb[39].mxu0 }
 0x146   :  { %582 = vst.msk [vmem:[%s1518_s3 + $0x60] sm:$0xff] %vm569_vm1, %v568_v25 }
 0x147   :  { %v562_v28 = vmax.f32 %v523_v27, 0.0 }
 0x149   :  { %576 = vst.msk [vmem:[%s1518_s3 + $0x30] sm:$0xff] %vm569_vm1, %v562_v28 }

// kernel: dueling_q_forward.7
= control target key start
LH: loop header
LB: loop body
LE: loop exit
PB: predicated region body
PF: predicated region fallthrough
CT: control target
= control target key end

     0   :  { %vm12595_vm0 = vcmask 48128   ;;  %s20017_s1 = inlined_call_operand.vmem [shape: bf16[3200,1024], index: 1, kind: input, shape index: {}]   ;;  %s20018_s0 = inlined_call_operand.vmem [shape: bf16[8,3200], index: 0, kind: input, shape index: {}]   ;;  %s20019_s3 = inlined_call_operand.vmem [shape: bf16[1024,7], index: 3, kind: input, shape index: {}]   ;;  %s20020_s2 = inlined_call_operand.vmem [shape: f32[1,1024], index: 2, kind: input, shape index: {}]   ;;  %s20021_s4 = inlined_call_operand.vmem [shape: f32[1,7], index: 4, kind: input, shape index: {}]   ;;  %s20022_s5 = inlined_call_operand.vmem [shape: f32[8,6], index: 5, kind: output, shape index: {}]  }
   0x1   :  { %v34_v0 = vld [vmem:[%s20017_s1] sm:$0xff]  ;;  %v35_v2 = vld [vmem:[%s20017_s1 + $0x8] sm:$0xff] }
   0x2   :  { %v38_v1 = vld [vmem:[%s20017_s1 + $0x20] sm:$0xff]  ;;  %v39_v4 = vld [vmem:[%s20017_s1 + $0x28] sm:$0xff] }
   0x3   :  { %v12642_v3 = vcombine.high %v34_v0, %v38_v1  ;;  %v12641_v5 = vcombine.low %v34_v0, %v38_v1  ;;  %v42_v6 = vld [vmem:[%s20017_s1 + $0x40] sm:$0xff]  ;;  %v12644_v8 = vcombine.high %v35_v2, %v39_v4  ;;  %v12643_v9 = vcombine.low %v35_v2, %v39_v4  ;;  %v43_v11 = vld [vmem:[%s20017_s1 + $0x48] sm:$0xff] }
   0x4   :  { %v46_v7 = vld [vmem:[%s20017_s1 + $0x60] sm:$0xff]  ;;  %v47_v12 = vld [vmem:[%s20017_s1 + $0x68] sm:$0xff] }
   0x5   :  { %v12650_v10 = vcombine.high %v42_v6, %v46_v7  ;;  %v50_v13 = vld [vmem:[%s20017_s1 + $0x80] sm:$0xff]  ;;  %9764 = vmatprep.subr.bf16.mxu0 %v12642_v3  ;;  %v12652_v14 = vcombine.high %v43_v11, %v47_v12  ;;  %v51_v16 = vld [vmem:[%s20017_s1 + $0x88] sm:$0xff]  ;;  %10297 = vmatprep.subr.bf16.mxu1 %v12644_v8  ;;  %v12649_v18 = vcombine.low %v42_v6, %v46_v7 }
   0x6   :  { %v54_v15 = vld [vmem:[%s20017_s1 + $0xa0] sm:$0xff]  ;;  %v55_v17 = vld [vmem:[%s20017_s1 + $0xa8] sm:$0xff]  ;;  %9765 = vmatpush1.bf16.msra.mxu0 %v12641_v5  ;;  %10298 = vmatpush1.bf16.msra.mxu1 %v12643_v9  ;;  %v12651_v19 = vcombine.low %v43_v11, %v47_v12 }
   0x7   :  { %9766 = vmatprep.subr.bf16.mxu0 %v12650_v10  ;;  %v12658_v20 = vcombine.high %v50_v13, %v54_v15  ;;  %10299 = vmatprep.subr.bf16.mxu1 %v12652_v14  ;;  %v12660_v21 = vcombine.high %v51_v16, %v55_v17  ;;  %v58_v22 = vld [vmem:[%s20017_s1 + $0xc0] sm:$0xff]  ;;  %v59_v24 = vld [vmem:[%s20017_s1 + $0xc8] sm:$0xff]  ;;  %v12657_v26 = vcombine.low %v50_v13, %v54_v15 }
   0x8   :  { %v62_v23 = vld [vmem:[%s20017_s1 + $0xe0] sm:$0xff]  ;;  %v63_v25 = vld [vmem:[%s20017_s1 + $0xe8] sm:$0xff]  ;;  %v12659_v27 = vcombine.low %v51_v16, %v55_v17 }
   0x9   :  { %v12666_v28 = vcombine.high %v58_v22, %v62_v23  ;;  %v12668_v29 = vcombine.high %v59_v24, %v63_v25  ;;  %v66_v30 = vld [vmem:[%s20017_s1 + $0x100] sm:$0xff]  ;;  %v67_v32 = vld [vmem:[%s20017_s1 + $0x108] sm:$0xff]  ;;  %v12665_v34 = vcombine.low %v58_v22, %v62_v23  ;;  %v12667_v35 = vcombine.low %v59_v24, %v63_v25 }
   0xa   :  { %9767 = vmatpush1.bf16.msra.mxu0 %v12649_v18  ;;  %10300 = vmatpush1.bf16.msra.mxu1 %v12651_v19  ;;  %v70_v31 = vld [vmem:[%s20017_s1 + $0x120] sm:$0xff]  ;;  %v71_v33 = vld [vmem:[%s20017_s1 + $0x128] sm:$0xff] }
   0xb   :  { %9768 = vmatprep.subr.bf16.mxu0 %v12658_v20  ;;  %10301 = vmatprep.subr.bf16.mxu1 %v12660_v21  ;;  %v12674_v36 = vcombine.high %v66_v30, %v70_v31  ;;  %v12676_v37 = vcombine.high %v67_v32, %v71_v33  ;;  %v74_v38 = vld [vmem:[%s20017_s1 + $0x140] sm:$0xff]  ;;  %v75_v40 = vld [vmem:[%s20017_s1 + $0x148] sm:$0xff]  ;;  %v12673_v42 = vcombine.low %v66_v30, %v70_v31 }
   0xc   :  { %v78_v39 = vld [vmem:[%s20017_s1 + $0x160] sm:$0xff]  ;;  %v79_v41 = vld [vmem:[%s20017_s1 + $0x168] sm:$0xff]  ;;  %v12675_v43 = vcombine.low %v67_v32, %v71_v33 }
   0xd   :  { %v12682_v44 = vcombine.high %v74_v38, %v78_v39  ;;  %v12684_v45 = vcombine.high %v75_v40, %v79_v41  ;;  %v82_v46 = vld [vmem:[%s20017_s1 + $0x180] sm:$0xff]  ;;  %v83_v48 = vld [vmem:[%s20017_s1 + $0x188] sm:$0xff]  ;;  %v12681_v50 = vcombine.low %v74_v38, %v78_v39  ;;  %v12683_v51 = vcombine.low %v75_v40, %v79_v41 }
   0xe   :  { %9769 = vmatpush1.bf16.msra.mxu0 %v12657_v26  ;;  %10302 = vmatpush1.bf16.msra.mxu1 %v12659_v27  ;;  %v86_v47 = vld [vmem:[%s20017_s1 + $0x1a0] sm:$0xff]  ;;  %v87_v49 = vld [vmem:[%s20017_s1 + $0x1a8] sm:$0xff] }
   0xf   :  { %9770 = vmatprep.subr.bf16.mxu0 %v12666_v28  ;;  %10303 = vmatprep.subr.bf16.mxu1 %v12668_v29  ;;  %v12690_v52 = vcombine.high %v82_v46, %v86_v47  ;;  %v14807_v53 = vld [vmem:[%s20018_s0] sm:$0xff]  ;;  %v12692_v54 = vcombine.high %v83_v48, %v87_v49  ;;  %v91_v58 = vld [vmem:[%s20017_s1 + $0x1c8] sm:$0xff]  ;;  %v12689_v60 = vcombine.low %v82_v46, %v86_v47 }
  0x10   :  { %v90_v55 = vld [vmem:[%s20017_s1 + $0x1c0] sm:$0xff]  ;;  %v14817_v57 = vcombine.high %v14807_v53, %v14807_v53  ;;  %v95_v59 = vld [vmem:[%s20017_s1 + $0x1e8] sm:$0xff]  ;;  %v12691_v61 = vcombine.low %v83_v48, %v87_v49 }
  0x11   :  { %v94_v56 = vld [vmem:[%s20017_s1 + $0x1e0] sm:$0xff]  ;;  %v12700_v63 = vcombine.high %v91_v58, %v95_v59  ;;  %v99_v2 = vld [vmem:[%s20017_s1 + $0x208] sm:$0xff]  ;;  %v12699_v5 = vcombine.low %v91_v58, %v95_v59 }
  0x12   :  { %9771 = vmatpush1.bf16.msra.mxu0 %v12665_v34  ;;  %10304 = vmatpush1.bf16.msra.mxu1 %v12667_v35  ;;  %v12698_v62 = vcombine.high %v90_v55, %v94_v56  ;;  %v98_v0 = vld [vmem:[%s20017_s1 + $0x200] sm:$0xff]  ;;  %v103_v3 = vld [vmem:[%s20017_s1 + $0x228] sm:$0xff]  ;;  %v12697_v4 = vcombine.low %v90_v55, %v94_v56 }
  0x13   :  { %9772 = vmatprep.subr.bf16.mxu0 %v12674_v36  ;;  %10305 = vmatprep.subr.bf16.mxu1 %v12676_v37  ;;  %v102_v1 = vld [vmem:[%s20017_s1 + $0x220] sm:$0xff]  ;;  %v12708_v7 = vcombine.high %v99_v2, %v103_v3  ;;  %v107_v10 = vld [vmem:[%s20017_s1 + $0x248] sm:$0xff]  ;;  %v12707_v13 = vcombine.low %v99_v2, %v103_v3 }
  0x14   :  { %9796 = vmatprep.mubr.bf16.mxu0 %v14817_v57  ;;  %10329 = vmatprep.mubr.bf16.mxu1 %v14817_v57  ;;  %v12706_v6 = vcombine.high %v98_v0, %v102_v1  ;;  %v106_v8 = vld [vmem:[%s20017_s1 + $0x240] sm:$0xff]  ;;  %v111_v11 = vld [vmem:[%s20017_s1 + $0x268] sm:$0xff]  ;;  %v12705_v12 = vcombine.low %v98_v0, %v102_v1 }
  0x15   :  { %v110_v9 = vld [vmem:[%s20017_s1 + $0x260] sm:$0xff]  ;;  %v12716_v15 = vcombine.high %v107_v10, %v111_v11  ;;  %v115_v18 = vld [vmem:[%s20017_s1 + $0x288] sm:$0xff]  ;;  %v12715_v21 = vcombine.low %v107_v10, %v111_v11 }
  0x16   :  { %9773 = vmatpush1.bf16.msra.mxu0 %v12673_v42  ;;  %10306 = vmatpush1.bf16.msra.mxu1 %v12675_v43  ;;  %v12714_v14 = vcombine.high %v106_v8, %v110_v9  ;;  %v114_v16 = vld [vmem:[%s20017_s1 + $0x280] sm:$0xff]  ;;  %v119_v19 = vld [vmem:[%s20017_s1 + $0x2a8] sm:$0xff]  ;;  %v12713_v20 = vcombine.low %v106_v8, %v110_v9 }
  0x17   :  { %9774 = vmatprep.subr.bf16.mxu0 %v12682_v44  ;;  %10307 = vmatprep.subr.bf16.mxu1 %v12684_v45  ;;  %v118_v17 = vld [vmem:[%s20017_s1 + $0x2a0] sm:$0xff]  ;;  %v12724_v23 = vcombine.high %v115_v18, %v119_v19  ;;  %v123_v26 = vld [vmem:[%s20017_s1 + $0x2c8] sm:$0xff]  ;;  %v12723_v29 = vcombine.low %v115_v18, %v119_v19 }
  0x18   :  { %v12722_v22 = vcombine.high %v114_v16, %v118_v17  ;;  %v122_v24 = vld [vmem:[%s20017_s1 + $0x2c0] sm:$0xff]  ;;  %v127_v27 = vld [vmem:[%s20017_s1 + $0x2e8] sm:$0xff]  ;;  %v12721_v28 = vcombine.low %v114_v16, %v118_v17 }
  0x19   :  { %v126_v25 = vld [vmem:[%s20017_s1 + $0x2e0] sm:$0xff]  ;;  %v12732_v31 = vcombine.high %v123_v26, %v127_v27  ;;  %v131_v34 = vld [vmem:[%s20017_s1 + $0x308] sm:$0xff]  ;;  %v12731_v37 = vcombine.low %v123_v26, %v127_v27 }
  0x1a   :  { %9775 = vmatpush1.bf16.msra.mxu0 %v12681_v50  ;;  %10308 = vmatpush1.bf16.msra.mxu1 %v12683_v51  ;;  %v12730_v30 = vcombine.high %v122_v24, %v126_v25  ;;  %v130_v32 = vld [vmem:[%s20017_s1 + $0x300] sm:$0xff]  ;;  %v135_v35 = vld [vmem:[%s20017_s1 + $0x328] sm:$0xff]  ;;  %v12729_v36 = vcombine.low %v122_v24, %v126_v25 }
  0x1b   :  { %9776 = vmatprep.subr.bf16.mxu0 %v12690_v52  ;;  %10309 = vmatprep.subr.bf16.mxu1 %v12692_v54  ;;  %v134_v33 = vld [vmem:[%s20017_s1 + $0x320] sm:$0xff]  ;;  %v12740_v39 = vcombine.high %v131_v34, %v135_v35  ;;  %v139_v42 = vld [vmem:[%s20017_s1 + $0x348] sm:$0xff]  ;;  %v12739_v45 = vcombine.low %v131_v34, %v135_v35 }
  0x1c   :  { %v12738_v38 = vcombine.high %v130_v32, %v134_v33  ;;  %v138_v40 = vld [vmem:[%s20017_s1 + $0x340] sm:$0xff]  ;;  %v143_v43 = vld [vmem:[%s20017_s1 + $0x368] sm:$0xff]  ;;  %v12737_v44 = vcombine.low %v130_v32, %v134_v33 }
  0x1d   :  { %v142_v41 = vld [vmem:[%s20017_s1 + $0x360] sm:$0xff]  ;;  %v12748_v47 = vcombine.high %v139_v42, %v143_v43  ;;  %v147_v50 = vld [vmem:[%s20017_s1 + $0x388] sm:$0xff]  ;;  %v12747_v54 = vcombine.low %v139_v42, %v143_v43 }
  0x1e   :  { %9777 = vmatpush1.bf16.msra.mxu0 %v12689_v60  ;;  %10310 = vmatpush1.bf16.msra.mxu1 %v12691_v61  ;;  %v12746_v46 = vcombine.high %v138_v40, %v142_v41  ;;  %v146_v48 = vld [vmem:[%s20017_s1 + $0x380] sm:$0xff]  ;;  %v151_v51 = vld [vmem:[%s20017_s1 + $0x3a8] sm:$0xff]  ;;  %v12745_v52 = vcombine.low %v138_v40, %v142_v41 }
  0x1f   :  { %9778 = vmatprep.subr.bf16.mxu0 %v12698_v62  ;;  %10311 = vmatprep.subr.bf16.mxu1 %v12700_v63  ;;  %v150_v49 = vld [vmem:[%s20017_s1 + $0x3a0] sm:$0xff]  ;;  %v12756_v56 = vcombine.high %v147_v50, %v151_v51  ;;  %v155_v60 = vld [vmem:[%s20017_s1 + $0x3c8] sm:$0xff]  ;;  %v12755_v63 = vcombine.low %v147_v50, %v151_v51 }
  0x20   :  { %v12754_v55 = vcombine.high %v146_v48, %v150_v49  ;;  %v154_v58 = vld [vmem:[%s20017_s1 + $0x3c0] sm:$0xff]  ;;  %v159_v61 = vld [vmem:[%s20017_s1 + $0x3e8] sm:$0xff]  ;;  %v12753_v62 = vcombine.low %v146_v48, %v150_v49 }
  0x21   :  { %v158_v59 = vld [vmem:[%s20017_s1 + $0x3e0] sm:$0xff]  ;;  %v12764_v1 = vcombine.high %v155_v60, %v159_v61 }
  0x22   :  { %9779 = vmatpush1.bf16.msra.mxu0 %v12697_v4  ;;  %10312 = vmatpush1.bf16.msra.mxu1 %v12699_v5  ;;  %v12762_v0 = vcombine.high %v154_v58, %v158_v59  ;;  %v162_v2 = vld [vmem:[%s20017_s1 + $0x400] sm:$0xff]  ;;  %v163_v4 = vld [vmem:[%s20017_s1 + $0x408] sm:$0xff] }
  0x23   :  { %9780 = vmatprep.subr.bf16.mxu0 %v12706_v6  ;;  %10313 = vmatprep.subr.bf16.mxu1 %v12708_v7  ;;  %v166_v3 = vld [vmem:[%s20017_s1 + $0x420] sm:$0xff]  ;;  %v167_v5 = vld [vmem:[%s20017_s1 + $0x428] sm:$0xff]  ;;  %v12761_v6 = vcombine.low %v154_v58, %v158_v59  ;;  %v12763_v7 = vcombine.low %v155_v60, %v159_v61 }
  0x24   :  { %v12770_v8 = vcombine.high %v162_v2, %v166_v3  ;;  %v12772_v9 = vcombine.high %v163_v4, %v167_v5  ;;  %v170_v10 = vld [vmem:[%s20017_s1 + $0x440] sm:$0xff]  ;;  %v12769_v16 = vcombine.low %v162_v2, %v166_v3  ;;  %v12771_v17 = vcombine.low %v163_v4, %v167_v5 }
  0x25   :  { %v174_v11 = vld [vmem:[%s20017_s1 + $0x460] sm:$0xff] }
  0x26   :  { %9781 = vmatpush1.bf16.msra.mxu0 %v12705_v12  ;;  %10314 = vmatpush1.bf16.msra.mxu1 %v12707_v13  ;;  %v14943_v12 = vcombine.low %v14807_v53, %v14807_v53  ;;  %v171_v13 = vld [vmem:[%s20017_s1 + $0x448] sm:$0xff]  ;;  %v12778_v53 = vcombine.high %v170_v10, %v174_v11  ;;  %v178_v19 = vld [vmem:[%s20017_s1 + $0x480] sm:$0xff]  ;;  %v12777_v24 = vcombine.low %v170_v10, %v174_v11 }
  0x27   :  { %9782 = vmatprep.subr.bf16.mxu0 %v12714_v14  ;;  %10315 = vmatprep.subr.bf16.mxu1 %v12716_v15  ;;  %v175_v14 = vld [vmem:[%s20017_s1 + $0x468] sm:$0xff] }
  0x28   :  { %v14954_v15 = vld [vmem:[%s20018_s0 + $0x8] sm:$0xff]  ;;  %v12780_v18 = vcombine.high %v171_v13, %v175_v14  ;;  %v12779_v25 = vcombine.low %v171_v13, %v175_v14 }
  0x2a   :  { %9783 = vmatpush1.bf16.msra.mxu0 %v12713_v20  ;;  %10316 = vmatpush1.bf16.msra.mxu1 %v12715_v21  ;;  %v182_v20 = vld [vmem:[%s20017_s1 + $0x4a0] sm:$0xff]  ;;  %v14964_v21 = vcombine.high %v14954_v15, %v14954_v15 }
  0x2b   :  { %9784 = vmatprep.subr.bf16.mxu0 %v12722_v22  ;;  %10317 = vmatprep.subr.bf16.mxu1 %v12724_v23  ;;  %v179_v22 = vld [vmem:[%s20017_s1 + $0x488] sm:$0xff]  ;;  %v12786_v26 = vcombine.high %v178_v19, %v182_v20  ;;  %v12785_v32 = vcombine.low %v178_v19, %v182_v20 }
  0x2c   :  { %v183_v23 = vld [vmem:[%s20017_s1 + $0x4a8] sm:$0xff] }
  0x2d   :  { %v12788_v27 = vcombine.high %v179_v22, %v183_v23  ;;  %v12787_v33 = vcombine.low %v179_v22, %v183_v23 }
  0x2e   :  { %9785 = vmatpush1.bf16.msra.mxu0 %v12721_v28  ;;  %10318 = vmatpush1.bf16.msra.mxu1 %v12723_v29  ;;  %v186_v28 = vld [vmem:[%s20017_s1 + $0x4c0] sm:$0xff] }
  0x2f   :  { %9786 = vmatprep.subr.bf16.mxu0 %v12730_v30  ;;  %10319 = vmatprep.subr.bf16.mxu1 %v12732_v31  ;;  %v190_v29 = vld [vmem:[%s20017_s1 + $0x4e0] sm:$0xff]  ;;  %v187_v30 = vld [vmem:[%s20017_s1 + $0x4c8] sm:$0xff] }
  0x30   :  { %v191_v31 = vld [vmem:[%s20017_s1 + $0x4e8] sm:$0xff]  ;;  %v12794_v34 = vcombine.high %v186_v28, %v190_v29  ;;  %v12793_v40 = vcombine.low %v186_v28, %v190_v29 }
  0x31   :  { %v12796_v35 = vcombine.high %v187_v30, %v191_v31  ;;  %v12795_v41 = vcombine.low %v187_v30, %v191_v31 }
  0x32   :  { %9787 = vmatpush1.bf16.msra.mxu0 %v12729_v36  ;;  %10320 = vmatpush1.bf16.msra.mxu1 %v12731_v37  ;;  %v194_v36 = vld [vmem:[%s20017_s1 + $0x500] sm:$0xff] }
  0x33   :  { %9788 = vmatprep.subr.bf16.mxu0 %v12738_v38  ;;  %10321 = vmatprep.subr.bf16.mxu1 %v12740_v39  ;;  %v198_v37 = vld [vmem:[%s20017_s1 + $0x520] sm:$0xff]  ;;  %v195_v38 = vld [vmem:[%s20017_s1 + $0x508] sm:$0xff] }
  0x34   :  { %v199_v39 = vld [vmem:[%s20017_s1 + $0x528] sm:$0xff]  ;;  %v12802_v42 = vcombine.high %v194_v36, %v198_v37  ;;  %v12801_v48 = vcombine.low %v194_v36, %v198_v37 }
  0x35   :  { %v12804_v43 = vcombine.high %v195_v38, %v199_v39  ;;  %v12803_v49 = vcombine.low %v195_v38, %v199_v39 }
  0x36   :  { %9789 = vmatpush1.bf16.msra.mxu0 %v12737_v44  ;;  %10322 = vmatpush1.bf16.msra.mxu1 %v12739_v45  ;;  %v202_v44 = vld [vmem:[%s20017_s1 + $0x540] sm:$0xff] }
  0x37   :  { %9790 = vmatprep.subr.bf16.mxu0 %v12746_v46  ;;  %10323 = vmatprep.subr.bf16.mxu1 %v12748_v47  ;;  %v206_v45 = vld [vmem:[%s20017_s1 + $0x560] sm:$0xff]  ;;  %v203_v46 = vld [vmem:[%s20017_s1 + $0x548] sm:$0xff] }
  0x38   :  { %v207_v47 = vld [vmem:[%s20017_s1 + $0x568] sm:$0xff]  ;;  %v12810_v50 = vcombine.high %v202_v44, %v206_v45  ;;  %v12809_v58 = vcombine.low %v202_v44, %v206_v45 }
  0x39   :  { %v12812_v51 = vcombine.high %v203_v46, %v207_v47  ;;  %v12811_v59 = vcombine.low %v203_v46, %v207_v47 }
  0x3a   :  { %9791 = vmatpush1.bf16.msra.mxu0 %v12745_v52  ;;  %10324 = vmatpush1.bf16.msra.mxu1 %v12747_v54  ;;  %v210_v52 = vld [vmem:[%s20017_s1 + $0x580] sm:$0xff] }
  0x3b   :  { %9792 = vmatprep.subr.bf16.mxu0 %v12754_v55  ;;  %10325 = vmatprep.subr.bf16.mxu1 %v12756_v56  ;;  %v214_v54 = vld [vmem:[%s20017_s1 + $0x5a0] sm:$0xff]  ;;  %v211_v55 = vld [vmem:[%s20017_s1 + $0x588] sm:$0xff] }
  0x3c   :  { %v215_v56 = vld [vmem:[%s20017_s1 + $0x5a8] sm:$0xff]  ;;  %v12818_v60 = vcombine.high %v210_v52, %v214_v54  ;;  %v12817_v2 = vcombine.low %v210_v52, %v214_v54 }
  0x3d   :  { %v12820_v61 = vcombine.high %v211_v55, %v215_v56  ;;  %v12819_v3 = vcombine.low %v211_v55, %v215_v56 }
  0x3e   :  { %9793 = vmatpush1.bf16.msra.mxu0 %v12753_v62  ;;  %10326 = vmatpush1.bf16.msra.mxu1 %v12755_v63  ;;  %v218_v62 = vld [vmem:[%s20017_s1 + $0x5c0] sm:$0xff] }
  0x3f   :  { %9794 = vmatprep.subr.bf16.mxu0 %v12762_v0  ;;  %10327 = vmatprep.subr.bf16.mxu1 %v12764_v1  ;;  %v222_v63 = vld [vmem:[%s20017_s1 + $0x5e0] sm:$0xff]  ;;  %v219_v0 = vld [vmem:[%s20017_s1 + $0x5c8] sm:$0xff] }
  0x40   :  { %v223_v1 = vld [vmem:[%s20017_s1 + $0x5e8] sm:$0xff]  ;;  %v12826_v4 = vcombine.high %v218_v62, %v222_v63  ;;  %v12825_v10 = vcombine.low %v218_v62, %v222_v63 }
  0x41   :  { %v12828_v5 = vcombine.high %v219_v0, %v223_v1  ;;  %v12827_v11 = vcombine.low %v219_v0, %v223_v1 }
  0x42   :  { %9795 = vmatpush1.bf16.msra.mxu0 %v12761_v6  ;;  %10328 = vmatpush1.bf16.msra.mxu1 %v12763_v7  ;;  %v226_v6 = vld [vmem:[%s20017_s1 + $0x600] sm:$0xff] }
  0x43   :  { %9805 = vmatprep.subr.bf16.mxu0 %v12770_v8  ;;  %10338 = vmatprep.subr.bf16.mxu1 %v12772_v9  ;;  %v230_v7 = vld [vmem:[%s20017_s1 + $0x620] sm:$0xff]  ;;  %v227_v8 = vld [vmem:[%s20017_s1 + $0x608] sm:$0xff] }
  0x44   :  { %v231_v9 = vld [vmem:[%s20017_s1 + $0x628] sm:$0xff]  ;;  %v12834_v13 = vcombine.high %v226_v6, %v230_v7  ;;  %v12833_v19 = vcombine.low %v226_v6, %v230_v7 }
  0x45   :  { %9797 = vmatmul.mubr.bf16.vlgmr.msra.gmra.mrb[0].mxu0 %v14943_v12  ;;  %10330 = vmatmul.mubr.bf16.vlgmr.msra.gmra.mrb[0].mxu1 %v14943_v12  ;;  %v12836_v14 = vcombine.high %v227_v8, %v231_v9  ;;  %v12835_v20 = vcombine.low %v227_v8, %v231_v9 }
  0x46   :  { %9806 = vmatpush1.bf16.msra.mxu0 %v12769_v16  ;;  %10339 = vmatpush1.bf16.msra.mxu1 %v12771_v17  ;;  %v234_v16 = vld [vmem:[%s20017_s1 + $0x640] sm:$0xff] }
  0x47   :  { %9807 = vmatprep.subr.bf16.mxu0 %v12778_v53  ;;  %10340 = vmatprep.subr.bf16.mxu1 %v12780_v18  ;;  %v238_v17 = vld [vmem:[%s20017_s1 + $0x660] sm:$0xff]  ;;  %v235_v53 = vld [vmem:[%s20017_s1 + $0x648] sm:$0xff] }
  0x48   :  { %9837 = vmatprep.mubr.bf16.mxu0 %v14964_v21  ;;  %10370 = vmatprep.mubr.bf16.mxu1 %v14964_v21  ;;  %v239_v18 = vld [vmem:[%s20017_s1 + $0x668] sm:$0xff]  ;;  %v12842_v22 = vcombine.high %v234_v16, %v238_v17  ;;  %v12841_v28 = vcombine.low %v234_v16, %v238_v17 }
  0x49   :  { %v12844_v23 = vcombine.high %v235_v53, %v239_v18  ;;  %v12843_v29 = vcombine.low %v235_v53, %v239_v18 }
  0x4a   :  { %9808 = vmatpush1.bf16.msra.mxu0 %v12777_v24  ;;  %10341 = vmatpush1.bf16.msra.mxu1 %v12779_v25  ;;  %v242_v24 = vld [vmem:[%s20017_s1 + $0x680] sm:$0xff] }
  0x4b   :  { %9809 = vmatprep.subr.bf16.mxu0 %v12786_v26  ;;  %10342 = vmatprep.subr.bf16.mxu1 %v12788_v27  ;;  %v246_v25 = vld [vmem:[%s20017_s1 + $0x6a0] sm:$0xff]  ;;  %v243_v26 = vld [vmem:[%s20017_s1 + $0x688] sm:$0xff] }
  0x4c   :  { %v247_v27 = vld [vmem:[%s20017_s1 + $0x6a8] sm:$0xff]  ;;  %v12850_v30 = vcombine.high %v242_v24, %v246_v25  ;;  %v12849_v36 = vcombine.low %v242_v24, %v246_v25  ;;  %v15163_v25 = vld [vmem:[%s20018_s0 + $0x10] sm:$0xff] }
  0x4d   :  { %v12852_v31 = vcombine.high %v243_v26, %v247_v27  ;;  %v12851_v37 = vcombine.low %v243_v26, %v247_v27  ;;  %v303_v24 = vld [vmem:[%s20017_s1 + $0x868] sm:$0xff] }
  0x4e   :  { %9810 = vmatpush1.bf16.msra.mxu0 %v12785_v32  ;;  %10343 = vmatpush1.bf16.msra.mxu1 %v12787_v33  ;;  %v250_v32 = vld [vmem:[%s20017_s1 + $0x6c0] sm:$0xff] }
  0x4f   :  { %9811 = vmatprep.subr.bf16.mxu0 %v12794_v34  ;;  %10344 = vmatprep.subr.bf16.mxu1 %v12796_v35  ;;  %v254_v33 = vld [vmem:[%s20017_s1 + $0x6e0] sm:$0xff]  ;;  %v251_v34 = vld [vmem:[%s20017_s1 + $0x6c8] sm:$0xff] }
  0x50   :  { %v255_v35 = vld [vmem:[%s20017_s1 + $0x6e8] sm:$0xff]  ;;  %v12858_v38 = vcombine.high %v250_v32, %v254_v33  ;;  %v12857_v44 = vcombine.low %v250_v32, %v254_v33 }
  0x51   :  { %v12860_v39 = vcombine.high %v251_v34, %v255_v35  ;;  %v12859_v45 = vcombine.low %v251_v34, %v255_v35  ;;  %v307_v32 = vld [vmem:[%s20017_s1 + $0x888] sm:$0xff] }
  0x52   :  { %9812 = vmatpush1.bf16.msra.mxu0 %v12793_v40  ;;  %10345 = vmatpush1.bf16.msra.mxu1 %v12795_v41  ;;  %v258_v40 = vld [vmem:[%s20017_s1 + $0x700] sm:$0xff]  ;;  %v311_v33 = vld [vmem:[%s20017_s1 + $0x8a8] sm:$0xff] }
  0x53   :  { %9813 = vmatprep.subr.bf16.mxu0 %v12802_v42  ;;  %10346 = vmatprep.subr.bf16.mxu1 %v12804_v43  ;;  %v262_v41 = vld [vmem:[%s20017_s1 + $0x720] sm:$0xff]  ;;  %v259_v42 = vld [vmem:[%s20017_s1 + $0x708] sm:$0xff] }
  0x54   :  { %v263_v43 = vld [vmem:[%s20017_s1 + $0x728] sm:$0xff]  ;;  %v12866_v46 = vcombine.high %v258_v40, %v262_v41  ;;  %v12865_v52 = vcombine.low %v258_v40, %v262_v41 }
  0x55   :  { %v12868_v47 = vcombine.high %v259_v42, %v263_v43  ;;  %v12867_v54 = vcombine.low %v259_v42, %v263_v43  ;;  %v315_v40 = vld [vmem:[%s20017_s1 + $0x8c8] sm:$0xff]  ;;  %v12915_v43 = vcombine.low %v307_v32, %v311_v33 }
  0x56   :  { %9814 = vmatpush1.bf16.msra.mxu0 %v12801_v48  ;;  %10347 = vmatpush1.bf16.msra.mxu1 %v12803_v49  ;;  %v266_v48 = vld [vmem:[%s20017_s1 + $0x740] sm:$0xff]  ;;  %v319_v41 = vld [vmem:[%s20017_s1 + $0x8e8] sm:$0xff] }
  0x57   :  { %9815 = vmatprep.subr.bf16.mxu0 %v12810_v50  ;;  %10348 = vmatprep.subr.bf16.mxu1 %v12812_v51  ;;  %v270_v49 = vld [vmem:[%s20017_s1 + $0x760] sm:$0xff]  ;;  %v267_v50 = vld [vmem:[%s20017_s1 + $0x748] sm:$0xff] }
  0x58   :  { %v271_v51 = vld [vmem:[%s20017_s1 + $0x768] sm:$0xff]  ;;  %v12874_v55 = vcombine.high %v266_v48, %v270_v49  ;;  %v12873_v62 = vcombine.low %v266_v48, %v270_v49 }
  0x59   :  { %v12876_v56 = vcombine.high %v267_v50, %v271_v51  ;;  %v12875_v63 = vcombine.low %v267_v50, %v271_v51  ;;  %v323_v48 = vld [vmem:[%s20017_s1 + $0x908] sm:$0xff]  ;;  %v12923_v51 = vcombine.low %v315_v40, %v319_v41 }
  0x5a   :  { %9816 = vmatpush1.bf16.msra.mxu0 %v12809_v58  ;;  %10349 = vmatpush1.bf16.msra.mxu1 %v12811_v59  ;;  %v274_v58 = vld [vmem:[%s20017_s1 + $0x780] sm:$0xff]  ;;  %v327_v49 = vld [vmem:[%s20017_s1 + $0x928] sm:$0xff] }
  0x5b   :  { %9817 = vmatprep.subr.bf16.mxu0 %v12818_v60  ;;  %10350 = vmatprep.subr.bf16.mxu1 %v12820_v61  ;;  %v278_v59 = vld [vmem:[%s20017_s1 + $0x7a0] sm:$0xff]  ;;  %v275_v60 = vld [vmem:[%s20017_s1 + $0x788] sm:$0xff] }
  0x5c   :  { %v279_v61 = vld [vmem:[%s20017_s1 + $0x7a8] sm:$0xff]  ;;  %v12882_v0 = vcombine.high %v274_v58, %v278_v59  ;;  %v12881_v6 = vcombine.low %v274_v58, %v278_v59 }
  0x5d   :  { %v12884_v1 = vcombine.high %v275_v60, %v279_v61  ;;  %v12883_v7 = vcombine.low %v275_v60, %v279_v61  ;;  %v331_v58 = vld [vmem:[%s20017_s1 + $0x948] sm:$0xff]  ;;  %v12931_v61 = vcombine.low %v323_v48, %v327_v49 }
  0x5e   :  { %9818 = vmatpush1.bf16.msra.mxu0 %v12817_v2  ;;  %10351 = vmatpush1.bf16.msra.mxu1 %v12819_v3  ;;  %v282_v2 = vld [vmem:[%s20017_s1 + $0x7c0] sm:$0xff]  ;;  %v335_v59 = vld [vmem:[%s20017_s1 + $0x968] sm:$0xff] }
  0x5f   :  { %9819 = vmatprep.subr.bf16.mxu0 %v12826_v4  ;;  %10352 = vmatprep.subr.bf16.mxu1 %v12828_v5  ;;  %v286_v3 = vld [vmem:[%s20017_s1 + $0x7e0] sm:$0xff]  ;;  %v283_v4 = vld [vmem:[%s20017_s1 + $0x7c8] sm:$0xff] }
  0x60   :  { %v287_v5 = vld [vmem:[%s20017_s1 + $0x7e8] sm:$0xff]  ;;  %v12890_v8 = vcombine.high %v282_v2, %v286_v3  ;;  %v12889_v16 = vcombine.low %v282_v2, %v286_v3 }
  0x61   :  { %v12892_v9 = vcombine.high %v283_v4, %v287_v5  ;;  %v12891_v17 = vcombine.low %v283_v4, %v287_v5  ;;  %v339_v2 = vld [vmem:[%s20017_s1 + $0x988] sm:$0xff]  ;;  %v12939_v5 = vcombine.low %v331_v58, %v335_v59 }
  0x62   :  { %9820 = vmatpush1.bf16.msra.mxu0 %v12825_v10  ;;  %10353 = vmatpush1.bf16.msra.mxu1 %v12827_v11  ;;  %v290_v10 = vld [vmem:[%s20017_s1 + $0x800] sm:$0xff]  ;;  %v343_v3 = vld [vmem:[%s20017_s1 + $0x9a8] sm:$0xff] }
  0x63   :  { %9821 = vmatprep.subr.bf16.mxu0 %v12834_v13  ;;  %10354 = vmatprep.subr.bf16.mxu1 %v12836_v14  ;;  %v294_v11 = vld [vmem:[%s20017_s1 + $0x820] sm:$0xff]  ;;  %v291_v13 = vld [vmem:[%s20017_s1 + $0x808] sm:$0xff] }
  0x64   :  { %v295_v14 = vld [vmem:[%s20017_s1 + $0x828] sm:$0xff]  ;;  %v12898_v53 = vcombine.high %v290_v10, %v294_v11  ;;  %v12897_v26 = vcombine.low %v290_v10, %v294_v11 }
  0x65   :  { %v12900_v18 = vcombine.high %v291_v13, %v295_v14  ;;  %v12899_v27 = vcombine.low %v291_v13, %v295_v14  ;;  %v347_v10 = vld [vmem:[%s20017_s1 + $0x9c8] sm:$0xff]  ;;  %v12947_v14 = vcombine.low %v339_v2, %v343_v3 }
  0x66   :  { %9822 = vmatpush1.bf16.msra.mxu0 %v12833_v19  ;;  %10355 = vmatpush1.bf16.msra.mxu1 %v12835_v20  ;;  %v298_v19 = vld [vmem:[%s20017_s1 + $0x840] sm:$0xff]  ;;  %v351_v11 = vld [vmem:[%s20017_s1 + $0x9e8] sm:$0xff] }
  0x67   :  { %9823 = vmatprep.subr.bf16.mxu0 %v12842_v22  ;;  %10356 = vmatprep.subr.bf16.mxu1 %v12844_v23  ;;  %v302_v20 = vld [vmem:[%s20017_s1 + $0x860] sm:$0xff]  ;;  %v15152_v22 = vcombine.low %v14954_v15, %v14954_v15  ;;  %v299_v23 = vld [vmem:[%s20017_s1 + $0x848] sm:$0xff] }
  0x68   :  { %v12906_v15 = vcombine.high %v298_v19, %v302_v20  ;;  %v12905_v34 = vcombine.low %v298_v19, %v302_v20  ;;  %v12907_v35 = vcombine.low %v299_v23, %v303_v24  ;;  %v355_v19 = vld [vmem:[%s20017_s1 + $0xa08] sm:$0xff] }
  0x69   :  { %v359_v20 = vld [vmem:[%s20017_s1 + $0xa28] sm:$0xff] }
  0x6a   :  { %9824 = vmatpush1.bf16.msra.mxu0 %v12841_v28  ;;  %10357 = vmatpush1.bf16.msra.mxu1 %v12843_v29  ;;  %v12908_v28 = vcombine.high %v299_v23, %v303_v24  ;;  %v306_v29 = vld [vmem:[%s20017_s1 + $0x880] sm:$0xff]  ;;  %v12955_v24 = vcombine.low %v347_v10, %v351_v11 }
  0x6b   :  { %9825 = vmatprep.subr.bf16.mxu0 %v12850_v30  ;;  %10358 = vmatprep.subr.bf16.mxu1 %v12852_v31  ;;  %v310_v30 = vld [vmem:[%s20017_s1 + $0x8a0] sm:$0xff]  ;;  %v15173_v31 = vcombine.high %v15163_v25, %v15163_v25 }
  0x6c   :  { %v12913_v42 = vcombine.low %v306_v29, %v310_v30 }
  0x6e   :  { %9826 = vmatpush1.bf16.msra.mxu0 %v12849_v36  ;;  %10359 = vmatpush1.bf16.msra.mxu1 %v12851_v37  ;;  %v12914_v36 = vcombine.high %v306_v29, %v310_v30  ;;  %v12916_v37 = vcombine.high %v307_v32, %v311_v33  ;;  %v363_v29 = vld [vmem:[%s20017_s1 + $0xa48] sm:$0xff]  ;;  %v12963_v33 = vcombine.low %v355_v19, %v359_v20 }
  0x6f   :  { %9827 = vmatprep.subr.bf16.mxu0 %v12858_v38  ;;  %10360 = vmatprep.subr.bf16.mxu1 %v12860_v39  ;;  %v314_v38 = vld [vmem:[%s20017_s1 + $0x8c0] sm:$0xff]  ;;  %v367_v30 = vld [vmem:[%s20017_s1 + $0xa68] sm:$0xff] }
  0x70   :  { %v318_v39 = vld [vmem:[%s20017_s1 + $0x8e0] sm:$0xff] }
  0x71   :  { %v12921_v50 = vcombine.low %v314_v38, %v318_v39 }
  0x72   :  { %9828 = vmatpush1.bf16.msra.mxu0 %v12857_v44  ;;  %10361 = vmatpush1.bf16.msra.mxu1 %v12859_v45  ;;  %v12922_v44 = vcombine.high %v314_v38, %v318_v39  ;;  %v12924_v45 = vcombine.high %v315_v40, %v319_v41  ;;  %v371_v38 = vld [vmem:[%s20017_s1 + $0xa88] sm:$0xff]  ;;  %v12971_v41 = vcombine.low %v363_v29, %v367_v30 }
  0x73   :  { %9829 = vmatprep.subr.bf16.mxu0 %v12866_v46  ;;  %10362 = vmatprep.subr.bf16.mxu1 %v12868_v47  ;;  %v322_v46 = vld [vmem:[%s20017_s1 + $0x900] sm:$0xff]  ;;  %v375_v39 = vld [vmem:[%s20017_s1 + $0xaa8] sm:$0xff] }
  0x74   :  { %v326_v47 = vld [vmem:[%s20017_s1 + $0x920] sm:$0xff] }
  0x75   :  { %v12929_v60 = vcombine.low %v322_v46, %v326_v47 }
  0x76   :  { %9830 = vmatpush1.bf16.msra.mxu0 %v12865_v52  ;;  %10363 = vmatpush1.bf16.msra.mxu1 %v12867_v54  ;;  %v12930_v52 = vcombine.high %v322_v46, %v326_v47  ;;  %v12932_v54 = vcombine.high %v323_v48, %v327_v49  ;;  %v379_v46 = vld [vmem:[%s20017_s1 + $0xac8] sm:$0xff]  ;;  %v12979_v49 = vcombine.low %v371_v38, %v375_v39 }
  0x77   :  { %9831 = vmatprep.subr.bf16.mxu0 %v12874_v55  ;;  %10364 = vmatprep.subr.bf16.mxu1 %v12876_v56  ;;  %v330_v55 = vld [vmem:[%s20017_s1 + $0x940] sm:$0xff]  ;;  %v383_v47 = vld [vmem:[%s20017_s1 + $0xae8] sm:$0xff] }
  0x78   :  { %v334_v56 = vld [vmem:[%s20017_s1 + $0x960] sm:$0xff] }
  0x79   :  { %v12937_v4 = vcombine.low %v330_v55, %v334_v56 }
  0x7a   :  { %9832 = vmatpush1.bf16.msra.mxu0 %v12873_v62  ;;  %10365 = vmatpush1.bf16.msra.mxu1 %v12875_v63  ;;  %v12938_v62 = vcombine.high %v330_v55, %v334_v56  ;;  %v12940_v63 = vcombine.high %v331_v58, %v335_v59  ;;  %v387_v55 = vld [vmem:[%s20017_s1 + $0xb08] sm:$0xff]  ;;  %v12987_v59 = vcombine.low %v379_v46, %v383_v47 }
  0x7b   :  { %9833 = vmatprep.subr.bf16.mxu0 %v12882_v0  ;;  %10366 = vmatprep.subr.bf16.mxu1 %v12884_v1  ;;  %v338_v0 = vld [vmem:[%s20017_s1 + $0x980] sm:$0xff]  ;;  %v391_v56 = vld [vmem:[%s20017_s1 + $0xb28] sm:$0xff] }
  0x7c   :  { %v342_v1 = vld [vmem:[%s20017_s1 + $0x9a0] sm:$0xff] }
  0x7d   :  { %v12945_v13 = vcombine.low %v338_v0, %v342_v1 }
  0x7e   :  { %9834 = vmatpush1.bf16.msra.mxu0 %v12881_v6  ;;  %10367 = vmatpush1.bf16.msra.mxu1 %v12883_v7  ;;  %v12946_v6 = vcombine.high %v338_v0, %v342_v1  ;;  %v12948_v7 = vcombine.high %v339_v2, %v343_v3  ;;  %v395_v0 = vld [vmem:[%s20017_s1 + $0xb48] sm:$0xff]  ;;  %v12995_v3 = vcombine.low %v387_v55, %v391_v56 }
  0x7f   :  { %9835 = vmatprep.subr.bf16.mxu0 %v12890_v8  ;;  %10368 = vmatprep.subr.bf16.mxu1 %v12892_v9  ;;  %v346_v8 = vld [vmem:[%s20017_s1 + $0x9c0] sm:$0xff]  ;;  %v399_v1 = vld [vmem:[%s20017_s1 + $0xb68] sm:$0xff] }
  0x80   :  { %v350_v9 = vld [vmem:[%s20017_s1 + $0x9e0] sm:$0xff] }
  0x81   :  { %v12953_v23 = vcombine.low %v346_v8, %v350_v9 }
  0x82   :  { %9836 = vmatpush1.bf16.msra.mxu0 %v12889_v16  ;;  %10369 = vmatpush1.bf16.msra.mxu1 %v12891_v17  ;;  %v12954_v16 = vcombine.high %v346_v8, %v350_v9  ;;  %v12956_v17 = vcombine.high %v347_v10, %v351_v11  ;;  %v403_v8 = vld [vmem:[%s20017_s1 + $0xb88] sm:$0xff]  ;;  %v13003_v11 = vcombine.low %v395_v0, %v399_v1 }
  0x83   :  { %9846 = vmatprep.subr.bf16.mxu0 %v12898_v53  ;;  %10379 = vmatprep.subr.bf16.mxu1 %v12900_v18  ;;  %v354_v53 = vld [vmem:[%s20017_s1 + $0xa00] sm:$0xff]  ;;  %v407_v9 = vld [vmem:[%s20017_s1 + $0xba8] sm:$0xff] }
  0x84   :  { %v358_v18 = vld [vmem:[%s20017_s1 + $0xa20] sm:$0xff] }
  0x85   :  { %9838 = vmatmul.mubr.bf16.vlgmr.msra.gmra.mrb[0].mxu0 %v15152_v22  ;;  %10371 = vmatmul.mubr.bf16.vlgmr.msra.gmra.mrb[0].mxu1 %v15152_v22  ;;  %v12961_v32 = vcombine.low %v354_v53, %v358_v18 }
  0x86   :  { %9847 = vmatpush1.bf16.msra.mxu0 %v12897_v26  ;;  %10380 = vmatpush1.bf16.msra.mxu1 %v12899_v27  ;;  %v12962_v26 = vcombine.high %v354_v53, %v358_v18  ;;  %v12964_v27 = vcombine.high %v355_v19, %v359_v20  ;;  %v411_v53 = vld [vmem:[%s20017_s1 + $0xbc8] sm:$0xff]  ;;  %v13011_v20 = vcombine.low %v403_v8, %v407_v9 }
  0x87   :  { %9848 = vmatprep.subr.bf16.mxu0 %v12906_v15  ;;  %10381 = vmatprep.subr.bf16.mxu1 %v12908_v28  ;;  %v362_v15 = vld [vmem:[%s20017_s1 + $0xa40] sm:$0xff]  ;;  %v415_v18 = vld [vmem:[%s20017_s1 + $0xbe8] sm:$0xff] }
  0x88   :  { %9878 = vmatprep.mubr.bf16.mxu0 %v15173_v31  ;;  %10411 = vmatprep.mubr.bf16.mxu1 %v15173_v31  ;;  %v366_v28 = vld [vmem:[%s20017_s1 + $0xa60] sm:$0xff] }
  0x89   :  { %v12969_v40 = vcombine.low %v362_v15, %v366_v28 }
  0x8a   :  { %9849 = vmatpush1.bf16.msra.mxu0 %v12905_v34  ;;  %10382 = vmatpush1.bf16.msra.mxu1 %v12907_v35  ;;  %v12970_v34 = vcombine.high %v362_v15, %v366_v28  ;;  %v12972_v35 = vcombine.high %v363_v29, %v367_v30  ;;  %v419_v15 = vld [vmem:[%s20017_s1 + $0xc08] sm:$0xff]  ;;  %v13019_v30 = vcombine.low %v411_v53, %v415_v18 }
  0x8b   :  { %9850 = vmatprep.subr.bf16.mxu0 %v12914_v36  ;;  %10383 = vmatprep.subr.bf16.mxu1 %v12916_v37  ;;  %v370_v36 = vld [vmem:[%s20017_s1 + $0xa80] sm:$0xff]  ;;  %v423_v28 = vld [vmem:[%s20017_s1 + $0xc28] sm:$0xff] }
  0x8c   :  { %v374_v37 = vld [vmem:[%s20017_s1 + $0xaa0] sm:$0xff] }
  0x8d   :  { %v12977_v48 = vcombine.low %v370_v36, %v374_v37 }
  0x8e   :  { %9851 = vmatpush1.bf16.msra.mxu0 %v12913_v42  ;;  %10384 = vmatpush1.bf16.msra.mxu1 %v12915_v43  ;;  %v12978_v42 = vcombine.high %v370_v36, %v374_v37  ;;  %v12980_v43 = vcombine.high %v371_v38, %v375_v39  ;;  %v15361_v36 = vcombine.low %v15163_v25, %v15163_v25  ;;  %v427_v37 = vld [vmem:[%s20017_s1 + $0xc48] sm:$0xff]  ;;  %v15372_v39 = vld [vmem:[%s20018_s0 + $0x18] sm:$0xff] }
  0x8f   :  { %9852 = vmatprep.subr.bf16.mxu0 %v12922_v44  ;;  %10385 = vmatprep.subr.bf16.mxu1 %v12924_v45  ;;  %v378_v44 = vld [vmem:[%s20017_s1 + $0xac0] sm:$0xff]  ;;  %v431_v38 = vld [vmem:[%s20017_s1 + $0xc68] sm:$0xff] }
  0x90   :  { %v382_v45 = vld [vmem:[%s20017_s1 + $0xae0] sm:$0xff] }
  0x91   :  { %v12985_v58 = vcombine.low %v378_v44, %v382_v45 }
  0x92   :  { %9853 = vmatpush1.bf16.msra.mxu0 %v12921_v50  ;;  %10386 = vmatpush1.bf16.msra.mxu1 %v12923_v51  ;;  %v12986_v50 = vcombine.high %v378_v44, %v382_v45  ;;  %v12988_v51 = vcombine.high %v379_v46, %v383_v47  ;;  %v438_v44 = vld [vmem:[%s20017_s1 + $0xca0] sm:$0xff]  ;;  %v15382_v45 = vcombine.high %v15372_v39, %v15372_v39  ;;  %v435_v46 = vld [vmem:[%s20017_s1 + $0xc88] sm:$0xff] }
  0x93   :  { %9854 = vmatprep.subr.bf16.mxu0 %v12930_v52  ;;  %10387 = vmatprep.subr.bf16.mxu1 %v12932_v54  ;;  %v386_v52 = vld [vmem:[%s20017_s1 + $0xb00] sm:$0xff]  ;;  %v439_v47 = vld [vmem:[%s20017_s1 + $0xca8] sm:$0xff] }
  0x94   :  { %v390_v54 = vld [vmem:[%s20017_s1 + $0xb20] sm:$0xff] }
  0x95   :  { %v12993_v2 = vcombine.low %v386_v52, %v390_v54 }
  0x96   :  { %9855 = vmatpush1.bf16.msra.mxu0 %v12929_v60  ;;  %10388 = vmatpush1.bf16.msra.mxu1 %v12931_v61  ;;  %v12994_v60 = vcombine.high %v386_v52, %v390_v54  ;;  %v12996_v61 = vcombine.high %v387_v55, %v391_v56  ;;  %v442_v52 = vld [vmem:[%s20017_s1 + $0xcc0] sm:$0xff]  ;;  %v443_v55 = vld [vmem:[%s20017_s1 + $0xcc8] sm:$0xff] }
  0x97   :  { %9856 = vmatprep.subr.bf16.mxu0 %v12938_v62  ;;  %10389 = vmatprep.subr.bf16.mxu1 %v12940_v63  ;;  %v394_v62 = vld [vmem:[%s20017_s1 + $0xb40] sm:$0xff]  ;;  %v447_v56 = vld [vmem:[%s20017_s1 + $0xce8] sm:$0xff] }
  0x98   :  { %v398_v63 = vld [vmem:[%s20017_s1 + $0xb60] sm:$0xff] }
  0x99   :  { %v13001_v10 = vcombine.low %v394_v62, %v398_v63  ;;  %v446_v54 = vld [vmem:[%s20017_s1 + $0xce0] sm:$0xff] }
  0x9a   :  { %9857 = vmatpush1.bf16.msra.mxu0 %v12937_v4  ;;  %10390 = vmatpush1.bf16.msra.mxu1 %v12939_v5  ;;  %v13002_v4 = vcombine.high %v394_v62, %v398_v63  ;;  %v13004_v5 = vcombine.high %v395_v0, %v399_v1  ;;  %v450_v62 = vld [vmem:[%s20017_s1 + $0xd00] sm:$0xff]  ;;  %v451_v0 = vld [vmem:[%s20017_s1 + $0xd08] sm:$0xff] }
  0x9b   :  { %9858 = vmatprep.subr.bf16.mxu0 %v12946_v6  ;;  %10391 = vmatprep.subr.bf16.mxu1 %v12948_v7  ;;  %v402_v6 = vld [vmem:[%s20017_s1 + $0xb80] sm:$0xff]  ;;  %v455_v1 = vld [vmem:[%s20017_s1 + $0xd28] sm:$0xff] }
  0x9c   :  { %v406_v7 = vld [vmem:[%s20017_s1 + $0xba0] sm:$0xff] }
  0x9d   :  { %v13009_v19 = vcombine.low %v402_v6, %v406_v7  ;;  %v454_v63 = vld [vmem:[%s20017_s1 + $0xd20] sm:$0xff] }
  0x9e   :  { %9859 = vmatpush1.bf16.msra.mxu0 %v12945_v13  ;;  %10392 = vmatpush1.bf16.msra.mxu1 %v12947_v14  ;;  %v13010_v13 = vcombine.high %v402_v6, %v406_v7  ;;  %v13012_v14 = vcombine.high %v403_v8, %v407_v9  ;;  %v458_v6 = vld [vmem:[%s20017_s1 + $0xd40] sm:$0xff]  ;;  %v459_v8 = vld [vmem:[%s20017_s1 + $0xd48] sm:$0xff] }
  0x9f   :  { %9860 = vmatprep.subr.bf16.mxu0 %v12954_v16  ;;  %10393 = vmatprep.subr.bf16.mxu1 %v12956_v17  ;;  %v410_v16 = vld [vmem:[%s20017_s1 + $0xbc0] sm:$0xff]  ;;  %v463_v9 = vld [vmem:[%s20017_s1 + $0xd68] sm:$0xff] }
  0xa0   :  { %v414_v17 = vld [vmem:[%s20017_s1 + $0xbe0] sm:$0xff] }
  0xa1   :  { %v13017_v29 = vcombine.low %v410_v16, %v414_v17  ;;  %v462_v7 = vld [vmem:[%s20017_s1 + $0xd60] sm:$0xff] }
  0xa2   :  { %9861 = vmatpush1.bf16.msra.mxu0 %v12953_v23  ;;  %10394 = vmatpush1.bf16.msra.mxu1 %v12955_v24  ;;  %v13018_v23 = vcombine.high %v410_v16, %v414_v17  ;;  %v13020_v24 = vcombine.high %v411_v53, %v415_v18  ;;  %v466_v16 = vld [vmem:[%s20017_s1 + $0xd80] sm:$0xff]  ;;  %v467_v53 = vld [vmem:[%s20017_s1 + $0xd88] sm:$0xff] }
  0xa3   :  { %9862 = vmatprep.subr.bf16.mxu0 %v12962_v26  ;;  %10395 = vmatprep.subr.bf16.mxu1 %v12964_v27  ;;  %v418_v26 = vld [vmem:[%s20017_s1 + $0xc00] sm:$0xff]  ;;  %v471_v18 = vld [vmem:[%s20017_s1 + $0xda8] sm:$0xff] }
  0xa4   :  { %v422_v27 = vld [vmem:[%s20017_s1 + $0xc20] sm:$0xff] }
  0xa5   :  { %v470_v17 = vld [vmem:[%s20017_s1 + $0xda0] sm:$0xff] }
  0xa6   :  { %9863 = vmatpush1.bf16.msra.mxu0 %v12961_v32  ;;  %10396 = vmatpush1.bf16.msra.mxu1 %v12963_v33  ;;  %v13026_v32 = vcombine.high %v418_v26, %v422_v27  ;;  %v13028_v33 = vcombine.high %v419_v15, %v423_v28 }
  0xa7   :  { %9864 = vmatprep.subr.bf16.mxu0 %v12970_v34  ;;  %10397 = vmatprep.subr.bf16.mxu1 %v12972_v35  ;;  %v426_v34 = vld [vmem:[%s20017_s1 + $0xc40] sm:$0xff] }
  0xa8   :  { %v430_v35 = vld [vmem:[%s20017_s1 + $0xc60] sm:$0xff] }
  0xa9   :  { %v13034_v25 = vcombine.high %v426_v34, %v430_v35 }
  0xaa   :  { %9865 = vmatpush1.bf16.msra.mxu0 %v12969_v40  ;;  %10398 = vmatpush1.bf16.msra.mxu1 %v12971_v41  ;;  %v13025_v40 = vcombine.low %v418_v26, %v422_v27  ;;  %v13027_v41 = vcombine.low %v419_v15, %v423_v28  ;;  %v474_v26 = vld [vmem:[%s20017_s1 + $0xdc0] sm:$0xff]  ;;  %v475_v15 = vld [vmem:[%s20017_s1 + $0xdc8] sm:$0xff] }
  0xab   :  { %9866 = vmatprep.subr.bf16.mxu0 %v12978_v42  ;;  %10399 = vmatprep.subr.bf16.mxu1 %v12980_v43  ;;  %v13036_v42 = vcombine.high %v427_v37, %v431_v38  ;;  %v434_v43 = vld [vmem:[%s20017_s1 + $0xc80] sm:$0xff]  ;;  %v479_v28 = vld [vmem:[%s20017_s1 + $0xde8] sm:$0xff] }
  0xac   :  { %v478_v27 = vld [vmem:[%s20017_s1 + $0xde0] sm:$0xff] }
  0xae   :  { %9867 = vmatpush1.bf16.msra.mxu0 %v12977_v48  ;;  %10400 = vmatpush1.bf16.msra.mxu1 %v12979_v49  ;;  %v13033_v48 = vcombine.low %v426_v34, %v430_v35  ;;  %v13035_v49 = vcombine.low %v427_v37, %v431_v38  ;;  %v482_v34 = vld [vmem:[%s20017_s1 + $0xe00] sm:$0xff]  ;;  %v483_v37 = vld [vmem:[%s20017_s1 + $0xe08] sm:$0xff] }
  0xaf   :  { %9868 = vmatprep.subr.bf16.mxu0 %v12986_v50  ;;  %10401 = vmatprep.subr.bf16.mxu1 %v12988_v51  ;;  %v13042_v50 = vcombine.high %v434_v43, %v438_v44  ;;  %v13044_v51 = vcombine.high %v435_v46, %v439_v47  ;;  %v486_v35 = vld [vmem:[%s20017_s1 + $0xe20] sm:$0xff]  ;;  %v487_v38 = vld [vmem:[%s20017_s1 + $0xe28] sm:$0xff] }
  0xb2   :  { %9869 = vmatpush1.bf16.msra.mxu0 %v12985_v58  ;;  %10402 = vmatpush1.bf16.msra.mxu1 %v12987_v59  ;;  %v13041_v58 = vcombine.low %v434_v43, %v438_v44  ;;  %v13043_v59 = vcombine.low %v435_v46, %v439_v47  ;;  %v490_v43 = vld [vmem:[%s20017_s1 + $0xe40] sm:$0xff]  ;;  %v491_v46 = vld [vmem:[%s20017_s1 + $0xe48] sm:$0xff] }
  0xb3   :  { %9870 = vmatprep.subr.bf16.mxu0 %v12994_v60  ;;  %10403 = vmatprep.subr.bf16.mxu1 %v12996_v61  ;;  %v13050_v60 = vcombine.high %v442_v52, %v446_v54  ;;  %v13052_v61 = vcombine.high %v443_v55, %v447_v56  ;;  %v494_v44 = vld [vmem:[%s20017_s1 + $0xe60] sm:$0xff]  ;;  %v495_v47 = vld [vmem:[%s20017_s1 + $0xe68] sm:$0xff] }
  0xb6   :  { %9871 = vmatpush1.bf16.msra.mxu0 %v12993_v2  ;;  %10404 = vmatpush1.bf16.msra.mxu1 %v12995_v3  ;;  %v13049_v2 = vcombine.low %v442_v52, %v446_v54  ;;  %v13051_v3 = vcombine.low %v443_v55, %v447_v56  ;;  %v498_v52 = vld [vmem:[%s20017_s1 + $0xe80] sm:$0xff]  ;;  %v499_v55 = vld [vmem:[%s20017_s1 + $0xe88] sm:$0xff] }
  0xb7   :  { %9872 = vmatprep.subr.bf16.mxu0 %v13002_v4  ;;  %10405 = vmatprep.subr.bf16.mxu1 %v13004_v5  ;;  %v13058_v4 = vcombine.high %v450_v62, %v454_v63  ;;  %v13060_v5 = vcombine.high %v451_v0, %v455_v1  ;;  %v502_v54 = vld [vmem:[%s20017_s1 + $0xea0] sm:$0xff]  ;;  %v503_v56 = vld [vmem:[%s20017_s1 + $0xea8] sm:$0xff] }
  0xba   :  { %9873 = vmatpush1.bf16.msra.mxu0 %v13001_v10  ;;  %10406 = vmatpush1.bf16.msra.mxu1 %v13003_v11  ;;  %v13057_v10 = vcombine.low %v450_v62, %v454_v63  ;;  %v13059_v11 = vcombine.low %v451_v0, %v455_v1  ;;  %v506_v62 = vld [vmem:[%s20017_s1 + $0xec0] sm:$0xff]  ;;  %v507_v0 = vld [vmem:[%s20017_s1 + $0xec8] sm:$0xff] }
  0xbb   :  { %9874 = vmatprep.subr.bf16.mxu0 %v13010_v13  ;;  %10407 = vmatprep.subr.bf16.mxu1 %v13012_v14  ;;  %v13066_v13 = vcombine.high %v458_v6, %v462_v7  ;;  %v13068_v14 = vcombine.high %v459_v8, %v463_v9  ;;  %v510_v63 = vld [vmem:[%s20017_s1 + $0xee0] sm:$0xff]  ;;  %v511_v1 = vld [vmem:[%s20017_s1 + $0xee8] sm:$0xff] }
  0xbe   :  { %9875 = vmatpush1.bf16.msra.mxu0 %v13009_v19  ;;  %10408 = vmatpush1.bf16.msra.mxu1 %v13011_v20  ;;  %v13065_v19 = vcombine.low %v458_v6, %v462_v7  ;;  %v13067_v20 = vcombine.low %v459_v8, %v463_v9  ;;  %v514_v6 = vld [vmem:[%s20017_s1 + $0xf00] sm:$0xff]  ;;  %v515_v8 = vld [vmem:[%s20017_s1 + $0xf08] sm:$0xff] }
  0xbf   :  { %9876 = vmatprep.subr.bf16.mxu0 %v13018_v23  ;;  %10409 = vmatprep.subr.bf16.mxu1 %v13020_v24  ;;  %v13074_v23 = vcombine.high %v466_v16, %v470_v17  ;;  %v13076_v24 = vcombine.high %v467_v53, %v471_v18  ;;  %v518_v7 = vld [vmem:[%s20017_s1 + $0xf20] sm:$0xff]  ;;  %v519_v9 = vld [vmem:[%s20017_s1 + $0xf28] sm:$0xff] }
  0xc2   :  { %9877 = vmatpush1.bf16.msra.mxu0 %v13017_v29  ;;  %10410 = vmatpush1.bf16.msra.mxu1 %v13019_v30  ;;  %v13073_v29 = vcombine.low %v466_v16, %v470_v17  ;;  %v13075_v30 = vcombine.low %v467_v53, %v471_v18  ;;  %v522_v16 = vld [vmem:[%s20017_s1 + $0xf40] sm:$0xff]  ;;  %v523_v53 = vld [vmem:[%s20017_s1 + $0xf48] sm:$0xff] }
  0xc3   :  { %9887 = vmatprep.subr.bf16.mxu0 %v13026_v32  ;;  %10420 = vmatprep.subr.bf16.mxu1 %v13028_v33  ;;  %v13082_v32 = vcombine.high %v474_v26, %v478_v27  ;;  %v13084_v33 = vcombine.high %v475_v15, %v479_v28  ;;  %v526_v17 = vld [vmem:[%s20017_s1 + $0xf60] sm:$0xff]  ;;  %v527_v18 = vld [vmem:[%s20017_s1 + $0xf68] sm:$0xff] }
  0xc5   :  { %9879 = vmatmul.mubr.bf16.vlgmr.msra.gmra.mrb[0].mxu0 %v15361_v36  ;;  %10412 = vmatmul.mubr.bf16.vlgmr.msra.gmra.mrb[0].mxu1 %v15361_v36 }
  0xc6   :  { %9888 = vmatpush1.bf16.msra.mxu0 %v13025_v40  ;;  %10421 = vmatpush1.bf16.msra.mxu1 %v13027_v41  ;;  %v13081_v40 = vcombine.low %v474_v26, %v478_v27  ;;  %v13083_v41 = vcombine.low %v475_v15, %v479_v28  ;;  %v530_v26 = vld [vmem:[%s20017_s1 + $0xf80] sm:$0xff]  ;;  %v531_v15 = vld [vmem:[%s20017_s1 + $0xf88] sm:$0xff] }
  0xc7   :  { %9889 = vmatprep.subr.bf16.mxu0 %v13034_v25  ;;  %10422 = vmatprep.subr.bf16.mxu1 %v13036_v42  ;;  %v13090_v25 = vcombine.high %v482_v34, %v486_v35  ;;  %v13092_v42 = vcombine.high %v483_v37, %v487_v38  ;;  %v534_v27 = vld [vmem:[%s20017_s1 + $0xfa0] sm:$0xff]  ;;  %v535_v28 = vld [vmem:[%s20017_s1 + $0xfa8] sm:$0xff] }
  0xc8   :  { %9919 = vmatprep.mubr.bf16.mxu0 %v15382_v45  ;;  %10452 = vmatprep.mubr.bf16.mxu1 %v15382_v45 }
  0xca   :  { %9890 = vmatpush1.bf16.msra.mxu0 %v13033_v48  ;;  %10423 = vmatpush1.bf16.msra.mxu1 %v13035_v49  ;;  %v13089_v48 = vcombine.low %v482_v34, %v486_v35  ;;  %v13091_v49 = vcombine.low %v483_v37, %v487_v38  ;;  %v538_v34 = vld [vmem:[%s20017_s1 + $0xfc0] sm:$0xff]  ;;  %v539_v37 = vld [vmem:[%s20017_s1 + $0xfc8] sm:$0xff] }
  0xcb   :  { %9891 = vmatprep.subr.bf16.mxu0 %v13042_v50  ;;  %10424 = vmatprep.subr.bf16.mxu1 %v13044_v51  ;;  %v13098_v50 = vcombine.high %v490_v43, %v494_v44  ;;  %v13100_v51 = vcombine.high %v491_v46, %v495_v47  ;;  %v542_v35 = vld [vmem:[%s20017_s1 + $0xfe0] sm:$0xff]  ;;  %v543_v38 = vld [vmem:[%s20017_s1 + $0xfe8] sm:$0xff] }
  0xce   :  { %9892 = vmatpush1.bf16.msra.mxu0 %v13041_v58  ;;  %10425 = vmatpush1.bf16.msra.mxu1 %v13043_v59  ;;  %v13097_v58 = vcombine.low %v490_v43, %v494_v44  ;;  %v13099_v59 = vcombine.low %v491_v46, %v495_v47  ;;  %v546_v43 = vld [vmem:[%s20017_s1 + $0x1000] sm:$0xff]  ;;  %v547_v46 = vld [vmem:[%s20017_s1 + $0x1008] sm:$0xff] }
  0xcf   :  { %9893 = vmatprep.subr.bf16.mxu0 %v13050_v60  ;;  %10426 = vmatprep.subr.bf16.mxu1 %v13052_v61  ;;  %v13106_v60 = vcombine.high %v498_v52, %v502_v54  ;;  %v13108_v61 = vcombine.high %v499_v55, %v503_v56  ;;  %v550_v44 = vld [vmem:[%s20017_s1 + $0x1020] sm:$0xff]  ;;  %v551_v47 = vld [vmem:[%s20017_s1 + $0x1028] sm:$0xff] }
  0xd2   :  { %9894 = vmatpush1.bf16.msra.mxu0 %v13049_v2  ;;  %10427 = vmatpush1.bf16.msra.mxu1 %v13051_v3  ;;  %v13105_v2 = vcombine.low %v498_v52, %v502_v54  ;;  %v13107_v3 = vcombine.low %v499_v55, %v503_v56  ;;  %v554_v52 = vld [vmem:[%s20017_s1 + $0x1040] sm:$0xff]  ;;  %v15570_v55 = vcombine.low %v15372_v39, %v15372_v39  ;;  %v555_v56 = vld [vmem:[%s20017_s1 + $0x1048] sm:$0xff] }
  0xd3   :  { %9895 = vmatprep.subr.bf16.mxu0 %v13058_v4  ;;  %10428 = vmatprep.subr.bf16.mxu1 %v13060_v5  ;;  %v13114_v4 = vcombine.high %v506_v62, %v510_v63  ;;  %v13116_v5 = vcombine.high %v507_v0, %v511_v1  ;;  %v558_v54 = vld [vmem:[%s20017_s1 + $0x1060] sm:$0xff] }
  0xd4   :  { %v13162_v39 = vcombine.high %v554_v52, %v558_v54 }
  0xd6   :  { %9896 = vmatpush1.bf16.msra.mxu0 %v13057_v10  ;;  %10429 = vmatpush1.bf16.msra.mxu1 %v13059_v11  ;;  %v13113_v10 = vcombine.low %v506_v62, %v510_v63  ;;  %v13115_v11 = vcombine.low %v507_v0, %v511_v1  ;;  %v562_v63 = vld [vmem:[%s20017_s1 + $0x1080] sm:$0xff] }
  0xd7   :  { %9897 = vmatprep.subr.bf16.mxu0 %v13066_v13  ;;  %10430 = vmatprep.subr.bf16.mxu1 %v13068_v14  ;;  %v13122_v13 = vcombine.high %v514_v6, %v518_v7  ;;  %v13124_v14 = vcombine.high %v515_v8, %v519_v9  ;;  %v566_v0 = vld [vmem:[%s20017_s1 + $0x10a0] sm:$0xff] }
  0xda   :  { %9898 = vmatpush1.bf16.msra.mxu0 %v13065_v19  ;;  %10431 = vmatpush1.bf16.msra.mxu1 %v13067_v20  ;;  %v13121_v19 = vcombine.low %v514_v6, %v518_v7  ;;  %v13123_v20 = vcombine.low %v515_v8, %v519_v9  ;;  %v13170_v6 = vcombine.high %v562_v63, %v566_v0  ;;  %v570_v8 = vld [vmem:[%s20017_s1 + $0x10c0] sm:$0xff] }
  0xdb   :  { %9899 = vmatprep.subr.bf16.mxu0 %v13074_v23  ;;  %10432 = vmatprep.subr.bf16.mxu1 %v13076_v24  ;;  %v13130_v23 = vcombine.high %v522_v16, %v526_v17  ;;  %v13132_v24 = vcombine.high %v523_v53, %v527_v18  ;;  %v574_v9 = vld [vmem:[%s20017_s1 + $0x10e0] sm:$0xff] }
  0xde   :  { %9900 = vmatpush1.bf16.msra.mxu0 %v13073_v29  ;;  %10433 = vmatpush1.bf16.msra.mxu1 %v13075_v30  ;;  %v13129_v29 = vcombine.low %v522_v16, %v526_v17  ;;  %v13131_v30 = vcombine.low %v523_v53, %v527_v18  ;;  %v13178_v16 = vcombine.high %v570_v8, %v574_v9  ;;  %v578_v53 = vld [vmem:[%s20017_s1 + $0x1100] sm:$0xff] }
  0xdf   :  { %9901 = vmatprep.subr.bf16.mxu0 %v13082_v32  ;;  %10434 = vmatprep.subr.bf16.mxu1 %v13084_v33  ;;  %v13138_v32 = vcombine.high %v530_v26, %v534_v27  ;;  %v13140_v33 = vcombine.high %v531_v15, %v535_v28  ;;  %v582_v18 = vld [vmem:[%s20017_s1 + $0x1120] sm:$0xff] }
  0xe2   :  { %9902 = vmatpush1.bf16.msra.mxu0 %v13081_v40  ;;  %10435 = vmatpush1.bf16.msra.mxu1 %v13083_v41  ;;  %v13137_v40 = vcombine.low %v530_v26, %v534_v27  ;;  %v13139_v41 = vcombine.low %v531_v15, %v535_v28  ;;  %v13186_v26 = vcombine.high %v578_v53, %v582_v18  ;;  %v586_v15 = vld [vmem:[%s20017_s1 + $0x1140] sm:$0xff] }
  0xe3   :  { %9903 = vmatprep.subr.bf16.mxu0 %v13090_v25  ;;  %10436 = vmatprep.subr.bf16.mxu1 %v13092_v42  ;;  %v13146_v25 = vcombine.high %v538_v34, %v542_v35  ;;  %v13148_v42 = vcombine.high %v539_v37, %v543_v38  ;;  %v590_v28 = vld [vmem:[%s20017_s1 + $0x1160] sm:$0xff] }
  0xe6   :  { %9904 = vmatpush1.bf16.msra.mxu0 %v13089_v48  ;;  %10437 = vmatpush1.bf16.msra.mxu1 %v13091_v49  ;;  %v13145_v48 = vcombine.low %v538_v34, %v542_v35  ;;  %v13147_v49 = vcombine.low %v539_v37, %v543_v38  ;;  %v13194_v34 = vcombine.high %v586_v15, %v590_v28  ;;  %v594_v37 = vld [vmem:[%s20017_s1 + $0x1180] sm:$0xff] }
  0xe7   :  { %9905 = vmatprep.subr.bf16.mxu0 %v13098_v50  ;;  %10438 = vmatprep.subr.bf16.mxu1 %v13100_v51  ;;  %v13154_v50 = vcombine.high %v546_v43, %v550_v44  ;;  %v13156_v51 = vcombine.high %v547_v46, %v551_v47  ;;  %v598_v38 = vld [vmem:[%s20017_s1 + $0x11a0] sm:$0xff] }
  0xea   :  { %9906 = vmatpush1.bf16.msra.mxu0 %v13097_v58  ;;  %10439 = vmatpush1.bf16.msra.mxu1 %v13099_v59  ;;  %v559_v58 = vld [vmem:[%s20017_s1 + $0x1068] sm:$0xff]  ;;  %v15581_v59 = vld [vmem:[%s20018_s0 + $0x20] sm:$0xff] }
  0xeb   :  { %9907 = vmatprep.subr.bf16.mxu0 %v13106_v60  ;;  %10440 = vmatprep.subr.bf16.mxu1 %v13108_v61  ;;  %v13153_v60 = vcombine.low %v546_v43, %v550_v44  ;;  %v13155_v61 = vcombine.low %v547_v46, %v551_v47  ;;  %v13164_v62 = vcombine.high %v555_v56, %v559_v58  ;;  %v602_v46 = vld [vmem:[%s20017_s1 + $0x11c0] sm:$0xff] }
  0xec   :  { %v15591_v1 = vcombine.high %v15581_v59, %v15581_v59  ;;  %v13202_v43 = vcombine.high %v594_v37, %v598_v38  ;;  %v606_v47 = vld [vmem:[%s20017_s1 + $0x11e0] sm:$0xff] }
  0xee   :  { %9908 = vmatpush1.bf16.msra.mxu0 %v13105_v2  ;;  %10441 = vmatpush1.bf16.msra.mxu1 %v13107_v3  ;;  %v563_v2 = vld [vmem:[%s20017_s1 + $0x1088] sm:$0xff] }
  0xef   :  { %9909 = vmatprep.subr.bf16.mxu0 %v13114_v4  ;;  %10442 = vmatprep.subr.bf16.mxu1 %v13116_v5  ;;  %v567_v3 = vld [vmem:[%s20017_s1 + $0x10a8] sm:$0xff]  ;;  %v13161_v4 = vcombine.low %v554_v52, %v558_v54  ;;  %v13163_v5 = vcombine.low %v555_v56, %v559_v58  ;;  %v13210_v52 = vcombine.high %v602_v46, %v606_v47  ;;  %v610_v56 = vld [vmem:[%s20017_s1 + $0x1200] sm:$0xff] }
  0xf0   :  { %v13172_v7 = vcombine.high %v563_v2, %v567_v3  ;;  %v614_v58 = vld [vmem:[%s20017_s1 + $0x1220] sm:$0xff] }
  0xf2   :  { %9910 = vmatpush1.bf16.msra.mxu0 %v13113_v10  ;;  %10443 = vmatpush1.bf16.msra.mxu1 %v13115_v11  ;;  %v571_v10 = vld [vmem:[%s20017_s1 + $0x10c8] sm:$0xff] }
  0xf3   :  { %9911 = vmatprep.subr.bf16.mxu0 %v13122_v13  ;;  %10444 = vmatprep.subr.bf16.mxu1 %v13124_v14  ;;  %v575_v11 = vld [vmem:[%s20017_s1 + $0x10e8] sm:$0xff]  ;;  %v13169_v13 = vcombine.low %v562_v63, %v566_v0  ;;  %v13171_v14 = vcombine.low %v563_v2, %v567_v3  ;;  %v13218_v63 = vcombine.high %v610_v56, %v614_v58  ;;  %v618_v2 = vld [vmem:[%s20017_s1 + $0x1240] sm:$0xff] }
  0xf4   :  { %v13180_v17 = vcombine.high %v571_v10, %v575_v11  ;;  %v622_v3 = vld [vmem:[%s20017_s1 + $0x1260] sm:$0xff] }
  0xf6   :  { %9912 = vmatpush1.bf16.msra.mxu0 %v13121_v19  ;;  %10445 = vmatpush1.bf16.msra.mxu1 %v13123_v20  ;;  %v579_v19 = vld [vmem:[%s20017_s1 + $0x1108] sm:$0xff] }
  0xf7   :  { %9913 = vmatprep.subr.bf16.mxu0 %v13130_v23  ;;  %10446 = vmatprep.subr.bf16.mxu1 %v13132_v24  ;;  %v583_v20 = vld [vmem:[%s20017_s1 + $0x1128] sm:$0xff]  ;;  %v13177_v23 = vcombine.low %v570_v8, %v574_v9  ;;  %v13179_v24 = vcombine.low %v571_v10, %v575_v11  ;;  %v13226_v8 = vcombine.high %v618_v2, %v622_v3  ;;  %v626_v10 = vld [vmem:[%s20017_s1 + $0x1280] sm:$0xff] }
  0xf8   :  { %v13188_v27 = vcombine.high %v579_v19, %v583_v20  ;;  %v630_v11 = vld [vmem:[%s20017_s1 + $0x12a0] sm:$0xff] }
  0xfa   :  { %9914 = vmatpush1.bf16.msra.mxu0 %v13129_v29  ;;  %10447 = vmatpush1.bf16.msra.mxu1 %v13131_v30  ;;  %v587_v29 = vld [vmem:[%s20017_s1 + $0x1148] sm:$0xff] }
  0xfb   :  { %9915 = vmatprep.subr.bf16.mxu0 %v13138_v32  ;;  %10448 = vmatprep.subr.bf16.mxu1 %v13140_v33  ;;  %v591_v30 = vld [vmem:[%s20017_s1 + $0x1168] sm:$0xff]  ;;  %v13185_v32 = vcombine.low %v578_v53, %v582_v18  ;;  %v13187_v33 = vcombine.low %v579_v19, %v583_v20  ;;  %v13234_v53 = vcombine.high %v626_v10, %v630_v11  ;;  %v634_v19 = vld [vmem:[%s20017_s1 + $0x12c0] sm:$0xff] }
  0xfc   :  { %v13196_v35 = vcombine.high %v587_v29, %v591_v30  ;;  %v638_v20 = vld [vmem:[%s20017_s1 + $0x12e0] sm:$0xff] }
  0xfe   :  { %9916 = vmatpush1.bf16.msra.mxu0 %v13137_v40  ;;  %10449 = vmatpush1.bf16.msra.mxu1 %v13139_v41  ;;  %v595_v40 = vld [vmem:[%s20017_s1 + $0x1188] sm:$0xff] }
  0xff   :  { %9917 = vmatprep.subr.bf16.mxu0 %v13146_v25  ;;  %10450 = vmatprep.subr.bf16.mxu1 %v13148_v42  ;;  %v599_v41 = vld [vmem:[%s20017_s1 + $0x11a8] sm:$0xff]  ;;  %v13193_v25 = vcombine.low %v586_v15, %v590_v28  ;;  %v13195_v42 = vcombine.low %v587_v29, %v591_v30  ;;  %v13242_v15 = vcombine.high %v634_v19, %v638_v20  ;;  %v642_v29 = vld [vmem:[%s20017_s1 + $0x1300] sm:$0xff] }
 0x100   :  { %v13204_v44 = vcombine.high %v595_v40, %v599_v41  ;;  %v646_v30 = vld [vmem:[%s20017_s1 + $0x1320] sm:$0xff] }
 0x102   :  { %9918 = vmatpush1.bf16.msra.mxu0 %v13145_v48  ;;  %10451 = vmatpush1.bf16.msra.mxu1 %v13147_v49  ;;  %v603_v48 = vld [vmem:[%s20017_s1 + $0x11c8] sm:$0xff] }
 0x103   :  { %9928 = vmatprep.subr.bf16.mxu0 %v13154_v50  ;;  %10461 = vmatprep.subr.bf16.mxu1 %v13156_v51  ;;  %v607_v49 = vld [vmem:[%s20017_s1 + $0x11e8] sm:$0xff]  ;;  %v13201_v50 = vcombine.low %v594_v37, %v598_v38  ;;  %v13203_v51 = vcombine.low %v595_v40, %v599_v41  ;;  %v13250_v37 = vcombine.high %v642_v29, %v646_v30  ;;  %v650_v40 = vld [vmem:[%s20017_s1 + $0x1340] sm:$0xff] }
 0x104   :  { %v13212_v54 = vcombine.high %v603_v48, %v607_v49  ;;  %v654_v41 = vld [vmem:[%s20017_s1 + $0x1360] sm:$0xff] }
 0x105   :  { %9920 = vmatmul.mubr.bf16.vlgmr.msra.gmra.mrb[0].mxu0 %v15570_v55  ;;  %10453 = vmatmul.mubr.bf16.vlgmr.msra.gmra.mrb[0].mxu1 %v15570_v55 }
 0x106   :  { %9929 = vmatpush1.bf16.msra.mxu0 %v13153_v60  ;;  %10462 = vmatpush1.bf16.msra.mxu1 %v13155_v61  ;;  %v611_v60 = vld [vmem:[%s20017_s1 + $0x1208] sm:$0xff] }
 0x107   :  { %9930 = vmatprep.subr.bf16.mxu0 %v13162_v39  ;;  %10463 = vmatprep.subr.bf16.mxu1 %v13164_v62  ;;  %v615_v61 = vld [vmem:[%s20017_s1 + $0x1228] sm:$0xff]  ;;  %v13209_v39 = vcombine.low %v602_v46, %v606_v47  ;;  %v13211_v62 = vcombine.low %v603_v48, %v607_v49  ;;  %v13258_v46 = vcombine.high %v650_v40, %v654_v41  ;;  %v658_v48 = vld [vmem:[%s20017_s1 + $0x1380] sm:$0xff] }
 0x108   :  { %9960 = vmatprep.mubr.bf16.mxu0 %v15591_v1  ;;  %10493 = vmatprep.mubr.bf16.mxu1 %v15591_v1  ;;  %v13220_v0 = vcombine.high %v611_v60, %v615_v61  ;;  %v662_v49 = vld [vmem:[%s20017_s1 + $0x13a0] sm:$0xff] }
 0x10a   :  { %9931 = vmatpush1.bf16.msra.mxu0 %v13161_v4  ;;  %10464 = vmatpush1.bf16.msra.mxu1 %v13163_v5  ;;  %v619_v4 = vld [vmem:[%s20017_s1 + $0x1248] sm:$0xff] }
 0x10b   :  { %9932 = vmatprep.subr.bf16.mxu0 %v13170_v6  ;;  %10465 = vmatprep.subr.bf16.mxu1 %v13172_v7  ;;  %v623_v5 = vld [vmem:[%s20017_s1 + $0x1268] sm:$0xff]  ;;  %v13217_v6 = vcombine.low %v610_v56, %v614_v58  ;;  %v13219_v7 = vcombine.low %v611_v60, %v615_v61  ;;  %v13266_v56 = vcombine.high %v658_v48, %v662_v49  ;;  %v666_v60 = vld [vmem:[%s20017_s1 + $0x13c0] sm:$0xff] }
 0x10c   :  { %v13228_v9 = vcombine.high %v619_v4, %v623_v5  ;;  %v670_v61 = vld [vmem:[%s20017_s1 + $0x13e0] sm:$0xff] }
 0x10e   :  { %9933 = vmatpush1.bf16.msra.mxu0 %v13169_v13  ;;  %10466 = vmatpush1.bf16.msra.mxu1 %v13171_v14  ;;  %v627_v13 = vld [vmem:[%s20017_s1 + $0x1288] sm:$0xff] }
 0x10f   :  { %9934 = vmatprep.subr.bf16.mxu0 %v13178_v16  ;;  %10467 = vmatprep.subr.bf16.mxu1 %v13180_v17  ;;  %v631_v14 = vld [vmem:[%s20017_s1 + $0x12a8] sm:$0xff]  ;;  %v13225_v16 = vcombine.low %v618_v2, %v622_v3  ;;  %v13227_v17 = vcombine.low %v619_v4, %v623_v5  ;;  %v13274_v2 = vcombine.high %v666_v60, %v670_v61  ;;  %v674_v4 = vld [vmem:[%s20017_s1 + $0x1400] sm:$0xff] }
 0x110   :  { %v13236_v18 = vcombine.high %v627_v13, %v631_v14  ;;  %v678_v5 = vld [vmem:[%s20017_s1 + $0x1420] sm:$0xff] }
 0x112   :  { %9935 = vmatpush1.bf16.msra.mxu0 %v13177_v23  ;;  %10468 = vmatpush1.bf16.msra.mxu1 %v13179_v24  ;;  %v635_v23 = vld [vmem:[%s20017_s1 + $0x12c8] sm:$0xff] }
 0x113   :  { %9936 = vmatprep.subr.bf16.mxu0 %v13186_v26  ;;  %10469 = vmatprep.subr.bf16.mxu1 %v13188_v27  ;;  %v639_v24 = vld [vmem:[%s20017_s1 + $0x12e8] sm:$0xff]  ;;  %v13233_v26 = vcombine.low %v626_v10, %v630_v11  ;;  %v13235_v27 = vcombine.low %v627_v13, %v631_v14  ;;  %v13282_v10 = vcombine.high %v674_v4, %v678_v5  ;;  %v682_v13 = vld [vmem:[%s20017_s1 + $0x1440] sm:$0xff] }
 0x114   :  { %v13244_v28 = vcombine.high %v635_v23, %v639_v24  ;;  %v686_v14 = vld [vmem:[%s20017_s1 + $0x1460] sm:$0xff] }
 0x116   :  { %9937 = vmatpush1.bf16.msra.mxu0 %v13185_v32  ;;  %10470 = vmatpush1.bf16.msra.mxu1 %v13187_v33  ;;  %v643_v32 = vld [vmem:[%s20017_s1 + $0x1308] sm:$0xff] }
 0x117   :  { %9938 = vmatprep.subr.bf16.mxu0 %v13194_v34  ;;  %10471 = vmatprep.subr.bf16.mxu1 %v13196_v35  ;;  %v647_v33 = vld [vmem:[%s20017_s1 + $0x1328] sm:$0xff]  ;;  %v13241_v34 = vcombine.low %v634_v19, %v638_v20  ;;  %v13243_v35 = vcombine.low %v635_v23, %v639_v24  ;;  %v13281_v19 = vcombine.low %v674_v4, %v678_v5  ;;  %v690_v24 = vld [vmem:[%s20017_s1 + $0x1480] sm:$0xff] }
 0x118   :  { %v13252_v38 = vcombine.high %v643_v32, %v647_v33 }
 0x11a   :  { %9939 = vmatpush1.bf16.msra.mxu0 %v13193_v25  ;;  %10472 = vmatpush1.bf16.msra.mxu1 %v13195_v42  ;;  %v651_v25 = vld [vmem:[%s20017_s1 + $0x1348] sm:$0xff] }
 0x11b   :  { %9940 = vmatprep.subr.bf16.mxu0 %v13202_v43  ;;  %10473 = vmatprep.subr.bf16.mxu1 %v13204_v44  ;;  %v655_v42 = vld [vmem:[%s20017_s1 + $0x1368] sm:$0xff]  ;;  %v13249_v43 = vcombine.low %v642_v29, %v646_v30  ;;  %v13251_v44 = vcombine.low %v643_v32, %v647_v33  ;;  %v13289_v29 = vcombine.low %v682_v13, %v686_v14 }
 0x11c   :  { %v13260_v47 = vcombine.high %v651_v25, %v655_v42 }
 0x11e   :  { %9941 = vmatpush1.bf16.msra.mxu0 %v13201_v50  ;;  %10474 = vmatpush1.bf16.msra.mxu1 %v13203_v51  ;;  %v659_v50 = vld [vmem:[%s20017_s1 + $0x1388] sm:$0xff] }
 0x11f   :  { %9942 = vmatprep.subr.bf16.mxu0 %v13210_v52  ;;  %10475 = vmatprep.subr.bf16.mxu1 %v13212_v54  ;;  %v663_v51 = vld [vmem:[%s20017_s1 + $0x13a8] sm:$0xff]  ;;  %v13257_v52 = vcombine.low %v650_v40, %v654_v41  ;;  %v13259_v54 = vcombine.low %v651_v25, %v655_v42 }
 0x120   :  { %v13268_v58 = vcombine.high %v659_v50, %v663_v51 }
 0x122   :  { %9943 = vmatpush1.bf16.msra.mxu0 %v13209_v39  ;;  %10476 = vmatpush1.bf16.msra.mxu1 %v13211_v62  ;;  %v667_v39 = vld [vmem:[%s20017_s1 + $0x13c8] sm:$0xff] }
 0x123   :  { %9944 = vmatprep.subr.bf16.mxu0 %v13218_v63  ;;  %10477 = vmatprep.subr.bf16.mxu1 %v13220_v0  ;;  %v671_v62 = vld [vmem:[%s20017_s1 + $0x13e8] sm:$0xff]  ;;  %v13265_v63 = vcombine.low %v658_v48, %v662_v49  ;;  %v13267_v0 = vcombine.low %v659_v50, %v663_v51 }
 0x124   :  { %v13276_v3 = vcombine.high %v667_v39, %v671_v62 }
 0x126   :  { %9945 = vmatpush1.bf16.msra.mxu0 %v13217_v6  ;;  %10478 = vmatpush1.bf16.msra.mxu1 %v13219_v7  ;;  %v675_v6 = vld [vmem:[%s20017_s1 + $0x1408] sm:$0xff] }
 0x127   :  { %9946 = vmatprep.subr.bf16.mxu0 %v13226_v8  ;;  %10479 = vmatprep.subr.bf16.mxu1 %v13228_v9  ;;  %v679_v7 = vld [vmem:[%s20017_s1 + $0x1428] sm:$0xff]  ;;  %v13273_v8 = vcombine.low %v666_v60, %v670_v61  ;;  %v13275_v9 = vcombine.low %v667_v39, %v671_v62 }
 0x128   :  { %v13284_v11 = vcombine.high %v675_v6, %v679_v7  ;;  %v13283_v20 = vcombine.low %v675_v6, %v679_v7 }
 0x12a   :  { %9947 = vmatpush1.bf16.msra.mxu0 %v13225_v16  ;;  %10480 = vmatpush1.bf16.msra.mxu1 %v13227_v17  ;;  %v15779_v16 = vcombine.low %v15581_v59, %v15581_v59  ;;  %v683_v17 = vld [vmem:[%s20017_s1 + $0x1448] sm:$0xff]  ;;  %v13290_v59 = vcombine.high %v682_v13, %v686_v14 }
 0x12b   :  { %9948 = vmatprep.subr.bf16.mxu0 %v13234_v53  ;;  %10481 = vmatprep.subr.bf16.mxu1 %v13236_v18  ;;  %v687_v53 = vld [vmem:[%s20017_s1 + $0x1468] sm:$0xff] }
 0x12c   :  { %v15790_v18 = vld [vmem:[%s20018_s0 + $0x28] sm:$0xff]  ;;  %v13292_v23 = vcombine.high %v683_v17, %v687_v53  ;;  %v13291_v30 = vcombine.low %v683_v17, %v687_v53 }
 0x12e   :  { %9949 = vmatpush1.bf16.msra.mxu0 %v13233_v26  ;;  %10482 = vmatpush1.bf16.msra.mxu1 %v13235_v27  ;;  %v694_v26 = vld [vmem:[%s20017_s1 + $0x14a0] sm:$0xff]  ;;  %v15800_v27 = vcombine.high %v15790_v18, %v15790_v18 }
 0x12f   :  { %9950 = vmatprep.subr.bf16.mxu0 %v13242_v15  ;;  %10483 = vmatprep.subr.bf16.mxu1 %v13244_v28  ;;  %v691_v15 = vld [vmem:[%s20017_s1 + $0x1488] sm:$0xff]  ;;  %v13298_v32 = vcombine.high %v690_v24, %v694_v26  ;;  %v13297_v40 = vcombine.low %v690_v24, %v694_v26 }
 0x130   :  { %v695_v28 = vld [vmem:[%s20017_s1 + $0x14a8] sm:$0xff] }
 0x131   :  { %v13300_v33 = vcombine.high %v691_v15, %v695_v28  ;;  %v13299_v41 = vcombine.low %v691_v15, %v695_v28 }
 0x132   :  { %9951 = vmatpush1.bf16.msra.mxu0 %v13241_v34  ;;  %10484 = vmatpush1.bf16.msra.mxu1 %v13243_v35  ;;  %v698_v34 = vld [vmem:[%s20017_s1 + $0x14c0] sm:$0xff] }
 0x133   :  { %9952 = vmatprep.subr.bf16.mxu0 %v13250_v37  ;;  %10485 = vmatprep.subr.bf16.mxu1 %v13252_v38  ;;  %v702_v35 = vld [vmem:[%s20017_s1 + $0x14e0] sm:$0xff]  ;;  %v699_v37 = vld [vmem:[%s20017_s1 + $0x14c8] sm:$0xff] }
 0x134   :  { %v703_v38 = vld [vmem:[%s20017_s1 + $0x14e8] sm:$0xff]  ;;  %v13306_v25 = vcombine.high %v698_v34, %v702_v35  ;;  %v13305_v48 = vcombine.low %v698_v34, %v702_v35 }
 0x135   :  { %v13308_v42 = vcombine.high %v699_v37, %v703_v38  ;;  %v13307_v49 = vcombine.low %v699_v37, %v703_v38 }
 0x136   :  { %9953 = vmatpush1.bf16.msra.mxu0 %v13249_v43  ;;  %10486 = vmatpush1.bf16.msra.mxu1 %v13251_v44  ;;  %v706_v43 = vld [vmem:[%s20017_s1 + $0x1500] sm:$0xff] }
 0x137   :  { %9954 = vmatprep.subr.bf16.mxu0 %v13258_v46  ;;  %10487 = vmatprep.subr.bf16.mxu1 %v13260_v47  ;;  %v710_v44 = vld [vmem:[%s20017_s1 + $0x1520] sm:$0xff]  ;;  %v707_v46 = vld [vmem:[%s20017_s1 + $0x1508] sm:$0xff] }
 0x138   :  { %v711_v47 = vld [vmem:[%s20017_s1 + $0x1528] sm:$0xff]  ;;  %v13314_v50 = vcombine.high %v706_v43, %v710_v44  ;;  %v13313_v60 = vcombine.low %v706_v43, %v710_v44 }
 0x139   :  { %v13316_v51 = vcombine.high %v707_v46, %v711_v47  ;;  %v13315_v61 = vcombine.low %v707_v46, %v711_v47 }
 0x13a   :  { %9955 = vmatpush1.bf16.msra.mxu0 %v13257_v52  ;;  %10488 = vmatpush1.bf16.msra.mxu1 %v13259_v54  ;;  %v714_v52 = vld [vmem:[%s20017_s1 + $0x1540] sm:$0xff] }
 0x13b   :  { %9956 = vmatprep.subr.bf16.mxu0 %v13266_v56  ;;  %10489 = vmatprep.subr.bf16.mxu1 %v13268_v58  ;;  %v718_v54 = vld [vmem:[%s20017_s1 + $0x1560] sm:$0xff]  ;;  %v715_v56 = vld [vmem:[%s20017_s1 + $0x1548] sm:$0xff] }
 0x13c   :  { %v719_v58 = vld [vmem:[%s20017_s1 + $0x1568] sm:$0xff]  ;;  %v13322_v39 = vcombine.high %v714_v52, %v718_v54  ;;  %v13321_v4 = vcombine.low %v714_v52, %v718_v54 }
 0x13d   :  { %v13324_v62 = vcombine.high %v715_v56, %v719_v58  ;;  %v13323_v5 = vcombine.low %v715_v56, %v719_v58 }
 0x13e   :  { %9957 = vmatpush1.bf16.msra.mxu0 %v13265_v63  ;;  %10490 = vmatpush1.bf16.msra.mxu1 %v13267_v0  ;;  %v722_v63 = vld [vmem:[%s20017_s1 + $0x1580] sm:$0xff] }
 0x13f   :  { %9958 = vmatprep.subr.bf16.mxu0 %v13274_v2  ;;  %10491 = vmatprep.subr.bf16.mxu1 %v13276_v3  ;;  %v726_v0 = vld [vmem:[%s20017_s1 + $0x15a0] sm:$0xff]  ;;  %v723_v2 = vld [vmem:[%s20017_s1 + $0x1588] sm:$0xff] }
 0x140   :  { %v727_v3 = vld [vmem:[%s20017_s1 + $0x15a8] sm:$0xff]  ;;  %v13330_v6 = vcombine.high %v722_v63, %v726_v0  ;;  %v13329_v13 = vcombine.low %v722_v63, %v726_v0 }
 0x141   :  { %v13332_v7 = vcombine.high %v723_v2, %v727_v3  ;;  %v13331_v14 = vcombine.low %v723_v2, %v727_v3 }
 0x142   :  { %9959 = vmatpush1.bf16.msra.mxu0 %v13273_v8  ;;  %10492 = vmatpush1.bf16.msra.mxu1 %v13275_v9  ;;  %v730_v8 = vld [vmem:[%s20017_s1 + $0x15c0] sm:$0xff] }
 0x143   :  { %9969 = vmatprep.subr.bf16.mxu0 %v13282_v10  ;;  %10502 = vmatprep.subr.bf16.mxu1 %v13284_v11  ;;  %v734_v9 = vld [vmem:[%s20017_s1 + $0x15e0] sm:$0xff]  ;;  %v731_v10 = vld [vmem:[%s20017_s1 + $0x15c8] sm:$0xff] }
 0x144   :  { %v735_v11 = vld [vmem:[%s20017_s1 + $0x15e8] sm:$0xff]  ;;  %v13338_v17 = vcombine.high %v730_v8, %v734_v9  ;;  %v13337_v24 = vcombine.low %v730_v8, %v734_v9 }
 0x145   :  { %9961 = vmatmul.mubr.bf16.vlgmr.msra.gmra.mrb[0].mxu0 %v15779_v16  ;;  %10494 = vmatmul.mubr.bf16.vlgmr.msra.gmra.mrb[0].mxu1 %v15779_v16  ;;  %v13340_v53 = vcombine.high %v731_v10, %v735_v11  ;;  %v13339_v26 = vcombine.low %v731_v10, %v735_v11 }
 0x146   :  { %9970 = vmatpush1.bf16.msra.mxu0 %v13281_v19  ;;  %10503 = vmatpush1.bf16.msra.mxu1 %v13283_v20  ;;  %v738_v19 = vld [vmem:[%s20017_s1 + $0x1600] sm:$0xff] }
 0x147   :  { %9971 = vmatprep.subr.bf16.mxu0 %v13290_v59  ;;  %10504 = vmatprep.subr.bf16.mxu1 %v13292_v23  ;;  %v742_v20 = vld [vmem:[%s20017_s1 + $0x1620] sm:$0xff]  ;;  %v739_v59 = vld [vmem:[%s20017_s1 + $0x1608] sm:$0xff] }
 0x148   :  { %10001 = vmatprep.mubr.bf16.mxu0 %v15800_v27  ;;  %10534 = vmatprep.mubr.bf16.mxu1 %v15800_v27  ;;  %v743_v23 = vld [vmem:[%s20017_s1 + $0x1628] sm:$0xff]  ;;  %v13346_v15 = vcombine.high %v738_v19, %v742_v20  ;;  %v13345_v34 = vcombine.low %v738_v19, %v742_v20 }
 0x149   :  { %v13348_v28 = vcombine.high %v739_v59, %v743_v23  ;;  %v13347_v35 = vcombine.low %v739_v59, %v743_v23 }
 0x14a   :  { %9972 = vmatpush1.bf16.msra.mxu0 %v13289_v29  ;;  %10505 = vmatpush1.bf16.msra.mxu1 %v13291_v30  ;;  %v746_v29 = vld [vmem:[%s20017_s1 + $0x1640] sm:$0xff] }
 0x14b   :  { %9973 = vmatprep.subr.bf16.mxu0 %v13298_v32  ;;  %10506 = vmatprep.subr.bf16.mxu1 %v13300_v33  ;;  %v750_v30 = vld [vmem:[%s20017_s1 + $0x1660] sm:$0xff]  ;;  %v747_v32 = vld [vmem:[%s20017_s1 + $0x1648] sm:$0xff] }
 0x14c   :  { %v751_v33 = vld [vmem:[%s20017_s1 + $0x1668] sm:$0xff]  ;;  %v13354_v37 = vcombine.high %v746_v29, %v750_v30  ;;  %v13353_v43 = vcombine.low %v746_v29, %v750_v30 }
 0x14d   :  { %v13356_v38 = vcombine.high %v747_v32, %v751_v33  ;;  %v13355_v44 = vcombine.low %v747_v32, %v751_v33 }
 0x14e   :  { %9974 = vmatpush1.bf16.msra.mxu0 %v13297_v40  ;;  %10507 = vmatpush1.bf16.msra.mxu1 %v13299_v41  ;;  %v754_v40 = vld [vmem:[%s20017_s1 + $0x1680] sm:$0xff] }
 0x14f   :  { %9975 = vmatprep.subr.bf16.mxu0 %v13306_v25  ;;  %10508 = vmatprep.subr.bf16.mxu1 %v13308_v42  ;;  %v758_v41 = vld [vmem:[%s20017_s1 + $0x16a0] sm:$0xff]  ;;  %v755_v25 = vld [vmem:[%s20017_s1 + $0x1688] sm:$0xff] }
 0x150   :  { %v759_v42 = vld [vmem:[%s20017_s1 + $0x16a8] sm:$0xff]  ;;  %v13362_v46 = vcombine.high %v754_v40, %v758_v41  ;;  %v13361_v52 = vcombine.low %v754_v40, %v758_v41 }
 0x151   :  { %v13364_v47 = vcombine.high %v755_v25, %v759_v42  ;;  %v13363_v54 = vcombine.low %v755_v25, %v759_v42 }
 0x152   :  { %9976 = vmatpush1.bf16.msra.mxu0 %v13305_v48  ;;  %10509 = vmatpush1.bf16.msra.mxu1 %v13307_v49  ;;  %v762_v48 = vld [vmem:[%s20017_s1 + $0x16c0] sm:$0xff] }
 0x153   :  { %9977 = vmatprep.subr.bf16.mxu0 %v13314_v50  ;;  %10510 = vmatprep.subr.bf16.mxu1 %v13316_v51  ;;  %v766_v49 = vld [vmem:[%s20017_s1 + $0x16e0] sm:$0xff]  ;;  %v763_v50 = vld [vmem:[%s20017_s1 + $0x16c8] sm:$0xff] }
 0x154   :  { %v767_v51 = vld [vmem:[%s20017_s1 + $0x16e8] sm:$0xff]  ;;  %v13370_v56 = vcombine.high %v762_v48, %v766_v49  ;;  %v13369_v63 = vcombine.low %v762_v48, %v766_v49  ;;  %v15999_v49 = vld [vmem:[%s20018_s0 + $0x30] sm:$0xff] }
 0x155   :  { %v13372_v58 = vcombine.high %v763_v50, %v767_v51  ;;  %v13371_v0 = vcombine.low %v763_v50, %v767_v51  ;;  %v815_v48 = vld [vmem:[%s20017_s1 + $0x1868] sm:$0xff] }
 0x156   :  { %9978 = vmatpush1.bf16.msra.mxu0 %v13313_v60  ;;  %10511 = vmatpush1.bf16.msra.mxu1 %v13315_v61  ;;  %v770_v60 = vld [vmem:[%s20017_s1 + $0x1700] sm:$0xff] }
 0x157   :  { %9979 = vmatprep.subr.bf16.mxu0 %v13322_v39  ;;  %10512 = vmatprep.subr.bf16.mxu1 %v13324_v62  ;;  %v774_v61 = vld [vmem:[%s20017_s1 + $0x1720] sm:$0xff]  ;;  %v771_v39 = vld [vmem:[%s20017_s1 + $0x1708] sm:$0xff] }
 0x158   :  { %v775_v62 = vld [vmem:[%s20017_s1 + $0x1728] sm:$0xff]  ;;  %v13378_v2 = vcombine.high %v770_v60, %v774_v61  ;;  %v13377_v8 = vcombine.low %v770_v60, %v774_v61 }
 0x159   :  { %v13380_v3 = vcombine.high %v771_v39, %v775_v62  ;;  %v13379_v9 = vcombine.low %v771_v39, %v775_v62  ;;  %v819_v60 = vld [vmem:[%s20017_s1 + $0x1888] sm:$0xff] }
 0x15a   :  { %9980 = vmatpush1.bf16.msra.mxu0 %v13321_v4  ;;  %10513 = vmatpush1.bf16.msra.mxu1 %v13323_v5  ;;  %v778_v4 = vld [vmem:[%s20017_s1 + $0x1740] sm:$0xff]  ;;  %v823_v61 = vld [vmem:[%s20017_s1 + $0x18a8] sm:$0xff] }
 0x15b   :  { %9981 = vmatprep.subr.bf16.mxu0 %v13330_v6  ;;  %10514 = vmatprep.subr.bf16.mxu1 %v13332_v7  ;;  %v782_v5 = vld [vmem:[%s20017_s1 + $0x1760] sm:$0xff]  ;;  %v779_v6 = vld [vmem:[%s20017_s1 + $0x1748] sm:$0xff] }
 0x15c   :  { %v783_v7 = vld [vmem:[%s20017_s1 + $0x1768] sm:$0xff]  ;;  %v13386_v10 = vcombine.high %v778_v4, %v782_v5  ;;  %v13385_v19 = vcombine.low %v778_v4, %v782_v5 }
 0x15d   :  { %v13388_v11 = vcombine.high %v779_v6, %v783_v7  ;;  %v13387_v20 = vcombine.low %v779_v6, %v783_v7  ;;  %v827_v4 = vld [vmem:[%s20017_s1 + $0x18c8] sm:$0xff]  ;;  %v13427_v7 = vcombine.low %v819_v60, %v823_v61 }
 0x15e   :  { %9982 = vmatpush1.bf16.msra.mxu0 %v13329_v13  ;;  %10515 = vmatpush1.bf16.msra.mxu1 %v13331_v14  ;;  %v786_v13 = vld [vmem:[%s20017_s1 + $0x1780] sm:$0xff]  ;;  %v831_v5 = vld [vmem:[%s20017_s1 + $0x18e8] sm:$0xff] }
 0x15f   :  { %9983 = vmatprep.subr.bf16.mxu0 %v13338_v17  ;;  %10516 = vmatprep.subr.bf16.mxu1 %v13340_v53  ;;  %v790_v14 = vld [vmem:[%s20017_s1 + $0x17a0] sm:$0xff]  ;;  %v787_v17 = vld [vmem:[%s20017_s1 + $0x1788] sm:$0xff] }
 0x160   :  { %v791_v53 = vld [vmem:[%s20017_s1 + $0x17a8] sm:$0xff]  ;;  %v13394_v59 = vcombine.high %v786_v13, %v790_v14  ;;  %v13393_v29 = vcombine.low %v786_v13, %v790_v14 }
 0x161   :  { %v13396_v23 = vcombine.high %v787_v17, %v791_v53  ;;  %v13395_v30 = vcombine.low %v787_v17, %v791_v53  ;;  %v835_v13 = vld [vmem:[%s20017_s1 + $0x1908] sm:$0xff]  ;;  %v13435_v53 = vcombine.low %v827_v4, %v831_v5 }
 0x162   :  { %9984 = vmatpush1.bf16.msra.mxu0 %v13337_v24  ;;  %10517 = vmatpush1.bf16.msra.mxu1 %v13339_v26  ;;  %v794_v24 = vld [vmem:[%s20017_s1 + $0x17c0] sm:$0xff]  ;;  %v839_v14 = vld [vmem:[%s20017_s1 + $0x1928] sm:$0xff] }
 0x163   :  { %9985 = vmatprep.subr.bf16.mxu0 %v13346_v15  ;;  %10518 = vmatprep.subr.bf16.mxu1 %v13348_v28  ;;  %v798_v26 = vld [vmem:[%s20017_s1 + $0x17e0] sm:$0xff]  ;;  %v795_v15 = vld [vmem:[%s20017_s1 + $0x17c8] sm:$0xff] }
 0x164   :  { %v799_v28 = vld [vmem:[%s20017_s1 + $0x17e8] sm:$0xff]  ;;  %v13402_v32 = vcombine.high %v794_v24, %v798_v26  ;;  %v13401_v40 = vcombine.low %v794_v24, %v798_v26 }
 0x165   :  { %v13404_v33 = vcombine.high %v795_v15, %v799_v28  ;;  %v13403_v41 = vcombine.low %v795_v15, %v799_v28  ;;  %v843_v24 = vld [vmem:[%s20017_s1 + $0x1948] sm:$0xff]  ;;  %v13443_v28 = vcombine.low %v835_v13, %v839_v14 }
 0x166   :  { %9986 = vmatpush1.bf16.msra.mxu0 %v13345_v34  ;;  %10519 = vmatpush1.bf16.msra.mxu1 %v13347_v35  ;;  %v802_v34 = vld [vmem:[%s20017_s1 + $0x1800] sm:$0xff]  ;;  %v847_v26 = vld [vmem:[%s20017_s1 + $0x1968] sm:$0xff] }
 0x167   :  { %9987 = vmatprep.subr.bf16.mxu0 %v13354_v37  ;;  %10520 = vmatprep.subr.bf16.mxu1 %v13356_v38  ;;  %v806_v35 = vld [vmem:[%s20017_s1 + $0x1820] sm:$0xff]  ;;  %v803_v37 = vld [vmem:[%s20017_s1 + $0x1808] sm:$0xff] }
 0x168   :  { %v807_v38 = vld [vmem:[%s20017_s1 + $0x1828] sm:$0xff]  ;;  %v13410_v25 = vcombine.high %v802_v34, %v806_v35  ;;  %v13409_v50 = vcombine.low %v802_v34, %v806_v35 }
 0x169   :  { %v13412_v42 = vcombine.high %v803_v37, %v807_v38  ;;  %v13411_v51 = vcombine.low %v803_v37, %v807_v38  ;;  %v851_v34 = vld [vmem:[%s20017_s1 + $0x1988] sm:$0xff]  ;;  %v13451_v38 = vcombine.low %v843_v24, %v847_v26 }
 0x16a   :  { %9988 = vmatpush1.bf16.msra.mxu0 %v13353_v43  ;;  %10521 = vmatpush1.bf16.msra.mxu1 %v13355_v44  ;;  %v810_v43 = vld [vmem:[%s20017_s1 + $0x1840] sm:$0xff]  ;;  %v855_v35 = vld [vmem:[%s20017_s1 + $0x19a8] sm:$0xff] }
 0x16b   :  { %9989 = vmatprep.subr.bf16.mxu0 %v13362_v46  ;;  %10522 = vmatprep.subr.bf16.mxu1 %v13364_v47  ;;  %v814_v44 = vld [vmem:[%s20017_s1 + $0x1860] sm:$0xff]  ;;  %v15988_v46 = vcombine.low %v15790_v18, %v15790_v18  ;;  %v811_v47 = vld [vmem:[%s20017_s1 + $0x1848] sm:$0xff] }
 0x16c   :  { %v13418_v18 = vcombine.high %v810_v43, %v814_v44  ;;  %v13417_v39 = vcombine.low %v810_v43, %v814_v44  ;;  %v13419_v62 = vcombine.low %v811_v47, %v815_v48  ;;  %v859_v43 = vld [vmem:[%s20017_s1 + $0x19c8] sm:$0xff] }
 0x16d   :  { %v863_v44 = vld [vmem:[%s20017_s1 + $0x19e8] sm:$0xff] }
 0x16e   :  { %9990 = vmatpush1.bf16.msra.mxu0 %v13361_v52  ;;  %10523 = vmatpush1.bf16.msra.mxu1 %v13363_v54  ;;  %v13420_v52 = vcombine.high %v811_v47, %v815_v48  ;;  %v818_v54 = vld [vmem:[%s20017_s1 + $0x1880] sm:$0xff]  ;;  %v13459_v48 = vcombine.low %v851_v34, %v855_v35 }
 0x16f   :  { %9991 = vmatprep.subr.bf16.mxu0 %v13370_v56  ;;  %10524 = vmatprep.subr.bf16.mxu1 %v13372_v58  ;;  %v822_v56 = vld [vmem:[%s20017_s1 + $0x18a0] sm:$0xff]  ;;  %v16009_v58 = vcombine.high %v15999_v49, %v15999_v49 }
 0x170   :  { %v13425_v6 = vcombine.low %v818_v54, %v822_v56 }
 0x172   :  { %9992 = vmatpush1.bf16.msra.mxu0 %v13369_v63  ;;  %10525 = vmatpush1.bf16.msra.mxu1 %v13371_v0  ;;  %v13426_v63 = vcombine.high %v818_v54, %v822_v56  ;;  %v13428_v0 = vcombine.high %v819_v60, %v823_v61  ;;  %v867_v54 = vld [vmem:[%s20017_s1 + $0x1a08] sm:$0xff]  ;;  %v13467_v61 = vcombine.low %v859_v43, %v863_v44 }
 0x173   :  { %9993 = vmatprep.subr.bf16.mxu0 %v13378_v2  ;;  %10526 = vmatprep.subr.bf16.mxu1 %v13380_v3  ;;  %v826_v2 = vld [vmem:[%s20017_s1 + $0x18c0] sm:$0xff]  ;;  %v871_v56 = vld [vmem:[%s20017_s1 + $0x1a28] sm:$0xff] }
 0x174   :  { %v830_v3 = vld [vmem:[%s20017_s1 + $0x18e0] sm:$0xff] }
 0x175   :  { %v13433_v17 = vcombine.low %v826_v2, %v830_v3 }
 0x176   :  { %9994 = vmatpush1.bf16.msra.mxu0 %v13377_v8  ;;  %10527 = vmatpush1.bf16.msra.mxu1 %v13379_v9  ;;  %v13434_v8 = vcombine.high %v826_v2, %v830_v3  ;;  %v13436_v9 = vcombine.high %v827_v4, %v831_v5  ;;  %v875_v2 = vld [vmem:[%s20017_s1 + $0x1a48] sm:$0xff]  ;;  %v13475_v5 = vcombine.low %v867_v54, %v871_v56 }
 0x177   :  { %9995 = vmatprep.subr.bf16.mxu0 %v13386_v10  ;;  %10528 = vmatprep.subr.bf16.mxu1 %v13388_v11  ;;  %v834_v10 = vld [vmem:[%s20017_s1 + $0x1900] sm:$0xff]  ;;  %v879_v3 = vld [vmem:[%s20017_s1 + $0x1a68] sm:$0xff] }
 0x178   :  { %v838_v11 = vld [vmem:[%s20017_s1 + $0x1920] sm:$0xff] }
 0x179   :  { %v13441_v15 = vcombine.low %v834_v10, %v838_v11 }
 0x17a   :  { %9996 = vmatpush1.bf16.msra.mxu0 %v13385_v19  ;;  %10529 = vmatpush1.bf16.msra.mxu1 %v13387_v20  ;;  %v13442_v19 = vcombine.high %v834_v10, %v838_v11  ;;  %v13444_v20 = vcombine.high %v835_v13, %v839_v14  ;;  %v883_v10 = vld [vmem:[%s20017_s1 + $0x1a88] sm:$0xff]  ;;  %v13483_v14 = vcombine.low %v875_v2, %v879_v3 }
 0x17b   :  { %9997 = vmatprep.subr.bf16.mxu0 %v13394_v59  ;;  %10530 = vmatprep.subr.bf16.mxu1 %v13396_v23  ;;  %v842_v59 = vld [vmem:[%s20017_s1 + $0x1940] sm:$0xff]  ;;  %v887_v11 = vld [vmem:[%s20017_s1 + $0x1aa8] sm:$0xff] }
 0x17c   :  { %v846_v23 = vld [vmem:[%s20017_s1 + $0x1960] sm:$0xff] }
 0x17d   :  { %v13449_v37 = vcombine.low %v842_v59, %v846_v23 }
 0x17e   :  { %9998 = vmatpush1.bf16.msra.mxu0 %v13393_v29  ;;  %10531 = vmatpush1.bf16.msra.mxu1 %v13395_v30  ;;  %v13450_v29 = vcombine.high %v842_v59, %v846_v23  ;;  %v13452_v30 = vcombine.high %v843_v24, %v847_v26  ;;  %v891_v59 = vld [vmem:[%s20017_s1 + $0x1ac8] sm:$0xff]  ;;  %v13491_v26 = vcombine.low %v883_v10, %v887_v11 }
 0x17f   :  { %9999 = vmatprep.subr.bf16.mxu0 %v13402_v32  ;;  %10532 = vmatprep.subr.bf16.mxu1 %v13404_v33  ;;  %v850_v32 = vld [vmem:[%s20017_s1 + $0x1980] sm:$0xff]  ;;  %v895_v23 = vld [vmem:[%s20017_s1 + $0x1ae8] sm:$0xff] }
 0x180   :  { %v854_v33 = vld [vmem:[%s20017_s1 + $0x19a0] sm:$0xff] }
 0x181   :  { %v13457_v47 = vcombine.low %v850_v32, %v854_v33 }
 0x182   :  { %10000 = vmatpush1.bf16.msra.mxu0 %v13401_v40  ;;  %10533 = vmatpush1.bf16.msra.mxu1 %v13403_v41  ;;  %v13458_v40 = vcombine.high %v850_v32, %v854_v33  ;;  %v13460_v41 = vcombine.high %v851_v34, %v855_v35  ;;  %v899_v32 = vld [vmem:[%s20017_s1 + $0x1b08] sm:$0xff]  ;;  %v13499_v35 = vcombine.low %v891_v59, %v895_v23 }
 0x183   :  { %10010 = vmatprep.subr.bf16.mxu0 %v13410_v25  ;;  %10543 = vmatprep.subr.bf16.mxu1 %v13412_v42  ;;  %v858_v25 = vld [vmem:[%s20017_s1 + $0x19c0] sm:$0xff]  ;;  %v903_v33 = vld [vmem:[%s20017_s1 + $0x1b28] sm:$0xff] }
 0x184   :  { %v862_v42 = vld [vmem:[%s20017_s1 + $0x19e0] sm:$0xff] }
 0x185   :  { %10002 = vmatmul.mubr.bf16.vlgmr.msra.gmra.mrb[0].mxu0 %v15988_v46  ;;  %10535 = vmatmul.mubr.bf16.vlgmr.msra.gmra.mrb[0].mxu1 %v15988_v46  ;;  %v13465_v60 = vcombine.low %v858_v25, %v862_v42 }
 0x186   :  { %10011 = vmatpush1.bf16.msra.mxu0 %v13409_v50  ;;  %10544 = vmatpush1.bf16.msra.mxu1 %v13411_v51  ;;  %v13466_v50 = vcombine.high %v858_v25, %v862_v42  ;;  %v13468_v51 = vcombine.high %v859_v43, %v863_v44  ;;  %v907_v25 = vld [vmem:[%s20017_s1 + $0x1b48] sm:$0xff]  ;;  %v13507_v44 = vcombine.low %v899_v32, %v903_v33 }
 0x187   :  { %10012 = vmatprep.subr.bf16.mxu0 %v13418_v18  ;;  %10545 = vmatprep.subr.bf16.mxu1 %v13420_v52  ;;  %v866_v18 = vld [vmem:[%s20017_s1 + $0x1a00] sm:$0xff]  ;;  %v911_v42 = vld [vmem:[%s20017_s1 + $0x1b68] sm:$0xff] }
 0x188   :  { %10042 = vmatprep.mubr.bf16.mxu0 %v16009_v58  ;;  %10575 = vmatprep.mubr.bf16.mxu1 %v16009_v58  ;;  %v870_v52 = vld [vmem:[%s20017_s1 + $0x1a20] sm:$0xff] }
 0x189   :  { %v13473_v4 = vcombine.low %v866_v18, %v870_v52 }
 0x18a   :  { %10013 = vmatpush1.bf16.msra.mxu0 %v13417_v39  ;;  %10546 = vmatpush1.bf16.msra.mxu1 %v13419_v62  ;;  %v13474_v39 = vcombine.high %v866_v18, %v870_v52  ;;  %v13476_v62 = vcombine.high %v867_v54, %v871_v56  ;;  %v915_v18 = vld [vmem:[%s20017_s1 + $0x1b88] sm:$0xff]  ;;  %v13515_v56 = vcombine.low %v907_v25, %v911_v42 }
 0x18b   :  { %10014 = vmatprep.subr.bf16.mxu0 %v13426_v63  ;;  %10547 = vmatprep.subr.bf16.mxu1 %v13428_v0  ;;  %v874_v63 = vld [vmem:[%s20017_s1 + $0x1a40] sm:$0xff]  ;;  %v919_v52 = vld [vmem:[%s20017_s1 + $0x1ba8] sm:$0xff] }
 0x18c   :  { %v878_v0 = vld [vmem:[%s20017_s1 + $0x1a60] sm:$0xff] }
 0x18d   :  { %v13481_v13 = vcombine.low %v874_v63, %v878_v0 }
 0x18e   :  { %10015 = vmatpush1.bf16.msra.mxu0 %v13425_v6  ;;  %10548 = vmatpush1.bf16.msra.mxu1 %v13427_v7  ;;  %v13482_v6 = vcombine.high %v874_v63, %v878_v0  ;;  %v13484_v7 = vcombine.high %v875_v2, %v879_v3  ;;  %v923_v63 = vld [vmem:[%s20017_s1 + $0x1bc8] sm:$0xff]  ;;  %v13523_v3 = vcombine.low %v915_v18, %v919_v52 }
 0x18f   :  { %10016 = vmatprep.subr.bf16.mxu0 %v13434_v8  ;;  %10549 = vmatprep.subr.bf16.mxu1 %v13436_v9  ;;  %v882_v8 = vld [vmem:[%s20017_s1 + $0x1a80] sm:$0xff]  ;;  %v927_v0 = vld [vmem:[%s20017_s1 + $0x1be8] sm:$0xff] }
 0x190   :  { %v886_v9 = vld [vmem:[%s20017_s1 + $0x1aa0] sm:$0xff] }
 0x191   :  { %v13489_v24 = vcombine.low %v882_v8, %v886_v9 }
 0x192   :  { %10017 = vmatpush1.bf16.msra.mxu0 %v13433_v17  ;;  %10550 = vmatpush1.bf16.msra.mxu1 %v13435_v53  ;;  %v13490_v17 = vcombine.high %v882_v8, %v886_v9  ;;  %v13492_v53 = vcombine.high %v883_v10, %v887_v11  ;;  %v931_v8 = vld [vmem:[%s20017_s1 + $0x1c08] sm:$0xff]  ;;  %v13531_v11 = vcombine.low %v923_v63, %v927_v0 }
 0x193   :  { %10018 = vmatprep.subr.bf16.mxu0 %v13442_v19  ;;  %10551 = vmatprep.subr.bf16.mxu1 %v13444_v20  ;;  %v890_v19 = vld [vmem:[%s20017_s1 + $0x1ac0] sm:$0xff]  ;;  %v935_v9 = vld [vmem:[%s20017_s1 + $0x1c28] sm:$0xff] }
 0x194   :  { %v894_v20 = vld [vmem:[%s20017_s1 + $0x1ae0] sm:$0xff] }
 0x195   :  { %v13497_v34 = vcombine.low %v890_v19, %v894_v20 }
 0x196   :  { %10019 = vmatpush1.bf16.msra.mxu0 %v13441_v15  ;;  %10552 = vmatpush1.bf16.msra.mxu1 %v13443_v28  ;;  %v13498_v15 = vcombine.high %v890_v19, %v894_v20  ;;  %v13500_v28 = vcombine.high %v891_v59, %v895_v23  ;;  %v16197_v19 = vcombine.low %v15999_v49, %v15999_v49  ;;  %v939_v20 = vld [vmem:[%s20017_s1 + $0x1c48] sm:$0xff]  ;;  %v16208_v23 = vld [vmem:[%s20018_s0 + $0x38] sm:$0xff] }
 0x197   :  { %10020 = vmatprep.subr.bf16.mxu0 %v13450_v29  ;;  %10553 = vmatprep.subr.bf16.mxu1 %v13452_v30  ;;  %v898_v29 = vld [vmem:[%s20017_s1 + $0x1b00] sm:$0xff]  ;;  %v943_v59 = vld [vmem:[%s20017_s1 + $0x1c68] sm:$0xff] }
 0x198   :  { %v902_v30 = vld [vmem:[%s20017_s1 + $0x1b20] sm:$0xff] }
 0x199   :  { %v13505_v43 = vcombine.low %v898_v29, %v902_v30 }
 0x19a   :  { %10021 = vmatpush1.bf16.msra.mxu0 %v13449_v37  ;;  %10554 = vmatpush1.bf16.msra.mxu1 %v13451_v38  ;;  %v13506_v37 = vcombine.high %v898_v29, %v902_v30  ;;  %v13508_v38 = vcombine.high %v899_v32, %v903_v33  ;;  %v950_v29 = vld [vmem:[%s20017_s1 + $0x1ca0] sm:$0xff]  ;;  %v16218_v30 = vcombine.high %v16208_v23, %v16208_v23  ;;  %v947_v32 = vld [vmem:[%s20017_s1 + $0x1c88] sm:$0xff] }
 0x19b   :  { %10022 = vmatprep.subr.bf16.mxu0 %v13458_v40  ;;  %10555 = vmatprep.subr.bf16.mxu1 %v13460_v41  ;;  %v906_v40 = vld [vmem:[%s20017_s1 + $0x1b40] sm:$0xff]  ;;  %v951_v33 = vld [vmem:[%s20017_s1 + $0x1ca8] sm:$0xff] }
 0x19c   :  { %v910_v41 = vld [vmem:[%s20017_s1 + $0x1b60] sm:$0xff] }
 0x19d   :  { %v13513_v54 = vcombine.low %v906_v40, %v910_v41 }
 0x19e   :  { %10023 = vmatpush1.bf16.msra.mxu0 %v13457_v47  ;;  %10556 = vmatpush1.bf16.msra.mxu1 %v13459_v48  ;;  %v13514_v47 = vcombine.high %v906_v40, %v910_v41  ;;  %v13516_v48 = vcombine.high %v907_v25, %v911_v42  ;;  %v954_v40 = vld [vmem:[%s20017_s1 + $0x1cc0] sm:$0xff]  ;;  %v955_v25 = vld [vmem:[%s20017_s1 + $0x1cc8] sm:$0xff] }
 0x19f   :  { %10024 = vmatprep.subr.bf16.mxu0 %v13466_v50  ;;  %10557 = vmatprep.subr.bf16.mxu1 %v13468_v51  ;;  %v914_v50 = vld [vmem:[%s20017_s1 + $0x1b80] sm:$0xff]  ;;  %v959_v42 = vld [vmem:[%s20017_s1 + $0x1ce8] sm:$0xff] }
 0x1a0   :  { %v918_v51 = vld [vmem:[%s20017_s1 + $0x1ba0] sm:$0xff] }
 0x1a1   :  { %v13521_v2 = vcombine.low %v914_v50, %v918_v51  ;;  %v958_v41 = vld [vmem:[%s20017_s1 + $0x1ce0] sm:$0xff] }
 0x1a2   :  { %10025 = vmatpush1.bf16.msra.mxu0 %v13465_v60  ;;  %10558 = vmatpush1.bf16.msra.mxu1 %v13467_v61  ;;  %v13522_v60 = vcombine.high %v914_v50, %v918_v51  ;;  %v13524_v61 = vcombine.high %v915_v18, %v919_v52  ;;  %v962_v50 = vld [vmem:[%s20017_s1 + $0x1d00] sm:$0xff]  ;;  %v963_v18 = vld [vmem:[%s20017_s1 + $0x1d08] sm:$0xff] }
 0x1a3   :  { %10026 = vmatprep.subr.bf16.mxu0 %v13474_v39  ;;  %10559 = vmatprep.subr.bf16.mxu1 %v13476_v62  ;;  %v922_v39 = vld [vmem:[%s20017_s1 + $0x1bc0] sm:$0xff]  ;;  %v967_v52 = vld [vmem:[%s20017_s1 + $0x1d28] sm:$0xff] }
 0x1a4   :  { %v926_v62 = vld [vmem:[%s20017_s1 + $0x1be0] sm:$0xff] }
 0x1a5   :  { %v13529_v10 = vcombine.low %v922_v39, %v926_v62  ;;  %v966_v51 = vld [vmem:[%s20017_s1 + $0x1d20] sm:$0xff] }
 0x1a6   :  { %10027 = vmatpush1.bf16.msra.mxu0 %v13473_v4  ;;  %10560 = vmatpush1.bf16.msra.mxu1 %v13475_v5  ;;  %v13530_v4 = vcombine.high %v922_v39, %v926_v62  ;;  %v13532_v5 = vcombine.high %v923_v63, %v927_v0  ;;  %v970_v39 = vld [vmem:[%s20017_s1 + $0x1d40] sm:$0xff]  ;;  %v971_v63 = vld [vmem:[%s20017_s1 + $0x1d48] sm:$0xff] }
 0x1a7   :  { %10028 = vmatprep.subr.bf16.mxu0 %v13482_v6  ;;  %10561 = vmatprep.subr.bf16.mxu1 %v13484_v7  ;;  %v930_v6 = vld [vmem:[%s20017_s1 + $0x1c00] sm:$0xff]  ;;  %v975_v0 = vld [vmem:[%s20017_s1 + $0x1d68] sm:$0xff] }
 0x1a8   :  { %v934_v7 = vld [vmem:[%s20017_s1 + $0x1c20] sm:$0xff] }
 0x1a9   :  { %v974_v62 = vld [vmem:[%s20017_s1 + $0x1d60] sm:$0xff] }
 0x1aa   :  { %10029 = vmatpush1.bf16.msra.mxu0 %v13481_v13  ;;  %10562 = vmatpush1.bf16.msra.mxu1 %v13483_v14  ;;  %v13538_v13 = vcombine.high %v930_v6, %v934_v7  ;;  %v13540_v14 = vcombine.high %v931_v8, %v935_v9 }
 0x1ab   :  { %10030 = vmatprep.subr.bf16.mxu0 %v13490_v17  ;;  %10563 = vmatprep.subr.bf16.mxu1 %v13492_v53  ;;  %v938_v17 = vld [vmem:[%s20017_s1 + $0x1c40] sm:$0xff] }
 0x1ac   :  { %v942_v53 = vld [vmem:[%s20017_s1 + $0x1c60] sm:$0xff] }
 0x1ad   :  { %v13546_v49 = vcombine.high %v938_v17, %v942_v53 }
 0x1ae   :  { %10031 = vmatpush1.bf16.msra.mxu0 %v13489_v24  ;;  %10564 = vmatpush1.bf16.msra.mxu1 %v13491_v26  ;;  %v13537_v24 = vcombine.low %v930_v6, %v934_v7  ;;  %v13539_v26 = vcombine.low %v931_v8, %v935_v9  ;;  %v978_v6 = vld [vmem:[%s20017_s1 + $0x1d80] sm:$0xff]  ;;  %v979_v8 = vld [vmem:[%s20017_s1 + $0x1d88] sm:$0xff] }
 0x1af   :  { %10032 = vmatprep.subr.bf16.mxu0 %v13498_v15  ;;  %10565 = vmatprep.subr.bf16.mxu1 %v13500_v28  ;;  %v13548_v15 = vcombine.high %v939_v20, %v943_v59  ;;  %v946_v28 = vld [vmem:[%s20017_s1 + $0x1c80] sm:$0xff]  ;;  %v983_v9 = vld [vmem:[%s20017_s1 + $0x1da8] sm:$0xff] }
 0x1b0   :  { %v982_v7 = vld [vmem:[%s20017_s1 + $0x1da0] sm:$0xff] }
 0x1b2   :  { %10033 = vmatpush1.bf16.msra.mxu0 %v13497_v34  ;;  %10566 = vmatpush1.bf16.msra.mxu1 %v13499_v35  ;;  %v13545_v34 = vcombine.low %v938_v17, %v942_v53  ;;  %v13547_v35 = vcombine.low %v939_v20, %v943_v59  ;;  %v986_v17 = vld [vmem:[%s20017_s1 + $0x1dc0] sm:$0xff]  ;;  %v987_v20 = vld [vmem:[%s20017_s1 + $0x1dc8] sm:$0xff] }
 0x1b3   :  { %10034 = vmatprep.subr.bf16.mxu0 %v13506_v37  ;;  %10567 = vmatprep.subr.bf16.mxu1 %v13508_v38  ;;  %v13554_v37 = vcombine.high %v946_v28, %v950_v29  ;;  %v13556_v38 = vcombine.high %v947_v32, %v951_v33  ;;  %v990_v53 = vld [vmem:[%s20017_s1 + $0x1de0] sm:$0xff]  ;;  %v991_v59 = vld [vmem:[%s20017_s1 + $0x1de8] sm:$0xff] }
 0x1b6   :  { %10035 = vmatpush1.bf16.msra.mxu0 %v13505_v43  ;;  %10568 = vmatpush1.bf16.msra.mxu1 %v13507_v44  ;;  %v13553_v43 = vcombine.low %v946_v28, %v950_v29  ;;  %v13555_v44 = vcombine.low %v947_v32, %v951_v33  ;;  %v994_v28 = vld [vmem:[%s20017_s1 + $0x1e00] sm:$0xff]  ;;  %v995_v32 = vld [vmem:[%s20017_s1 + $0x1e08] sm:$0xff] }
 0x1b7   :  { %10036 = vmatprep.subr.bf16.mxu0 %v13514_v47  ;;  %10569 = vmatprep.subr.bf16.mxu1 %v13516_v48  ;;  %v13562_v47 = vcombine.high %v954_v40, %v958_v41  ;;  %v13564_v48 = vcombine.high %v955_v25, %v959_v42  ;;  %v998_v29 = vld [vmem:[%s20017_s1 + $0x1e20] sm:$0xff]  ;;  %v999_v33 = vld [vmem:[%s20017_s1 + $0x1e28] sm:$0xff] }
 0x1ba   :  { %10037 = vmatpush1.bf16.msra.mxu0 %v13513_v54  ;;  %10570 = vmatpush1.bf16.msra.mxu1 %v13515_v56  ;;  %v13561_v54 = vcombine.low %v954_v40, %v958_v41  ;;  %v13563_v56 = vcombine.low %v955_v25, %v959_v42  ;;  %v1002_v40 = vld [vmem:[%s20017_s1 + $0x1e40] sm:$0xff]  ;;  %v1003_v25 = vld [vmem:[%s20017_s1 + $0x1e48] sm:$0xff] }
 0x1bb   :  { %10038 = vmatprep.subr.bf16.mxu0 %v13522_v60  ;;  %10571 = vmatprep.subr.bf16.mxu1 %v13524_v61  ;;  %v13570_v60 = vcombine.high %v962_v50, %v966_v51  ;;  %v13572_v61 = vcombine.high %v963_v18, %v967_v52  ;;  %v1006_v41 = vld [vmem:[%s20017_s1 + $0x1e60] sm:$0xff]  ;;  %v1007_v42 = vld [vmem:[%s20017_s1 + $0x1e68] sm:$0xff] }
 0x1be   :  { %10039 = vmatpush1.bf16.msra.mxu0 %v13521_v2  ;;  %10572 = vmatpush1.bf16.msra.mxu1 %v13523_v3  ;;  %v13569_v2 = vcombine.low %v962_v50, %v966_v51  ;;  %v13571_v3 = vcombine.low %v963_v18, %v967_v52  ;;  %v1010_v50 = vld [vmem:[%s20017_s1 + $0x1e80] sm:$0xff]  ;;  %v1011_v18 = vld [vmem:[%s20017_s1 + $0x1e88] sm:$0xff] }
 0x1bf   :  { %10040 = vmatprep.subr.bf16.mxu0 %v13530_v4  ;;  %10573 = vmatprep.subr.bf16.mxu1 %v13532_v5  ;;  %v13578_v4 = vcombine.high %v970_v39, %v974_v62  ;;  %v13580_v5 = vcombine.high %v971_v63, %v975_v0  ;;  %v1014_v51 = vld [vmem:[%s20017_s1 + $0x1ea0] sm:$0xff]  ;;  %v1015_v52 = vld [vmem:[%s20017_s1 + $0x1ea8] sm:$0xff] }
 0x1c2   :  { %10041 = vmatpush1.bf16.msra.mxu0 %v13529_v10  ;;  %10574 = vmatpush1.bf16.msra.mxu1 %v13531_v11  ;;  %v13577_v10 = vcombine.low %v970_v39, %v974_v62  ;;  %v13579_v11 = vcombine.low %v971_v63, %v975_v0  ;;  %v1018_v39 = vld [vmem:[%s20017_s1 + $0x1ec0] sm:$0xff]  ;;  %v1019_v63 = vld [vmem:[%s20017_s1 + $0x1ec8] sm:$0xff] }
 0x1c3   :  { %10051 = vmatprep.subr.bf16.mxu0 %v13538_v13  ;;  %10584 = vmatprep.subr.bf16.mxu1 %v13540_v14  ;;  %v13586_v13 = vcombine.high %v978_v6, %v982_v7  ;;  %v13588_v14 = vcombine.high %v979_v8, %v983_v9  ;;  %v1022_v62 = vld [vmem:[%s20017_s1 + $0x1ee0] sm:$0xff]  ;;  %v1023_v0 = vld [vmem:[%s20017_s1 + $0x1ee8] sm:$0xff] }
 0x1c5   :  { %10043 = vmatmul.mubr.bf16.vlgmr.msra.gmra.mrb[0].mxu0 %v16197_v19  ;;  %10576 = vmatmul.mubr.bf16.vlgmr.msra.gmra.mrb[0].mxu1 %v16197_v19 }
 0x1c6   :  { %10052 = vmatpush1.bf16.msra.mxu0 %v13537_v24  ;;  %10585 = vmatpush1.bf16.msra.mxu1 %v13539_v26  ;;  %v13585_v24 = vcombine.low %v978_v6, %v982_v7  ;;  %v13587_v26 = vcombine.low %v979_v8, %v983_v9  ;;  %v1026_v6 = vld [vmem:[%s20017_s1 + $0x1f00] sm:$0xff]  ;;  %v1027_v8 = vld [vmem:[%s20017_s1 + $0x1f08] sm:$0xff] }
 0x1c7   :  { %10053 = vmatprep.subr.bf16.mxu0 %v13546_v49  ;;  %10586 = vmatprep.subr.bf16.mxu1 %v13548_v15  ;;  %v13594_v49 = vcombine.high %v986_v17, %v990_v53  ;;  %v13596_v15 = vcombine.high %v987_v20, %v991_v59  ;;  %v1030_v7 = vld [vmem:[%s20017_s1 + $0x1f20] sm:$0xff]  ;;  %v1031_v9 = vld [vmem:[%s20017_s1 + $0x1f28] sm:$0xff] }
 0x1c8   :  { %10083 = vmatprep.mubr.bf16.mxu0 %v16218_v30  ;;  %10616 = vmatprep.mubr.bf16.mxu1 %v16218_v30 }
 0x1ca   :  { %10054 = vmatpush1.bf16.msra.mxu0 %v13545_v34  ;;  %10587 = vmatpush1.bf16.msra.mxu1 %v13547_v35  ;;  %v13593_v34 = vcombine.low %v986_v17, %v990_v53  ;;  %v13595_v35 = vcombine.low %v987_v20, %v991_v59  ;;  %v1034_v17 = vld [vmem:[%s20017_s1 + $0x1f40] sm:$0xff]  ;;  %v1035_v20 = vld [vmem:[%s20017_s1 + $0x1f48] sm:$0xff] }
 0x1cb   :  { %10055 = vmatprep.subr.bf16.mxu0 %v13554_v37  ;;  %10588 = vmatprep.subr.bf16.mxu1 %v13556_v38  ;;  %v13602_v37 = vcombine.high %v994_v28, %v998_v29  ;;  %v13604_v38 = vcombine.high %v995_v32, %v999_v33  ;;  %v1038_v53 = vld [vmem:[%s20017_s1 + $0x1f60] sm:$0xff]  ;;  %v1039_v59 = vld [vmem:[%s20017_s1 + $0x1f68] sm:$0xff] }
 0x1ce   :  { %10056 = vmatpush1.bf16.msra.mxu0 %v13553_v43  ;;  %10589 = vmatpush1.bf16.msra.mxu1 %v13555_v44  ;;  %v13601_v43 = vcombine.low %v994_v28, %v998_v29  ;;  %v13603_v44 = vcombine.low %v995_v32, %v999_v33  ;;  %v1042_v28 = vld [vmem:[%s20017_s1 + $0x1f80] sm:$0xff]  ;;  %v1043_v32 = vld [vmem:[%s20017_s1 + $0x1f88] sm:$0xff] }
 0x1cf   :  { %10057 = vmatprep.subr.bf16.mxu0 %v13562_v47  ;;  %10590 = vmatprep.subr.bf16.mxu1 %v13564_v48  ;;  %v13610_v47 = vcombine.high %v1002_v40, %v1006_v41  ;;  %v13612_v48 = vcombine.high %v1003_v25, %v1007_v42  ;;  %v1046_v29 = vld [vmem:[%s20017_s1 + $0x1fa0] sm:$0xff]  ;;  %v1047_v33 = vld [vmem:[%s20017_s1 + $0x1fa8] sm:$0xff] }
 0x1d2   :  { %10058 = vmatpush1.bf16.msra.mxu0 %v13561_v54  ;;  %10591 = vmatpush1.bf16.msra.mxu1 %v13563_v56  ;;  %v13609_v54 = vcombine.low %v1002_v40, %v1006_v41  ;;  %v13611_v56 = vcombine.low %v1003_v25, %v1007_v42  ;;  %v1050_v40 = vld [vmem:[%s20017_s1 + $0x1fc0] sm:$0xff]  ;;  %v1051_v25 = vld [vmem:[%s20017_s1 + $0x1fc8] sm:$0xff] }
 0x1d3   :  { %10059 = vmatprep.subr.bf16.mxu0 %v13570_v60  ;;  %10592 = vmatprep.subr.bf16.mxu1 %v13572_v61  ;;  %v13618_v60 = vcombine.high %v1010_v50, %v1014_v51  ;;  %v13620_v61 = vcombine.high %v1011_v18, %v1015_v52  ;;  %v1054_v41 = vld [vmem:[%s20017_s1 + $0x1fe0] sm:$0xff]  ;;  %v1055_v42 = vld [vmem:[%s20017_s1 + $0x1fe8] sm:$0xff] }
 0x1d6   :  { %10060 = vmatpush1.bf16.msra.mxu0 %v13569_v2  ;;  %10593 = vmatpush1.bf16.msra.mxu1 %v13571_v3  ;;  %v13617_v2 = vcombine.low %v1010_v50, %v1014_v51  ;;  %v13619_v3 = vcombine.low %v1011_v18, %v1015_v52  ;;  %v1058_v50 = vld [vmem:[%s20017_s1 + $0x2000] sm:$0xff]  ;;  %v1059_v18 = vld [vmem:[%s20017_s1 + $0x2008] sm:$0xff] }
 0x1d7   :  { %10061 = vmatprep.subr.bf16.mxu0 %v13578_v4  ;;  %10594 = vmatprep.subr.bf16.mxu1 %v13580_v5  ;;  %v13626_v4 = vcombine.high %v1018_v39, %v1022_v62  ;;  %v13628_v5 = vcombine.high %v1019_v63, %v1023_v0  ;;  %v1062_v51 = vld [vmem:[%s20017_s1 + $0x2020] sm:$0xff]  ;;  %v1063_v52 = vld [vmem:[%s20017_s1 + $0x2028] sm:$0xff] }
 0x1da   :  { %10062 = vmatpush1.bf16.msra.mxu0 %v13577_v10  ;;  %10595 = vmatpush1.bf16.msra.mxu1 %v13579_v11  ;;  %v13625_v10 = vcombine.low %v1018_v39, %v1022_v62  ;;  %v13627_v11 = vcombine.low %v1019_v63, %v1023_v0  ;;  %v1066_v39 = vld [vmem:[%s20017_s1 + $0x2040] sm:$0xff]  ;;  %v16406_v63 = vcombine.low %v16208_v23, %v16208_v23  ;;  %v1067_v0 = vld [vmem:[%s20017_s1 + $0x2048] sm:$0xff] }
 0x1db   :  { %10063 = vmatprep.subr.bf16.mxu0 %v13586_v13  ;;  %10596 = vmatprep.subr.bf16.mxu1 %v13588_v14  ;;  %v13634_v13 = vcombine.high %v1026_v6, %v1030_v7  ;;  %v13636_v14 = vcombine.high %v1027_v8, %v1031_v9  ;;  %v1070_v62 = vld [vmem:[%s20017_s1 + $0x2060] sm:$0xff] }
 0x1dc   :  { %v13674_v23 = vcombine.high %v1066_v39, %v1070_v62 }
 0x1de   :  { %10064 = vmatpush1.bf16.msra.mxu0 %v13585_v24  ;;  %10597 = vmatpush1.bf16.msra.mxu1 %v13587_v26  ;;  %v13633_v24 = vcombine.low %v1026_v6, %v1030_v7  ;;  %v13635_v26 = vcombine.low %v1027_v8, %v1031_v9  ;;  %v1074_v7 = vld [vmem:[%s20017_s1 + $0x2080] sm:$0xff] }
 0x1df   :  { %10065 = vmatprep.subr.bf16.mxu0 %v13594_v49  ;;  %10598 = vmatprep.subr.bf16.mxu1 %v13596_v15  ;;  %v13642_v49 = vcombine.high %v1034_v17, %v1038_v53  ;;  %v13644_v15 = vcombine.high %v1035_v20, %v1039_v59  ;;  %v1078_v8 = vld [vmem:[%s20017_s1 + $0x20a0] sm:$0xff] }
 0x1e2   :  { %10066 = vmatpush1.bf16.msra.mxu0 %v13593_v34  ;;  %10599 = vmatpush1.bf16.msra.mxu1 %v13595_v35  ;;  %v13641_v34 = vcombine.low %v1034_v17, %v1038_v53  ;;  %v13643_v35 = vcombine.low %v1035_v20, %v1039_v59  ;;  %v13682_v17 = vcombine.high %v1074_v7, %v1078_v8  ;;  %v1082_v20 = vld [vmem:[%s20017_s1 + $0x20c0] sm:$0xff] }
 0x1e3   :  { %10067 = vmatprep.subr.bf16.mxu0 %v13602_v37  ;;  %10600 = vmatprep.subr.bf16.mxu1 %v13604_v38  ;;  %v13650_v37 = vcombine.high %v1042_v28, %v1046_v29  ;;  %v13652_v38 = vcombine.high %v1043_v32, %v1047_v33  ;;  %v1086_v59 = vld [vmem:[%s20017_s1 + $0x20e0] sm:$0xff] }
 0x1e6   :  { %10068 = vmatpush1.bf16.msra.mxu0 %v13601_v43  ;;  %10601 = vmatpush1.bf16.msra.mxu1 %v13603_v44  ;;  %v13649_v43 = vcombine.low %v1042_v28, %v1046_v29  ;;  %v13651_v44 = vcombine.low %v1043_v32, %v1047_v33  ;;  %v13690_v28 = vcombine.high %v1082_v20, %v1086_v59  ;;  %v1090_v32 = vld [vmem:[%s20017_s1 + $0x2100] sm:$0xff] }
 0x1e7   :  { %10069 = vmatprep.subr.bf16.mxu0 %v13610_v47  ;;  %10602 = vmatprep.subr.bf16.mxu1 %v13612_v48  ;;  %v13658_v47 = vcombine.high %v1050_v40, %v1054_v41  ;;  %v13660_v48 = vcombine.high %v1051_v25, %v1055_v42  ;;  %v1094_v33 = vld [vmem:[%s20017_s1 + $0x2120] sm:$0xff] }
 0x1ea   :  { %10070 = vmatpush1.bf16.msra.mxu0 %v13609_v54  ;;  %10603 = vmatpush1.bf16.msra.mxu1 %v13611_v56  ;;  %v13657_v54 = vcombine.low %v1050_v40, %v1054_v41  ;;  %v13659_v56 = vcombine.low %v1051_v25, %v1055_v42  ;;  %v13698_v40 = vcombine.high %v1090_v32, %v1094_v33  ;;  %v1098_v25 = vld [vmem:[%s20017_s1 + $0x2140] sm:$0xff] }
 0x1eb   :  { %10071 = vmatprep.subr.bf16.mxu0 %v13618_v60  ;;  %10604 = vmatprep.subr.bf16.mxu1 %v13620_v61  ;;  %v13666_v60 = vcombine.high %v1058_v50, %v1062_v51  ;;  %v13668_v61 = vcombine.high %v1059_v18, %v1063_v52  ;;  %v1102_v42 = vld [vmem:[%s20017_s1 + $0x2160] sm:$0xff] }
 0x1ee   :  { %10072 = vmatpush1.bf16.msra.mxu0 %v13617_v2  ;;  %10605 = vmatpush1.bf16.msra.mxu1 %v13619_v3  ;;  %v1071_v2 = vld [vmem:[%s20017_s1 + $0x2068] sm:$0xff]  ;;  %v16417_v3 = vld [vmem:[%s20018_s0 + $0x40] sm:$0xff] }
 0x1ef   :  { %10073 = vmatprep.subr.bf16.mxu0 %v13626_v4  ;;  %10606 = vmatprep.subr.bf16.mxu1 %v13628_v5  ;;  %v13665_v4 = vcombine.low %v1058_v50, %v1062_v51  ;;  %v13667_v5 = vcombine.low %v1059_v18, %v1063_v52  ;;  %v13676_v6 = vcombine.high %v1067_v0, %v1071_v2  ;;  %v1106_v18 = vld [vmem:[%s20017_s1 + $0x2180] sm:$0xff] }
 0x1f0   :  { %v16427_v9 = vcombine.high %v16417_v3, %v16417_v3  ;;  %v13706_v50 = vcombine.high %v1098_v25, %v1102_v42  ;;  %v1110_v52 = vld [vmem:[%s20017_s1 + $0x21a0] sm:$0xff] }
 0x1f2   :  { %10074 = vmatpush1.bf16.msra.mxu0 %v13625_v10  ;;  %10607 = vmatpush1.bf16.msra.mxu1 %v13627_v11  ;;  %v1075_v10 = vld [vmem:[%s20017_s1 + $0x2088] sm:$0xff] }
 0x1f3   :  { %10075 = vmatprep.subr.bf16.mxu0 %v13634_v13  ;;  %10608 = vmatprep.subr.bf16.mxu1 %v13636_v14  ;;  %v1079_v11 = vld [vmem:[%s20017_s1 + $0x20a8] sm:$0xff]  ;;  %v13673_v13 = vcombine.low %v1066_v39, %v1070_v62  ;;  %v13675_v14 = vcombine.low %v1067_v0, %v1071_v2  ;;  %v13714_v39 = vcombine.high %v1106_v18, %v1110_v52  ;;  %v1114_v0 = vld [vmem:[%s20017_s1 + $0x21c0] sm:$0xff] }
 0x1f4   :  { %v13684_v53 = vcombine.high %v1075_v10, %v1079_v11  ;;  %v1118_v2 = vld [vmem:[%s20017_s1 + $0x21e0] sm:$0xff] }
 0x1f6   :  { %10076 = vmatpush1.bf16.msra.mxu0 %v13633_v24  ;;  %10609 = vmatpush1.bf16.msra.mxu1 %v13635_v26  ;;  %v1083_v24 = vld [vmem:[%s20017_s1 + $0x20c8] sm:$0xff] }
 0x1f7   :  { %10077 = vmatprep.subr.bf16.mxu0 %v13642_v49  ;;  %10610 = vmatprep.subr.bf16.mxu1 %v13644_v15  ;;  %v1087_v26 = vld [vmem:[%s20017_s1 + $0x20e8] sm:$0xff]  ;;  %v13681_v49 = vcombine.low %v1074_v7, %v1078_v8  ;;  %v13683_v15 = vcombine.low %v1075_v10, %v1079_v11  ;;  %v13722_v7 = vcombine.high %v1114_v0, %v1118_v2  ;;  %v1122_v10 = vld [vmem:[%s20017_s1 + $0x2200] sm:$0xff] }
 0x1f8   :  { %v13692_v29 = vcombine.high %v1083_v24, %v1087_v26  ;;  %v1126_v11 = vld [vmem:[%s20017_s1 + $0x2220] sm:$0xff] }
 0x1fa   :  { %10078 = vmatpush1.bf16.msra.mxu0 %v13641_v34  ;;  %10611 = vmatpush1.bf16.msra.mxu1 %v13643_v35  ;;  %v1091_v34 = vld [vmem:[%s20017_s1 + $0x2108] sm:$0xff] }
 0x1fb   :  { %10079 = vmatprep.subr.bf16.mxu0 %v13650_v37  ;;  %10612 = vmatprep.subr.bf16.mxu1 %v13652_v38  ;;  %v1095_v35 = vld [vmem:[%s20017_s1 + $0x2128] sm:$0xff]  ;;  %v13689_v37 = vcombine.low %v1082_v20, %v1086_v59  ;;  %v13691_v38 = vcombine.low %v1083_v24, %v1087_v26  ;;  %v13730_v20 = vcombine.high %v1122_v10, %v1126_v11  ;;  %v1130_v24 = vld [vmem:[%s20017_s1 + $0x2240] sm:$0xff] }
 0x1fc   :  { %v13700_v41 = vcombine.high %v1091_v34, %v1095_v35  ;;  %v1134_v26 = vld [vmem:[%s20017_s1 + $0x2260] sm:$0xff] }
 0x1fe   :  { %10080 = vmatpush1.bf16.msra.mxu0 %v13649_v43  ;;  %10613 = vmatpush1.bf16.msra.mxu1 %v13651_v44  ;;  %v1099_v43 = vld [vmem:[%s20017_s1 + $0x2148] sm:$0xff] }
 0x1ff   :  { %10081 = vmatprep.subr.bf16.mxu0 %v13658_v47  ;;  %10614 = vmatprep.subr.bf16.mxu1 %v13660_v48  ;;  %v1103_v44 = vld [vmem:[%s20017_s1 + $0x2168] sm:$0xff]  ;;  %v13697_v47 = vcombine.low %v1090_v32, %v1094_v33  ;;  %v13699_v48 = vcombine.low %v1091_v34, %v1095_v35  ;;  %v13738_v32 = vcombine.high %v1130_v24, %v1134_v26  ;;  %v1138_v34 = vld [vmem:[%s20017_s1 + $0x2280] sm:$0xff] }
 0x200   :  { %v13708_v51 = vcombine.high %v1099_v43, %v1103_v44  ;;  %v1142_v35 = vld [vmem:[%s20017_s1 + $0x22a0] sm:$0xff] }
 0x202   :  { %10082 = vmatpush1.bf16.msra.mxu0 %v13657_v54  ;;  %10615 = vmatpush1.bf16.msra.mxu1 %v13659_v56  ;;  %v1107_v54 = vld [vmem:[%s20017_s1 + $0x2188] sm:$0xff] }
 0x203   :  { %10092 = vmatprep.subr.bf16.mxu0 %v13666_v60  ;;  %10625 = vmatprep.subr.bf16.mxu1 %v13668_v61  ;;  %v1111_v56 = vld [vmem:[%s20017_s1 + $0x21a8] sm:$0xff]  ;;  %v13705_v60 = vcombine.low %v1098_v25, %v1102_v42  ;;  %v13707_v61 = vcombine.low %v1099_v43, %v1103_v44  ;;  %v13746_v25 = vcombine.high %v1138_v34, %v1142_v35  ;;  %v1146_v43 = vld [vmem:[%s20017_s1 + $0x22c0] sm:$0xff] }
 0x204   :  { %v13716_v62 = vcombine.high %v1107_v54, %v1111_v56  ;;  %v1150_v44 = vld [vmem:[%s20017_s1 + $0x22e0] sm:$0xff] }
 0x205   :  { %10084 = vmatmul.mubr.bf16.vlgmr.msra.gmra.mrb[0].mxu0 %v16406_v63  ;;  %10617 = vmatmul.mubr.bf16.vlgmr.msra.gmra.mrb[0].mxu1 %v16406_v63 }
 0x206   :  { %10093 = vmatpush1.bf16.msra.mxu0 %v13665_v4  ;;  %10626 = vmatpush1.bf16.msra.mxu1 %v13667_v5  ;;  %v1115_v4 = vld [vmem:[%s20017_s1 + $0x21c8] sm:$0xff] }
 0x207   :  { %10094 = vmatprep.subr.bf16.mxu0 %v13674_v23  ;;  %10627 = vmatprep.subr.bf16.mxu1 %v13676_v6  ;;  %v1119_v5 = vld [vmem:[%s20017_s1 + $0x21e8] sm:$0xff]  ;;  %v13713_v23 = vcombine.low %v1106_v18, %v1110_v52  ;;  %v13715_v6 = vcombine.low %v1107_v54, %v1111_v56  ;;  %v13754_v18 = vcombine.high %v1146_v43, %v1150_v44  ;;  %v1154_v54 = vld [vmem:[%s20017_s1 + $0x2300] sm:$0xff] }
 0x208   :  { %10124 = vmatprep.mubr.bf16.mxu0 %v16427_v9  ;;  %10657 = vmatprep.mubr.bf16.mxu1 %v16427_v9  ;;  %v13724_v8 = vcombine.high %v1115_v4, %v1119_v5  ;;  %v1158_v56 = vld [vmem:[%s20017_s1 + $0x2320] sm:$0xff] }
 0x20a   :  { %10095 = vmatpush1.bf16.msra.mxu0 %v13673_v13  ;;  %10628 = vmatpush1.bf16.msra.mxu1 %v13675_v14  ;;  %v1123_v13 = vld [vmem:[%s20017_s1 + $0x2208] sm:$0xff] }
 0x20b   :  { %10096 = vmatprep.subr.bf16.mxu0 %v13682_v17  ;;  %10629 = vmatprep.subr.bf16.mxu1 %v13684_v53  ;;  %v1127_v14 = vld [vmem:[%s20017_s1 + $0x2228] sm:$0xff]  ;;  %v13721_v17 = vcombine.low %v1114_v0, %v1118_v2  ;;  %v13723_v53 = vcombine.low %v1115_v4, %v1119_v5  ;;  %v13762_v0 = vcombine.high %v1154_v54, %v1158_v56  ;;  %v1162_v4 = vld [vmem:[%s20017_s1 + $0x2340] sm:$0xff] }
 0x20c   :  { %v13732_v59 = vcombine.high %v1123_v13, %v1127_v14  ;;  %v1166_v5 = vld [vmem:[%s20017_s1 + $0x2360] sm:$0xff] }
 0x20e   :  { %10097 = vmatpush1.bf16.msra.mxu0 %v13681_v49  ;;  %10630 = vmatpush1.bf16.msra.mxu1 %v13683_v15  ;;  %v1131_v49 = vld [vmem:[%s20017_s1 + $0x2248] sm:$0xff] }
 0x20f   :  { %10098 = vmatprep.subr.bf16.mxu0 %v13690_v28  ;;  %10631 = vmatprep.subr.bf16.mxu1 %v13692_v29  ;;  %v1135_v15 = vld [vmem:[%s20017_s1 + $0x2268] sm:$0xff]  ;;  %v13729_v28 = vcombine.low %v1122_v10, %v1126_v11  ;;  %v13731_v29 = vcombine.low %v1123_v13, %v1127_v14  ;;  %v13770_v10 = vcombine.high %v1162_v4, %v1166_v5  ;;  %v1170_v13 = vld [vmem:[%s20017_s1 + $0x2380] sm:$0xff] }
 0x210   :  { %v13740_v33 = vcombine.high %v1131_v49, %v1135_v15  ;;  %v1174_v14 = vld [vmem:[%s20017_s1 + $0x23a0] sm:$0xff] }
 0x212   :  { %10099 = vmatpush1.bf16.msra.mxu0 %v13689_v37  ;;  %10632 = vmatpush1.bf16.msra.mxu1 %v13691_v38  ;;  %v1139_v37 = vld [vmem:[%s20017_s1 + $0x2288] sm:$0xff] }
 0x213   :  { %10100 = vmatprep.subr.bf16.mxu0 %v13698_v40  ;;  %10633 = vmatprep.subr.bf16.mxu1 %v13700_v41  ;;  %v1143_v38 = vld [vmem:[%s20017_s1 + $0x22a8] sm:$0xff]  ;;  %v13737_v40 = vcombine.low %v1130_v24, %v1134_v26  ;;  %v13739_v41 = vcombine.low %v1131_v49, %v1135_v15  ;;  %v13778_v24 = vcombine.high %v1170_v13, %v1174_v14  ;;  %v1178_v49 = vld [vmem:[%s20017_s1 + $0x23c0] sm:$0xff] }
 0x214   :  { %v13748_v42 = vcombine.high %v1139_v37, %v1143_v38  ;;  %v1182_v15 = vld [vmem:[%s20017_s1 + $0x23e0] sm:$0xff] }
 0x216   :  { %10101 = vmatpush1.bf16.msra.mxu0 %v13697_v47  ;;  %10634 = vmatpush1.bf16.msra.mxu1 %v13699_v48  ;;  %v1147_v47 = vld [vmem:[%s20017_s1 + $0x22c8] sm:$0xff] }
 0x217   :  { %10102 = vmatprep.subr.bf16.mxu0 %v13706_v50  ;;  %10635 = vmatprep.subr.bf16.mxu1 %v13708_v51  ;;  %v1151_v48 = vld [vmem:[%s20017_s1 + $0x22e8] sm:$0xff]  ;;  %v13745_v50 = vcombine.low %v1138_v34, %v1142_v35  ;;  %v13747_v51 = vcombine.low %v1139_v37, %v1143_v38  ;;  %v13786_v34 = vcombine.high %v1178_v49, %v1182_v15  ;;  %v1186_v37 = vld [vmem:[%s20017_s1 + $0x2400] sm:$0xff] }
 0x218   :  { %v13756_v52 = vcombine.high %v1147_v47, %v1151_v48  ;;  %v1190_v38 = vld [vmem:[%s20017_s1 + $0x2420] sm:$0xff] }
 0x21a   :  { %10103 = vmatpush1.bf16.msra.mxu0 %v13705_v60  ;;  %10636 = vmatpush1.bf16.msra.mxu1 %v13707_v61  ;;  %v1155_v60 = vld [vmem:[%s20017_s1 + $0x2308] sm:$0xff] }
 0x21b   :  { %10104 = vmatprep.subr.bf16.mxu0 %v13714_v39  ;;  %10637 = vmatprep.subr.bf16.mxu1 %v13716_v62  ;;  %v1159_v61 = vld [vmem:[%s20017_s1 + $0x2328] sm:$0xff]  ;;  %v13753_v39 = vcombine.low %v1146_v43, %v1150_v44  ;;  %v13755_v62 = vcombine.low %v1147_v47, %v1151_v48  ;;  %v13794_v43 = vcombine.high %v1186_v37, %v1190_v38  ;;  %v1194_v47 = vld [vmem:[%s20017_s1 + $0x2440] sm:$0xff] }
 0x21c   :  { %v13764_v2 = vcombine.high %v1155_v60, %v1159_v61  ;;  %v1198_v48 = vld [vmem:[%s20017_s1 + $0x2460] sm:$0xff] }
 0x21e   :  { %10105 = vmatpush1.bf16.msra.mxu0 %v13713_v23  ;;  %10638 = vmatpush1.bf16.msra.mxu1 %v13715_v6  ;;  %v1163_v23 = vld [vmem:[%s20017_s1 + $0x2348] sm:$0xff] }
 0x21f   :  { %10106 = vmatprep.subr.bf16.mxu0 %v13722_v7  ;;  %10639 = vmatprep.subr.bf16.mxu1 %v13724_v8  ;;  %v1167_v6 = vld [vmem:[%s20017_s1 + $0x2368] sm:$0xff]  ;;  %v13761_v7 = vcombine.low %v1154_v54, %v1158_v56  ;;  %v13763_v8 = vcombine.low %v1155_v60, %v1159_v61  ;;  %v13793_v54 = vcombine.low %v1186_v37, %v1190_v38  ;;  %v1202_v61 = vld [vmem:[%s20017_s1 + $0x2480] sm:$0xff] }
 0x220   :  { %v13772_v11 = vcombine.high %v1163_v23, %v1167_v6 }
 0x222   :  { %10107 = vmatpush1.bf16.msra.mxu0 %v13721_v17  ;;  %10640 = vmatpush1.bf16.msra.mxu1 %v13723_v53  ;;  %v1171_v17 = vld [vmem:[%s20017_s1 + $0x2388] sm:$0xff] }
 0x223   :  { %10108 = vmatprep.subr.bf16.mxu0 %v13730_v20  ;;  %10641 = vmatprep.subr.bf16.mxu1 %v13732_v59  ;;  %v1175_v53 = vld [vmem:[%s20017_s1 + $0x23a8] sm:$0xff]  ;;  %v13769_v20 = vcombine.low %v1162_v4, %v1166_v5  ;;  %v13771_v59 = vcombine.low %v1163_v23, %v1167_v6  ;;  %v13801_v4 = vcombine.low %v1194_v47, %v1198_v48 }
 0x224   :  { %v13780_v26 = vcombine.high %v1171_v17, %v1175_v53 }
 0x226   :  { %10109 = vmatpush1.bf16.msra.mxu0 %v13729_v28  ;;  %10642 = vmatpush1.bf16.msra.mxu1 %v13731_v29  ;;  %v1179_v28 = vld [vmem:[%s20017_s1 + $0x23c8] sm:$0xff] }
 0x227   :  { %10110 = vmatprep.subr.bf16.mxu0 %v13738_v32  ;;  %10643 = vmatprep.subr.bf16.mxu1 %v13740_v33  ;;  %v1183_v29 = vld [vmem:[%s20017_s1 + $0x23e8] sm:$0xff]  ;;  %v13777_v32 = vcombine.low %v1170_v13, %v1174_v14  ;;  %v13779_v33 = vcombine.low %v1171_v17, %v1175_v53 }
 0x228   :  { %v13788_v35 = vcombine.high %v1179_v28, %v1183_v29 }
 0x22a   :  { %10111 = vmatpush1.bf16.msra.mxu0 %v13737_v40  ;;  %10644 = vmatpush1.bf16.msra.mxu1 %v13739_v41  ;;  %v1187_v40 = vld [vmem:[%s20017_s1 + $0x2408] sm:$0xff] }
 0x22b   :  { %10112 = vmatprep.subr.bf16.mxu0 %v13746_v25  ;;  %10645 = vmatprep.subr.bf16.mxu1 %v13748_v42  ;;  %v1191_v41 = vld [vmem:[%s20017_s1 + $0x2428] sm:$0xff]  ;;  %v13785_v25 = vcombine.low %v1178_v49, %v1182_v15  ;;  %v13787_v42 = vcombine.low %v1179_v28, %v1183_v29 }
 0x22c   :  { %v13796_v44 = vcombine.high %v1187_v40, %v1191_v41  ;;  %v13795_v56 = vcombine.low %v1187_v40, %v1191_v41 }
 0x22e   :  { %10113 = vmatpush1.bf16.msra.mxu0 %v13745_v50  ;;  %10646 = vmatpush1.bf16.msra.mxu1 %v13747_v51  ;;  %v16615_v50 = vcombine.low %v16417_v3, %v16417_v3  ;;  %v1195_v51 = vld [vmem:[%s20017_s1 + $0x2448] sm:$0xff]  ;;  %v13802_v3 = vcombine.high %v1194_v47, %v1198_v48 }
 0x22f   :  { %10114 = vmatprep.subr.bf16.mxu0 %v13754_v18  ;;  %10647 = vmatprep.subr.bf16.mxu1 %v13756_v52  ;;  %v1199_v18 = vld [vmem:[%s20017_s1 + $0x2468] sm:$0xff] }
 0x230   :  { %v16626_v52 = vld [vmem:[%s20018_s0 + $0x48] sm:$0xff]  ;;  %v13804_v60 = vcombine.high %v1195_v51, %v1199_v18  ;;  %v13803_v5 = vcombine.low %v1195_v51, %v1199_v18 }
 0x232   :  { %10115 = vmatpush1.bf16.msra.mxu0 %v13753_v39  ;;  %10648 = vmatpush1.bf16.msra.mxu1 %v13755_v62  ;;  %v1206_v39 = vld [vmem:[%s20017_s1 + $0x24a0] sm:$0xff]  ;;  %v16636_v62 = vcombine.high %v16626_v52, %v16626_v52 }
 0x233   :  { %10116 = vmatprep.subr.bf16.mxu0 %v13762_v0  ;;  %10649 = vmatprep.subr.bf16.mxu1 %v13764_v2  ;;  %v1203_v0 = vld [vmem:[%s20017_s1 + $0x2488] sm:$0xff]  ;;  %v13810_v23 = vcombine.high %v1202_v61, %v1206_v39  ;;  %v13809_v13 = vcombine.low %v1202_v61, %v1206_v39 }
 0x234   :  { %v1207_v2 = vld [vmem:[%s20017_s1 + $0x24a8] sm:$0xff] }
 0x235   :  { %v13812_v6 = vcombine.high %v1203_v0, %v1207_v2  ;;  %v13811_v14 = vcombine.low %v1203_v0, %v1207_v2 }
 0x236   :  { %10117 = vmatpush1.bf16.msra.mxu0 %v13761_v7  ;;  %10650 = vmatpush1.bf16.msra.mxu1 %v13763_v8  ;;  %v1210_v7 = vld [vmem:[%s20017_s1 + $0x24c0] sm:$0xff] }
 0x237   :  { %10118 = vmatprep.subr.bf16.mxu0 %v13770_v10  ;;  %10651 = vmatprep.subr.bf16.mxu1 %v13772_v11  ;;  %v1214_v8 = vld [vmem:[%s20017_s1 + $0x24e0] sm:$0xff]  ;;  %v1211_v10 = vld [vmem:[%s20017_s1 + $0x24c8] sm:$0xff] }
 0x238   :  { %v1215_v11 = vld [vmem:[%s20017_s1 + $0x24e8] sm:$0xff]  ;;  %v13818_v17 = vcombine.high %v1210_v7, %v1214_v8  ;;  %v13817_v49 = vcombine.low %v1210_v7, %v1214_v8 }
 0x239   :  { %v13820_v53 = vcombine.high %v1211_v10, %v1215_v11  ;;  %v13819_v15 = vcombine.low %v1211_v10, %v1215_v11 }
 0x23a   :  { %10119 = vmatpush1.bf16.msra.mxu0 %v13769_v20  ;;  %10652 = vmatpush1.bf16.msra.mxu1 %v13771_v59  ;;  %v1218_v20 = vld [vmem:[%s20017_s1 + $0x2500] sm:$0xff] }
 0x23b   :  { %10120 = vmatprep.subr.bf16.mxu0 %v13778_v24  ;;  %10653 = vmatprep.subr.bf16.mxu1 %v13780_v26  ;;  %v1222_v59 = vld [vmem:[%s20017_s1 + $0x2520] sm:$0xff]  ;;  %v1219_v24 = vld [vmem:[%s20017_s1 + $0x2508] sm:$0xff] }
 0x23c   :  { %v1223_v26 = vld [vmem:[%s20017_s1 + $0x2528] sm:$0xff]  ;;  %v13826_v28 = vcombine.high %v1218_v20, %v1222_v59  ;;  %v13825_v37 = vcombine.low %v1218_v20, %v1222_v59 }
 0x23d   :  { %v13828_v29 = vcombine.high %v1219_v24, %v1223_v26  ;;  %v13827_v38 = vcombine.low %v1219_v24, %v1223_v26 }
 0x23e   :  { %10121 = vmatpush1.bf16.msra.mxu0 %v13777_v32  ;;  %10654 = vmatpush1.bf16.msra.mxu1 %v13779_v33  ;;  %v1226_v32 = vld [vmem:[%s20017_s1 + $0x2540] sm:$0xff] }
 0x23f   :  { %10122 = vmatprep.subr.bf16.mxu0 %v13786_v34  ;;  %10655 = vmatprep.subr.bf16.mxu1 %v13788_v35  ;;  %v1230_v33 = vld [vmem:[%s20017_s1 + $0x2560] sm:$0xff]  ;;  %v1227_v34 = vld [vmem:[%s20017_s1 + $0x2548] sm:$0xff] }
 0x240   :  { %v1231_v35 = vld [vmem:[%s20017_s1 + $0x2568] sm:$0xff]  ;;  %v13834_v40 = vcombine.high %v1226_v32, %v1230_v33  ;;  %v13833_v47 = vcombine.low %v1226_v32, %v1230_v33 }
 0x241   :  { %v13836_v41 = vcombine.high %v1227_v34, %v1231_v35  ;;  %v13835_v48 = vcombine.low %v1227_v34, %v1231_v35 }
 0x242   :  { %10123 = vmatpush1.bf16.msra.mxu0 %v13785_v25  ;;  %10656 = vmatpush1.bf16.msra.mxu1 %v13787_v42  ;;  %v1234_v25 = vld [vmem:[%s20017_s1 + $0x2580] sm:$0xff] }
 0x243   :  { %10133 = vmatprep.subr.bf16.mxu0 %v13794_v43  ;;  %10666 = vmatprep.subr.bf16.mxu1 %v13796_v44  ;;  %v1238_v42 = vld [vmem:[%s20017_s1 + $0x25a0] sm:$0xff]  ;;  %v1235_v43 = vld [vmem:[%s20017_s1 + $0x2588] sm:$0xff] }
 0x244   :  { %v1239_v44 = vld [vmem:[%s20017_s1 + $0x25a8] sm:$0xff]  ;;  %v13842_v51 = vcombine.high %v1234_v25, %v1238_v42  ;;  %v13841_v61 = vcombine.low %v1234_v25, %v1238_v42 }
 0x245   :  { %10125 = vmatmul.mubr.bf16.vlgmr.msra.gmra.mrb[0].mxu0 %v16615_v50  ;;  %10658 = vmatmul.mubr.bf16.vlgmr.msra.gmra.mrb[0].mxu1 %v16615_v50  ;;  %v13844_v18 = vcombine.high %v1235_v43, %v1239_v44  ;;  %v13843_v39 = vcombine.low %v1235_v43, %v1239_v44 }
 0x246   :  { %10134 = vmatpush1.bf16.msra.mxu0 %v13793_v54  ;;  %10667 = vmatpush1.bf16.msra.mxu1 %v13795_v56  ;;  %v1242_v54 = vld [vmem:[%s20017_s1 + $0x25c0] sm:$0xff] }
 0x247   :  { %10135 = vmatprep.subr.bf16.mxu0 %v13802_v3  ;;  %10668 = vmatprep.subr.bf16.mxu1 %v13804_v60  ;;  %v1246_v56 = vld [vmem:[%s20017_s1 + $0x25e0] sm:$0xff]  ;;  %v1243_v3 = vld [vmem:[%s20017_s1 + $0x25c8] sm:$0xff] }
 0x248   :  { %10165 = vmatprep.mubr.bf16.mxu0 %v16636_v62  ;;  %10698 = vmatprep.mubr.bf16.mxu1 %v16636_v62  ;;  %v1247_v60 = vld [vmem:[%s20017_s1 + $0x25e8] sm:$0xff]  ;;  %v13850_v0 = vcombine.high %v1242_v54, %v1246_v56  ;;  %v13849_v7 = vcombine.low %v1242_v54, %v1246_v56 }
 0x249   :  { %v13852_v2 = vcombine.high %v1243_v3, %v1247_v60  ;;  %v13851_v8 = vcombine.low %v1243_v3, %v1247_v60 }
 0x24a   :  { %10136 = vmatpush1.bf16.msra.mxu0 %v13801_v4  ;;  %10669 = vmatpush1.bf16.msra.mxu1 %v13803_v5  ;;  %v1250_v4 = vld [vmem:[%s20017_s1 + $0x2600] sm:$0xff] }
 0x24b   :  { %10137 = vmatprep.subr.bf16.mxu0 %v13810_v23  ;;  %10670 = vmatprep.subr.bf16.mxu1 %v13812_v6  ;;  %v1254_v5 = vld [vmem:[%s20017_s1 + $0x2620] sm:$0xff]  ;;  %v1251_v23 = vld [vmem:[%s20017_s1 + $0x2608] sm:$0xff] }
 0x24c   :  { %v1255_v6 = vld [vmem:[%s20017_s1 + $0x2628] sm:$0xff]  ;;  %v13858_v10 = vcombine.high %v1250_v4, %v1254_v5  ;;  %v13857_v20 = vcombine.low %v1250_v4, %v1254_v5 }
 0x24d   :  { %v13860_v11 = vcombine.high %v1251_v23, %v1255_v6  ;;  %v13859_v59 = vcombine.low %v1251_v23, %v1255_v6 }
 0x24e   :  { %10138 = vmatpush1.bf16.msra.mxu0 %v13809_v13  ;;  %10671 = vmatpush1.bf16.msra.mxu1 %v13811_v14  ;;  %v1258_v13 = vld [vmem:[%s20017_s1 + $0x2640] sm:$0xff] }
 0x24f   :  { %10139 = vmatprep.subr.bf16.mxu0 %v13818_v17  ;;  %10672 = vmatprep.subr.bf16.mxu1 %v13820_v53  ;;  %v1262_v14 = vld [vmem:[%s20017_s1 + $0x2660] sm:$0xff]  ;;  %v1259_v17 = vld [vmem:[%s20017_s1 + $0x2648] sm:$0xff] }
 0x250   :  { %v1263_v53 = vld [vmem:[%s20017_s1 + $0x2668] sm:$0xff]  ;;  %v13866_v24 = vcombine.high %v1258_v13, %v1262_v14  ;;  %v13865_v32 = vcombine.low %v1258_v13, %v1262_v14 }
 0x251   :  { %v13868_v26 = vcombine.high %v1259_v17, %v1263_v53  ;;  %v13867_v33 = vcombine.low %v1259_v17, %v1263_v53 }
 0x252   :  { %10140 = vmatpush1.bf16.msra.mxu0 %v13817_v49  ;;  %10673 = vmatpush1.bf16.msra.mxu1 %v13819_v15  ;;  %v1266_v49 = vld [vmem:[%s20017_s1 + $0x2680] sm:$0xff] }
 0x253   :  { %10141 = vmatprep.subr.bf16.mxu0 %v13826_v28  ;;  %10674 = vmatprep.subr.bf16.mxu1 %v13828_v29  ;;  %v1270_v15 = vld [vmem:[%s20017_s1 + $0x26a0] sm:$0xff]  ;;  %v1267_v28 = vld [vmem:[%s20017_s1 + $0x2688] sm:$0xff] }
 0x254   :  { %v1271_v29 = vld [vmem:[%s20017_s1 + $0x26a8] sm:$0xff]  ;;  %v13874_v34 = vcombine.high %v1266_v49, %v1270_v15  ;;  %v13873_v25 = vcombine.low %v1266_v49, %v1270_v15 }
 0x255   :  { %v13876_v35 = vcombine.high %v1267_v28, %v1271_v29  ;;  %v13875_v42 = vcombine.low %v1267_v28, %v1271_v29 }
 0x256   :  { %10142 = vmatpush1.bf16.msra.mxu0 %v13825_v37  ;;  %10675 = vmatpush1.bf16.msra.mxu1 %v13827_v38  ;;  %v1274_v37 = vld [vmem:[%s20017_s1 + $0x26c0] sm:$0xff] }
 0x257   :  { %10143 = vmatprep.subr.bf16.mxu0 %v13834_v40  ;;  %10676 = vmatprep.subr.bf16.mxu1 %v13836_v41  ;;  %v1278_v38 = vld [vmem:[%s20017_s1 + $0x26e0] sm:$0xff]  ;;  %v1275_v40 = vld [vmem:[%s20017_s1 + $0x26c8] sm:$0xff] }
 0x258   :  { %v1279_v41 = vld [vmem:[%s20017_s1 + $0x26e8] sm:$0xff]  ;;  %v13882_v43 = vcombine.high %v1274_v37, %v1278_v38  ;;  %v13881_v54 = vcombine.low %v1274_v37, %v1278_v38 }
 0x259   :  { %v13884_v44 = vcombine.high %v1275_v40, %v1279_v41  ;;  %v13883_v56 = vcombine.low %v1275_v40, %v1279_v41 }
 0x25a   :  { %10144 = vmatpush1.bf16.msra.mxu0 %v13833_v47  ;;  %10677 = vmatpush1.bf16.msra.mxu1 %v13835_v48  ;;  %v1282_v47 = vld [vmem:[%s20017_s1 + $0x2700] sm:$0xff] }
 0x25b   :  { %10145 = vmatprep.subr.bf16.mxu0 %v13842_v51  ;;  %10678 = vmatprep.subr.bf16.mxu1 %v13844_v18  ;;  %v1286_v48 = vld [vmem:[%s20017_s1 + $0x2720] sm:$0xff]  ;;  %v1283_v51 = vld [vmem:[%s20017_s1 + $0x2708] sm:$0xff] }
 0x25c   :  { %v1287_v18 = vld [vmem:[%s20017_s1 + $0x2728] sm:$0xff]  ;;  %v13890_v3 = vcombine.high %v1282_v47, %v1286_v48  ;;  %v13889_v4 = vcombine.low %v1282_v47, %v1286_v48  ;;  %v16835_v48 = vld [vmem:[%s20018_s0 + $0x50] sm:$0xff] }
 0x25d   :  { %v13892_v60 = vcombine.high %v1283_v51, %v1287_v18  ;;  %v13891_v5 = vcombine.low %v1283_v51, %v1287_v18  ;;  %v1327_v47 = vld [vmem:[%s20017_s1 + $0x2868] sm:$0xff] }
 0x25e   :  { %10146 = vmatpush1.bf16.msra.mxu0 %v13841_v61  ;;  %10679 = vmatpush1.bf16.msra.mxu1 %v13843_v39  ;;  %v1290_v61 = vld [vmem:[%s20017_s1 + $0x2740] sm:$0xff] }
 0x25f   :  { %10147 = vmatprep.subr.bf16.mxu0 %v13850_v0  ;;  %10680 = vmatprep.subr.bf16.mxu1 %v13852_v2  ;;  %v1294_v39 = vld [vmem:[%s20017_s1 + $0x2760] sm:$0xff]  ;;  %v1291_v0 = vld [vmem:[%s20017_s1 + $0x2748] sm:$0xff] }
 0x260   :  { %v1295_v2 = vld [vmem:[%s20017_s1 + $0x2768] sm:$0xff]  ;;  %v13898_v23 = vcombine.high %v1290_v61, %v1294_v39  ;;  %v13897_v13 = vcombine.low %v1290_v61, %v1294_v39 }
 0x261   :  { %v13900_v6 = vcombine.high %v1291_v0, %v1295_v2  ;;  %v13899_v14 = vcombine.low %v1291_v0, %v1295_v2  ;;  %v1331_v61 = vld [vmem:[%s20017_s1 + $0x2888] sm:$0xff] }
 0x262   :  { %10148 = vmatpush1.bf16.msra.mxu0 %v13849_v7  ;;  %10681 = vmatpush1.bf16.msra.mxu1 %v13851_v8  ;;  %v1298_v7 = vld [vmem:[%s20017_s1 + $0x2780] sm:$0xff]  ;;  %v1335_v39 = vld [vmem:[%s20017_s1 + $0x28a8] sm:$0xff] }
 0x263   :  { %10149 = vmatprep.subr.bf16.mxu0 %v13858_v10  ;;  %10682 = vmatprep.subr.bf16.mxu1 %v13860_v11  ;;  %v1302_v8 = vld [vmem:[%s20017_s1 + $0x27a0] sm:$0xff]  ;;  %v1299_v10 = vld [vmem:[%s20017_s1 + $0x2788] sm:$0xff] }
 0x264   :  { %v1303_v11 = vld [vmem:[%s20017_s1 + $0x27a8] sm:$0xff]  ;;  %v13906_v17 = vcombine.high %v1298_v7, %v1302_v8  ;;  %v13905_v49 = vcombine.low %v1298_v7, %v1302_v8 }
 0x265   :  { %v13908_v53 = vcombine.high %v1299_v10, %v1303_v11  ;;  %v13907_v15 = vcombine.low %v1299_v10, %v1303_v11  ;;  %v1339_v7 = vld [vmem:[%s20017_s1 + $0x28c8] sm:$0xff]  ;;  %v13939_v11 = vcombine.low %v1331_v61, %v1335_v39 }
 0x266   :  { %10150 = vmatpush1.bf16.msra.mxu0 %v13857_v20  ;;  %10683 = vmatpush1.bf16.msra.mxu1 %v13859_v59  ;;  %v1306_v20 = vld [vmem:[%s20017_s1 + $0x27c0] sm:$0xff]  ;;  %v1343_v8 = vld [vmem:[%s20017_s1 + $0x28e8] sm:$0xff] }
 0x267   :  { %10151 = vmatprep.subr.bf16.mxu0 %v13866_v24  ;;  %10684 = vmatprep.subr.bf16.mxu1 %v13868_v26  ;;  %v1310_v59 = vld [vmem:[%s20017_s1 + $0x27e0] sm:$0xff]  ;;  %v1307_v24 = vld [vmem:[%s20017_s1 + $0x27c8] sm:$0xff] }
 0x268   :  { %v1311_v26 = vld [vmem:[%s20017_s1 + $0x27e8] sm:$0xff]  ;;  %v13914_v28 = vcombine.high %v1306_v20, %v1310_v59  ;;  %v13913_v37 = vcombine.low %v1306_v20, %v1310_v59 }
 0x269   :  { %v13916_v29 = vcombine.high %v1307_v24, %v1311_v26  ;;  %v13915_v38 = vcombine.low %v1307_v24, %v1311_v26  ;;  %v1347_v20 = vld [vmem:[%s20017_s1 + $0x2908] sm:$0xff]  ;;  %v13947_v26 = vcombine.low %v1339_v7, %v1343_v8 }
 0x26a   :  { %10152 = vmatpush1.bf16.msra.mxu0 %v13865_v32  ;;  %10685 = vmatpush1.bf16.msra.mxu1 %v13867_v33  ;;  %v1314_v32 = vld [vmem:[%s20017_s1 + $0x2800] sm:$0xff]  ;;  %v1351_v59 = vld [vmem:[%s20017_s1 + $0x2928] sm:$0xff] }
 0x26b   :  { %10153 = vmatprep.subr.bf16.mxu0 %v13874_v34  ;;  %10686 = vmatprep.subr.bf16.mxu1 %v13876_v35  ;;  %v1318_v33 = vld [vmem:[%s20017_s1 + $0x2820] sm:$0xff]  ;;  %v1315_v34 = vld [vmem:[%s20017_s1 + $0x2808] sm:$0xff] }
 0x26c   :  { %v1319_v35 = vld [vmem:[%s20017_s1 + $0x2828] sm:$0xff]  ;;  %v13922_v40 = vcombine.high %v1314_v32, %v1318_v33  ;;  %v13921_v51 = vcombine.low %v1314_v32, %v1318_v33 }
 0x26d   :  { %v13924_v41 = vcombine.high %v1315_v34, %v1319_v35  ;;  %v13923_v18 = vcombine.low %v1315_v34, %v1319_v35  ;;  %v1355_v32 = vld [vmem:[%s20017_s1 + $0x2948] sm:$0xff]  ;;  %v13955_v35 = vcombine.low %v1347_v20, %v1351_v59 }
 0x26e   :  { %10154 = vmatpush1.bf16.msra.mxu0 %v13873_v25  ;;  %10687 = vmatpush1.bf16.msra.mxu1 %v13875_v42  ;;  %v1322_v25 = vld [vmem:[%s20017_s1 + $0x2840] sm:$0xff]  ;;  %v1359_v33 = vld [vmem:[%s20017_s1 + $0x2968] sm:$0xff] }
 0x26f   :  { %10155 = vmatprep.subr.bf16.mxu0 %v13882_v43  ;;  %10688 = vmatprep.subr.bf16.mxu1 %v13884_v44  ;;  %v1326_v42 = vld [vmem:[%s20017_s1 + $0x2860] sm:$0xff]  ;;  %v16824_v43 = vcombine.low %v16626_v52, %v16626_v52  ;;  %v1323_v44 = vld [vmem:[%s20017_s1 + $0x2848] sm:$0xff] }
 0x270   :  { %v13930_v52 = vcombine.high %v1322_v25, %v1326_v42  ;;  %v13929_v0 = vcombine.low %v1322_v25, %v1326_v42  ;;  %v13931_v2 = vcombine.low %v1323_v44, %v1327_v47  ;;  %v1363_v25 = vld [vmem:[%s20017_s1 + $0x2988] sm:$0xff] }
 0x271   :  { %v1367_v42 = vld [vmem:[%s20017_s1 + $0x29a8] sm:$0xff] }
 0x272   :  { %10156 = vmatpush1.bf16.msra.mxu0 %v13881_v54  ;;  %10689 = vmatpush1.bf16.msra.mxu1 %v13883_v56  ;;  %v13932_v54 = vcombine.high %v1323_v44, %v1327_v47  ;;  %v1330_v56 = vld [vmem:[%s20017_s1 + $0x2880] sm:$0xff]  ;;  %v13963_v47 = vcombine.low %v1355_v32, %v1359_v33 }
 0x273   :  { %10157 = vmatprep.subr.bf16.mxu0 %v13890_v3  ;;  %10690 = vmatprep.subr.bf16.mxu1 %v13892_v60  ;;  %v1334_v3 = vld [vmem:[%s20017_s1 + $0x28a0] sm:$0xff]  ;;  %v16845_v60 = vcombine.high %v16835_v48, %v16835_v48 }
 0x274   :  { %v13937_v10 = vcombine.low %v1330_v56, %v1334_v3 }
 0x276   :  { %10158 = vmatpush1.bf16.msra.mxu0 %v13889_v4  ;;  %10691 = vmatpush1.bf16.msra.mxu1 %v13891_v5  ;;  %v13938_v4 = vcombine.high %v1330_v56, %v1334_v3  ;;  %v13940_v5 = vcombine.high %v1331_v61, %v1335_v39  ;;  %v1371_v56 = vld [vmem:[%s20017_s1 + $0x29c8] sm:$0xff]  ;;  %v13971_v39 = vcombine.low %v1363_v25, %v1367_v42 }
 0x277   :  { %10159 = vmatprep.subr.bf16.mxu0 %v13898_v23  ;;  %10692 = vmatprep.subr.bf16.mxu1 %v13900_v6  ;;  %v1338_v23 = vld [vmem:[%s20017_s1 + $0x28c0] sm:$0xff]  ;;  %v1375_v3 = vld [vmem:[%s20017_s1 + $0x29e8] sm:$0xff] }
 0x278   :  { %v1342_v6 = vld [vmem:[%s20017_s1 + $0x28e0] sm:$0xff] }
 0x279   :  { %v13945_v24 = vcombine.low %v1338_v23, %v1342_v6 }
 0x27a   :  { %10160 = vmatpush1.bf16.msra.mxu0 %v13897_v13  ;;  %10693 = vmatpush1.bf16.msra.mxu1 %v13899_v14  ;;  %v13946_v13 = vcombine.high %v1338_v23, %v1342_v6  ;;  %v13948_v14 = vcombine.high %v1339_v7, %v1343_v8  ;;  %v1379_v23 = vld [vmem:[%s20017_s1 + $0x2a08] sm:$0xff]  ;;  %v13979_v8 = vcombine.low %v1371_v56, %v1375_v3 }
 0x27b   :  { %10161 = vmatprep.subr.bf16.mxu0 %v13906_v17  ;;  %10694 = vmatprep.subr.bf16.mxu1 %v13908_v53  ;;  %v1346_v17 = vld [vmem:[%s20017_s1 + $0x2900] sm:$0xff]  ;;  %v1383_v6 = vld [vmem:[%s20017_s1 + $0x2a28] sm:$0xff] }
 0x27c   :  { %v1350_v53 = vld [vmem:[%s20017_s1 + $0x2920] sm:$0xff] }
 0x27d   :  { %v13953_v34 = vcombine.low %v1346_v17, %v1350_v53 }
 0x27e   :  { %10162 = vmatpush1.bf16.msra.mxu0 %v13905_v49  ;;  %10695 = vmatpush1.bf16.msra.mxu1 %v13907_v15  ;;  %v13954_v49 = vcombine.high %v1346_v17, %v1350_v53  ;;  %v13956_v15 = vcombine.high %v1347_v20, %v1351_v59  ;;  %v1387_v17 = vld [vmem:[%s20017_s1 + $0x2a48] sm:$0xff]  ;;  %v13987_v59 = vcombine.low %v1379_v23, %v1383_v6 }
 0x27f   :  { %10163 = vmatprep.subr.bf16.mxu0 %v13914_v28  ;;  %10696 = vmatprep.subr.bf16.mxu1 %v13916_v29  ;;  %v1354_v28 = vld [vmem:[%s20017_s1 + $0x2940] sm:$0xff]  ;;  %v1391_v53 = vld [vmem:[%s20017_s1 + $0x2a68] sm:$0xff] }
 0x280   :  { %v1358_v29 = vld [vmem:[%s20017_s1 + $0x2960] sm:$0xff] }
 0x281   :  { %v13961_v44 = vcombine.low %v1354_v28, %v1358_v29 }
 0x282   :  { %10164 = vmatpush1.bf16.msra.mxu0 %v13913_v37  ;;  %10697 = vmatpush1.bf16.msra.mxu1 %v13915_v38  ;;  %v13962_v37 = vcombine.high %v1354_v28, %v1358_v29  ;;  %v13964_v38 = vcombine.high %v1355_v32, %v1359_v33  ;;  %v14688_v28 = vmov 0   ;;  %v1395_v29 = vld [vmem:[%s20017_s1 + $0x2a88] sm:$0xff] }
 0x283   :  { %10174 = vmatprep.subr.bf16.mxu0 %v13922_v40  ;;  %10707 = vmatprep.subr.bf16.mxu1 %v13924_v41  ;;  %v1362_v40 = vld [vmem:[%s20017_s1 + $0x2980] sm:$0xff]  ;;  %v1399_v32 = vld [vmem:[%s20017_s1 + $0x2aa8] sm:$0xff] }
 0x284   :  { %v1366_v41 = vld [vmem:[%s20017_s1 + $0x29a0] sm:$0xff]  ;;  %14596 = vset.pattern.permute.xlu1 %v14688_v28  ;;  %14597 = vset.pattern.permute.xlu0 %v14688_v28 }
 0x285   :  { %10166 = vmatmul.mubr.bf16.vlgmr.msra.gmra.mrb[0].mxu0 %v16824_v43  ;;  %10699 = vmatmul.mubr.bf16.vlgmr.msra.gmra.mrb[0].mxu1 %v16824_v43  ;;  %v13969_v61 = vcombine.low %v1362_v40, %v1366_v41 }
 0x286   :  { %10175 = vmatpush1.bf16.msra.mxu0 %v13921_v51  ;;  %10708 = vmatpush1.bf16.msra.mxu1 %v13923_v18  ;;  %v13970_v51 = vcombine.high %v1362_v40, %v1366_v41  ;;  %v13972_v18 = vcombine.high %v1363_v25, %v1367_v42  ;;  %v1406_v40 = vld [vmem:[%s20017_s1 + $0x2ae0] sm:$0xff]  ;;  %v1403_v41 = vld [vmem:[%s20017_s1 + $0x2ac8] sm:$0xff] }
 0x287   :  { %10176 = vmatprep.subr.bf16.mxu0 %v13930_v52  ;;  %10709 = vmatprep.subr.bf16.mxu1 %v13932_v54  ;;  %v1370_v52 = vld [vmem:[%s20017_s1 + $0x29c0] sm:$0xff]  ;;  %v1407_v25 = vld [vmem:[%s20017_s1 + $0x2ae8] sm:$0xff] }
 0x288   :  { %10206 = vmatprep.mubr.bf16.mxu0 %v16845_v60  ;;  %10739 = vmatprep.mubr.bf16.mxu1 %v16845_v60  ;;  %v1374_v54 = vld [vmem:[%s20017_s1 + $0x29e0] sm:$0xff] }
 0x289   :  { %v13977_v7 = vcombine.low %v1370_v52, %v1374_v54 }
 0x28a   :  { %10177 = vmatpush1.bf16.msra.mxu0 %v13929_v0  ;;  %10710 = vmatpush1.bf16.msra.mxu1 %v13931_v2  ;;  %v13978_v0 = vcombine.high %v1370_v52, %v1374_v54  ;;  %v13980_v2 = vcombine.high %v1371_v56, %v1375_v3  ;;  %v1414_v52 = vld [vmem:[%s20017_s1 + $0x2b20] sm:$0xff]  ;;  %v1411_v54 = vld [vmem:[%s20017_s1 + $0x2b08] sm:$0xff] }
 0x28b   :  { %10178 = vmatprep.subr.bf16.mxu0 %v13938_v4  ;;  %10711 = vmatprep.subr.bf16.mxu1 %v13940_v5  ;;  %v1378_v4 = vld [vmem:[%s20017_s1 + $0x2a00] sm:$0xff]  ;;  %v1415_v56 = vld [vmem:[%s20017_s1 + $0x2b28] sm:$0xff] }
 0x28c   :  { %v1382_v5 = vld [vmem:[%s20017_s1 + $0x2a20] sm:$0xff] }
 0x28d   :  { %v13985_v20 = vcombine.low %v1378_v4, %v1382_v5 }
 0x28e   :  { %10179 = vmatpush1.bf16.msra.mxu0 %v13937_v10  ;;  %10712 = vmatpush1.bf16.msra.mxu1 %v13939_v11  ;;  %v13986_v10 = vcombine.high %v1378_v4, %v1382_v5  ;;  %v13988_v11 = vcombine.high %v1379_v23, %v1383_v6  ;;  %v1422_v4 = vld [vmem:[%s20017_s1 + $0x2b60] sm:$0xff]  ;;  %v1419_v5 = vld [vmem:[%s20017_s1 + $0x2b48] sm:$0xff] }
 0x28f   :  { %10180 = vmatprep.subr.bf16.mxu0 %v13946_v13  ;;  %10713 = vmatprep.subr.bf16.mxu1 %v13948_v14  ;;  %v1386_v13 = vld [vmem:[%s20017_s1 + $0x2a40] sm:$0xff]  ;;  %v1423_v23 = vld [vmem:[%s20017_s1 + $0x2b68] sm:$0xff] }
 0x290   :  { %v1390_v14 = vld [vmem:[%s20017_s1 + $0x2a60] sm:$0xff] }
 0x291   :  { %v13993_v33 = vcombine.low %v1386_v13, %v1390_v14 }
 0x292   :  { %10181 = vmatpush1.bf16.msra.mxu0 %v13945_v24  ;;  %10714 = vmatpush1.bf16.msra.mxu1 %v13947_v26  ;;  %v13994_v24 = vcombine.high %v1386_v13, %v1390_v14  ;;  %v13996_v26 = vcombine.high %v1387_v17, %v1391_v53  ;;  %v1430_v13 = vld [vmem:[%s20017_s1 + $0x2ba0] sm:$0xff]  ;;  %v1427_v14 = vld [vmem:[%s20017_s1 + $0x2b88] sm:$0xff] }
 0x293   :  { %10182 = vmatprep.subr.bf16.mxu0 %v13954_v49  ;;  %10715 = vmatprep.subr.bf16.mxu1 %v13956_v15  ;;  %v1394_v49 = vld [vmem:[%s20017_s1 + $0x2a80] sm:$0xff] }
 0x294   :  { %v1398_v15 = vld [vmem:[%s20017_s1 + $0x2aa0] sm:$0xff] }
 0x295   :  { %v14001_v42 = vcombine.low %v1394_v49, %v1398_v15 }
 0x296   :  { %10183 = vmatpush1.bf16.msra.mxu0 %v13953_v34  ;;  %10716 = vmatpush1.bf16.msra.mxu1 %v13955_v35  ;;  %v13995_v34 = vcombine.low %v1387_v17, %v1391_v53  ;;  %v14002_v35 = vcombine.high %v1394_v49, %v1398_v15  ;;  %v1431_v17 = vld [vmem:[%s20017_s1 + $0x2ba8] sm:$0xff]  ;;  %v1438_v49 = vld [vmem:[%s20017_s1 + $0x2be0] sm:$0xff] }
 0x297   :  { %10184 = vmatprep.subr.bf16.mxu0 %v13962_v37  ;;  %10717 = vmatprep.subr.bf16.mxu1 %v13964_v38  ;;  %v14004_v37 = vcombine.high %v1395_v29, %v1399_v32  ;;  %v1402_v38 = vld [vmem:[%s20017_s1 + $0x2ac0] sm:$0xff]  ;;  %v1435_v15 = vld [vmem:[%s20017_s1 + $0x2bc8] sm:$0xff] }
 0x298   :  { %v14009_v3 = vcombine.low %v1402_v38, %v1406_v40 }
 0x29a   :  { %10185 = vmatpush1.bf16.msra.mxu0 %v13961_v44  ;;  %10718 = vmatpush1.bf16.msra.mxu1 %v13963_v47  ;;  %v14003_v44 = vcombine.low %v1395_v29, %v1399_v32  ;;  %v14010_v47 = vcombine.high %v1402_v38, %v1406_v40  ;;  %v1439_v29 = vld [vmem:[%s20017_s1 + $0x2be8] sm:$0xff]  ;;  %v1446_v38 = vld [vmem:[%s20017_s1 + $0x2c20] sm:$0xff] }
 0x29b   :  { %10186 = vmatprep.subr.bf16.mxu0 %v13970_v51  ;;  %10719 = vmatprep.subr.bf16.mxu1 %v13972_v18  ;;  %v14012_v51 = vcombine.high %v1403_v41, %v1407_v25  ;;  %v1410_v18 = vld [vmem:[%s20017_s1 + $0x2b00] sm:$0xff]  ;;  %v1443_v40 = vld [vmem:[%s20017_s1 + $0x2c08] sm:$0xff] }
 0x29c   :  { %v14017_v6 = vcombine.low %v1410_v18, %v1414_v52 }
 0x29e   :  { %10187 = vmatpush1.bf16.msra.mxu0 %v13969_v61  ;;  %10720 = vmatpush1.bf16.msra.mxu1 %v13971_v39  ;;  %v14011_v61 = vcombine.low %v1403_v41, %v1407_v25  ;;  %v14018_v39 = vcombine.high %v1410_v18, %v1414_v52  ;;  %v1447_v41 = vld [vmem:[%s20017_s1 + $0x2c28] sm:$0xff]  ;;  %v1454_v18 = vld [vmem:[%s20017_s1 + $0x2c60] sm:$0xff]  ;;  %v17035_v52 = vcombine.low %v16835_v48, %v16835_v48 }
 0x29f   :  { %10188 = vmatprep.subr.bf16.mxu0 %v13978_v0  ;;  %10721 = vmatprep.subr.bf16.mxu1 %v13980_v2  ;;  %v14020_v0 = vcombine.high %v1411_v54, %v1415_v56  ;;  %v1418_v2 = vld [vmem:[%s20017_s1 + $0x2b40] sm:$0xff] }
 0x2a0   :  { %v14025_v53 = vcombine.low %v1418_v2, %v1422_v4 }
 0x2a2   :  { %10189 = vmatpush1.bf16.msra.mxu0 %v13977_v7  ;;  %10722 = vmatpush1.bf16.msra.mxu1 %v13979_v8  ;;  %v14019_v7 = vcombine.low %v1411_v54, %v1415_v56  ;;  %v14026_v8 = vcombine.high %v1418_v2, %v1422_v4  ;;  %v1451_v54 = vld [vmem:[%s20017_s1 + $0x2c48] sm:$0xff]  ;;  %v1458_v2 = vld [vmem:[%s20017_s1 + $0x2c80] sm:$0xff] }
 0x2a3   :  { %10190 = vmatprep.subr.bf16.mxu0 %v13986_v10  ;;  %10723 = vmatprep.subr.bf16.mxu1 %v13988_v11  ;;  %v14028_v10 = vcombine.high %v1419_v5, %v1423_v23  ;;  %v1426_v11 = vld [vmem:[%s20017_s1 + $0x2b80] sm:$0xff]  ;;  %v1455_v56 = vld [vmem:[%s20017_s1 + $0x2c68] sm:$0xff] }
 0x2a4   :  { %v14033_v32 = vcombine.low %v1426_v11, %v1430_v13  ;;  %v1462_v4 = vld [vmem:[%s20017_s1 + $0x2ca0] sm:$0xff] }
 0x2a6   :  { %10191 = vmatpush1.bf16.msra.mxu0 %v13985_v20  ;;  %10724 = vmatpush1.bf16.msra.mxu1 %v13987_v59  ;;  %v14027_v20 = vcombine.low %v1419_v5, %v1423_v23  ;;  %v14034_v59 = vcombine.high %v1426_v11, %v1430_v13  ;;  %v1459_v23 = vld [vmem:[%s20017_s1 + $0x2c88] sm:$0xff]  ;;  %v1466_v13 = vld [vmem:[%s20017_s1 + $0x2cc0] sm:$0xff] }
 0x2a7   :  { %10192 = vmatprep.subr.bf16.mxu0 %v13994_v24  ;;  %10725 = vmatprep.subr.bf16.mxu1 %v13996_v26  ;;  %v14036_v24 = vcombine.high %v1427_v14, %v1431_v17  ;;  %v1434_v26 = vld [vmem:[%s20017_s1 + $0x2bc0] sm:$0xff] }
 0x2a8   :  { %v14041_v25 = vcombine.low %v1434_v26, %v1438_v49 }
 0x2aa   :  { %10193 = vmatpush1.bf16.msra.mxu0 %v13993_v33  ;;  %10726 = vmatpush1.bf16.msra.mxu1 %v13995_v34  ;;  %v14035_v33 = vcombine.low %v1427_v14, %v1431_v17  ;;  %v14042_v34 = vcombine.high %v1434_v26, %v1438_v49  ;;  %v1470_v14 = vld [vmem:[%s20017_s1 + $0x2ce0] sm:$0xff]  ;;  %v1467_v17 = vld [vmem:[%s20017_s1 + $0x2cc8] sm:$0xff] }
 0x2ab   :  { %10194 = vmatprep.subr.bf16.mxu0 %v14002_v35  ;;  %10727 = vmatprep.subr.bf16.mxu1 %v14004_v37  ;;  %v14044_v35 = vcombine.high %v1435_v15, %v1439_v29  ;;  %v1442_v37 = vld [vmem:[%s20017_s1 + $0x2c00] sm:$0xff] }
 0x2ac   :  { %v1474_v49 = vld [vmem:[%s20017_s1 + $0x2d00] sm:$0xff] }
 0x2ae   :  { %10195 = vmatpush1.bf16.msra.mxu0 %v14001_v42  ;;  %10728 = vmatpush1.bf16.msra.mxu1 %v14003_v44  ;;  %v14043_v42 = vcombine.low %v1435_v15, %v1439_v29  ;;  %v14050_v44 = vcombine.high %v1442_v37, %v1446_v38  ;;  %v1478_v15 = vld [vmem:[%s20017_s1 + $0x2d20] sm:$0xff]  ;;  %v1475_v29 = vld [vmem:[%s20017_s1 + $0x2d08] sm:$0xff] }
 0x2af   :  { %10196 = vmatprep.subr.bf16.mxu0 %v14010_v47  ;;  %10729 = vmatprep.subr.bf16.mxu1 %v14012_v51  ;;  %v14052_v47 = vcombine.high %v1443_v40, %v1447_v41  ;;  %v1450_v51 = vld [vmem:[%s20017_s1 + $0x2c40] sm:$0xff] }
 0x2b0   :  { %v14058_v48 = vcombine.high %v1450_v51, %v1454_v18 }
 0x2b2   :  { %10197 = vmatpush1.bf16.msra.mxu0 %v14009_v3  ;;  %10730 = vmatpush1.bf16.msra.mxu1 %v14011_v61  ;;  %v17046_v3 = vld [vmem:[%s20018_s0 + $0x58] sm:$0xff]  ;;  %v14049_v61 = vcombine.low %v1442_v37, %v1446_v38  ;;  %v1482_v38 = vld [vmem:[%s20017_s1 + $0x2d40] sm:$0xff] }
 0x2b3   :  { %10198 = vmatprep.subr.bf16.mxu0 %v14018_v39  ;;  %10731 = vmatprep.subr.bf16.mxu1 %v14020_v0  ;;  %v14051_v39 = vcombine.low %v1443_v40, %v1447_v41  ;;  %v14060_v0 = vcombine.high %v1451_v54, %v1455_v56  ;;  %v17056_v5 = vcombine.high %v17046_v3, %v17046_v3  ;;  %v1486_v40 = vld [vmem:[%s20017_s1 + $0x2d60] sm:$0xff]  ;;  %v1483_v41 = vld [vmem:[%s20017_s1 + $0x2d48] sm:$0xff] }
 0x2b6   :  { %10199 = vmatpush1.bf16.msra.mxu0 %v14017_v6  ;;  %10732 = vmatpush1.bf16.msra.mxu1 %v14019_v7  ;;  %v1463_v6 = vld [vmem:[%s20017_s1 + $0x2ca8] sm:$0xff]  ;;  %v14057_v7 = vcombine.low %v1450_v51, %v1454_v18  ;;  %v1490_v18 = vld [vmem:[%s20017_s1 + $0x2d80] sm:$0xff] }
 0x2b7   :  { %10200 = vmatprep.subr.bf16.mxu0 %v14026_v8  ;;  %10733 = vmatprep.subr.bf16.mxu1 %v14028_v10  ;;  %v14059_v8 = vcombine.low %v1451_v54, %v1455_v56  ;;  %v14066_v10 = vcombine.high %v1458_v2, %v1462_v4  ;;  %v14068_v11 = vcombine.high %v1459_v23, %v1463_v6  ;;  %v1494_v54 = vld [vmem:[%s20017_s1 + $0x2da0] sm:$0xff]  ;;  %v1491_v56 = vld [vmem:[%s20017_s1 + $0x2d88] sm:$0xff] }
 0x2ba   :  { %10201 = vmatpush1.bf16.msra.mxu0 %v14025_v53  ;;  %10734 = vmatpush1.bf16.msra.mxu1 %v14027_v20  ;;  %v1471_v53 = vld [vmem:[%s20017_s1 + $0x2ce8] sm:$0xff]  ;;  %v14065_v20 = vcombine.low %v1458_v2, %v1462_v4  ;;  %v1498_v4 = vld [vmem:[%s20017_s1 + $0x2dc0] sm:$0xff] }
 0x2bb   :  { %10202 = vmatprep.subr.bf16.mxu0 %v14034_v59  ;;  %10735 = vmatprep.subr.bf16.mxu1 %v14036_v24  ;;  %v14067_v59 = vcombine.low %v1459_v23, %v1463_v6  ;;  %v14074_v24 = vcombine.high %v1466_v13, %v1470_v14  ;;  %v14076_v26 = vcombine.high %v1467_v17, %v1471_v53  ;;  %v1502_v23 = vld [vmem:[%s20017_s1 + $0x2de0] sm:$0xff]  ;;  %v1499_v6 = vld [vmem:[%s20017_s1 + $0x2dc8] sm:$0xff] }
 0x2be   :  { %10203 = vmatpush1.bf16.msra.mxu0 %v14033_v32  ;;  %10736 = vmatpush1.bf16.msra.mxu1 %v14035_v33  ;;  %v1479_v32 = vld [vmem:[%s20017_s1 + $0x2d28] sm:$0xff]  ;;  %v14073_v33 = vcombine.low %v1466_v13, %v1470_v14  ;;  %v1506_v14 = vld [vmem:[%s20017_s1 + $0x2e00] sm:$0xff] }
 0x2bf   :  { %10204 = vmatprep.subr.bf16.mxu0 %v14042_v34  ;;  %10737 = vmatprep.subr.bf16.mxu1 %v14044_v35  ;;  %v14075_v34 = vcombine.low %v1467_v17, %v1471_v53  ;;  %v14082_v35 = vcombine.high %v1474_v49, %v1478_v15  ;;  %v14084_v37 = vcombine.high %v1475_v29, %v1479_v32  ;;  %v1510_v17 = vld [vmem:[%s20017_s1 + $0x2e20] sm:$0xff]  ;;  %v1507_v53 = vld [vmem:[%s20017_s1 + $0x2e08] sm:$0xff] }
 0x2c2   :  { %10205 = vmatpush1.bf16.msra.mxu0 %v14041_v25  ;;  %10738 = vmatpush1.bf16.msra.mxu1 %v14043_v42  ;;  %v1487_v25 = vld [vmem:[%s20017_s1 + $0x2d68] sm:$0xff]  ;;  %v14081_v42 = vcombine.low %v1474_v49, %v1478_v15  ;;  %v1514_v15 = vld [vmem:[%s20017_s1 + $0x2e40] sm:$0xff] }
 0x2c3   :  { %10215 = vmatprep.subr.bf16.mxu0 %v14050_v44  ;;  %10748 = vmatprep.subr.bf16.mxu1 %v14052_v47  ;;  %v14083_v44 = vcombine.low %v1475_v29, %v1479_v32  ;;  %v14090_v47 = vcombine.high %v1482_v38, %v1486_v40  ;;  %v14092_v51 = vcombine.high %v1483_v41, %v1487_v25  ;;  %v1518_v29 = vld [vmem:[%s20017_s1 + $0x2e60] sm:$0xff]  ;;  %v1515_v32 = vld [vmem:[%s20017_s1 + $0x2e48] sm:$0xff] }
 0x2c5   :  { %10207 = vmatmul.mubr.bf16.vlgmr.msra.gmra.mrb[0].mxu0 %v17035_v52  ;;  %10740 = vmatmul.mubr.bf16.vlgmr.msra.gmra.mrb[0].mxu1 %v17035_v52 }
 0x2c6   :  { %10216 = vmatpush1.bf16.msra.mxu0 %v14049_v61  ;;  %10749 = vmatpush1.bf16.msra.mxu1 %v14051_v39  ;;  %v1495_v61 = vld [vmem:[%s20017_s1 + $0x2da8] sm:$0xff]  ;;  %v14089_v39 = vcombine.low %v1482_v38, %v1486_v40  ;;  %v1522_v40 = vld [vmem:[%s20017_s1 + $0x2e80] sm:$0xff] }
 0x2c7   :  { %10217 = vmatprep.subr.bf16.mxu0 %v14058_v48  ;;  %10750 = vmatprep.subr.bf16.mxu1 %v14060_v0  ;;  %v14091_v48 = vcombine.low %v1483_v41, %v1487_v25  ;;  %v14098_v0 = vcombine.high %v1490_v18, %v1494_v54  ;;  %v14100_v2 = vcombine.high %v1491_v56, %v1495_v61  ;;  %v1526_v41 = vld [vmem:[%s20017_s1 + $0x2ea0] sm:$0xff]  ;;  %v1523_v25 = vld [vmem:[%s20017_s1 + $0x2e88] sm:$0xff] }
 0x2c8   :  { %10247 = vmatprep.mubr.bf16.mxu0 %v17056_v5  ;;  %10780 = vmatprep.mubr.bf16.mxu1 %v17056_v5 }
 0x2ca   :  { %10218 = vmatpush1.bf16.msra.mxu0 %v14057_v7  ;;  %10751 = vmatpush1.bf16.msra.mxu1 %v14059_v8  ;;  %v1503_v7 = vld [vmem:[%s20017_s1 + $0x2de8] sm:$0xff]  ;;  %v14097_v8 = vcombine.low %v1490_v18, %v1494_v54  ;;  %v1530_v54 = vld [vmem:[%s20017_s1 + $0x2ec0] sm:$0xff] }
 0x2cb   :  { %10219 = vmatprep.subr.bf16.mxu0 %v14066_v10  ;;  %10752 = vmatprep.subr.bf16.mxu1 %v14068_v11  ;;  %v14099_v10 = vcombine.low %v1491_v56, %v1495_v61  ;;  %v14106_v11 = vcombine.high %v1498_v4, %v1502_v23  ;;  %v14108_v13 = vcombine.high %v1499_v6, %v1503_v7  ;;  %v1534_v56 = vld [vmem:[%s20017_s1 + $0x2ee0] sm:$0xff]  ;;  %v1531_v61 = vld [vmem:[%s20017_s1 + $0x2ec8] sm:$0xff] }
 0x2ce   :  { %10220 = vmatpush1.bf16.msra.mxu0 %v14065_v20  ;;  %10753 = vmatpush1.bf16.msra.mxu1 %v14067_v59  ;;  %v1511_v20 = vld [vmem:[%s20017_s1 + $0x2e28] sm:$0xff]  ;;  %v14105_v59 = vcombine.low %v1498_v4, %v1502_v23  ;;  %v1538_v23 = vld [vmem:[%s20017_s1 + $0x2f00] sm:$0xff] }
 0x2cf   :  { %10221 = vmatprep.subr.bf16.mxu0 %v14074_v24  ;;  %10754 = vmatprep.subr.bf16.mxu1 %v14076_v26  ;;  %v14107_v24 = vcombine.low %v1499_v6, %v1503_v7  ;;  %v14114_v26 = vcombine.high %v1506_v14, %v1510_v17  ;;  %v14116_v49 = vcombine.high %v1507_v53, %v1511_v20  ;;  %v1542_v6 = vld [vmem:[%s20017_s1 + $0x2f20] sm:$0xff]  ;;  %v1539_v7 = vld [vmem:[%s20017_s1 + $0x2f08] sm:$0xff] }
 0x2d2   :  { %10222 = vmatpush1.bf16.msra.mxu0 %v14073_v33  ;;  %10755 = vmatpush1.bf16.msra.mxu1 %v14075_v34  ;;  %v1519_v33 = vld [vmem:[%s20017_s1 + $0x2e68] sm:$0xff]  ;;  %v14113_v34 = vcombine.low %v1506_v14, %v1510_v17  ;;  %v1546_v17 = vld [vmem:[%s20017_s1 + $0x2f40] sm:$0xff] }
 0x2d3   :  { %10223 = vmatprep.subr.bf16.mxu0 %v14082_v35  ;;  %10756 = vmatprep.subr.bf16.mxu1 %v14084_v37  ;;  %v14115_v35 = vcombine.low %v1507_v53, %v1511_v20  ;;  %v14122_v37 = vcombine.high %v1514_v15, %v1518_v29  ;;  %v14124_v38 = vcombine.high %v1515_v32, %v1519_v33  ;;  %v1550_v53 = vld [vmem:[%s20017_s1 + $0x2f60] sm:$0xff]  ;;  %v1547_v20 = vld [vmem:[%s20017_s1 + $0x2f48] sm:$0xff] }
 0x2d6   :  { %10224 = vmatpush1.bf16.msra.mxu0 %v14081_v42  ;;  %10757 = vmatpush1.bf16.msra.mxu1 %v14083_v44  ;;  %v1527_v42 = vld [vmem:[%s20017_s1 + $0x2ea8] sm:$0xff]  ;;  %v14121_v44 = vcombine.low %v1514_v15, %v1518_v29  ;;  %v1554_v29 = vld [vmem:[%s20017_s1 + $0x2f80] sm:$0xff] }
 0x2d7   :  { %10225 = vmatprep.subr.bf16.mxu0 %v14090_v47  ;;  %10758 = vmatprep.subr.bf16.mxu1 %v14092_v51  ;;  %v14123_v47 = vcombine.low %v1515_v32, %v1519_v33  ;;  %v14130_v51 = vcombine.high %v1522_v40, %v1526_v41  ;;  %v14132_v18 = vcombine.high %v1523_v25, %v1527_v42  ;;  %v1558_v32 = vld [vmem:[%s20017_s1 + $0x2fa0] sm:$0xff]  ;;  %v1555_v33 = vld [vmem:[%s20017_s1 + $0x2f88] sm:$0xff] }
 0x2da   :  { %10226 = vmatpush1.bf16.msra.mxu0 %v14089_v39  ;;  %10759 = vmatpush1.bf16.msra.mxu1 %v14091_v48  ;;  %v1535_v39 = vld [vmem:[%s20017_s1 + $0x2ee8] sm:$0xff]  ;;  %v14129_v48 = vcombine.low %v1522_v40, %v1526_v41  ;;  %v1562_v41 = vld [vmem:[%s20017_s1 + $0x2fc0] sm:$0xff] }
 0x2db   :  { %10227 = vmatprep.subr.bf16.mxu0 %v14098_v0  ;;  %10760 = vmatprep.subr.bf16.mxu1 %v14100_v2  ;;  %v14131_v0 = vcombine.low %v1523_v25, %v1527_v42  ;;  %v14138_v2 = vcombine.high %v1530_v54, %v1534_v56  ;;  %v14140_v4 = vcombine.high %v1531_v61, %v1535_v39  ;;  %v1566_v25 = vld [vmem:[%s20017_s1 + $0x2fe0] sm:$0xff]  ;;  %v1563_v42 = vld [vmem:[%s20017_s1 + $0x2fc8] sm:$0xff] }
 0x2de   :  { %10228 = vmatpush1.bf16.msra.mxu0 %v14097_v8  ;;  %10761 = vmatpush1.bf16.msra.mxu1 %v14099_v10  ;;  %v1543_v8 = vld [vmem:[%s20017_s1 + $0x2f28] sm:$0xff]  ;;  %v14137_v10 = vcombine.low %v1530_v54, %v1534_v56  ;;  %v1570_v56 = vld [vmem:[%s20017_s1 + $0x3000] sm:$0xff] }
 0x2df   :  { %10229 = vmatprep.subr.bf16.mxu0 %v14106_v11  ;;  %10762 = vmatprep.subr.bf16.mxu1 %v14108_v13  ;;  %v14139_v11 = vcombine.low %v1531_v61, %v1535_v39  ;;  %v14146_v13 = vcombine.high %v1538_v23, %v1542_v6  ;;  %v14148_v14 = vcombine.high %v1539_v7, %v1543_v8  ;;  %v1574_v61 = vld [vmem:[%s20017_s1 + $0x3020] sm:$0xff]  ;;  %v1571_v39 = vld [vmem:[%s20017_s1 + $0x3008] sm:$0xff] }
 0x2e2   :  { %10230 = vmatpush1.bf16.msra.mxu0 %v14105_v59  ;;  %10763 = vmatpush1.bf16.msra.mxu1 %v14107_v24  ;;  %v1551_v59 = vld [vmem:[%s20017_s1 + $0x2f68] sm:$0xff]  ;;  %v14145_v24 = vcombine.low %v1538_v23, %v1542_v6  ;;  %v1578_v6 = vld [vmem:[%s20017_s1 + $0x3040] sm:$0xff] }
 0x2e3   :  { %10231 = vmatprep.subr.bf16.mxu0 %v14114_v26  ;;  %10764 = vmatprep.subr.bf16.mxu1 %v14116_v49  ;;  %v14147_v26 = vcombine.low %v1539_v7, %v1543_v8  ;;  %v14154_v49 = vcombine.high %v1546_v17, %v1550_v53  ;;  %v14156_v15 = vcombine.high %v1547_v20, %v1551_v59  ;;  %v1582_v7 = vld [vmem:[%s20017_s1 + $0x3060] sm:$0xff] }
 0x2e4   :  { %v17244_v8 = vcombine.low %v17046_v3, %v17046_v3  ;;  %v1586_v3 = vld [vmem:[%s20017_s1 + $0x3080] sm:$0xff] }
 0x2e6   :  { %10232 = vmatpush1.bf16.msra.mxu0 %v14113_v34  ;;  %10765 = vmatpush1.bf16.msra.mxu1 %v14115_v35  ;;  %v1559_v34 = vld [vmem:[%s20017_s1 + $0x2fa8] sm:$0xff]  ;;  %v14153_v35 = vcombine.low %v1546_v17, %v1550_v53  ;;  %v14186_v17 = vcombine.high %v1578_v6, %v1582_v7 }
 0x2e7   :  { %10233 = vmatprep.subr.bf16.mxu0 %v14122_v37  ;;  %10766 = vmatprep.subr.bf16.mxu1 %v14124_v38  ;;  %v14155_v37 = vcombine.low %v1547_v20, %v1551_v59  ;;  %v14162_v38 = vcombine.high %v1554_v29, %v1558_v32  ;;  %v14164_v40 = vcombine.high %v1555_v33, %v1559_v34  ;;  %v1590_v20 = vld [vmem:[%s20017_s1 + $0x30a0] sm:$0xff]  ;;  %v1587_v59 = vld [vmem:[%s20017_s1 + $0x3088] sm:$0xff] }
 0x2ea   :  { %10234 = vmatpush1.bf16.msra.mxu0 %v14121_v44  ;;  %10767 = vmatpush1.bf16.msra.mxu1 %v14123_v47  ;;  %v1567_v44 = vld [vmem:[%s20017_s1 + $0x2fe8] sm:$0xff]  ;;  %v14161_v47 = vcombine.low %v1554_v29, %v1558_v32  ;;  %v1594_v32 = vld [vmem:[%s20017_s1 + $0x30c0] sm:$0xff] }
 0x2eb   :  { %10235 = vmatprep.subr.bf16.mxu0 %v14130_v51  ;;  %10768 = vmatprep.subr.bf16.mxu1 %v14132_v18  ;;  %v14163_v51 = vcombine.low %v1555_v33, %v1559_v34  ;;  %v14170_v18 = vcombine.high %v1562_v41, %v1566_v25  ;;  %v14172_v54 = vcombine.high %v1563_v42, %v1567_v44  ;;  %v1598_v33 = vld [vmem:[%s20017_s1 + $0x30e0] sm:$0xff]  ;;  %v1595_v34 = vld [vmem:[%s20017_s1 + $0x30c8] sm:$0xff] }
 0x2ee   :  { %10236 = vmatpush1.bf16.msra.mxu0 %v14129_v48  ;;  %10769 = vmatpush1.bf16.msra.mxu1 %v14131_v0  ;;  %v1575_v48 = vld [vmem:[%s20017_s1 + $0x3028] sm:$0xff]  ;;  %v14169_v0 = vcombine.low %v1562_v41, %v1566_v25  ;;  %v1602_v25 = vld [vmem:[%s20017_s1 + $0x3100] sm:$0xff] }
 0x2ef   :  { %10237 = vmatprep.subr.bf16.mxu0 %v14138_v2  ;;  %10770 = vmatprep.subr.bf16.mxu1 %v14140_v4  ;;  %v14171_v2 = vcombine.low %v1563_v42, %v1567_v44  ;;  %v14178_v4 = vcombine.high %v1570_v56, %v1574_v61  ;;  %v14180_v23 = vcombine.high %v1571_v39, %v1575_v48  ;;  %v1606_v42 = vld [vmem:[%s20017_s1 + $0x3120] sm:$0xff]  ;;  %v1603_v44 = vld [vmem:[%s20017_s1 + $0x3108] sm:$0xff] }
 0x2f2   :  { %10238 = vmatpush1.bf16.msra.mxu0 %v14137_v10  ;;  %10771 = vmatpush1.bf16.msra.mxu1 %v14139_v11  ;;  %v1579_v10 = vld [vmem:[%s20017_s1 + $0x3048] sm:$0xff] }
 0x2f3   :  { %10239 = vmatprep.subr.bf16.mxu0 %v14146_v13  ;;  %10772 = vmatprep.subr.bf16.mxu1 %v14148_v14  ;;  %v1583_v11 = vld [vmem:[%s20017_s1 + $0x3068] sm:$0xff]  ;;  %v14177_v13 = vcombine.low %v1570_v56, %v1574_v61  ;;  %v14179_v14 = vcombine.low %v1571_v39, %v1575_v48  ;;  %v1610_v61 = vld [vmem:[%s20017_s1 + $0x3140] sm:$0xff] }
 0x2f4   :  { %v14188_v53 = vcombine.high %v1579_v10, %v1583_v11  ;;  %v1614_v39 = vld [vmem:[%s20017_s1 + $0x3160] sm:$0xff]  ;;  %v1611_v48 = vld [vmem:[%s20017_s1 + $0x3148] sm:$0xff] }
 0x2f6   :  { %10240 = vmatpush1.bf16.msra.mxu0 %v14145_v24  ;;  %10773 = vmatpush1.bf16.msra.mxu1 %v14147_v26  ;;  %v1591_v24 = vld [vmem:[%s20017_s1 + $0x30a8] sm:$0xff]  ;;  %v14185_v26 = vcombine.low %v1578_v6, %v1582_v7  ;;  %v1618_v7 = vld [vmem:[%s20017_s1 + $0x3180] sm:$0xff] }
 0x2f7   :  { %10241 = vmatprep.subr.bf16.mxu0 %v14154_v49  ;;  %10774 = vmatprep.subr.bf16.mxu1 %v14156_v15  ;;  %v14187_v49 = vcombine.low %v1579_v10, %v1583_v11  ;;  %v14194_v15 = vcombine.high %v1586_v3, %v1590_v20  ;;  %v14196_v29 = vcombine.high %v1587_v59, %v1591_v24  ;;  %v1622_v10 = vld [vmem:[%s20017_s1 + $0x31a0] sm:$0xff]  ;;  %v1619_v11 = vld [vmem:[%s20017_s1 + $0x3188] sm:$0xff] }
 0x2fa   :  { %10242 = vmatpush1.bf16.msra.mxu0 %v14153_v35  ;;  %10775 = vmatpush1.bf16.msra.mxu1 %v14155_v37  ;;  %v1599_v35 = vld [vmem:[%s20017_s1 + $0x30e8] sm:$0xff]  ;;  %v14193_v37 = vcombine.low %v1586_v3, %v1590_v20  ;;  %v1626_v20 = vld [vmem:[%s20017_s1 + $0x31c0] sm:$0xff] }
 0x2fb   :  { %10243 = vmatprep.subr.bf16.mxu0 %v14162_v38  ;;  %10776 = vmatprep.subr.bf16.mxu1 %v14164_v40  ;;  %v14195_v38 = vcombine.low %v1587_v59, %v1591_v24  ;;  %v14202_v40 = vcombine.high %v1594_v32, %v1598_v33  ;;  %v14204_v41 = vcombine.high %v1595_v34, %v1599_v35  ;;  %v1630_v59 = vld [vmem:[%s20017_s1 + $0x31e0] sm:$0xff]  ;;  %v1627_v24 = vld [vmem:[%s20017_s1 + $0x31c8] sm:$0xff] }
 0x2fe   :  { %10244 = vmatpush1.bf16.msra.mxu0 %v14161_v47  ;;  %10777 = vmatpush1.bf16.msra.mxu1 %v14163_v51  ;;  %v1607_v47 = vld [vmem:[%s20017_s1 + $0x3128] sm:$0xff]  ;;  %v14201_v51 = vcombine.low %v1594_v32, %v1598_v33  ;;  %v36_v33 = vld [vmem:[%s20017_s1 + $0x10] sm:$0xff] }
 0x2ff   :  { %10245 = vmatprep.subr.bf16.mxu0 %v14170_v18  ;;  %10778 = vmatprep.subr.bf16.mxu1 %v14172_v54  ;;  %v14203_v18 = vcombine.low %v1595_v34, %v1599_v35  ;;  %v14210_v54 = vcombine.high %v1602_v25, %v1606_v42  ;;  %v14212_v56 = vcombine.high %v1603_v44, %v1607_v47  ;;  %v40_v34 = vld [vmem:[%s20017_s1 + $0x30] sm:$0xff]  ;;  %v37_v35 = vld [vmem:[%s20017_s1 + $0x18] sm:$0xff] }
 0x302   :  { %10246 = vmatpush1.bf16.msra.mxu0 %v14169_v0  ;;  %10779 = vmatpush1.bf16.msra.mxu1 %v14171_v2  ;;  %v1615_v0 = vld [vmem:[%s20017_s1 + $0x3168] sm:$0xff]  ;;  %v14209_v2 = vcombine.low %v1602_v25, %v1606_v42  ;;  %v44_v42 = vld [vmem:[%s20017_s1 + $0x50] sm:$0xff] }
 0x303   :  { %10256 = vmatprep.subr.bf16.mxu0 %v14178_v4  ;;  %10789 = vmatprep.subr.bf16.mxu1 %v14180_v23  ;;  %v14211_v4 = vcombine.low %v1603_v44, %v1607_v47  ;;  %v14218_v23 = vcombine.high %v1610_v61, %v1614_v39  ;;  %v14220_v6 = vcombine.high %v1611_v48, %v1615_v0  ;;  %v48_v44 = vld [vmem:[%s20017_s1 + $0x70] sm:$0xff]  ;;  %v14622_v47 = vld [vmem:[%s20018_s0 + $0x60] ss:$0 sps:$4 sm:$0xff]  }
 0x305   :  { %10248 = vmatmul.mubr.bf16.vlgmr.msra.gmra.mrb[0].mxu0 %v17244_v8  ;;  %10781 = vmatmul.mubr.bf16.vlgmr.msra.gmra.mrb[0].mxu1 %v17244_v8 }
 0x306   :  { %10257 = vmatpush1.bf16.msra.mxu0 %v14177_v13  ;;  %10790 = vmatpush1.bf16.msra.mxu1 %v14179_v14  ;;  %v1623_v13 = vld [vmem:[%s20017_s1 + $0x31a8] sm:$0xff]  ;;  %v14217_v14 = vcombine.low %v1610_v61, %v1614_v39  ;;  %v12654_v61 = vcombine.high %v44_v42, %v48_v44 }
 0x307   :  { %10258 = vmatprep.subr.bf16.mxu0 %v14186_v17  ;;  %10791 = vmatprep.subr.bf16.mxu1 %v14188_v53  ;;  %v14219_v17 = vcombine.low %v1611_v48, %v1615_v0  ;;  %v14226_v53 = vcombine.high %v1618_v7, %v1622_v10  ;;  %v14228_v3 = vcombine.high %v1619_v11, %v1623_v13  ;;  %v52_v48 = vld [vmem:[%s20017_s1 + $0x90] sm:$0xff] }
 0x308   :  { %10288 = vmatprep.mubr.bf16.mxu0 %v14688_v28  ;;  %10821 = vmatprep.mubr.bf16.mxu1 %v14688_v28  ;;  %v56_v0 = vld [vmem:[%s20017_s1 + $0xb0] sm:$0xff] }
 0x30a   :  { %10259 = vmatpush1.bf16.msra.mxu0 %v14185_v26  ;;  %10792 = vmatpush1.bf16.msra.mxu1 %v14187_v49  ;;  %v1631_v26 = vld [vmem:[%s20017_s1 + $0x31e8] sm:$0xff]  ;;  %v14225_v49 = vcombine.low %v1618_v7, %v1622_v10  ;;  %v12662_v7 = vcombine.high %v52_v48, %v56_v0 }
 0x30b   :  { %10260 = vmatprep.subr.bf16.mxu0 %v14194_v15  ;;  %10793 = vmatprep.subr.bf16.mxu1 %v14196_v29  ;;  %v14227_v15 = vcombine.low %v1619_v11, %v1623_v13  ;;  %v14234_v29 = vcombine.high %v1626_v20, %v1630_v59  ;;  %v14236_v32 = vcombine.high %v1627_v24, %v1631_v26  ;;  %v60_v11 = vld [vmem:[%s20017_s1 + $0xd0] sm:$0xff] }
 0x30c   :  { %v64_v13 = vld [vmem:[%s20017_s1 + $0xf0] sm:$0xff] }
 0x30e   :  { %10261 = vmatpush1.bf16.msra.mxu0 %v14193_v37  ;;  %10794 = vmatpush1.bf16.msra.mxu1 %v14195_v38  ;;  %v41_v37 = vld [vmem:[%s20017_s1 + $0x38] sm:$0xff]  ;;  %v14233_v38 = vcombine.low %v1626_v20, %v1630_v59  ;;  %v12670_v20 = vcombine.high %v60_v11, %v64_v13 }
 0x30f   :  { %10262 = vmatprep.subr.bf16.mxu0 %v14202_v40  ;;  %10795 = vmatprep.subr.bf16.mxu1 %v14204_v41  ;;  %v14235_v40 = vcombine.low %v1627_v24, %v1631_v26  ;;  %v12646_v41 = vcombine.high %v36_v33, %v40_v34  ;;  %v12648_v25 = vcombine.high %v37_v35, %v41_v37  ;;  %v68_v24 = vld [vmem:[%s20017_s1 + $0x110] sm:$0xff] }
 0x310   :  { %v72_v26 = vld [vmem:[%s20017_s1 + $0x130] sm:$0xff] }
 0x312   :  { %10263 = vmatpush1.bf16.msra.mxu0 %v14201_v51  ;;  %10796 = vmatpush1.bf16.msra.mxu1 %v14203_v18  ;;  %v45_v51 = vld [vmem:[%s20017_s1 + $0x58] sm:$0xff] }
 0x313   :  { %10264 = vmatprep.subr.bf16.mxu0 %v14210_v54  ;;  %10797 = vmatprep.subr.bf16.mxu1 %v14212_v56  ;;  %v49_v18 = vld [vmem:[%s20017_s1 + $0x78] sm:$0xff]  ;;  %v12645_v54 = vcombine.low %v36_v33, %v40_v34  ;;  %v12647_v56 = vcombine.low %v37_v35, %v41_v37  ;;  %v76_v34 = vld [vmem:[%s20017_s1 + $0x150] sm:$0xff] }
 0x314   :  { %v12656_v39 = vcombine.high %v45_v51, %v49_v18  ;;  %v80_v35 = vld [vmem:[%s20017_s1 + $0x170] sm:$0xff]  ;;  %v77_v37 = vld [vmem:[%s20017_s1 + $0x158] sm:$0xff] }
 0x316   :  { %10265 = vmatpush1.bf16.msra.mxu0 %v14209_v2  ;;  %10798 = vmatpush1.bf16.msra.mxu1 %v14211_v4  ;;  %v53_v2 = vld [vmem:[%s20017_s1 + $0x98] sm:$0xff] }
 0x317   :  { %10266 = vmatprep.subr.bf16.mxu0 %v14218_v23  ;;  %10799 = vmatprep.subr.bf16.mxu1 %v14220_v6  ;;  %v57_v4 = vld [vmem:[%s20017_s1 + $0xb8] sm:$0xff]  ;;  %v12653_v23 = vcombine.low %v44_v42, %v48_v44  ;;  %v12655_v6 = vcombine.low %v45_v51, %v49_v18  ;;  %v84_v44 = vld [vmem:[%s20017_s1 + $0x190] sm:$0xff] }
 0x318   :  { %v12664_v10 = vcombine.high %v53_v2, %v57_v4  ;;  %v85_v51 = vld [vmem:[%s20017_s1 + $0x198] sm:$0xff] }
 0x319   :  { %v89_v18 = vld [vmem:[%s20017_s1 + $0x1b8] sm:$0xff] }
 0x31a   :  { %10267 = vmatpush1.bf16.msra.mxu0 %v14217_v14  ;;  %10800 = vmatpush1.bf16.msra.mxu1 %v14219_v17  ;;  %v61_v14 = vld [vmem:[%s20017_s1 + $0xd8] sm:$0xff] }
 0x31b   :  { %10268 = vmatprep.subr.bf16.mxu0 %v14226_v53  ;;  %10801 = vmatprep.subr.bf16.mxu1 %v14228_v3  ;;  %v65_v17 = vld [vmem:[%s20017_s1 + $0xf8] sm:$0xff]  ;;  %v12661_v53 = vcombine.low %v52_v48, %v56_v0  ;;  %v12663_v3 = vcombine.low %v53_v2, %v57_v4  ;;  %v92_v48 = vld [vmem:[%s20017_s1 + $0x1d0] sm:$0xff] }
 0x31c   :  { %v12672_v59 = vcombine.high %v61_v14, %v65_v17  ;;  %v96_v0 = vld [vmem:[%s20017_s1 + $0x1f0] sm:$0xff]  ;;  %v93_v2 = vld [vmem:[%s20017_s1 + $0x1d8] sm:$0xff] }
 0x31d   :  { %v97_v4 = vld [vmem:[%s20017_s1 + $0x1f8] sm:$0xff] }
 0x31e   :  { %10269 = vmatpush1.bf16.msra.mxu0 %v14225_v49  ;;  %10802 = vmatpush1.bf16.msra.mxu1 %v14227_v15  ;;  %v73_v49 = vld [vmem:[%s20017_s1 + $0x138] sm:$0xff]  ;;  %v12669_v15 = vcombine.low %v60_v11, %v64_v13  ;;  %v100_v11 = vld [vmem:[%s20017_s1 + $0x210] sm:$0xff] }
 0x31f   :  { %10270 = vmatprep.subr.bf16.mxu0 %v14234_v29  ;;  %10803 = vmatprep.subr.bf16.mxu1 %v14236_v32  ;;  %v12671_v29 = vcombine.low %v61_v14, %v65_v17  ;;  %v12678_v32 = vcombine.high %v68_v24, %v72_v26  ;;  %v104_v13 = vld [vmem:[%s20017_s1 + $0x230] sm:$0xff]  ;;  %v101_v14 = vld [vmem:[%s20017_s1 + $0x218] sm:$0xff] }
 0x320   :  { %v105_v17 = vld [vmem:[%s20017_s1 + $0x238] sm:$0xff] }
 0x322   :  { %10271 = vmatpush1.bf16.msra.mxu0 %v14233_v38  ;;  %10804 = vmatpush1.bf16.msra.mxu1 %v14235_v40  ;;  %v81_v38 = vld [vmem:[%s20017_s1 + $0x178] sm:$0xff]  ;;  %v12677_v40 = vcombine.low %v68_v24, %v72_v26  ;;  %v108_v24 = vld [vmem:[%s20017_s1 + $0x250] sm:$0xff] }
 0x323   :  { %10830 = vmatprep.subr.bf16.mxu0 %v12646_v41  ;;  %11363 = vmatprep.subr.bf16.mxu1 %v12648_v25  ;;  %v12686_v25 = vcombine.high %v76_v34, %v80_v35  ;;  %v12688_v42 = vcombine.high %v77_v37, %v81_v38  ;;  %v112_v26 = vld [vmem:[%s20017_s1 + $0x270] sm:$0xff] }
 0x325   :  { %10289 = vmatmul.mubr.bf16.vlgmr.msra.gmra.mrb[0].mxu0 %v14622_v47  ;;  %10822 = vmatmul.mubr.bf16.vlgmr.msra.gmra.mrb[0].mxu1 %v14622_v47  ;;  %v88_v47 = vld [vmem:[%s20017_s1 + $0x1b0] sm:$0xff] }
 0x326   :  { %10831 = vmatpush1.bf16.msra.mxu0 %v12645_v54  ;;  %11364 = vmatpush1.bf16.msra.mxu1 %v12647_v56  ;;  %v12685_v54 = vcombine.low %v76_v34, %v80_v35  ;;  %v12687_v56 = vcombine.low %v77_v37, %v81_v38  ;;  %v116_v34 = vld [vmem:[%s20017_s1 + $0x290] sm:$0xff]  ;;  %v117_v37 = vld [vmem:[%s20017_s1 + $0x298] sm:$0xff] }
 0x327   :  { %10832 = vmatprep.subr.bf16.mxu0 %v12654_v61  ;;  %11365 = vmatprep.subr.bf16.mxu1 %v12656_v39  ;;  %v12694_v61 = vcombine.high %v84_v44, %v88_v47  ;;  %v12696_v39 = vcombine.high %v85_v51, %v89_v18  ;;  %v120_v35 = vld [vmem:[%s20017_s1 + $0x2b0] sm:$0xff]  ;;  %v121_v38 = vld [vmem:[%s20017_s1 + $0x2b8] sm:$0xff] }
 0x328   :  { %10862 = vmatprep.mubr.bf16.mxu0 %v14817_v57  ;;  %11395 = vmatprep.mubr.bf16.mxu1 %v14817_v57  ;;  %v69_v57 = vld [vmem:[%s20017_s1 + $0x118] sm:$0xff] }
 0x329   :  { %v12680_v33 = vcombine.high %v69_v57, %v73_v49  ;;  %v12679_v41 = vcombine.low %v69_v57, %v73_v49  ;;  %v109_v57 = vld [vmem:[%s20017_s1 + $0x258] sm:$0xff] }
 0x32a   :  { %10833 = vmatpush1.bf16.msra.mxu0 %v12653_v23  ;;  %11366 = vmatpush1.bf16.msra.mxu1 %v12655_v6  ;;  %v12693_v23 = vcombine.low %v84_v44, %v88_v47  ;;  %v12695_v6 = vcombine.low %v85_v51, %v89_v18  ;;  %v113_v49 = vld [vmem:[%s20017_s1 + $0x278] sm:$0xff]  ;;  %v124_v44 = vld [vmem:[%s20017_s1 + $0x2d0] sm:$0xff] }
 0x32b   :  { %10834 = vmatprep.subr.bf16.mxu0 %v12662_v7  ;;  %11367 = vmatprep.subr.bf16.mxu1 %v12664_v10  ;;  %v12702_v7 = vcombine.high %v92_v48, %v96_v0  ;;  %v12704_v10 = vcombine.high %v93_v2, %v97_v4  ;;  %v128_v47 = vld [vmem:[%s20017_s1 + $0x2f0] sm:$0xff]  ;;  %v125_v51 = vld [vmem:[%s20017_s1 + $0x2d8] sm:$0xff] }
 0x32c   :  { %v129_v18 = vld [vmem:[%s20017_s1 + $0x2f8] sm:$0xff] }
 0x32e   :  { %10835 = vmatpush1.bf16.msra.mxu0 %v12661_v53  ;;  %11368 = vmatpush1.bf16.msra.mxu1 %v12663_v3  ;;  %v12701_v53 = vcombine.low %v92_v48, %v96_v0  ;;  %v12703_v3 = vcombine.low %v93_v2, %v97_v4  ;;  %v132_v48 = vld [vmem:[%s20017_s1 + $0x310] sm:$0xff]  ;;  %v133_v2 = vld [vmem:[%s20017_s1 + $0x318] sm:$0xff] }
 0x32f   :  { %10836 = vmatprep.subr.bf16.mxu0 %v12670_v20  ;;  %11369 = vmatprep.subr.bf16.mxu1 %v12672_v59  ;;  %v12710_v20 = vcombine.high %v100_v11, %v104_v13  ;;  %v12712_v59 = vcombine.high %v101_v14, %v105_v17  ;;  %v136_v0 = vld [vmem:[%s20017_s1 + $0x330] sm:$0xff]  ;;  %v137_v4 = vld [vmem:[%s20017_s1 + $0x338] sm:$0xff] }
 0x332   :  { %10837 = vmatpush1.bf16.msra.mxu0 %v12669_v15  ;;  %11370 = vmatpush1.bf16.msra.mxu1 %v12671_v29  ;;  %v12709_v15 = vcombine.low %v100_v11, %v104_v13  ;;  %v12711_v29 = vcombine.low %v101_v14, %v105_v17  ;;  %v140_v11 = vld [vmem:[%s20017_s1 + $0x350] sm:$0xff]  ;;  %v141_v14 = vld [vmem:[%s20017_s1 + $0x358] sm:$0xff] }
 0x333   :  { %10838 = vmatprep.subr.bf16.mxu0 %v12678_v32  ;;  %11371 = vmatprep.subr.bf16.mxu1 %v12680_v33  ;;  %v12718_v32 = vcombine.high %v108_v24, %v112_v26  ;;  %v12720_v33 = vcombine.high %v109_v57, %v113_v49  ;;  %v144_v13 = vld [vmem:[%s20017_s1 + $0x370] sm:$0xff]  ;;  %v145_v17 = vld [vmem:[%s20017_s1 + $0x378] sm:$0xff] }
 0x336   :  { %10839 = vmatpush1.bf16.msra.mxu0 %v12677_v40  ;;  %11372 = vmatpush1.bf16.msra.mxu1 %v12679_v41  ;;  %v12717_v40 = vcombine.low %v108_v24, %v112_v26  ;;  %v12719_v41 = vcombine.low %v109_v57, %v113_v49  ;;  %v148_v24 = vld [vmem:[%s20017_s1 + $0x390] sm:$0xff]  ;;  %v149_v57 = vld [vmem:[%s20017_s1 + $0x398] sm:$0xff] }
 0x337   :  { %10840 = vmatprep.subr.bf16.mxu0 %v12686_v25  ;;  %11373 = vmatprep.subr.bf16.mxu1 %v12688_v42  ;;  %v12726_v25 = vcombine.high %v116_v34, %v120_v35  ;;  %v12728_v42 = vcombine.high %v117_v37, %v121_v38  ;;  %v152_v26 = vld [vmem:[%s20017_s1 + $0x3b0] sm:$0xff]  ;;  %v153_v49 = vld [vmem:[%s20017_s1 + $0x3b8] sm:$0xff] }
 0x33a   :  { %10841 = vmatpush1.bf16.msra.mxu0 %v12685_v54  ;;  %11374 = vmatpush1.bf16.msra.mxu1 %v12687_v56  ;;  %v12725_v54 = vcombine.low %v116_v34, %v120_v35  ;;  %v12727_v56 = vcombine.low %v117_v37, %v121_v38  ;;  %v156_v34 = vld [vmem:[%s20017_s1 + $0x3d0] sm:$0xff]  ;;  %v157_v37 = vld [vmem:[%s20017_s1 + $0x3d8] sm:$0xff] }
 0x33b   :  { %10842 = vmatprep.subr.bf16.mxu0 %v12694_v61  ;;  %11375 = vmatprep.subr.bf16.mxu1 %v12696_v39  ;;  %v12734_v61 = vcombine.high %v124_v44, %v128_v47  ;;  %v12736_v39 = vcombine.high %v125_v51, %v129_v18  ;;  %v160_v35 = vld [vmem:[%s20017_s1 + $0x3f0] sm:$0xff]  ;;  %v161_v38 = vld [vmem:[%s20017_s1 + $0x3f8] sm:$0xff] }
 0x33e   :  { %10843 = vmatpush1.bf16.msra.mxu0 %v12693_v23  ;;  %11376 = vmatpush1.bf16.msra.mxu1 %v12695_v6  ;;  %v12733_v23 = vcombine.low %v124_v44, %v128_v47  ;;  %v12735_v6 = vcombine.low %v125_v51, %v129_v18  ;;  %v164_v44 = vld [vmem:[%s20017_s1 + $0x410] sm:$0xff]  ;;  %v165_v51 = vld [vmem:[%s20017_s1 + $0x418] sm:$0xff] }
 0x33f   :  { %10844 = vmatprep.subr.bf16.mxu0 %v12702_v7  ;;  %11377 = vmatprep.subr.bf16.mxu1 %v12704_v10  ;;  %v12742_v7 = vcombine.high %v132_v48, %v136_v0  ;;  %v12744_v10 = vcombine.high %v133_v2, %v137_v4  ;;  %v168_v47 = vld [vmem:[%s20017_s1 + $0x430] sm:$0xff]  ;;  %v169_v18 = vld [vmem:[%s20017_s1 + $0x438] sm:$0xff] }
 0x342   :  { %10845 = vmatpush1.bf16.msra.mxu0 %v12701_v53  ;;  %11378 = vmatpush1.bf16.msra.mxu1 %v12703_v3  ;;  %v12741_v53 = vcombine.low %v132_v48, %v136_v0  ;;  %v12743_v3 = vcombine.low %v133_v2, %v137_v4  ;;  %v172_v48 = vld [vmem:[%s20017_s1 + $0x450] sm:$0xff]  ;;  %v173_v2 = vld [vmem:[%s20017_s1 + $0x458] sm:$0xff] }
 0x343   :  { %10846 = vmatprep.subr.bf16.mxu0 %v12710_v20  ;;  %11379 = vmatprep.subr.bf16.mxu1 %v12712_v59  ;;  %v12750_v20 = vcombine.high %v140_v11, %v144_v13  ;;  %v12752_v59 = vcombine.high %v141_v14, %v145_v17  ;;  %v176_v0 = vld [vmem:[%s20017_s1 + $0x470] sm:$0xff]  ;;  %v177_v4 = vld [vmem:[%s20017_s1 + $0x478] sm:$0xff] }
 0x346   :  { %10847 = vmatpush1.bf16.msra.mxu0 %v12709_v15  ;;  %11380 = vmatpush1.bf16.msra.mxu1 %v12711_v29  ;;  %v12749_v15 = vcombine.low %v140_v11, %v144_v13  ;;  %v12751_v29 = vcombine.low %v141_v14, %v145_v17  ;;  %v180_v11 = vld [vmem:[%s20017_s1 + $0x490] sm:$0xff]  ;;  %v181_v14 = vld [vmem:[%s20017_s1 + $0x498] sm:$0xff] }
 0x347   :  { %10848 = vmatprep.subr.bf16.mxu0 %v12718_v32  ;;  %11381 = vmatprep.subr.bf16.mxu1 %v12720_v33  ;;  %v12758_v32 = vcombine.high %v148_v24, %v152_v26  ;;  %v12760_v33 = vcombine.high %v149_v57, %v153_v49  ;;  %v184_v13 = vld [vmem:[%s20017_s1 + $0x4b0] sm:$0xff]  ;;  %v185_v17 = vld [vmem:[%s20017_s1 + $0x4b8] sm:$0xff] }
 0x34a   :  { %10849 = vmatpush1.bf16.msra.mxu0 %v12717_v40  ;;  %11382 = vmatpush1.bf16.msra.mxu1 %v12719_v41  ;;  %v12757_v40 = vcombine.low %v148_v24, %v152_v26  ;;  %v12759_v41 = vcombine.low %v149_v57, %v153_v49  ;;  %v188_v24 = vld [vmem:[%s20017_s1 + $0x4d0] sm:$0xff]  ;;  %v193_v57 = vld [vmem:[%s20017_s1 + $0x4f8] sm:$0xff]  ;;  %v12789_v49 = vcombine.low %v180_v11, %v184_v13 }
 0x34b   :  { %10850 = vmatprep.subr.bf16.mxu0 %v12726_v25  ;;  %11383 = vmatprep.subr.bf16.mxu1 %v12728_v42  ;;  %v12766_v25 = vcombine.high %v156_v34, %v160_v35  ;;  %v12768_v42 = vcombine.high %v157_v37, %v161_v38  ;;  %v192_v26 = vld [vmem:[%s20017_s1 + $0x4f0] sm:$0xff] }
 0x34e   :  { %10851 = vmatpush1.bf16.msra.mxu0 %v12725_v54  ;;  %11384 = vmatpush1.bf16.msra.mxu1 %v12727_v56  ;;  %v12765_v54 = vcombine.low %v156_v34, %v160_v35  ;;  %v12767_v56 = vcombine.low %v157_v37, %v161_v38  ;;  %v200_v34 = vld [vmem:[%s20017_s1 + $0x530] sm:$0xff]  ;;  %v201_v35 = vld [vmem:[%s20017_s1 + $0x538] sm:$0xff]  ;;  %v12797_v37 = vcombine.low %v188_v24, %v192_v26 }
 0x34f   :  { %10852 = vmatprep.subr.bf16.mxu0 %v12734_v61  ;;  %11385 = vmatprep.subr.bf16.mxu1 %v12736_v39  ;;  %v12774_v61 = vcombine.high %v164_v44, %v168_v47  ;;  %v12776_v39 = vcombine.high %v165_v51, %v169_v18 }
 0x352   :  { %10853 = vmatpush1.bf16.msra.mxu0 %v12733_v23  ;;  %11386 = vmatpush1.bf16.msra.mxu1 %v12735_v6  ;;  %v12773_v23 = vcombine.low %v164_v44, %v168_v47  ;;  %v12775_v6 = vcombine.low %v165_v51, %v169_v18  ;;  %v205_v44 = vld [vmem:[%s20017_s1 + $0x558] sm:$0xff] }
 0x353   :  { %10854 = vmatprep.subr.bf16.mxu0 %v12742_v7  ;;  %11387 = vmatprep.subr.bf16.mxu1 %v12744_v10  ;;  %v12782_v7 = vcombine.high %v172_v48, %v176_v0  ;;  %v12784_v10 = vcombine.high %v173_v2, %v177_v4  ;;  %v209_v47 = vld [vmem:[%s20017_s1 + $0x578] sm:$0xff] }
 0x356   :  { %10855 = vmatpush1.bf16.msra.mxu0 %v12741_v53  ;;  %11388 = vmatpush1.bf16.msra.mxu1 %v12743_v3  ;;  %v12781_v53 = vcombine.low %v172_v48, %v176_v0  ;;  %v12783_v3 = vcombine.low %v173_v2, %v177_v4  ;;  %v213_v48 = vld [vmem:[%s20017_s1 + $0x598] sm:$0xff]  ;;  %v12815_v4 = vcombine.low %v205_v44, %v209_v47 }
 0x357   :  { %10856 = vmatprep.subr.bf16.mxu0 %v12750_v20  ;;  %11389 = vmatprep.subr.bf16.mxu1 %v12752_v59  ;;  %v12790_v20 = vcombine.high %v180_v11, %v184_v13  ;;  %v12792_v59 = vcombine.high %v181_v14, %v185_v17  ;;  %v217_v0 = vld [vmem:[%s20017_s1 + $0x5b8] sm:$0xff] }
 0x358   :  { %v221_v11 = vld [vmem:[%s20017_s1 + $0x5d8] sm:$0xff] }
 0x359   :  { %v225_v13 = vld [vmem:[%s20017_s1 + $0x5f8] sm:$0xff] }
 0x35a   :  { %10857 = vmatpush1.bf16.msra.mxu0 %v12749_v15  ;;  %11390 = vmatpush1.bf16.msra.mxu1 %v12751_v29  ;;  %v12791_v15 = vcombine.low %v181_v14, %v185_v17  ;;  %v12798_v29 = vcombine.high %v188_v24, %v192_v26  ;;  %v12823_v17 = vcombine.low %v213_v48, %v217_v0  ;;  %v229_v24 = vld [vmem:[%s20017_s1 + $0x618] sm:$0xff] }
 0x35b   :  { %10858 = vmatprep.subr.bf16.mxu0 %v12758_v32  ;;  %11391 = vmatprep.subr.bf16.mxu1 %v12760_v33  ;;  %v196_v33 = vld [vmem:[%s20017_s1 + $0x510] sm:$0xff]  ;;  %v233_v26 = vld [vmem:[%s20017_s1 + $0x638] sm:$0xff] }
 0x35c   :  { %v12805_v51 = vcombine.low %v196_v33, %v200_v34 }
 0x35e   :  { %10859 = vmatpush1.bf16.msra.mxu0 %v12757_v40  ;;  %11392 = vmatpush1.bf16.msra.mxu1 %v12759_v41  ;;  %v12806_v40 = vcombine.high %v196_v33, %v200_v34  ;;  %v237_v33 = vld [vmem:[%s20017_s1 + $0x658] sm:$0xff] }
 0x35f   :  { %10860 = vmatprep.subr.bf16.mxu0 %v12766_v25  ;;  %11393 = vmatprep.subr.bf16.mxu1 %v12768_v42  ;;  %v204_v25 = vld [vmem:[%s20017_s1 + $0x550] sm:$0xff]  ;;  %v241_v34 = vld [vmem:[%s20017_s1 + $0x678] sm:$0xff] }
 0x360   :  { %v208_v42 = vld [vmem:[%s20017_s1 + $0x570] sm:$0xff] }
 0x361   :  { %v12813_v2 = vcombine.low %v204_v25, %v208_v42 }
 0x362   :  { %10861 = vmatpush1.bf16.msra.mxu0 %v12765_v54  ;;  %11394 = vmatpush1.bf16.msra.mxu1 %v12767_v56  ;;  %v12814_v54 = vcombine.high %v204_v25, %v208_v42  ;;  %v12816_v56 = vcombine.high %v205_v44, %v209_v47  ;;  %v245_v25 = vld [vmem:[%s20017_s1 + $0x698] sm:$0xff]  ;;  %v12847_v47 = vcombine.low %v237_v33, %v241_v34 }
 0x363   :  { %10871 = vmatprep.subr.bf16.mxu0 %v12774_v61  ;;  %11404 = vmatprep.subr.bf16.mxu1 %v12776_v39  ;;  %v212_v61 = vld [vmem:[%s20017_s1 + $0x590] sm:$0xff]  ;;  %v249_v42 = vld [vmem:[%s20017_s1 + $0x6b8] sm:$0xff] }
 0x364   :  { %v216_v39 = vld [vmem:[%s20017_s1 + $0x5b0] sm:$0xff] }
 0x365   :  { %10863 = vmatmul.mubr.bf16.vlgmr.msra.gmra.mrb[4].mxu0 %v14943_v12  ;;  %11396 = vmatmul.mubr.bf16.vlgmr.msra.gmra.mrb[4].mxu1 %v14943_v12  ;;  %v189_v12 = vld [vmem:[%s20017_s1 + $0x4d8] sm:$0xff]  ;;  %v12821_v14 = vcombine.low %v212_v61, %v216_v39 }
 0x366   :  { %10872 = vmatpush1.bf16.msra.mxu0 %v12773_v23  ;;  %11405 = vmatpush1.bf16.msra.mxu1 %v12775_v6  ;;  %v12800_v32 = vcombine.high %v189_v12, %v193_v57  ;;  %v12799_v38 = vcombine.low %v189_v12, %v193_v57  ;;  %v12822_v23 = vcombine.high %v212_v61, %v216_v39  ;;  %v253_v61 = vld [vmem:[%s20017_s1 + $0x6d8] sm:$0xff] }
 0x367   :  { %10873 = vmatprep.subr.bf16.mxu0 %v12782_v7  ;;  %11406 = vmatprep.subr.bf16.mxu1 %v12784_v10  ;;  %v12824_v6 = vcombine.high %v213_v48, %v217_v0  ;;  %v220_v7 = vld [vmem:[%s20017_s1 + $0x5d0] sm:$0xff]  ;;  %v12831_v57 = vcombine.low %v221_v11, %v225_v13  ;;  %v257_v39 = vld [vmem:[%s20017_s1 + $0x6f8] sm:$0xff]  ;;  %v12855_v0 = vcombine.low %v245_v25, %v249_v42 }
 0x368   :  { %10903 = vmatprep.mubr.bf16.mxu0 %v14964_v21  ;;  %11436 = vmatprep.mubr.bf16.mxu1 %v14964_v21  ;;  %v197_v21 = vld [vmem:[%s20017_s1 + $0x518] sm:$0xff]  ;;  %v224_v10 = vld [vmem:[%s20017_s1 + $0x5f0] sm:$0xff] }
 0x369   :  { %v12808_v41 = vcombine.high %v197_v21, %v201_v35  ;;  %v12807_v18 = vcombine.low %v197_v21, %v201_v35  ;;  %v12829_v12 = vcombine.low %v220_v7, %v224_v10  ;;  %v12839_v35 = vcombine.low %v229_v24, %v233_v26 }
 0x36a   :  { %10874 = vmatpush1.bf16.msra.mxu0 %v12781_v53  ;;  %11407 = vmatpush1.bf16.msra.mxu1 %v12783_v3  ;;  %v12830_v53 = vcombine.high %v220_v7, %v224_v10  ;;  %v12832_v3 = vcombine.high %v221_v11, %v225_v13  ;;  %v261_v7 = vld [vmem:[%s20017_s1 + $0x718] sm:$0xff]  ;;  %v12863_v13 = vcombine.low %v253_v61, %v257_v39 }
 0x36b   :  { %10875 = vmatprep.subr.bf16.mxu0 %v12790_v20  ;;  %11408 = vmatprep.subr.bf16.mxu1 %v12792_v59  ;;  %v228_v20 = vld [vmem:[%s20017_s1 + $0x610] sm:$0xff]  ;;  %v265_v10 = vld [vmem:[%s20017_s1 + $0x738] sm:$0xff] }
 0x36c   :  { %v232_v59 = vld [vmem:[%s20017_s1 + $0x630] sm:$0xff] }
 0x36d   :  { %v12837_v21 = vcombine.low %v228_v20, %v232_v59 }
 0x36e   :  { %10876 = vmatpush1.bf16.msra.mxu0 %v12789_v49  ;;  %11409 = vmatpush1.bf16.msra.mxu1 %v12791_v15  ;;  %v12838_v49 = vcombine.high %v228_v20, %v232_v59  ;;  %v12840_v15 = vcombine.high %v229_v24, %v233_v26  ;;  %v269_v20 = vld [vmem:[%s20017_s1 + $0x758] sm:$0xff]  ;;  %v12871_v26 = vcombine.low %v261_v7, %v265_v10 }
 0x36f   :  { %10877 = vmatprep.subr.bf16.mxu0 %v12798_v29  ;;  %11410 = vmatprep.subr.bf16.mxu1 %v12800_v32  ;;  %v236_v29 = vld [vmem:[%s20017_s1 + $0x650] sm:$0xff]  ;;  %v273_v59 = vld [vmem:[%s20017_s1 + $0x778] sm:$0xff] }
 0x370   :  { %v240_v32 = vld [vmem:[%s20017_s1 + $0x670] sm:$0xff] }
 0x371   :  { %v12845_v44 = vcombine.low %v236_v29, %v240_v32 }
 0x372   :  { %10878 = vmatpush1.bf16.msra.mxu0 %v12797_v37  ;;  %11411 = vmatpush1.bf16.msra.mxu1 %v12799_v38  ;;  %v12846_v37 = vcombine.high %v236_v29, %v240_v32  ;;  %v12848_v38 = vcombine.high %v237_v33, %v241_v34  ;;  %v277_v29 = vld [vmem:[%s20017_s1 + $0x798] sm:$0xff]  ;;  %v12879_v34 = vcombine.low %v269_v20, %v273_v59 }
 0x373   :  { %10879 = vmatprep.subr.bf16.mxu0 %v12806_v40  ;;  %11412 = vmatprep.subr.bf16.mxu1 %v12808_v41  ;;  %v244_v40 = vld [vmem:[%s20017_s1 + $0x690] sm:$0xff]  ;;  %v281_v32 = vld [vmem:[%s20017_s1 + $0x7b8] sm:$0xff] }
 0x374   :  { %v248_v41 = vld [vmem:[%s20017_s1 + $0x6b0] sm:$0xff] }
 0x375   :  { %v12853_v48 = vcombine.low %v244_v40, %v248_v41 }
 0x376   :  { %10880 = vmatpush1.bf16.msra.mxu0 %v12805_v51  ;;  %11413 = vmatpush1.bf16.msra.mxu1 %v12807_v18  ;;  %v12854_v51 = vcombine.high %v244_v40, %v248_v41  ;;  %v12856_v18 = vcombine.high %v245_v25, %v249_v42  ;;  %v285_v40 = vld [vmem:[%s20017_s1 + $0x7d8] sm:$0xff]  ;;  %v12887_v42 = vcombine.low %v277_v29, %v281_v32 }
 0x377   :  { %10881 = vmatprep.subr.bf16.mxu0 %v12814_v54  ;;  %11414 = vmatprep.subr.bf16.mxu1 %v12816_v56  ;;  %v252_v54 = vld [vmem:[%s20017_s1 + $0x6d0] sm:$0xff]  ;;  %v289_v41 = vld [vmem:[%s20017_s1 + $0x7f8] sm:$0xff] }
 0x378   :  { %v256_v56 = vld [vmem:[%s20017_s1 + $0x6f0] sm:$0xff] }
 0x379   :  { %v12861_v11 = vcombine.low %v252_v54, %v256_v56 }
 0x37a   :  { %10882 = vmatpush1.bf16.msra.mxu0 %v12813_v2  ;;  %11415 = vmatpush1.bf16.msra.mxu1 %v12815_v4  ;;  %v12862_v2 = vcombine.high %v252_v54, %v256_v56  ;;  %v12864_v4 = vcombine.high %v253_v61, %v257_v39  ;;  %v293_v54 = vld [vmem:[%s20017_s1 + $0x818] sm:$0xff]  ;;  %v12895_v39 = vcombine.low %v285_v40, %v289_v41 }
 0x37b   :  { %10883 = vmatprep.subr.bf16.mxu0 %v12822_v23  ;;  %11416 = vmatprep.subr.bf16.mxu1 %v12824_v6  ;;  %v260_v23 = vld [vmem:[%s20017_s1 + $0x710] sm:$0xff]  ;;  %v297_v56 = vld [vmem:[%s20017_s1 + $0x838] sm:$0xff] }
 0x37c   :  { %v264_v6 = vld [vmem:[%s20017_s1 + $0x730] sm:$0xff] }
 0x37d   :  { %v12869_v24 = vcombine.low %v260_v23, %v264_v6 }
 0x37e   :  { %10884 = vmatpush1.bf16.msra.mxu0 %v12821_v14  ;;  %11417 = vmatpush1.bf16.msra.mxu1 %v12823_v17  ;;  %v12870_v14 = vcombine.high %v260_v23, %v264_v6  ;;  %v12872_v17 = vcombine.high %v261_v7, %v265_v10  ;;  %v301_v23 = vld [vmem:[%s20017_s1 + $0x858] sm:$0xff]  ;;  %v12903_v10 = vcombine.low %v293_v54, %v297_v56 }
 0x37f   :  { %10885 = vmatprep.subr.bf16.mxu0 %v12830_v53  ;;  %11418 = vmatprep.subr.bf16.mxu1 %v12832_v3  ;;  %v268_v53 = vld [vmem:[%s20017_s1 + $0x750] sm:$0xff]  ;;  %v305_v6 = vld [vmem:[%s20017_s1 + $0x878] sm:$0xff] }
 0x380   :  { %v272_v3 = vld [vmem:[%s20017_s1 + $0x770] sm:$0xff] }
 0x381   :  { %v12877_v33 = vcombine.low %v268_v53, %v272_v3 }
 0x382   :  { %10886 = vmatpush1.bf16.msra.mxu0 %v12829_v12  ;;  %11419 = vmatpush1.bf16.msra.mxu1 %v12831_v57  ;;  %v12878_v12 = vcombine.high %v268_v53, %v272_v3  ;;  %v12880_v57 = vcombine.high %v269_v20, %v273_v59  ;;  %v309_v53 = vld [vmem:[%s20017_s1 + $0x898] sm:$0xff]  ;;  %v12911_v59 = vcombine.low %v301_v23, %v305_v6 }
 0x383   :  { %10887 = vmatprep.subr.bf16.mxu0 %v12838_v49  ;;  %11420 = vmatprep.subr.bf16.mxu1 %v12840_v15  ;;  %v276_v49 = vld [vmem:[%s20017_s1 + $0x790] sm:$0xff]  ;;  %v313_v3 = vld [vmem:[%s20017_s1 + $0x8b8] sm:$0xff] }
 0x384   :  { %v280_v15 = vld [vmem:[%s20017_s1 + $0x7b0] sm:$0xff] }
 0x385   :  { %v12885_v25 = vcombine.low %v276_v49, %v280_v15 }
 0x386   :  { %10888 = vmatpush1.bf16.msra.mxu0 %v12837_v21  ;;  %11421 = vmatpush1.bf16.msra.mxu1 %v12839_v35  ;;  %v12886_v21 = vcombine.high %v276_v49, %v280_v15  ;;  %v12888_v35 = vcombine.high %v277_v29, %v281_v32  ;;  %v321_v49 = vld [vmem:[%s20017_s1 + $0x8f8] sm:$0xff]  ;;  %v12919_v29 = vcombine.low %v309_v53, %v313_v3 }
 0x387   :  { %10889 = vmatprep.subr.bf16.mxu0 %v12846_v37  ;;  %11422 = vmatprep.subr.bf16.mxu1 %v12848_v38  ;;  %v284_v37 = vld [vmem:[%s20017_s1 + $0x7d0] sm:$0xff] }
 0x388   :  { %v288_v38 = vld [vmem:[%s20017_s1 + $0x7f0] sm:$0xff] }
 0x389   :  { %v12893_v61 = vcombine.low %v284_v37, %v288_v38 }
 0x38a   :  { %10890 = vmatpush1.bf16.msra.mxu0 %v12845_v44  ;;  %11423 = vmatpush1.bf16.msra.mxu1 %v12847_v47  ;;  %v12894_v44 = vcombine.high %v284_v37, %v288_v38  ;;  %v12896_v47 = vcombine.high %v285_v40, %v289_v41 }
 0x38b   :  { %10891 = vmatprep.subr.bf16.mxu0 %v12854_v51  ;;  %11424 = vmatprep.subr.bf16.mxu1 %v12856_v18  ;;  %v292_v51 = vld [vmem:[%s20017_s1 + $0x810] sm:$0xff] }
 0x38c   :  { %v296_v18 = vld [vmem:[%s20017_s1 + $0x830] sm:$0xff] }
 0x38d   :  { %v12901_v7 = vcombine.low %v292_v51, %v296_v18 }
 0x38e   :  { %10892 = vmatpush1.bf16.msra.mxu0 %v12853_v48  ;;  %11425 = vmatpush1.bf16.msra.mxu1 %v12855_v0  ;;  %v12902_v48 = vcombine.high %v292_v51, %v296_v18  ;;  %v12904_v0 = vcombine.high %v293_v54, %v297_v56 }
 0x38f   :  { %10893 = vmatprep.subr.bf16.mxu0 %v12862_v2  ;;  %11426 = vmatprep.subr.bf16.mxu1 %v12864_v4  ;;  %v300_v2 = vld [vmem:[%s20017_s1 + $0x850] sm:$0xff] }
 0x390   :  { %v304_v4 = vld [vmem:[%s20017_s1 + $0x870] sm:$0xff] }
 0x391   :  { %v12909_v20 = vcombine.low %v300_v2, %v304_v4 }
 0x392   :  { %10894 = vmatpush1.bf16.msra.mxu0 %v12861_v11  ;;  %11427 = vmatpush1.bf16.msra.mxu1 %v12863_v13  ;;  %v12910_v11 = vcombine.high %v300_v2, %v304_v4  ;;  %v12912_v13 = vcombine.high %v301_v23, %v305_v6 }
 0x393   :  { %10895 = vmatprep.subr.bf16.mxu0 %v12870_v14  ;;  %11428 = vmatprep.subr.bf16.mxu1 %v12872_v17  ;;  %v308_v14 = vld [vmem:[%s20017_s1 + $0x890] sm:$0xff] }
 0x394   :  { %v312_v17 = vld [vmem:[%s20017_s1 + $0x8b0] sm:$0xff] }
 0x395   :  { %v12917_v15 = vcombine.low %v308_v14, %v312_v17 }
 0x396   :  { %10896 = vmatpush1.bf16.msra.mxu0 %v12869_v24  ;;  %11429 = vmatpush1.bf16.msra.mxu1 %v12871_v26  ;;  %v12918_v24 = vcombine.high %v308_v14, %v312_v17  ;;  %v12920_v26 = vcombine.high %v309_v53, %v313_v3 }
 0x397   :  { %10897 = vmatprep.subr.bf16.mxu0 %v12878_v12  ;;  %11430 = vmatprep.subr.bf16.mxu1 %v12880_v57  ;;  %v316_v12 = vld [vmem:[%s20017_s1 + $0x8d0] sm:$0xff] }
 0x398   :  { %v320_v57 = vld [vmem:[%s20017_s1 + $0x8f0] sm:$0xff] }
 0x399   :  { %v12926_v32 = vcombine.high %v316_v12, %v320_v57  ;;  %v12925_v37 = vcombine.low %v316_v12, %v320_v57 }
 0x39a   :  { %10898 = vmatpush1.bf16.msra.mxu0 %v12877_v33  ;;  %11431 = vmatpush1.bf16.msra.mxu1 %v12879_v34  ;;  %v324_v34 = vld [vmem:[%s20017_s1 + $0x910] sm:$0xff] }
 0x39b   :  { %10899 = vmatprep.subr.bf16.mxu0 %v12886_v21  ;;  %11432 = vmatprep.subr.bf16.mxu1 %v12888_v35  ;;  %v328_v21 = vld [vmem:[%s20017_s1 + $0x930] sm:$0xff]  ;;  %v329_v35 = vld [vmem:[%s20017_s1 + $0x938] sm:$0xff] }
 0x39c   :  { %v12934_v40 = vcombine.high %v324_v34, %v328_v21  ;;  %v12933_v51 = vcombine.low %v324_v34, %v328_v21 }
 0x39e   :  { %10900 = vmatpush1.bf16.msra.mxu0 %v12885_v25  ;;  %11433 = vmatpush1.bf16.msra.mxu1 %v12887_v42  ;;  %v332_v25 = vld [vmem:[%s20017_s1 + $0x950] sm:$0xff] }
 0x39f   :  { %10901 = vmatprep.subr.bf16.mxu0 %v12894_v44  ;;  %11434 = vmatprep.subr.bf16.mxu1 %v12896_v47  ;;  %v336_v42 = vld [vmem:[%s20017_s1 + $0x970] sm:$0xff]  ;;  %v333_v44 = vld [vmem:[%s20017_s1 + $0x958] sm:$0xff] }
 0x3a0   :  { %v337_v47 = vld [vmem:[%s20017_s1 + $0x978] sm:$0xff]  ;;  %v12942_v54 = vcombine.high %v332_v25, %v336_v42  ;;  %v12941_v2 = vcombine.low %v332_v25, %v336_v42 }
 0x3a1   :  { %v12944_v56 = vcombine.high %v333_v44, %v337_v47  ;;  %v12943_v4 = vcombine.low %v333_v44, %v337_v47 }
 0x3a2   :  { %10902 = vmatpush1.bf16.msra.mxu0 %v12893_v61  ;;  %11435 = vmatpush1.bf16.msra.mxu1 %v12895_v39  ;;  %v340_v61 = vld [vmem:[%s20017_s1 + $0x990] sm:$0xff] }
 0x3a3   :  { %10912 = vmatprep.subr.bf16.mxu0 %v12902_v48  ;;  %11445 = vmatprep.subr.bf16.mxu1 %v12904_v0  ;;  %v344_v39 = vld [vmem:[%s20017_s1 + $0x9b0] sm:$0xff]  ;;  %v341_v48 = vld [vmem:[%s20017_s1 + $0x998] sm:$0xff] }
 0x3a4   :  { %v345_v0 = vld [vmem:[%s20017_s1 + $0x9b8] sm:$0xff]  ;;  %v12950_v23 = vcombine.high %v340_v61, %v344_v39  ;;  %v12949_v14 = vcombine.low %v340_v61, %v344_v39 }
 0x3a5   :  { %10904 = vmatmul.mubr.bf16.vlgmr.msra.gmra.mrb[4].mxu0 %v15152_v22  ;;  %11437 = vmatmul.mubr.bf16.vlgmr.msra.gmra.mrb[4].mxu1 %v15152_v22  ;;  %v317_v22 = vld [vmem:[%s20017_s1 + $0x8d8] sm:$0xff]  ;;  %v12952_v6 = vcombine.high %v341_v48, %v345_v0  ;;  %v12951_v17 = vcombine.low %v341_v48, %v345_v0 }
 0x3a6   :  { %10913 = vmatpush1.bf16.msra.mxu0 %v12901_v7  ;;  %11446 = vmatpush1.bf16.msra.mxu1 %v12903_v10  ;;  %v12928_v33 = vcombine.high %v317_v22, %v321_v49  ;;  %v12927_v38 = vcombine.low %v317_v22, %v321_v49  ;;  %v348_v7 = vld [vmem:[%s20017_s1 + $0x9d0] sm:$0xff] }
 0x3a7   :  { %10914 = vmatprep.subr.bf16.mxu0 %v12910_v11  ;;  %11447 = vmatprep.subr.bf16.mxu1 %v12912_v13  ;;  %v352_v10 = vld [vmem:[%s20017_s1 + $0x9f0] sm:$0xff]  ;;  %v349_v11 = vld [vmem:[%s20017_s1 + $0x9d8] sm:$0xff] }
 0x3a8   :  { %10944 = vmatprep.mubr.bf16.mxu0 %v15173_v31  ;;  %11477 = vmatprep.mubr.bf16.mxu1 %v15173_v31  ;;  %v325_v31 = vld [vmem:[%s20017_s1 + $0x918] sm:$0xff]  ;;  %v12958_v53 = vcombine.high %v348_v7, %v352_v10  ;;  %v12957_v12 = vcombine.low %v348_v7, %v352_v10 }
 0x3a9   :  { %v12936_v41 = vcombine.high %v325_v31, %v329_v35  ;;  %v12935_v18 = vcombine.low %v325_v31, %v329_v35  ;;  %v353_v13 = vld [vmem:[%s20017_s1 + $0x9f8] sm:$0xff] }
 0x3aa   :  { %10915 = vmatpush1.bf16.msra.mxu0 %v12909_v20  ;;  %11448 = vmatpush1.bf16.msra.mxu1 %v12911_v59  ;;  %v12960_v3 = vcombine.high %v349_v11, %v353_v13  ;;  %v356_v20 = vld [vmem:[%s20017_s1 + $0xa10] sm:$0xff]  ;;  %v12959_v57 = vcombine.low %v349_v11, %v353_v13 }
 0x3ab   :  { %10916 = vmatprep.subr.bf16.mxu0 %v12918_v24  ;;  %11449 = vmatprep.subr.bf16.mxu1 %v12920_v26  ;;  %v360_v59 = vld [vmem:[%s20017_s1 + $0xa30] sm:$0xff]  ;;  %v357_v24 = vld [vmem:[%s20017_s1 + $0xa18] sm:$0xff] }
 0x3ac   :  { %v361_v26 = vld [vmem:[%s20017_s1 + $0xa38] sm:$0xff]  ;;  %v12966_v22 = vcombine.high %v356_v20, %v360_v59  ;;  %v12965_v34 = vcombine.low %v356_v20, %v360_v59 }
 0x3ad   :  { %v12968_v49 = vcombine.high %v357_v24, %v361_v26  ;;  %v12967_v21 = vcombine.low %v357_v24, %v361_v26 }
 0x3ae   :  { %10917 = vmatpush1.bf16.msra.mxu0 %v12917_v15  ;;  %11450 = vmatpush1.bf16.msra.mxu1 %v12919_v29  ;;  %v364_v15 = vld [vmem:[%s20017_s1 + $0xa50] sm:$0xff] }
 0x3af   :  { %10918 = vmatprep.subr.bf16.mxu0 %v12926_v32  ;;  %11451 = vmatprep.subr.bf16.mxu1 %v12928_v33  ;;  %v368_v29 = vld [vmem:[%s20017_s1 + $0xa70] sm:$0xff]  ;;  %v365_v32 = vld [vmem:[%s20017_s1 + $0xa58] sm:$0xff] }
 0x3b0   :  { %v369_v33 = vld [vmem:[%s20017_s1 + $0xa78] sm:$0xff]  ;;  %v12974_v31 = vcombine.high %v364_v15, %v368_v29  ;;  %v12973_v25 = vcombine.low %v364_v15, %v368_v29 }
 0x3b1   :  { %v12976_v35 = vcombine.high %v365_v32, %v369_v33  ;;  %v12975_v42 = vcombine.low %v365_v32, %v369_v33 }
 0x3b2   :  { %10919 = vmatpush1.bf16.msra.mxu0 %v12925_v37  ;;  %11452 = vmatpush1.bf16.msra.mxu1 %v12927_v38  ;;  %v372_v37 = vld [vmem:[%s20017_s1 + $0xa90] sm:$0xff] }
 0x3b3   :  { %10920 = vmatprep.subr.bf16.mxu0 %v12934_v40  ;;  %11453 = vmatprep.subr.bf16.mxu1 %v12936_v41  ;;  %v376_v38 = vld [vmem:[%s20017_s1 + $0xab0] sm:$0xff]  ;;  %v373_v40 = vld [vmem:[%s20017_s1 + $0xa98] sm:$0xff] }
 0x3b4   :  { %v377_v41 = vld [vmem:[%s20017_s1 + $0xab8] sm:$0xff]  ;;  %v12982_v44 = vcombine.high %v372_v37, %v376_v38  ;;  %v12981_v61 = vcombine.low %v372_v37, %v376_v38 }
 0x3b5   :  { %v12984_v47 = vcombine.high %v373_v40, %v377_v41  ;;  %v12983_v39 = vcombine.low %v373_v40, %v377_v41 }
 0x3b6   :  { %10921 = vmatpush1.bf16.msra.mxu0 %v12933_v51  ;;  %11454 = vmatpush1.bf16.msra.mxu1 %v12935_v18  ;;  %v380_v51 = vld [vmem:[%s20017_s1 + $0xad0] sm:$0xff] }
 0x3b7   :  { %10922 = vmatprep.subr.bf16.mxu0 %v12942_v54  ;;  %11455 = vmatprep.subr.bf16.mxu1 %v12944_v56  ;;  %v384_v18 = vld [vmem:[%s20017_s1 + $0xaf0] sm:$0xff]  ;;  %v381_v54 = vld [vmem:[%s20017_s1 + $0xad8] sm:$0xff] }
 0x3b8   :  { %v385_v56 = vld [vmem:[%s20017_s1 + $0xaf8] sm:$0xff]  ;;  %v12990_v48 = vcombine.high %v380_v51, %v384_v18  ;;  %v12989_v7 = vcombine.low %v380_v51, %v384_v18 }
 0x3b9   :  { %v12992_v0 = vcombine.high %v381_v54, %v385_v56  ;;  %v12991_v10 = vcombine.low %v381_v54, %v385_v56 }
 0x3ba   :  { %10923 = vmatpush1.bf16.msra.mxu0 %v12941_v2  ;;  %11456 = vmatpush1.bf16.msra.mxu1 %v12943_v4  ;;  %v388_v2 = vld [vmem:[%s20017_s1 + $0xb10] sm:$0xff] }
 0x3bb   :  { %10924 = vmatprep.subr.bf16.mxu0 %v12950_v23  ;;  %11457 = vmatprep.subr.bf16.mxu1 %v12952_v6  ;;  %v392_v4 = vld [vmem:[%s20017_s1 + $0xb30] sm:$0xff]  ;;  %v389_v23 = vld [vmem:[%s20017_s1 + $0xb18] sm:$0xff] }
 0x3bc   :  { %v393_v6 = vld [vmem:[%s20017_s1 + $0xb38] sm:$0xff]  ;;  %v12998_v11 = vcombine.high %v388_v2, %v392_v4  ;;  %v12997_v20 = vcombine.low %v388_v2, %v392_v4 }
 0x3bd   :  { %v13000_v13 = vcombine.high %v389_v23, %v393_v6  ;;  %v12999_v59 = vcombine.low %v389_v23, %v393_v6 }
 0x3be   :  { %10925 = vmatpush1.bf16.msra.mxu0 %v12949_v14  ;;  %11458 = vmatpush1.bf16.msra.mxu1 %v12951_v17  ;;  %v396_v14 = vld [vmem:[%s20017_s1 + $0xb50] sm:$0xff] }
 0x3bf   :  { %10926 = vmatprep.subr.bf16.mxu0 %v12958_v53  ;;  %11459 = vmatprep.subr.bf16.mxu1 %v12960_v3  ;;  %v400_v17 = vld [vmem:[%s20017_s1 + $0xb70] sm:$0xff]  ;;  %v397_v53 = vld [vmem:[%s20017_s1 + $0xb58] sm:$0xff] }
 0x3c0   :  { %v401_v3 = vld [vmem:[%s20017_s1 + $0xb78] sm:$0xff]  ;;  %v13006_v24 = vcombine.high %v396_v14, %v400_v17  ;;  %v13005_v15 = vcombine.low %v396_v14, %v400_v17 }
 0x3c1   :  { %v13008_v26 = vcombine.high %v397_v53, %v401_v3  ;;  %v13007_v29 = vcombine.low %v397_v53, %v401_v3 }
 0x3c2   :  { %10927 = vmatpush1.bf16.msra.mxu0 %v12957_v12  ;;  %11460 = vmatpush1.bf16.msra.mxu1 %v12959_v57  ;;  %v404_v12 = vld [vmem:[%s20017_s1 + $0xb90] sm:$0xff] }
 0x3c3   :  { %10928 = vmatprep.subr.bf16.mxu0 %v12966_v22  ;;  %11461 = vmatprep.subr.bf16.mxu1 %v12968_v49  ;;  %v408_v57 = vld [vmem:[%s20017_s1 + $0xbb0] sm:$0xff]  ;;  %v405_v22 = vld [vmem:[%s20017_s1 + $0xb98] sm:$0xff] }
 0x3c4   :  { %v409_v49 = vld [vmem:[%s20017_s1 + $0xbb8] sm:$0xff]  ;;  %v13014_v32 = vcombine.high %v404_v12, %v408_v57  ;;  %v13013_v37 = vcombine.low %v404_v12, %v408_v57 }
 0x3c5   :  { %v13016_v33 = vcombine.high %v405_v22, %v409_v49  ;;  %v13015_v38 = vcombine.low %v405_v22, %v409_v49  ;;  %v452_v49 = vld [vmem:[%s20017_s1 + $0xd10] sm:$0xff] }
 0x3c6   :  { %10929 = vmatpush1.bf16.msra.mxu0 %v12965_v34  ;;  %11462 = vmatpush1.bf16.msra.mxu1 %v12967_v21  ;;  %v412_v34 = vld [vmem:[%s20017_s1 + $0xbd0] sm:$0xff] }
 0x3c7   :  { %10930 = vmatprep.subr.bf16.mxu0 %v12974_v31  ;;  %11463 = vmatprep.subr.bf16.mxu1 %v12976_v35  ;;  %v416_v21 = vld [vmem:[%s20017_s1 + $0xbf0] sm:$0xff]  ;;  %v413_v31 = vld [vmem:[%s20017_s1 + $0xbd8] sm:$0xff] }
 0x3c8   :  { %v417_v35 = vld [vmem:[%s20017_s1 + $0xbf8] sm:$0xff]  ;;  %v13022_v40 = vcombine.high %v412_v34, %v416_v21  ;;  %v13021_v51 = vcombine.low %v412_v34, %v416_v21 }
 0x3c9   :  { %v13024_v41 = vcombine.high %v413_v31, %v417_v35  ;;  %v13023_v18 = vcombine.low %v413_v31, %v417_v35  ;;  %v460_v31 = vld [vmem:[%s20017_s1 + $0xd50] sm:$0xff] }
 0x3ca   :  { %10931 = vmatpush1.bf16.msra.mxu0 %v12973_v25  ;;  %11464 = vmatpush1.bf16.msra.mxu1 %v12975_v42  ;;  %v420_v25 = vld [vmem:[%s20017_s1 + $0xc10] sm:$0xff] }
 0x3cb   :  { %10932 = vmatprep.subr.bf16.mxu0 %v12982_v44  ;;  %11465 = vmatprep.subr.bf16.mxu1 %v12984_v47  ;;  %v424_v42 = vld [vmem:[%s20017_s1 + $0xc30] sm:$0xff]  ;;  %v421_v44 = vld [vmem:[%s20017_s1 + $0xc18] sm:$0xff] }
 0x3cc   :  { %v425_v47 = vld [vmem:[%s20017_s1 + $0xc38] sm:$0xff]  ;;  %v13030_v54 = vcombine.high %v420_v25, %v424_v42  ;;  %v13029_v2 = vcombine.low %v420_v25, %v424_v42  ;;  %v464_v35 = vld [vmem:[%s20017_s1 + $0xd70] sm:$0xff] }
 0x3cd   :  { %v13032_v56 = vcombine.high %v421_v44, %v425_v47  ;;  %v13031_v4 = vcombine.low %v421_v44, %v425_v47  ;;  %v13070_v25 = vcombine.high %v460_v31, %v464_v35  ;;  %v468_v44 = vld [vmem:[%s20017_s1 + $0xd90] sm:$0xff] }
 0x3ce   :  { %10933 = vmatpush1.bf16.msra.mxu0 %v12981_v61  ;;  %11466 = vmatpush1.bf16.msra.mxu1 %v12983_v39  ;;  %v428_v61 = vld [vmem:[%s20017_s1 + $0xc50] sm:$0xff] }
 0x3cf   :  { %10934 = vmatprep.subr.bf16.mxu0 %v12990_v48  ;;  %11467 = vmatprep.subr.bf16.mxu1 %v12992_v0  ;;  %v432_v39 = vld [vmem:[%s20017_s1 + $0xc70] sm:$0xff]  ;;  %v429_v48 = vld [vmem:[%s20017_s1 + $0xc58] sm:$0xff] }
 0x3d0   :  { %v433_v0 = vld [vmem:[%s20017_s1 + $0xc78] sm:$0xff]  ;;  %v13038_v23 = vcombine.high %v428_v61, %v432_v39  ;;  %v13037_v14 = vcombine.low %v428_v61, %v432_v39  ;;  %v472_v47 = vld [vmem:[%s20017_s1 + $0xdb0] sm:$0xff] }
 0x3d1   :  { %v13040_v6 = vcombine.high %v429_v48, %v433_v0  ;;  %v13039_v17 = vcombine.low %v429_v48, %v433_v0  ;;  %v13078_v61 = vcombine.high %v468_v44, %v472_v47  ;;  %v476_v0 = vld [vmem:[%s20017_s1 + $0xdd0] sm:$0xff] }
 0x3d2   :  { %10935 = vmatpush1.bf16.msra.mxu0 %v12989_v7  ;;  %11468 = vmatpush1.bf16.msra.mxu1 %v12991_v10  ;;  %v436_v7 = vld [vmem:[%s20017_s1 + $0xc90] sm:$0xff] }
 0x3d3   :  { %10936 = vmatprep.subr.bf16.mxu0 %v12998_v11  ;;  %11469 = vmatprep.subr.bf16.mxu1 %v13000_v13  ;;  %v440_v10 = vld [vmem:[%s20017_s1 + $0xcb0] sm:$0xff]  ;;  %v437_v11 = vld [vmem:[%s20017_s1 + $0xc98] sm:$0xff] }
 0x3d4   :  { %v441_v13 = vld [vmem:[%s20017_s1 + $0xcb8] sm:$0xff]  ;;  %v13046_v53 = vcombine.high %v436_v7, %v440_v10 }
 0x3d5   :  { %v13048_v3 = vcombine.high %v437_v11, %v441_v13  ;;  %v13047_v12 = vcombine.low %v437_v11, %v441_v13  ;;  %v13077_v13 = vcombine.low %v468_v44, %v472_v47 }
 0x3d6   :  { %10937 = vmatpush1.bf16.msra.mxu0 %v12997_v20  ;;  %11470 = vmatpush1.bf16.msra.mxu1 %v12999_v59  ;;  %v444_v20 = vld [vmem:[%s20017_s1 + $0xcd0] sm:$0xff] }
 0x3d7   :  { %10938 = vmatprep.subr.bf16.mxu0 %v13006_v24  ;;  %11471 = vmatprep.subr.bf16.mxu1 %v13008_v26  ;;  %v448_v59 = vld [vmem:[%s20017_s1 + $0xcf0] sm:$0xff]  ;;  %v449_v24 = vld [vmem:[%s20017_s1 + $0xcf8] sm:$0xff]  ;;  %v13045_v26 = vcombine.low %v436_v7, %v440_v10 }
 0x3d8   :  { %v13054_v57 = vcombine.high %v444_v20, %v448_v59  ;;  %v481_v7 = vld [vmem:[%s20017_s1 + $0xdf8] sm:$0xff] }
 0x3da   :  { %10939 = vmatpush1.bf16.msra.mxu0 %v13005_v15  ;;  %11472 = vmatpush1.bf16.msra.mxu1 %v13007_v29  ;;  %v456_v15 = vld [vmem:[%s20017_s1 + $0xd30] sm:$0xff]  ;;  %v457_v29 = vld [vmem:[%s20017_s1 + $0xd38] sm:$0xff] }
 0x3db   :  { %10940 = vmatprep.subr.bf16.mxu0 %v13014_v32  ;;  %11473 = vmatprep.subr.bf16.mxu1 %v13016_v33  ;;  %v13053_v32 = vcombine.low %v444_v20, %v448_v59  ;;  %v13062_v34 = vcombine.high %v452_v49, %v456_v15 }
 0x3de   :  { %10941 = vmatpush1.bf16.msra.mxu0 %v13013_v37  ;;  %11474 = vmatpush1.bf16.msra.mxu1 %v13015_v38  ;;  %v461_v37 = vld [vmem:[%s20017_s1 + $0xd58] sm:$0xff] }
 0x3df   :  { %10942 = vmatprep.subr.bf16.mxu0 %v13022_v40  ;;  %11475 = vmatprep.subr.bf16.mxu1 %v13024_v41  ;;  %v465_v38 = vld [vmem:[%s20017_s1 + $0xd78] sm:$0xff]  ;;  %v13061_v40 = vcombine.low %v452_v49, %v456_v15 }
 0x3e0   :  { %v13072_v42 = vcombine.high %v461_v37, %v465_v38 }
 0x3e2   :  { %10943 = vmatpush1.bf16.msra.mxu0 %v13021_v51  ;;  %11476 = vmatpush1.bf16.msra.mxu1 %v13023_v18  ;;  %v469_v51 = vld [vmem:[%s20017_s1 + $0xd98] sm:$0xff] }
 0x3e3   :  { %10953 = vmatprep.subr.bf16.mxu0 %v13030_v54  ;;  %11486 = vmatprep.subr.bf16.mxu1 %v13032_v56  ;;  %v473_v18 = vld [vmem:[%s20017_s1 + $0xdb8] sm:$0xff]  ;;  %v13069_v54 = vcombine.low %v460_v31, %v464_v35  ;;  %v13071_v56 = vcombine.low %v461_v37, %v465_v38  ;;  %v500_v37 = vld [vmem:[%s20017_s1 + $0xe90] sm:$0xff] }
 0x3e4   :  { %v13080_v48 = vcombine.high %v469_v51, %v473_v18  ;;  %v504_v38 = vld [vmem:[%s20017_s1 + $0xeb0] sm:$0xff] }
 0x3e5   :  { %10945 = vmatmul.mubr.bf16.vlgmr.msra.gmra.mrb[4].mxu0 %v15361_v36  ;;  %11478 = vmatmul.mubr.bf16.vlgmr.msra.gmra.mrb[4].mxu1 %v15361_v36  ;;  %v445_v36 = vld [vmem:[%s20017_s1 + $0xcd8] sm:$0xff]  ;;  %v13110_v44 = vcombine.high %v500_v37, %v504_v38 }
 0x3e6   :  { %10954 = vmatpush1.bf16.msra.mxu0 %v13029_v2  ;;  %11487 = vmatpush1.bf16.msra.mxu1 %v13031_v4  ;;  %v13056_v22 = vcombine.high %v445_v36, %v449_v24  ;;  %v13055_v33 = vcombine.low %v445_v36, %v449_v24  ;;  %v480_v2 = vld [vmem:[%s20017_s1 + $0xdf0] sm:$0xff] }
 0x3e7   :  { %10955 = vmatprep.subr.bf16.mxu0 %v13038_v23  ;;  %11488 = vmatprep.subr.bf16.mxu1 %v13040_v6  ;;  %v477_v6 = vld [vmem:[%s20017_s1 + $0xdd8] sm:$0xff]  ;;  %v484_v36 = vld [vmem:[%s20017_s1 + $0xe10] sm:$0xff] }
 0x3e8   :  { %10985 = vmatprep.mubr.bf16.mxu0 %v15382_v45  ;;  %11518 = vmatprep.mubr.bf16.mxu1 %v15382_v45  ;;  %v453_v45 = vld [vmem:[%s20017_s1 + $0xd18] sm:$0xff]  ;;  %v13088_v59 = vcombine.high %v477_v6, %v481_v7  ;;  %v488_v24 = vld [vmem:[%s20017_s1 + $0xe30] sm:$0xff] }
 0x3e9   :  { %v13064_v21 = vcombine.high %v453_v45, %v457_v29  ;;  %v13063_v41 = vcombine.low %v453_v45, %v457_v29  ;;  %v13094_v49 = vcombine.high %v484_v36, %v488_v24  ;;  %v492_v45 = vld [vmem:[%s20017_s1 + $0xe50] sm:$0xff] }
 0x3ea   :  { %10956 = vmatpush1.bf16.msra.mxu0 %v13037_v14  ;;  %11489 = vmatpush1.bf16.msra.mxu1 %v13039_v17  ;;  %v496_v29 = vld [vmem:[%s20017_s1 + $0xe70] sm:$0xff] }
 0x3eb   :  { %10957 = vmatprep.subr.bf16.mxu0 %v13046_v53  ;;  %11490 = vmatprep.subr.bf16.mxu1 %v13048_v3  ;;  %v13079_v53 = vcombine.low %v469_v51, %v473_v18  ;;  %v13086_v3 = vcombine.high %v476_v0, %v480_v2  ;;  %v13102_v31 = vcombine.high %v492_v45, %v496_v29  ;;  %v508_v51 = vld [vmem:[%s20017_s1 + $0xed0] sm:$0xff] }
 0x3ec   :  { %v512_v18 = vld [vmem:[%s20017_s1 + $0xef0] sm:$0xff] }
 0x3ee   :  { %10958 = vmatpush1.bf16.msra.mxu0 %v13045_v26  ;;  %11491 = vmatpush1.bf16.msra.mxu1 %v13047_v12  ;;  %v485_v26 = vld [vmem:[%s20017_s1 + $0xe18] sm:$0xff] }
 0x3ef   :  { %10959 = vmatprep.subr.bf16.mxu0 %v13054_v57  ;;  %11492 = vmatprep.subr.bf16.mxu1 %v13056_v22  ;;  %v489_v12 = vld [vmem:[%s20017_s1 + $0xe38] sm:$0xff]  ;;  %v13085_v57 = vcombine.low %v476_v0, %v480_v2  ;;  %v13087_v22 = vcombine.low %v477_v6, %v481_v7  ;;  %v13118_v0 = vcombine.high %v508_v51, %v512_v18  ;;  %v516_v6 = vld [vmem:[%s20017_s1 + $0xf10] sm:$0xff] }
 0x3f0   :  { %v13096_v15 = vcombine.high %v485_v26, %v489_v12  ;;  %v520_v7 = vld [vmem:[%s20017_s1 + $0xf30] sm:$0xff] }
 0x3f2   :  { %10960 = vmatpush1.bf16.msra.mxu0 %v13053_v32  ;;  %11493 = vmatpush1.bf16.msra.mxu1 %v13055_v33  ;;  %v493_v32 = vld [vmem:[%s20017_s1 + $0xe58] sm:$0xff] }
 0x3f3   :  { %10961 = vmatprep.subr.bf16.mxu0 %v13062_v34  ;;  %11494 = vmatprep.subr.bf16.mxu1 %v13064_v21  ;;  %v497_v33 = vld [vmem:[%s20017_s1 + $0xe78] sm:$0xff]  ;;  %v13093_v34 = vcombine.low %v484_v36, %v488_v24  ;;  %v13095_v21 = vcombine.low %v485_v26, %v489_v12  ;;  %v13125_v26 = vcombine.low %v516_v6, %v520_v7 }
 0x3f4   :  { %v13104_v35 = vcombine.high %v493_v32, %v497_v33  ;;  %v525_v36 = vld [vmem:[%s20017_s1 + $0xf58] sm:$0xff] }
 0x3f5   :  { %v529_v24 = vld [vmem:[%s20017_s1 + $0xf78] sm:$0xff] }
 0x3f6   :  { %10962 = vmatpush1.bf16.msra.mxu0 %v13061_v40  ;;  %11495 = vmatpush1.bf16.msra.mxu1 %v13063_v41  ;;  %v501_v40 = vld [vmem:[%s20017_s1 + $0xe98] sm:$0xff] }
 0x3f7   :  { %10963 = vmatprep.subr.bf16.mxu0 %v13070_v25  ;;  %11496 = vmatprep.subr.bf16.mxu1 %v13072_v42  ;;  %v505_v41 = vld [vmem:[%s20017_s1 + $0xeb8] sm:$0xff]  ;;  %v13101_v25 = vcombine.low %v492_v45, %v496_v29  ;;  %v13103_v42 = vcombine.low %v493_v32, %v497_v33  ;;  %v13135_v33 = vcombine.low %v525_v36, %v529_v24 }
 0x3f8   :  { %v18005_v39 = vpop.f32.mrb[0].mxu0  ;;  %v18013_v4 = vpop.f32.mrb[0].mxu1  ;;  %v13112_v47 = vcombine.high %v501_v40, %v505_v41  ;;  %v533_v45 = vld [vmem:[%s20017_s1 + $0xf98] sm:$0xff] }
 0x3f9   :  { %v18015_v23 = vpop.f32.mrb[1].mxu0  ;;  %v18023_v10 = vpop.f32.mrb[1].mxu1  ;;  %v537_v29 = vld [vmem:[%s20017_s1 + $0xfb8] sm:$0xff] }
 0x3fa   :  { %v10294_v11 = vpop.f32.mrb[2].mxu0  ;;  %10964 = vmatpush1.bf16.msra.mxu0 %v13069_v54  ;;  %v10827_v14 = vpop.f32.mrb[2].mxu1  ;;  %11497 = vmatpush1.bf16.msra.mxu1 %v13071_v56  ;;  %v509_v54 = vld [vmem:[%s20017_s1 + $0xed8] sm:$0xff] }
 0x3fb   :  { %v10295_v17 = vpop.f32.mrb[3].mxu0  ;;  %10965 = vmatprep.subr.bf16.mxu0 %v13078_v61  ;;  %v10828_v20 = vpop.f32.mrb[3].mxu1  ;;  %11498 = vmatprep.subr.bf16.mxu1 %v13080_v48  ;;  %v513_v56 = vld [vmem:[%s20017_s1 + $0xef8] sm:$0xff]  ;;  %v13109_v61 = vcombine.low %v500_v37, %v504_v38  ;;  %v13111_v48 = vcombine.low %v501_v40, %v505_v41  ;;  %v13117_v14 = vcombine.low %v508_v51, %v512_v18 }
 0x3fc   :  { %v13120_v2 = vcombine.high %v509_v54, %v513_v56  ;;  %v517_v11 = vld [vmem:[%s20017_s1 + $0xf18] sm:$0xff]  ;;  %v13119_v17 = vcombine.low %v509_v54, %v513_v56  ;;  %v524_v20 = vld [vmem:[%s20017_s1 + $0xf50] sm:$0xff]  ;;  %v13143_v41 = vcombine.low %v533_v45, %v537_v29 }
 0x3fd   :  { %v541_v37 = vld [vmem:[%s20017_s1 + $0xfd8] sm:$0xff] }
 0x3fe   :  { %10966 = vmatpush1.bf16.msra.mxu0 %v13077_v13  ;;  %11499 = vmatpush1.bf16.msra.mxu1 %v13079_v53  ;;  %v521_v13 = vld [vmem:[%s20017_s1 + $0xf38] sm:$0xff]  ;;  %v13126_v53 = vcombine.high %v516_v6, %v520_v7 }
 0x3ff   :  { %10967 = vmatprep.subr.bf16.mxu0 %v13086_v3  ;;  %11500 = vmatprep.subr.bf16.mxu1 %v13088_v59  ;;  %v13128_v3 = vcombine.high %v517_v11, %v521_v13  ;;  %v528_v59 = vld [vmem:[%s20017_s1 + $0xf70] sm:$0xff]  ;;  %v13127_v12 = vcombine.low %v517_v11, %v521_v13  ;;  %v545_v38 = vld [vmem:[%s20017_s1 + $0xff8] sm:$0xff] }
 0x400   :  { %v13133_v32 = vcombine.low %v524_v20, %v528_v59  ;;  %v549_v51 = vld [vmem:[%s20017_s1 + $0x1018] sm:$0xff]  ;;  %v13151_v56 = vcombine.low %v541_v37, %v545_v38 }
 0x401   :  { %v553_v18 = vld [vmem:[%s20017_s1 + $0x1038] sm:$0xff] }
 0x402   :  { %10968 = vmatpush1.bf16.msra.mxu0 %v13085_v57  ;;  %11501 = vmatpush1.bf16.msra.mxu1 %v13087_v22  ;;  %v13134_v57 = vcombine.high %v524_v20, %v528_v59  ;;  %v13136_v22 = vcombine.high %v525_v36, %v529_v24  ;;  %v557_v6 = vld [vmem:[%s20017_s1 + $0x1058] sm:$0xff]  ;;  %v13159_v13 = vcombine.low %v549_v51, %v553_v18 }
 0x403   :  { %10969 = vmatprep.subr.bf16.mxu0 %v13094_v49  ;;  %11502 = vmatprep.subr.bf16.mxu1 %v13096_v15  ;;  %v532_v49 = vld [vmem:[%s20017_s1 + $0xf90] sm:$0xff]  ;;  %v561_v7 = vld [vmem:[%s20017_s1 + $0x1078] sm:$0xff] }
 0x404   :  { %v536_v15 = vld [vmem:[%s20017_s1 + $0xfb0] sm:$0xff]  ;;  %v565_v20 = vld [vmem:[%s20017_s1 + $0x1098] sm:$0xff]  ;;  %v13167_v24 = vcombine.low %v557_v6, %v561_v7 }
 0x405   :  { %v13141_v40 = vcombine.low %v532_v49, %v536_v15  ;;  %v569_v59 = vld [vmem:[%s20017_s1 + $0x10b8] sm:$0xff] }
 0x406   :  { %10970 = vmatpush1.bf16.msra.mxu0 %v13093_v34  ;;  %11503 = vmatpush1.bf16.msra.mxu1 %v13095_v21  ;;  %v13142_v34 = vcombine.high %v532_v49, %v536_v15  ;;  %v13144_v21 = vcombine.high %v533_v45, %v537_v29  ;;  %v577_v49 = vld [vmem:[%s20017_s1 + $0x10f8] sm:$0xff]  ;;  %v13175_v45 = vcombine.low %v565_v20, %v569_v59 }
 0x407   :  { %10971 = vmatprep.subr.bf16.mxu0 %v13102_v31  ;;  %11504 = vmatprep.subr.bf16.mxu1 %v13104_v35  ;;  %v540_v31 = vld [vmem:[%s20017_s1 + $0xfd0] sm:$0xff] }
 0x408   :  { %v544_v35 = vld [vmem:[%s20017_s1 + $0xff0] sm:$0xff] }
 0x409   :  { %v13149_v54 = vcombine.low %v540_v31, %v544_v35 }
 0x40a   :  { %10972 = vmatpush1.bf16.msra.mxu0 %v13101_v25  ;;  %11505 = vmatpush1.bf16.msra.mxu1 %v13103_v42  ;;  %v13150_v25 = vcombine.high %v540_v31, %v544_v35  ;;  %v13152_v42 = vcombine.high %v541_v37, %v545_v38 }
 0x40b   :  { %10973 = vmatprep.subr.bf16.mxu0 %v13110_v44  ;;  %11506 = vmatprep.subr.bf16.mxu1 %v13112_v47  ;;  %v548_v44 = vld [vmem:[%s20017_s1 + $0x1010] sm:$0xff] }
 0x40c   :  { %v552_v47 = vld [vmem:[%s20017_s1 + $0x1030] sm:$0xff] }
 0x40d   :  { %v13157_v11 = vcombine.low %v548_v44, %v552_v47 }
 0x40e   :  { %10974 = vmatpush1.bf16.msra.mxu0 %v13109_v61  ;;  %11507 = vmatpush1.bf16.msra.mxu1 %v13111_v48  ;;  %v13158_v61 = vcombine.high %v548_v44, %v552_v47  ;;  %v13160_v48 = vcombine.high %v549_v51, %v553_v18 }
 0x40f   :  { %10975 = vmatprep.subr.bf16.mxu0 %v13118_v0  ;;  %11508 = vmatprep.subr.bf16.mxu1 %v13120_v2  ;;  %v556_v0 = vld [vmem:[%s20017_s1 + $0x1050] sm:$0xff] }
 0x410   :  { %v560_v2 = vld [vmem:[%s20017_s1 + $0x1070] sm:$0xff] }
 0x411   :  { %v13165_v36 = vcombine.low %v556_v0, %v560_v2 }
 0x412   :  { %10976 = vmatpush1.bf16.msra.mxu0 %v13117_v14  ;;  %11509 = vmatpush1.bf16.msra.mxu1 %v13119_v17  ;;  %v13166_v14 = vcombine.high %v556_v0, %v560_v2  ;;  %v13168_v17 = vcombine.high %v557_v6, %v561_v7 }
 0x413   :  { %10977 = vmatprep.subr.bf16.mxu0 %v13126_v53  ;;  %11510 = vmatprep.subr.bf16.mxu1 %v13128_v3  ;;  %v564_v53 = vld [vmem:[%s20017_s1 + $0x1090] sm:$0xff] }
 0x414   :  { %v568_v3 = vld [vmem:[%s20017_s1 + $0x10b0] sm:$0xff] }
 0x415   :  { %v13173_v15 = vcombine.low %v564_v53, %v568_v3 }
 0x416   :  { %10978 = vmatpush1.bf16.msra.mxu0 %v13125_v26  ;;  %11511 = vmatpush1.bf16.msra.mxu1 %v13127_v12  ;;  %v13174_v26 = vcombine.high %v564_v53, %v568_v3  ;;  %v13176_v12 = vcombine.high %v565_v20, %v569_v59 }
 0x417   :  { %10979 = vmatprep.subr.bf16.mxu0 %v13134_v57  ;;  %11512 = vmatprep.subr.bf16.mxu1 %v13136_v22  ;;  %v572_v57 = vld [vmem:[%s20017_s1 + $0x10d0] sm:$0xff] }
 0x418   :  { %v576_v22 = vld [vmem:[%s20017_s1 + $0x10f0] sm:$0xff] }
 0x419   :  { %v13182_v29 = vcombine.high %v572_v57, %v576_v22  ;;  %v13181_v31 = vcombine.low %v572_v57, %v576_v22 }
 0x41a   :  { %10980 = vmatpush1.bf16.msra.mxu0 %v13133_v32  ;;  %11513 = vmatpush1.bf16.msra.mxu1 %v13135_v33  ;;  %v580_v33 = vld [vmem:[%s20017_s1 + $0x1110] sm:$0xff] }
 0x41b   :  { %10981 = vmatprep.subr.bf16.mxu0 %v13142_v34  ;;  %11514 = vmatprep.subr.bf16.mxu1 %v13144_v21  ;;  %v584_v34 = vld [vmem:[%s20017_s1 + $0x1130] sm:$0xff]  ;;  %v585_v21 = vld [vmem:[%s20017_s1 + $0x1138] sm:$0xff] }
 0x41c   :  { %v13190_v37 = vcombine.high %v580_v33, %v584_v34  ;;  %v13189_v44 = vcombine.low %v580_v33, %v584_v34 }
 0x41e   :  { %10982 = vmatpush1.bf16.msra.mxu0 %v13141_v40  ;;  %11515 = vmatpush1.bf16.msra.mxu1 %v13143_v41  ;;  %v588_v40 = vld [vmem:[%s20017_s1 + $0x1150] sm:$0xff] }
 0x41f   :  { %10983 = vmatprep.subr.bf16.mxu0 %v13150_v25  ;;  %11516 = vmatprep.subr.bf16.mxu1 %v13152_v42  ;;  %v592_v41 = vld [vmem:[%s20017_s1 + $0x1170] sm:$0xff]  ;;  %v589_v25 = vld [vmem:[%s20017_s1 + $0x1158] sm:$0xff] }
 0x420   :  { %v593_v42 = vld [vmem:[%s20017_s1 + $0x1178] sm:$0xff]  ;;  %v13198_v51 = vcombine.high %v588_v40, %v592_v41  ;;  %v13197_v0 = vcombine.low %v588_v40, %v592_v41 }
 0x421   :  { %v13200_v18 = vcombine.high %v589_v25, %v593_v42  ;;  %v13199_v2 = vcombine.low %v589_v25, %v593_v42 }
 0x422   :  { %10984 = vmatpush1.bf16.msra.mxu0 %v13149_v54  ;;  %11517 = vmatpush1.bf16.msra.mxu1 %v13151_v56  ;;  %v596_v54 = vld [vmem:[%s20017_s1 + $0x1190] sm:$0xff] }
 0x423   :  { %10994 = vmatprep.subr.bf16.mxu0 %v13158_v61  ;;  %11527 = vmatprep.subr.bf16.mxu1 %v13160_v48  ;;  %v600_v56 = vld [vmem:[%s20017_s1 + $0x11b0] sm:$0xff]  ;;  %v597_v61 = vld [vmem:[%s20017_s1 + $0x1198] sm:$0xff] }
 0x424   :  { %v601_v48 = vld [vmem:[%s20017_s1 + $0x11b8] sm:$0xff]  ;;  %v13206_v6 = vcombine.high %v596_v54, %v600_v56  ;;  %v13205_v53 = vcombine.low %v596_v54, %v600_v56 }
 0x425   :  { %10986 = vmatmul.mubr.bf16.vlgmr.msra.gmra.mrb[4].mxu0 %v15570_v55  ;;  %11519 = vmatmul.mubr.bf16.vlgmr.msra.gmra.mrb[4].mxu1 %v15570_v55  ;;  %v573_v55 = vld [vmem:[%s20017_s1 + $0x10d8] sm:$0xff]  ;;  %v13208_v7 = vcombine.high %v597_v61, %v601_v48  ;;  %v13207_v3 = vcombine.low %v597_v61, %v601_v48 }
 0x426   :  { %10995 = vmatpush1.bf16.msra.mxu0 %v13157_v11  ;;  %11528 = vmatpush1.bf16.msra.mxu1 %v13159_v13  ;;  %v13184_v32 = vcombine.high %v573_v55, %v577_v49  ;;  %v13183_v35 = vcombine.low %v573_v55, %v577_v49  ;;  %v604_v11 = vld [vmem:[%s20017_s1 + $0x11d0] sm:$0xff] }
 0x427   :  { %10996 = vmatprep.subr.bf16.mxu0 %v13166_v14  ;;  %11529 = vmatprep.subr.bf16.mxu1 %v13168_v17  ;;  %v608_v13 = vld [vmem:[%s20017_s1 + $0x11f0] sm:$0xff]  ;;  %v605_v14 = vld [vmem:[%s20017_s1 + $0x11d8] sm:$0xff] }
 0x428   :  { %11026 = vmatprep.mubr.bf16.mxu0 %v15591_v1  ;;  %11559 = vmatprep.mubr.bf16.mxu1 %v15591_v1  ;;  %v581_v1 = vld [vmem:[%s20017_s1 + $0x1118] sm:$0xff]  ;;  %v13214_v20 = vcombine.high %v604_v11, %v608_v13  ;;  %v13213_v57 = vcombine.low %v604_v11, %v608_v13 }
 0x429   :  { %v13192_v38 = vcombine.high %v581_v1, %v585_v21  ;;  %v13191_v47 = vcombine.low %v581_v1, %v585_v21  ;;  %v609_v17 = vld [vmem:[%s20017_s1 + $0x11f8] sm:$0xff] }
 0x42a   :  { %10997 = vmatpush1.bf16.msra.mxu0 %v13165_v36  ;;  %11530 = vmatpush1.bf16.msra.mxu1 %v13167_v24  ;;  %v13216_v59 = vcombine.high %v605_v14, %v609_v17  ;;  %v612_v36 = vld [vmem:[%s20017_s1 + $0x1210] sm:$0xff]  ;;  %v13215_v22 = vcombine.low %v605_v14, %v609_v17 }
 0x42b   :  { %10998 = vmatprep.subr.bf16.mxu0 %v13174_v26  ;;  %11531 = vmatprep.subr.bf16.mxu1 %v13176_v12  ;;  %v616_v24 = vld [vmem:[%s20017_s1 + $0x1230] sm:$0xff]  ;;  %v613_v26 = vld [vmem:[%s20017_s1 + $0x1218] sm:$0xff] }
 0x42c   :  { %v617_v12 = vld [vmem:[%s20017_s1 + $0x1238] sm:$0xff]  ;;  %v13222_v55 = vcombine.high %v612_v36, %v616_v24  ;;  %v13221_v33 = vcombine.low %v612_v36, %v616_v24 }
 0x42d   :  { %v13224_v49 = vcombine.high %v613_v26, %v617_v12  ;;  %v13223_v34 = vcombine.low %v613_v26, %v617_v12 }
 0x42e   :  { %10999 = vmatpush1.bf16.msra.mxu0 %v13173_v15  ;;  %11532 = vmatpush1.bf16.msra.mxu1 %v13175_v45  ;;  %v620_v15 = vld [vmem:[%s20017_s1 + $0x1250] sm:$0xff] }
 0x42f   :  { %11000 = vmatprep.subr.bf16.mxu0 %v13182_v29  ;;  %11533 = vmatprep.subr.bf16.mxu1 %v13184_v32  ;;  %v624_v45 = vld [vmem:[%s20017_s1 + $0x1270] sm:$0xff]  ;;  %v621_v29 = vld [vmem:[%s20017_s1 + $0x1258] sm:$0xff] }
 0x430   :  { %v625_v32 = vld [vmem:[%s20017_s1 + $0x1278] sm:$0xff]  ;;  %v13230_v1 = vcombine.high %v620_v15, %v624_v45  ;;  %v13229_v40 = vcombine.low %v620_v15, %v624_v45 }
 0x431   :  { %v13232_v21 = vcombine.high %v621_v29, %v625_v32  ;;  %v13231_v41 = vcombine.low %v621_v29, %v625_v32 }
 0x432   :  { %11001 = vmatpush1.bf16.msra.mxu0 %v13181_v31  ;;  %11534 = vmatpush1.bf16.msra.mxu1 %v13183_v35  ;;  %v628_v31 = vld [vmem:[%s20017_s1 + $0x1290] sm:$0xff] }
 0x433   :  { %11002 = vmatprep.subr.bf16.mxu0 %v13190_v37  ;;  %11535 = vmatprep.subr.bf16.mxu1 %v13192_v38  ;;  %v632_v35 = vld [vmem:[%s20017_s1 + $0x12b0] sm:$0xff]  ;;  %v629_v37 = vld [vmem:[%s20017_s1 + $0x1298] sm:$0xff] }
 0x434   :  { %v633_v38 = vld [vmem:[%s20017_s1 + $0x12b8] sm:$0xff]  ;;  %v13238_v25 = vcombine.high %v628_v31, %v632_v35  ;;  %v13237_v54 = vcombine.low %v628_v31, %v632_v35 }
 0x435   :  { %v13240_v42 = vcombine.high %v629_v37, %v633_v38  ;;  %v13239_v56 = vcombine.low %v629_v37, %v633_v38 }
 0x436   :  { %11003 = vmatpush1.bf16.msra.mxu0 %v13189_v44  ;;  %11536 = vmatpush1.bf16.msra.mxu1 %v13191_v47  ;;  %v636_v44 = vld [vmem:[%s20017_s1 + $0x12d0] sm:$0xff] }
 0x437   :  { %11004 = vmatprep.subr.bf16.mxu0 %v13198_v51  ;;  %11537 = vmatprep.subr.bf16.mxu1 %v13200_v18  ;;  %v640_v47 = vld [vmem:[%s20017_s1 + $0x12f0] sm:$0xff]  ;;  %v637_v51 = vld [vmem:[%s20017_s1 + $0x12d8] sm:$0xff] }
 0x438   :  { %v641_v18 = vld [vmem:[%s20017_s1 + $0x12f8] sm:$0xff]  ;;  %v13246_v61 = vcombine.high %v636_v44, %v640_v47  ;;  %v13245_v11 = vcombine.low %v636_v44, %v640_v47 }
 0x439   :  { %v13248_v48 = vcombine.high %v637_v51, %v641_v18  ;;  %v13247_v13 = vcombine.low %v637_v51, %v641_v18 }
 0x43a   :  { %11005 = vmatpush1.bf16.msra.mxu0 %v13197_v0  ;;  %11538 = vmatpush1.bf16.msra.mxu1 %v13199_v2  ;;  %v644_v0 = vld [vmem:[%s20017_s1 + $0x1310] sm:$0xff] }
 0x43b   :  { %11006 = vmatprep.subr.bf16.mxu0 %v13206_v6  ;;  %11539 = vmatprep.subr.bf16.mxu1 %v13208_v7  ;;  %v648_v2 = vld [vmem:[%s20017_s1 + $0x1330] sm:$0xff]  ;;  %v645_v6 = vld [vmem:[%s20017_s1 + $0x1318] sm:$0xff] }
 0x43c   :  { %v649_v7 = vld [vmem:[%s20017_s1 + $0x1338] sm:$0xff]  ;;  %v13254_v14 = vcombine.high %v644_v0, %v648_v2  ;;  %v13253_v36 = vcombine.low %v644_v0, %v648_v2 }
 0x43d   :  { %v13256_v17 = vcombine.high %v645_v6, %v649_v7  ;;  %v13255_v24 = vcombine.low %v645_v6, %v649_v7 }
 0x43e   :  { %11007 = vmatpush1.bf16.msra.mxu0 %v13205_v53  ;;  %11540 = vmatpush1.bf16.msra.mxu1 %v13207_v3  ;;  %v652_v53 = vld [vmem:[%s20017_s1 + $0x1350] sm:$0xff] }
 0x43f   :  { %11008 = vmatprep.subr.bf16.mxu0 %v13214_v20  ;;  %11541 = vmatprep.subr.bf16.mxu1 %v13216_v59  ;;  %v656_v3 = vld [vmem:[%s20017_s1 + $0x1370] sm:$0xff]  ;;  %v653_v20 = vld [vmem:[%s20017_s1 + $0x1358] sm:$0xff] }
 0x440   :  { %v657_v59 = vld [vmem:[%s20017_s1 + $0x1378] sm:$0xff]  ;;  %v13262_v26 = vcombine.high %v652_v53, %v656_v3  ;;  %v13261_v15 = vcombine.low %v652_v53, %v656_v3 }
 0x441   :  { %v13264_v12 = vcombine.high %v653_v20, %v657_v59  ;;  %v13263_v45 = vcombine.low %v653_v20, %v657_v59 }
 0x442   :  { %11009 = vmatpush1.bf16.msra.mxu0 %v13213_v57  ;;  %11542 = vmatpush1.bf16.msra.mxu1 %v13215_v22  ;;  %v660_v57 = vld [vmem:[%s20017_s1 + $0x1390] sm:$0xff] }
 0x443   :  { %11010 = vmatprep.subr.bf16.mxu0 %v13222_v55  ;;  %11543 = vmatprep.subr.bf16.mxu1 %v13224_v49  ;;  %v664_v22 = vld [vmem:[%s20017_s1 + $0x13b0] sm:$0xff]  ;;  %v661_v55 = vld [vmem:[%s20017_s1 + $0x1398] sm:$0xff] }
 0x444   :  { %v665_v49 = vld [vmem:[%s20017_s1 + $0x13b8] sm:$0xff]  ;;  %v13270_v29 = vcombine.high %v660_v57, %v664_v22  ;;  %v13269_v31 = vcombine.low %v660_v57, %v664_v22 }
 0x445   :  { %v13272_v32 = vcombine.high %v661_v55, %v665_v49  ;;  %v13271_v35 = vcombine.low %v661_v55, %v665_v49  ;;  %v708_v49 = vld [vmem:[%s20017_s1 + $0x1510] sm:$0xff] }
 0x446   :  { %11011 = vmatpush1.bf16.msra.mxu0 %v13221_v33  ;;  %11544 = vmatpush1.bf16.msra.mxu1 %v13223_v34  ;;  %v668_v33 = vld [vmem:[%s20017_s1 + $0x13d0] sm:$0xff] }
 0x447   :  { %11012 = vmatprep.subr.bf16.mxu0 %v13230_v1  ;;  %11545 = vmatprep.subr.bf16.mxu1 %v13232_v21  ;;  %v672_v34 = vld [vmem:[%s20017_s1 + $0x13f0] sm:$0xff]  ;;  %v669_v1 = vld [vmem:[%s20017_s1 + $0x13d8] sm:$0xff] }
 0x448   :  { %v673_v21 = vld [vmem:[%s20017_s1 + $0x13f8] sm:$0xff]  ;;  %v13278_v37 = vcombine.high %v668_v33, %v672_v34  ;;  %v13277_v44 = vcombine.low %v668_v33, %v672_v34 }
 0x449   :  { %v13280_v38 = vcombine.high %v669_v1, %v673_v21  ;;  %v13279_v47 = vcombine.low %v669_v1, %v673_v21  ;;  %v716_v1 = vld [vmem:[%s20017_s1 + $0x1550] sm:$0xff] }
 0x44a   :  { %11013 = vmatpush1.bf16.msra.mxu0 %v13229_v40  ;;  %11546 = vmatpush1.bf16.msra.mxu1 %v13231_v41  ;;  %v676_v40 = vld [vmem:[%s20017_s1 + $0x1410] sm:$0xff] }
 0x44b   :  { %11014 = vmatprep.subr.bf16.mxu0 %v13238_v25  ;;  %11547 = vmatprep.subr.bf16.mxu1 %v13240_v42  ;;  %v680_v41 = vld [vmem:[%s20017_s1 + $0x1430] sm:$0xff]  ;;  %v677_v25 = vld [vmem:[%s20017_s1 + $0x1418] sm:$0xff] }
 0x44c   :  { %v681_v42 = vld [vmem:[%s20017_s1 + $0x1438] sm:$0xff]  ;;  %v13286_v51 = vcombine.high %v676_v40, %v680_v41  ;;  %v13285_v0 = vcombine.low %v676_v40, %v680_v41  ;;  %v720_v21 = vld [vmem:[%s20017_s1 + $0x1570] sm:$0xff] }
 0x44d   :  { %v13288_v18 = vcombine.high %v677_v25, %v681_v42  ;;  %v13287_v2 = vcombine.low %v677_v25, %v681_v42  ;;  %v13326_v40 = vcombine.high %v716_v1, %v720_v21  ;;  %v724_v25 = vld [vmem:[%s20017_s1 + $0x1590] sm:$0xff] }
 0x44e   :  { %11015 = vmatpush1.bf16.msra.mxu0 %v13237_v54  ;;  %11548 = vmatpush1.bf16.msra.mxu1 %v13239_v56  ;;  %v684_v54 = vld [vmem:[%s20017_s1 + $0x1450] sm:$0xff] }
 0x44f   :  { %11016 = vmatprep.subr.bf16.mxu0 %v13246_v61  ;;  %11549 = vmatprep.subr.bf16.mxu1 %v13248_v48  ;;  %v688_v56 = vld [vmem:[%s20017_s1 + $0x1470] sm:$0xff]  ;;  %v685_v61 = vld [vmem:[%s20017_s1 + $0x1458] sm:$0xff] }
 0x450   :  { %v689_v48 = vld [vmem:[%s20017_s1 + $0x1478] sm:$0xff]  ;;  %v13294_v6 = vcombine.high %v684_v54, %v688_v56  ;;  %v13293_v53 = vcombine.low %v684_v54, %v688_v56  ;;  %v728_v42 = vld [vmem:[%s20017_s1 + $0x15b0] sm:$0xff] }
 0x451   :  { %v13296_v7 = vcombine.high %v685_v61, %v689_v48  ;;  %v13295_v3 = vcombine.low %v685_v61, %v689_v48  ;;  %v13334_v54 = vcombine.high %v724_v25, %v728_v42  ;;  %v732_v61 = vld [vmem:[%s20017_s1 + $0x15d0] sm:$0xff] }
 0x452   :  { %11017 = vmatpush1.bf16.msra.mxu0 %v13245_v11  ;;  %11550 = vmatpush1.bf16.msra.mxu1 %v13247_v13  ;;  %v692_v11 = vld [vmem:[%s20017_s1 + $0x1490] sm:$0xff] }
 0x453   :  { %11018 = vmatprep.subr.bf16.mxu0 %v13254_v14  ;;  %11551 = vmatprep.subr.bf16.mxu1 %v13256_v17  ;;  %v696_v13 = vld [vmem:[%s20017_s1 + $0x14b0] sm:$0xff]  ;;  %v693_v14 = vld [vmem:[%s20017_s1 + $0x1498] sm:$0xff] }
 0x454   :  { %v697_v17 = vld [vmem:[%s20017_s1 + $0x14b8] sm:$0xff]  ;;  %v13302_v20 = vcombine.high %v692_v11, %v696_v13  ;;  %v736_v48 = vld [vmem:[%s20017_s1 + $0x15f0] sm:$0xff] }
 0x455   :  { %v13304_v59 = vcombine.high %v693_v14, %v697_v17  ;;  %v13303_v57 = vcombine.low %v693_v14, %v697_v17  ;;  %v740_v14 = vld [vmem:[%s20017_s1 + $0x1610] sm:$0xff] }
 0x456   :  { %11019 = vmatpush1.bf16.msra.mxu0 %v13253_v36  ;;  %11552 = vmatpush1.bf16.msra.mxu1 %v13255_v24  ;;  %v700_v36 = vld [vmem:[%s20017_s1 + $0x14d0] sm:$0xff] }
 0x457   :  { %11020 = vmatprep.subr.bf16.mxu0 %v13262_v26  ;;  %11553 = vmatprep.subr.bf16.mxu1 %v13264_v12  ;;  %v704_v24 = vld [vmem:[%s20017_s1 + $0x14f0] sm:$0xff]  ;;  %v705_v26 = vld [vmem:[%s20017_s1 + $0x14f8] sm:$0xff]  ;;  %v13301_v12 = vcombine.low %v692_v11, %v696_v13  ;;  %v13342_v11 = vcombine.high %v732_v61, %v736_v48 }
 0x458   :  { %v13310_v22 = vcombine.high %v700_v36, %v704_v24  ;;  %v744_v17 = vld [vmem:[%s20017_s1 + $0x1630] sm:$0xff] }
 0x45a   :  { %11021 = vmatpush1.bf16.msra.mxu0 %v13261_v15  ;;  %11554 = vmatpush1.bf16.msra.mxu1 %v13263_v45  ;;  %v712_v15 = vld [vmem:[%s20017_s1 + $0x1530] sm:$0xff]  ;;  %v713_v45 = vld [vmem:[%s20017_s1 + $0x1538] sm:$0xff] }
 0x45b   :  { %11022 = vmatprep.subr.bf16.mxu0 %v13270_v29  ;;  %11555 = vmatprep.subr.bf16.mxu1 %v13272_v32  ;;  %v13309_v29 = vcombine.low %v700_v36, %v704_v24  ;;  %v13318_v33 = vcombine.high %v708_v49, %v712_v15  ;;  %v13350_v36 = vcombine.high %v740_v14, %v744_v17 }
 0x45e   :  { %11023 = vmatpush1.bf16.msra.mxu0 %v13269_v31  ;;  %11556 = vmatpush1.bf16.msra.mxu1 %v13271_v35  ;;  %v717_v31 = vld [vmem:[%s20017_s1 + $0x1558] sm:$0xff] }
 0x45f   :  { %11024 = vmatprep.subr.bf16.mxu0 %v13278_v37  ;;  %11557 = vmatprep.subr.bf16.mxu1 %v13280_v38  ;;  %v721_v35 = vld [vmem:[%s20017_s1 + $0x1578] sm:$0xff]  ;;  %v13317_v37 = vcombine.low %v708_v49, %v712_v15 }
 0x460   :  { %v13328_v41 = vcombine.high %v717_v31, %v721_v35 }
 0x462   :  { %11025 = vmatpush1.bf16.msra.mxu0 %v13277_v44  ;;  %11558 = vmatpush1.bf16.msra.mxu1 %v13279_v47  ;;  %v725_v44 = vld [vmem:[%s20017_s1 + $0x1598] sm:$0xff] }
 0x463   :  { %11035 = vmatprep.subr.bf16.mxu0 %v13286_v51  ;;  %11568 = vmatprep.subr.bf16.mxu1 %v13288_v18  ;;  %v729_v47 = vld [vmem:[%s20017_s1 + $0x15b8] sm:$0xff]  ;;  %v13325_v51 = vcombine.low %v716_v1, %v720_v21  ;;  %v13327_v18 = vcombine.low %v717_v31, %v721_v35  ;;  %v764_v31 = vld [vmem:[%s20017_s1 + $0x16d0] sm:$0xff] }
 0x464   :  { %v13336_v56 = vcombine.high %v725_v44, %v729_v47  ;;  %v768_v35 = vld [vmem:[%s20017_s1 + $0x16f0] sm:$0xff] }
 0x465   :  { %11027 = vmatmul.mubr.bf16.vlgmr.msra.gmra.mrb[4].mxu0 %v15779_v16  ;;  %11560 = vmatmul.mubr.bf16.vlgmr.msra.gmra.mrb[4].mxu1 %v15779_v16  ;;  %v701_v16 = vld [vmem:[%s20017_s1 + $0x14d8] sm:$0xff] }
 0x466   :  { %11036 = vmatpush1.bf16.msra.mxu0 %v13285_v0  ;;  %11569 = vmatpush1.bf16.msra.mxu1 %v13287_v2  ;;  %v13312_v55 = vcombine.high %v701_v16, %v705_v26  ;;  %v13311_v32 = vcombine.low %v701_v16, %v705_v26  ;;  %v733_v0 = vld [vmem:[%s20017_s1 + $0x15d8] sm:$0xff]  ;;  %v748_v16 = vld [vmem:[%s20017_s1 + $0x1650] sm:$0xff] }
 0x467   :  { %11037 = vmatprep.subr.bf16.mxu0 %v13294_v6  ;;  %11570 = vmatprep.subr.bf16.mxu1 %v13296_v7  ;;  %v737_v2 = vld [vmem:[%s20017_s1 + $0x15f8] sm:$0xff]  ;;  %v13333_v6 = vcombine.low %v724_v25, %v728_v42  ;;  %v13335_v7 = vcombine.low %v725_v44, %v729_v47  ;;  %v752_v26 = vld [vmem:[%s20017_s1 + $0x1670] sm:$0xff]  ;;  %v13374_v25 = vcombine.high %v764_v31, %v768_v35 }
 0x468   :  { %11067 = vmatprep.mubr.bf16.mxu0 %v15800_v27  ;;  %11600 = vmatprep.mubr.bf16.mxu1 %v15800_v27  ;;  %v709_v27 = vld [vmem:[%s20017_s1 + $0x1518] sm:$0xff]  ;;  %v13344_v13 = vcombine.high %v733_v0, %v737_v2  ;;  %v13358_v49 = vcombine.high %v748_v16, %v752_v26  ;;  %v772_v44 = vld [vmem:[%s20017_s1 + $0x1710] sm:$0xff] }
 0x469   :  { %v13320_v34 = vcombine.high %v709_v27, %v713_v45  ;;  %v13319_v38 = vcombine.low %v709_v27, %v713_v45  ;;  %v756_v27 = vld [vmem:[%s20017_s1 + $0x1690] sm:$0xff] }
 0x46a   :  { %11038 = vmatpush1.bf16.msra.mxu0 %v13293_v53  ;;  %11571 = vmatpush1.bf16.msra.mxu1 %v13295_v3  ;;  %v741_v53 = vld [vmem:[%s20017_s1 + $0x1618] sm:$0xff]  ;;  %v760_v45 = vld [vmem:[%s20017_s1 + $0x16b0] sm:$0xff] }
 0x46b   :  { %11039 = vmatprep.subr.bf16.mxu0 %v13302_v20  ;;  %11572 = vmatprep.subr.bf16.mxu1 %v13304_v59  ;;  %v745_v3 = vld [vmem:[%s20017_s1 + $0x1638] sm:$0xff]  ;;  %v13341_v20 = vcombine.low %v732_v61, %v736_v48  ;;  %v13343_v59 = vcombine.low %v733_v0, %v737_v2  ;;  %v13366_v1 = vcombine.high %v756_v27, %v760_v45  ;;  %v776_v47 = vld [vmem:[%s20017_s1 + $0x1730] sm:$0xff] }
 0x46c   :  { %v13352_v24 = vcombine.high %v741_v53, %v745_v3  ;;  %v13382_v61 = vcombine.high %v772_v44, %v776_v47  ;;  %v780_v0 = vld [vmem:[%s20017_s1 + $0x1750] sm:$0xff] }
 0x46d   :  { %v784_v2 = vld [vmem:[%s20017_s1 + $0x1770] sm:$0xff] }
 0x46e   :  { %11040 = vmatpush1.bf16.msra.mxu0 %v13301_v12  ;;  %11573 = vmatpush1.bf16.msra.mxu1 %v13303_v57  ;;  %v749_v12 = vld [vmem:[%s20017_s1 + $0x1658] sm:$0xff] }
 0x46f   :  { %11041 = vmatprep.subr.bf16.mxu0 %v13310_v22  ;;  %11574 = vmatprep.subr.bf16.mxu1 %v13312_v55  ;;  %v753_v57 = vld [vmem:[%s20017_s1 + $0x1678] sm:$0xff]  ;;  %v13349_v22 = vcombine.low %v740_v14, %v744_v17  ;;  %v13351_v55 = vcombine.low %v741_v53, %v745_v3  ;;  %v13390_v14 = vcombine.high %v780_v0, %v784_v2  ;;  %v788_v53 = vld [vmem:[%s20017_s1 + $0x1790] sm:$0xff] }
 0x470   :  { %v13360_v15 = vcombine.high %v749_v12, %v753_v57  ;;  %v792_v3 = vld [vmem:[%s20017_s1 + $0x17b0] sm:$0xff] }
 0x472   :  { %11042 = vmatpush1.bf16.msra.mxu0 %v13309_v29  ;;  %11575 = vmatpush1.bf16.msra.mxu1 %v13311_v32  ;;  %v757_v29 = vld [vmem:[%s20017_s1 + $0x1698] sm:$0xff] }
 0x473   :  { %11043 = vmatprep.subr.bf16.mxu0 %v13318_v33  ;;  %11576 = vmatprep.subr.bf16.mxu1 %v13320_v34  ;;  %v761_v32 = vld [vmem:[%s20017_s1 + $0x16b8] sm:$0xff]  ;;  %v13357_v33 = vcombine.low %v748_v16, %v752_v26  ;;  %v13359_v34 = vcombine.low %v749_v12, %v753_v57  ;;  %v13398_v16 = vcombine.high %v788_v53, %v792_v3  ;;  %v796_v12 = vld [vmem:[%s20017_s1 + $0x17d0] sm:$0xff] }
 0x474   :  { %v13368_v21 = vcombine.high %v757_v29, %v761_v32  ;;  %v800_v57 = vld [vmem:[%s20017_s1 + $0x17f0] sm:$0xff] }
 0x476   :  { %11044 = vmatpush1.bf16.msra.mxu0 %v13317_v37  ;;  %11577 = vmatpush1.bf16.msra.mxu1 %v13319_v38  ;;  %v765_v37 = vld [vmem:[%s20017_s1 + $0x16d8] sm:$0xff] }
 0x477   :  { %11045 = vmatprep.subr.bf16.mxu0 %v13326_v40  ;;  %11578 = vmatprep.subr.bf16.mxu1 %v13328_v41  ;;  %v769_v38 = vld [vmem:[%s20017_s1 + $0x16f8] sm:$0xff]  ;;  %v13365_v40 = vcombine.low %v756_v27, %v760_v45  ;;  %v13367_v41 = vcombine.low %v757_v29, %v761_v32  ;;  %v13406_v27 = vcombine.high %v796_v12, %v800_v57  ;;  %v804_v29 = vld [vmem:[%s20017_s1 + $0x1810] sm:$0xff] }
 0x478   :  { %v13376_v42 = vcombine.high %v765_v37, %v769_v38  ;;  %v808_v32 = vld [vmem:[%s20017_s1 + $0x1830] sm:$0xff] }
 0x47a   :  { %11046 = vmatpush1.bf16.msra.mxu0 %v13325_v51  ;;  %11579 = vmatpush1.bf16.msra.mxu1 %v13327_v18  ;;  %v773_v51 = vld [vmem:[%s20017_s1 + $0x1718] sm:$0xff] }
 0x47b   :  { %11047 = vmatprep.subr.bf16.mxu0 %v13334_v54  ;;  %11580 = vmatprep.subr.bf16.mxu1 %v13336_v56  ;;  %v777_v18 = vld [vmem:[%s20017_s1 + $0x1738] sm:$0xff]  ;;  %v13373_v54 = vcombine.low %v764_v31, %v768_v35  ;;  %v13375_v56 = vcombine.low %v765_v37, %v769_v38  ;;  %v13414_v31 = vcombine.high %v804_v29, %v808_v32  ;;  %v812_v37 = vld [vmem:[%s20017_s1 + $0x1850] sm:$0xff] }
 0x47c   :  { %v13384_v48 = vcombine.high %v773_v51, %v777_v18  ;;  %v816_v38 = vld [vmem:[%s20017_s1 + $0x1870] sm:$0xff] }
 0x47e   :  { %11048 = vmatpush1.bf16.msra.mxu0 %v13333_v6  ;;  %11581 = vmatpush1.bf16.msra.mxu1 %v13335_v7  ;;  %v781_v6 = vld [vmem:[%s20017_s1 + $0x1758] sm:$0xff] }
 0x47f   :  { %11049 = vmatprep.subr.bf16.mxu0 %v13342_v11  ;;  %11582 = vmatprep.subr.bf16.mxu1 %v13344_v13  ;;  %v785_v7 = vld [vmem:[%s20017_s1 + $0x1778] sm:$0xff]  ;;  %v13381_v11 = vcombine.low %v772_v44, %v776_v47  ;;  %v13383_v13 = vcombine.low %v773_v51, %v777_v18  ;;  %v13422_v44 = vcombine.high %v812_v37, %v816_v38  ;;  %v820_v51 = vld [vmem:[%s20017_s1 + $0x1890] sm:$0xff] }
 0x480   :  { %v13392_v17 = vcombine.high %v781_v6, %v785_v7  ;;  %v824_v18 = vld [vmem:[%s20017_s1 + $0x18b0] sm:$0xff] }
 0x482   :  { %11050 = vmatpush1.bf16.msra.mxu0 %v13341_v20  ;;  %11583 = vmatpush1.bf16.msra.mxu1 %v13343_v59  ;;  %v789_v20 = vld [vmem:[%s20017_s1 + $0x1798] sm:$0xff] }
 0x483   :  { %11051 = vmatprep.subr.bf16.mxu0 %v13350_v36  ;;  %11584 = vmatprep.subr.bf16.mxu1 %v13352_v24  ;;  %v793_v59 = vld [vmem:[%s20017_s1 + $0x17b8] sm:$0xff]  ;;  %v13389_v36 = vcombine.low %v780_v0, %v784_v2  ;;  %v13391_v24 = vcombine.low %v781_v6, %v785_v7  ;;  %v13430_v0 = vcombine.high %v820_v51, %v824_v18  ;;  %v828_v6 = vld [vmem:[%s20017_s1 + $0x18d0] sm:$0xff] }
 0x484   :  { %v13400_v26 = vcombine.high %v789_v20, %v793_v59  ;;  %v832_v7 = vld [vmem:[%s20017_s1 + $0x18f0] sm:$0xff] }
 0x486   :  { %11052 = vmatpush1.bf16.msra.mxu0 %v13349_v22  ;;  %11585 = vmatpush1.bf16.msra.mxu1 %v13351_v55  ;;  %v797_v22 = vld [vmem:[%s20017_s1 + $0x17d8] sm:$0xff] }
 0x487   :  { %11053 = vmatprep.subr.bf16.mxu0 %v13358_v49  ;;  %11586 = vmatprep.subr.bf16.mxu1 %v13360_v15  ;;  %v801_v55 = vld [vmem:[%s20017_s1 + $0x17f8] sm:$0xff]  ;;  %v13397_v49 = vcombine.low %v788_v53, %v792_v3  ;;  %v13399_v15 = vcombine.low %v789_v20, %v793_v59  ;;  %v836_v3 = vld [vmem:[%s20017_s1 + $0x1910] sm:$0xff] }
 0x488   :  { %v13408_v45 = vcombine.high %v797_v22, %v801_v55  ;;  %v840_v20 = vld [vmem:[%s20017_s1 + $0x1930] sm:$0xff]  ;;  %v841_v59 = vld [vmem:[%s20017_s1 + $0x1938] sm:$0xff] }
 0x48a   :  { %11054 = vmatpush1.bf16.msra.mxu0 %v13357_v33  ;;  %11587 = vmatpush1.bf16.msra.mxu1 %v13359_v34  ;;  %v805_v33 = vld [vmem:[%s20017_s1 + $0x1818] sm:$0xff] }
 0x48b   :  { %11055 = vmatprep.subr.bf16.mxu0 %v13366_v1  ;;  %11588 = vmatprep.subr.bf16.mxu1 %v13368_v21  ;;  %v809_v34 = vld [vmem:[%s20017_s1 + $0x1838] sm:$0xff]  ;;  %v13405_v1 = vcombine.low %v796_v12, %v800_v57  ;;  %v13407_v21 = vcombine.low %v797_v22, %v801_v55  ;;  %v844_v12 = vld [vmem:[%s20017_s1 + $0x1950] sm:$0xff] }
 0x48c   :  { %v13416_v35 = vcombine.high %v805_v33, %v809_v34  ;;  %v848_v57 = vld [vmem:[%s20017_s1 + $0x1970] sm:$0xff]  ;;  %v845_v22 = vld [vmem:[%s20017_s1 + $0x1958] sm:$0xff] }
 0x48d   :  { %v849_v55 = vld [vmem:[%s20017_s1 + $0x1978] sm:$0xff] }
 0x48e   :  { %11056 = vmatpush1.bf16.msra.mxu0 %v13365_v40  ;;  %11589 = vmatpush1.bf16.msra.mxu1 %v13367_v41  ;;  %v813_v40 = vld [vmem:[%s20017_s1 + $0x1858] sm:$0xff] }
 0x48f   :  { %11057 = vmatprep.subr.bf16.mxu0 %v13374_v25  ;;  %11590 = vmatprep.subr.bf16.mxu1 %v13376_v42  ;;  %v817_v41 = vld [vmem:[%s20017_s1 + $0x1878] sm:$0xff]  ;;  %v13413_v25 = vcombine.low %v804_v29, %v808_v32  ;;  %v13415_v42 = vcombine.low %v805_v33, %v809_v34  ;;  %v852_v29 = vld [vmem:[%s20017_s1 + $0x1990] sm:$0xff] }
 0x490   :  { %v13424_v47 = vcombine.high %v813_v40, %v817_v41  ;;  %v856_v32 = vld [vmem:[%s20017_s1 + $0x19b0] sm:$0xff]  ;;  %v853_v33 = vld [vmem:[%s20017_s1 + $0x1998] sm:$0xff] }
 0x491   :  { %v857_v34 = vld [vmem:[%s20017_s1 + $0x19b8] sm:$0xff] }
 0x492   :  { %11058 = vmatpush1.bf16.msra.mxu0 %v13373_v54  ;;  %11591 = vmatpush1.bf16.msra.mxu1 %v13375_v56  ;;  %v821_v54 = vld [vmem:[%s20017_s1 + $0x1898] sm:$0xff] }
 0x493   :  { %11059 = vmatprep.subr.bf16.mxu0 %v13382_v61  ;;  %11592 = vmatprep.subr.bf16.mxu1 %v13384_v48  ;;  %v825_v56 = vld [vmem:[%s20017_s1 + $0x18b8] sm:$0xff]  ;;  %v13421_v61 = vcombine.low %v812_v37, %v816_v38  ;;  %v13423_v48 = vcombine.low %v813_v40, %v817_v41  ;;  %v860_v37 = vld [vmem:[%s20017_s1 + $0x19d0] sm:$0xff] }
 0x494   :  { %v13432_v2 = vcombine.high %v821_v54, %v825_v56  ;;  %v864_v38 = vld [vmem:[%s20017_s1 + $0x19f0] sm:$0xff]  ;;  %v861_v40 = vld [vmem:[%s20017_s1 + $0x19d8] sm:$0xff] }
 0x495   :  { %v865_v41 = vld [vmem:[%s20017_s1 + $0x19f8] sm:$0xff] }
 0x496   :  { %11060 = vmatpush1.bf16.msra.mxu0 %v13381_v11  ;;  %11593 = vmatpush1.bf16.msra.mxu1 %v13383_v13  ;;  %v833_v11 = vld [vmem:[%s20017_s1 + $0x18f8] sm:$0xff]  ;;  %v13429_v13 = vcombine.low %v820_v51, %v824_v18  ;;  %v868_v51 = vld [vmem:[%s20017_s1 + $0x1a10] sm:$0xff] }
 0x497   :  { %11061 = vmatprep.subr.bf16.mxu0 %v13390_v14  ;;  %11594 = vmatprep.subr.bf16.mxu1 %v13392_v17  ;;  %v13431_v14 = vcombine.low %v821_v54, %v825_v56  ;;  %v13438_v17 = vcombine.high %v828_v6, %v832_v7  ;;  %v872_v18 = vld [vmem:[%s20017_s1 + $0x1a30] sm:$0xff]  ;;  %v869_v54 = vld [vmem:[%s20017_s1 + $0x1a18] sm:$0xff] }
 0x498   :  { %v873_v56 = vld [vmem:[%s20017_s1 + $0x1a38] sm:$0xff] }
 0x49a   :  { %11062 = vmatpush1.bf16.msra.mxu0 %v13389_v36  ;;  %11595 = vmatpush1.bf16.msra.mxu1 %v13391_v24  ;;  %v13437_v36 = vcombine.low %v828_v6, %v832_v7  ;;  %v876_v6 = vld [vmem:[%s20017_s1 + $0x1a50] sm:$0xff] }
 0x49b   :  { %11063 = vmatprep.subr.bf16.mxu0 %v13398_v16  ;;  %11596 = vmatprep.subr.bf16.mxu1 %v13400_v26  ;;  %v13446_v16 = vcombine.high %v836_v3, %v840_v20  ;;  %v880_v7 = vld [vmem:[%s20017_s1 + $0x1a70] sm:$0xff] }
 0x49e   :  { %11064 = vmatpush1.bf16.msra.mxu0 %v13397_v49  ;;  %11597 = vmatpush1.bf16.msra.mxu1 %v13399_v15  ;;  %v13445_v49 = vcombine.low %v836_v3, %v840_v20  ;;  %v884_v3 = vld [vmem:[%s20017_s1 + $0x1a90] sm:$0xff] }
 0x49f   :  { %11065 = vmatprep.subr.bf16.mxu0 %v13406_v27  ;;  %11598 = vmatprep.subr.bf16.mxu1 %v13408_v45  ;;  %v13454_v27 = vcombine.high %v844_v12, %v848_v57  ;;  %v13456_v45 = vcombine.high %v845_v22, %v849_v55  ;;  %v888_v20 = vld [vmem:[%s20017_s1 + $0x1ab0] sm:$0xff] }
 0x4a2   :  { %11066 = vmatpush1.bf16.msra.mxu0 %v13405_v1  ;;  %11599 = vmatpush1.bf16.msra.mxu1 %v13407_v21  ;;  %v13453_v1 = vcombine.low %v844_v12, %v848_v57  ;;  %v13455_v21 = vcombine.low %v845_v22, %v849_v55  ;;  %v892_v12 = vld [vmem:[%s20017_s1 + $0x1ad0] sm:$0xff]  ;;  %v893_v22 = vld [vmem:[%s20017_s1 + $0x1ad8] sm:$0xff] }
 0x4a3   :  { %11076 = vmatprep.subr.bf16.mxu0 %v13414_v31  ;;  %11609 = vmatprep.subr.bf16.mxu1 %v13416_v35  ;;  %v13462_v31 = vcombine.high %v852_v29, %v856_v32  ;;  %v13464_v35 = vcombine.high %v853_v33, %v857_v34  ;;  %v896_v57 = vld [vmem:[%s20017_s1 + $0x1af0] sm:$0xff]  ;;  %v897_v55 = vld [vmem:[%s20017_s1 + $0x1af8] sm:$0xff] }
 0x4a5   :  { %11068 = vmatmul.mubr.bf16.vlgmr.msra.gmra.mrb[4].mxu0 %v15988_v46  ;;  %11601 = vmatmul.mubr.bf16.vlgmr.msra.gmra.mrb[4].mxu1 %v15988_v46  ;;  %v829_v46 = vld [vmem:[%s20017_s1 + $0x18d8] sm:$0xff] }
 0x4a6   :  { %11077 = vmatpush1.bf16.msra.mxu0 %v13413_v25  ;;  %11610 = vmatpush1.bf16.msra.mxu1 %v13415_v42  ;;  %v13440_v53 = vcombine.high %v829_v46, %v833_v11  ;;  %v13439_v24 = vcombine.low %v829_v46, %v833_v11  ;;  %v13461_v25 = vcombine.low %v852_v29, %v856_v32  ;;  %v877_v46 = vld [vmem:[%s20017_s1 + $0x1a58] sm:$0xff]  ;;  %v900_v29 = vld [vmem:[%s20017_s1 + $0x1b10] sm:$0xff] }
 0x4a7   :  { %11078 = vmatprep.subr.bf16.mxu0 %v13422_v44  ;;  %11611 = vmatprep.subr.bf16.mxu1 %v13424_v47  ;;  %v13463_v42 = vcombine.low %v853_v33, %v857_v34  ;;  %v13470_v44 = vcombine.high %v860_v37, %v864_v38  ;;  %v13472_v47 = vcombine.high %v861_v40, %v865_v41  ;;  %v881_v11 = vld [vmem:[%s20017_s1 + $0x1a78] sm:$0xff]  ;;  %v904_v32 = vld [vmem:[%s20017_s1 + $0x1b30] sm:$0xff] }
 0x4a8   :  { %11108 = vmatprep.mubr.bf16.mxu0 %v16009_v58  ;;  %11641 = vmatprep.mubr.bf16.mxu1 %v16009_v58  ;;  %v837_v58 = vld [vmem:[%s20017_s1 + $0x1918] sm:$0xff] }
 0x4a9   :  { %v13448_v26 = vcombine.high %v837_v58, %v841_v59  ;;  %v13447_v15 = vcombine.low %v837_v58, %v841_v59  ;;  %v885_v58 = vld [vmem:[%s20017_s1 + $0x1a98] sm:$0xff] }
 0x4aa   :  { %11079 = vmatpush1.bf16.msra.mxu0 %v13421_v61  ;;  %11612 = vmatpush1.bf16.msra.mxu1 %v13423_v48  ;;  %v13469_v61 = vcombine.low %v860_v37, %v864_v38  ;;  %v13471_v48 = vcombine.low %v861_v40, %v865_v41  ;;  %v889_v59 = vld [vmem:[%s20017_s1 + $0x1ab8] sm:$0xff]  ;;  %v908_v37 = vld [vmem:[%s20017_s1 + $0x1b50] sm:$0xff] }
 0x4ab   :  { %11080 = vmatprep.subr.bf16.mxu0 %v13430_v0  ;;  %11613 = vmatprep.subr.bf16.mxu1 %v13432_v2  ;;  %v13478_v0 = vcombine.high %v868_v51, %v872_v18  ;;  %v13480_v2 = vcombine.high %v869_v54, %v873_v56  ;;  %v901_v33 = vld [vmem:[%s20017_s1 + $0x1b18] sm:$0xff]  ;;  %v912_v38 = vld [vmem:[%s20017_s1 + $0x1b70] sm:$0xff] }
 0x4ac   :  { %v905_v34 = vld [vmem:[%s20017_s1 + $0x1b38] sm:$0xff] }
 0x4ad   :  { %v909_v40 = vld [vmem:[%s20017_s1 + $0x1b58] sm:$0xff] }
 0x4ae   :  { %11081 = vmatpush1.bf16.msra.mxu0 %v13429_v13  ;;  %11614 = vmatpush1.bf16.msra.mxu1 %v13431_v14  ;;  %v13477_v13 = vcombine.low %v868_v51, %v872_v18  ;;  %v13479_v14 = vcombine.low %v869_v54, %v873_v56  ;;  %v913_v41 = vld [vmem:[%s20017_s1 + $0x1b78] sm:$0xff]  ;;  %v916_v51 = vld [vmem:[%s20017_s1 + $0x1b90] sm:$0xff] }
 0x4af   :  { %11082 = vmatprep.subr.bf16.mxu0 %v13438_v17  ;;  %11615 = vmatprep.subr.bf16.mxu1 %v13440_v53  ;;  %v13486_v17 = vcombine.high %v876_v6, %v880_v7  ;;  %v13488_v53 = vcombine.high %v877_v46, %v881_v11  ;;  %v920_v18 = vld [vmem:[%s20017_s1 + $0x1bb0] sm:$0xff]  ;;  %v917_v54 = vld [vmem:[%s20017_s1 + $0x1b98] sm:$0xff] }
 0x4b0   :  { %v921_v56 = vld [vmem:[%s20017_s1 + $0x1bb8] sm:$0xff] }
 0x4b2   :  { %11083 = vmatpush1.bf16.msra.mxu0 %v13437_v36  ;;  %11616 = vmatpush1.bf16.msra.mxu1 %v13439_v24  ;;  %v13485_v36 = vcombine.low %v876_v6, %v880_v7  ;;  %v13487_v24 = vcombine.low %v877_v46, %v881_v11  ;;  %v924_v6 = vld [vmem:[%s20017_s1 + $0x1bd0] sm:$0xff]  ;;  %v925_v46 = vld [vmem:[%s20017_s1 + $0x1bd8] sm:$0xff] }
 0x4b3   :  { %11084 = vmatprep.subr.bf16.mxu0 %v13446_v16  ;;  %11617 = vmatprep.subr.bf16.mxu1 %v13448_v26  ;;  %v13494_v16 = vcombine.high %v884_v3, %v888_v20  ;;  %v13496_v26 = vcombine.high %v885_v58, %v889_v59  ;;  %v928_v7 = vld [vmem:[%s20017_s1 + $0x1bf0] sm:$0xff]  ;;  %v929_v11 = vld [vmem:[%s20017_s1 + $0x1bf8] sm:$0xff] }
 0x4b6   :  { %11085 = vmatpush1.bf16.msra.mxu0 %v13445_v49  ;;  %11618 = vmatpush1.bf16.msra.mxu1 %v13447_v15  ;;  %v13493_v49 = vcombine.low %v884_v3, %v888_v20  ;;  %v13495_v15 = vcombine.low %v885_v58, %v889_v59  ;;  %v932_v3 = vld [vmem:[%s20017_s1 + $0x1c10] sm:$0xff]  ;;  %v933_v58 = vld [vmem:[%s20017_s1 + $0x1c18] sm:$0xff] }
 0x4b7   :  { %11086 = vmatprep.subr.bf16.mxu0 %v13454_v27  ;;  %11619 = vmatprep.subr.bf16.mxu1 %v13456_v45  ;;  %v13502_v27 = vcombine.high %v892_v12, %v896_v57  ;;  %v13504_v45 = vcombine.high %v893_v22, %v897_v55  ;;  %v936_v20 = vld [vmem:[%s20017_s1 + $0x1c30] sm:$0xff]  ;;  %v937_v59 = vld [vmem:[%s20017_s1 + $0x1c38] sm:$0xff] }
 0x4ba   :  { %11087 = vmatpush1.bf16.msra.mxu0 %v13453_v1  ;;  %11620 = vmatpush1.bf16.msra.mxu1 %v13455_v21  ;;  %v13501_v1 = vcombine.low %v892_v12, %v896_v57  ;;  %v13503_v21 = vcombine.low %v893_v22, %v897_v55  ;;  %v940_v12 = vld [vmem:[%s20017_s1 + $0x1c50] sm:$0xff]  ;;  %v941_v22 = vld [vmem:[%s20017_s1 + $0x1c58] sm:$0xff] }
 0x4bb   :  { %11088 = vmatprep.subr.bf16.mxu0 %v13462_v31  ;;  %11621 = vmatprep.subr.bf16.mxu1 %v13464_v35  ;;  %v13510_v31 = vcombine.high %v900_v29, %v904_v32  ;;  %v13512_v35 = vcombine.high %v901_v33, %v905_v34  ;;  %v944_v57 = vld [vmem:[%s20017_s1 + $0x1c70] sm:$0xff]  ;;  %v945_v55 = vld [vmem:[%s20017_s1 + $0x1c78] sm:$0xff] }
 0x4be   :  { %11089 = vmatpush1.bf16.msra.mxu0 %v13461_v25  ;;  %11622 = vmatpush1.bf16.msra.mxu1 %v13463_v42  ;;  %v13509_v25 = vcombine.low %v900_v29, %v904_v32  ;;  %v13511_v42 = vcombine.low %v901_v33, %v905_v34  ;;  %v948_v29 = vld [vmem:[%s20017_s1 + $0x1c90] sm:$0xff]  ;;  %v949_v33 = vld [vmem:[%s20017_s1 + $0x1c98] sm:$0xff] }
 0x4bf   :  { %11090 = vmatprep.subr.bf16.mxu0 %v13470_v44  ;;  %11623 = vmatprep.subr.bf16.mxu1 %v13472_v47  ;;  %v13518_v44 = vcombine.high %v908_v37, %v912_v38  ;;  %v13520_v47 = vcombine.high %v909_v40, %v913_v41  ;;  %v952_v32 = vld [vmem:[%s20017_s1 + $0x1cb0] sm:$0xff]  ;;  %v953_v34 = vld [vmem:[%s20017_s1 + $0x1cb8] sm:$0xff] }
 0x4c2   :  { %11091 = vmatpush1.bf16.msra.mxu0 %v13469_v61  ;;  %11624 = vmatpush1.bf16.msra.mxu1 %v13471_v48  ;;  %v13517_v61 = vcombine.low %v908_v37, %v912_v38  ;;  %v13519_v48 = vcombine.low %v909_v40, %v913_v41  ;;  %v956_v37 = vld [vmem:[%s20017_s1 + $0x1cd0] sm:$0xff]  ;;  %v961_v40 = vld [vmem:[%s20017_s1 + $0x1cf8] sm:$0xff]  ;;  %v13557_v41 = vcombine.low %v948_v29, %v952_v32 }
 0x4c3   :  { %11092 = vmatprep.subr.bf16.mxu0 %v13478_v0  ;;  %11625 = vmatprep.subr.bf16.mxu1 %v13480_v2  ;;  %v13526_v0 = vcombine.high %v916_v51, %v920_v18  ;;  %v13528_v2 = vcombine.high %v917_v54, %v921_v56  ;;  %v960_v38 = vld [vmem:[%s20017_s1 + $0x1cf0] sm:$0xff] }
 0x4c6   :  { %11093 = vmatpush1.bf16.msra.mxu0 %v13477_v13  ;;  %11626 = vmatpush1.bf16.msra.mxu1 %v13479_v14  ;;  %v13525_v13 = vcombine.low %v916_v51, %v920_v18  ;;  %v13527_v14 = vcombine.low %v917_v54, %v921_v56  ;;  %v968_v51 = vld [vmem:[%s20017_s1 + $0x1d30] sm:$0xff]  ;;  %v969_v18 = vld [vmem:[%s20017_s1 + $0x1d38] sm:$0xff]  ;;  %v13565_v54 = vcombine.low %v956_v37, %v960_v38 }
 0x4c7   :  { %11094 = vmatprep.subr.bf16.mxu0 %v13486_v17  ;;  %11627 = vmatprep.subr.bf16.mxu1 %v13488_v53  ;;  %v13534_v17 = vcombine.high %v924_v6, %v928_v7  ;;  %v13536_v53 = vcombine.high %v925_v46, %v929_v11 }
 0x4ca   :  { %11095 = vmatpush1.bf16.msra.mxu0 %v13485_v36  ;;  %11628 = vmatpush1.bf16.msra.mxu1 %v13487_v24  ;;  %v13533_v36 = vcombine.low %v924_v6, %v928_v7  ;;  %v13535_v24 = vcombine.low %v925_v46, %v929_v11  ;;  %v973_v6 = vld [vmem:[%s20017_s1 + $0x1d58] sm:$0xff] }
 0x4cb   :  { %11096 = vmatprep.subr.bf16.mxu0 %v13494_v16  ;;  %11629 = vmatprep.subr.bf16.mxu1 %v13496_v26  ;;  %v13542_v16 = vcombine.high %v932_v3, %v936_v20  ;;  %v13544_v26 = vcombine.high %v933_v58, %v937_v59  ;;  %v977_v7 = vld [vmem:[%s20017_s1 + $0x1d78] sm:$0xff] }
 0x4ce   :  { %11097 = vmatpush1.bf16.msra.mxu0 %v13493_v49  ;;  %11630 = vmatpush1.bf16.msra.mxu1 %v13495_v15  ;;  %v13541_v49 = vcombine.low %v932_v3, %v936_v20  ;;  %v13543_v15 = vcombine.low %v933_v58, %v937_v59  ;;  %v981_v3 = vld [vmem:[%s20017_s1 + $0x1d98] sm:$0xff]  ;;  %v13583_v59 = vcombine.low %v973_v6, %v977_v7 }
 0x4cf   :  { %11098 = vmatprep.subr.bf16.mxu0 %v13502_v27  ;;  %11631 = vmatprep.subr.bf16.mxu1 %v13504_v45  ;;  %v13550_v27 = vcombine.high %v940_v12, %v944_v57  ;;  %v13552_v45 = vcombine.high %v941_v22, %v945_v55  ;;  %v985_v20 = vld [vmem:[%s20017_s1 + $0x1db8] sm:$0xff] }
 0x4d2   :  { %11099 = vmatpush1.bf16.msra.mxu0 %v13501_v1  ;;  %11632 = vmatpush1.bf16.msra.mxu1 %v13503_v21  ;;  %v13549_v1 = vcombine.low %v940_v12, %v944_v57  ;;  %v13551_v21 = vcombine.low %v941_v22, %v945_v55  ;;  %v989_v12 = vld [vmem:[%s20017_s1 + $0x1dd8] sm:$0xff]  ;;  %v13591_v55 = vcombine.low %v981_v3, %v985_v20 }
 0x4d3   :  { %11100 = vmatprep.subr.bf16.mxu0 %v13510_v31  ;;  %11633 = vmatprep.subr.bf16.mxu1 %v13512_v35  ;;  %v13558_v31 = vcombine.high %v948_v29, %v952_v32  ;;  %v13560_v35 = vcombine.high %v949_v33, %v953_v34  ;;  %v993_v57 = vld [vmem:[%s20017_s1 + $0x1df8] sm:$0xff] }
 0x4d4   :  { %v997_v29 = vld [vmem:[%s20017_s1 + $0x1e18] sm:$0xff] }
 0x4d5   :  { %v1001_v32 = vld [vmem:[%s20017_s1 + $0x1e38] sm:$0xff] }
 0x4d6   :  { %11101 = vmatpush1.bf16.msra.mxu0 %v13509_v25  ;;  %11634 = vmatpush1.bf16.msra.mxu1 %v13511_v42  ;;  %v13559_v25 = vcombine.low %v949_v33, %v953_v34  ;;  %v13566_v42 = vcombine.high %v956_v37, %v960_v38  ;;  %v13599_v34 = vcombine.low %v989_v12, %v993_v57  ;;  %v1005_v37 = vld [vmem:[%s20017_s1 + $0x1e58] sm:$0xff] }
 0x4d7   :  { %11102 = vmatprep.subr.bf16.mxu0 %v13518_v44  ;;  %11635 = vmatprep.subr.bf16.mxu1 %v13520_v47  ;;  %v964_v47 = vld [vmem:[%s20017_s1 + $0x1d10] sm:$0xff]  ;;  %v1009_v38 = vld [vmem:[%s20017_s1 + $0x1e78] sm:$0xff] }
 0x4d8   :  { %v13573_v46 = vcombine.low %v964_v47, %v968_v51 }
 0x4da   :  { %11103 = vmatpush1.bf16.msra.mxu0 %v13517_v61  ;;  %11636 = vmatpush1.bf16.msra.mxu1 %v13519_v48  ;;  %v13574_v61 = vcombine.high %v964_v47, %v968_v51  ;;  %v1013_v47 = vld [vmem:[%s20017_s1 + $0x1e98] sm:$0xff] }
 0x4db   :  { %11104 = vmatprep.subr.bf16.mxu0 %v13526_v0  ;;  %11637 = vmatprep.subr.bf16.mxu1 %v13528_v2  ;;  %v972_v0 = vld [vmem:[%s20017_s1 + $0x1d50] sm:$0xff]  ;;  %v1017_v51 = vld [vmem:[%s20017_s1 + $0x1eb8] sm:$0xff] }
 0x4dc   :  { %v976_v2 = vld [vmem:[%s20017_s1 + $0x1d70] sm:$0xff] }
 0x4dd   :  { %v13581_v58 = vcombine.low %v972_v0, %v976_v2 }
 0x4de   :  { %11105 = vmatpush1.bf16.msra.mxu0 %v13525_v13  ;;  %11638 = vmatpush1.bf16.msra.mxu1 %v13527_v14  ;;  %v13582_v13 = vcombine.high %v972_v0, %v976_v2  ;;  %v13584_v14 = vcombine.high %v973_v6, %v977_v7  ;;  %v1021_v0 = vld [vmem:[%s20017_s1 + $0x1ed8] sm:$0xff]  ;;  %v13623_v7 = vcombine.low %v1013_v47, %v1017_v51 }
 0x4df   :  { %11106 = vmatprep.subr.bf16.mxu0 %v13534_v17  ;;  %11639 = vmatprep.subr.bf16.mxu1 %v13536_v53  ;;  %v980_v17 = vld [vmem:[%s20017_s1 + $0x1d90] sm:$0xff]  ;;  %v1025_v2 = vld [vmem:[%s20017_s1 + $0x1ef8] sm:$0xff] }
 0x4e0   :  { %v984_v53 = vld [vmem:[%s20017_s1 + $0x1db0] sm:$0xff] }
 0x4e1   :  { %v13589_v22 = vcombine.low %v980_v17, %v984_v53 }
 0x4e2   :  { %11107 = vmatpush1.bf16.msra.mxu0 %v13533_v36  ;;  %11640 = vmatpush1.bf16.msra.mxu1 %v13535_v24  ;;  %v13590_v36 = vcombine.high %v980_v17, %v984_v53  ;;  %v13592_v24 = vcombine.high %v981_v3, %v985_v20  ;;  %v1029_v17 = vld [vmem:[%s20017_s1 + $0x1f18] sm:$0xff]  ;;  %v13631_v20 = vcombine.low %v1021_v0, %v1025_v2 }
 0x4e3   :  { %11117 = vmatprep.subr.bf16.mxu0 %v13542_v16  ;;  %11650 = vmatprep.subr.bf16.mxu1 %v13544_v26  ;;  %v988_v16 = vld [vmem:[%s20017_s1 + $0x1dd0] sm:$0xff]  ;;  %v1033_v53 = vld [vmem:[%s20017_s1 + $0x1f38] sm:$0xff] }
 0x4e4   :  { %v992_v26 = vld [vmem:[%s20017_s1 + $0x1df0] sm:$0xff] }
 0x4e5   :  { %11109 = vmatmul.mubr.bf16.vlgmr.msra.gmra.mrb[4].mxu0 %v16197_v19  ;;  %11642 = vmatmul.mubr.bf16.vlgmr.msra.gmra.mrb[4].mxu1 %v16197_v19  ;;  %v957_v19 = vld [vmem:[%s20017_s1 + $0x1cd8] sm:$0xff]  ;;  %v13597_v33 = vcombine.low %v988_v16, %v992_v26 }
 0x4e6   :  { %11118 = vmatpush1.bf16.msra.mxu0 %v13541_v49  ;;  %11651 = vmatpush1.bf16.msra.mxu1 %v13543_v15  ;;  %v13568_v44 = vcombine.high %v957_v19, %v961_v40  ;;  %v13567_v56 = vcombine.low %v957_v19, %v961_v40  ;;  %v13598_v49 = vcombine.high %v988_v16, %v992_v26  ;;  %v1037_v16 = vld [vmem:[%s20017_s1 + $0x1f58] sm:$0xff] }
 0x4e7   :  { %11119 = vmatprep.subr.bf16.mxu0 %v13550_v27  ;;  %11652 = vmatprep.subr.bf16.mxu1 %v13552_v45  ;;  %v13600_v15 = vcombine.high %v989_v12, %v993_v57  ;;  %v996_v27 = vld [vmem:[%s20017_s1 + $0x1e10] sm:$0xff]  ;;  %v13607_v40 = vcombine.low %v997_v29, %v1001_v32  ;;  %v1041_v26 = vld [vmem:[%s20017_s1 + $0x1f78] sm:$0xff]  ;;  %v13639_v57 = vcombine.low %v1029_v17, %v1033_v53 }
 0x4e8   :  { %11149 = vmatprep.mubr.bf16.mxu0 %v16218_v30  ;;  %11682 = vmatprep.mubr.bf16.mxu1 %v16218_v30  ;;  %v965_v30 = vld [vmem:[%s20017_s1 + $0x1d18] sm:$0xff]  ;;  %v1000_v45 = vld [vmem:[%s20017_s1 + $0x1e30] sm:$0xff] }
 0x4e9   :  { %v13576_v48 = vcombine.high %v965_v30, %v969_v18  ;;  %v13575_v11 = vcombine.low %v965_v30, %v969_v18  ;;  %v13605_v19 = vcombine.low %v996_v27, %v1000_v45  ;;  %v13615_v18 = vcombine.low %v1005_v37, %v1009_v38 }
 0x4ea   :  { %11120 = vmatpush1.bf16.msra.mxu0 %v13549_v1  ;;  %11653 = vmatpush1.bf16.msra.mxu1 %v13551_v21  ;;  %v13606_v1 = vcombine.high %v996_v27, %v1000_v45  ;;  %v13608_v21 = vcombine.high %v997_v29, %v1001_v32  ;;  %v1045_v27 = vld [vmem:[%s20017_s1 + $0x1f98] sm:$0xff]  ;;  %v13647_v32 = vcombine.low %v1037_v16, %v1041_v26 }
 0x4eb   :  { %11121 = vmatprep.subr.bf16.mxu0 %v13558_v31  ;;  %11654 = vmatprep.subr.bf16.mxu1 %v13560_v35  ;;  %v1004_v31 = vld [vmem:[%s20017_s1 + $0x1e50] sm:$0xff]  ;;  %v1049_v45 = vld [vmem:[%s20017_s1 + $0x1fb8] sm:$0xff] }
 0x4ec   :  { %v1008_v35 = vld [vmem:[%s20017_s1 + $0x1e70] sm:$0xff] }
 0x4ed   :  { %v13613_v30 = vcombine.low %v1004_v31, %v1008_v35 }
 0x4ee   :  { %11122 = vmatpush1.bf16.msra.mxu0 %v13557_v41  ;;  %11655 = vmatpush1.bf16.msra.mxu1 %v13559_v25  ;;  %v13614_v41 = vcombine.high %v1004_v31, %v1008_v35  ;;  %v13616_v25 = vcombine.high %v1005_v37, %v1009_v38  ;;  %v1053_v31 = vld [vmem:[%s20017_s1 + $0x1fd8] sm:$0xff]  ;;  %v13655_v38 = vcombine.low %v1045_v27, %v1049_v45 }
 0x4ef   :  { %11123 = vmatprep.subr.bf16.mxu0 %v13566_v42  ;;  %11656 = vmatprep.subr.bf16.mxu1 %v13568_v44  ;;  %v1012_v42 = vld [vmem:[%s20017_s1 + $0x1e90] sm:$0xff]  ;;  %v1057_v35 = vld [vmem:[%s20017_s1 + $0x1ff8] sm:$0xff] }
 0x4f0   :  { %v1016_v44 = vld [vmem:[%s20017_s1 + $0x1eb0] sm:$0xff] }
 0x4f1   :  { %v13621_v6 = vcombine.low %v1012_v42, %v1016_v44 }
 0x4f2   :  { %11124 = vmatpush1.bf16.msra.mxu0 %v13565_v54  ;;  %11657 = vmatpush1.bf16.msra.mxu1 %v13567_v56  ;;  %v13622_v54 = vcombine.high %v1012_v42, %v1016_v44  ;;  %v13624_v56 = vcombine.high %v1013_v47, %v1017_v51  ;;  %v1061_v42 = vld [vmem:[%s20017_s1 + $0x2018] sm:$0xff]  ;;  %v13663_v51 = vcombine.low %v1053_v31, %v1057_v35 }
 0x4f3   :  { %11125 = vmatprep.subr.bf16.mxu0 %v13574_v61  ;;  %11658 = vmatprep.subr.bf16.mxu1 %v13576_v48  ;;  %v1020_v61 = vld [vmem:[%s20017_s1 + $0x1ed0] sm:$0xff]  ;;  %v1065_v44 = vld [vmem:[%s20017_s1 + $0x2038] sm:$0xff] }
 0x4f4   :  { %v1024_v48 = vld [vmem:[%s20017_s1 + $0x1ef0] sm:$0xff] }
 0x4f5   :  { %v13629_v3 = vcombine.low %v1020_v61, %v1024_v48 }
 0x4f6   :  { %11126 = vmatpush1.bf16.msra.mxu0 %v13573_v46  ;;  %11659 = vmatpush1.bf16.msra.mxu1 %v13575_v11  ;;  %v13630_v46 = vcombine.high %v1020_v61, %v1024_v48  ;;  %v13632_v11 = vcombine.high %v1021_v0, %v1025_v2  ;;  %v1069_v61 = vld [vmem:[%s20017_s1 + $0x2058] sm:$0xff]  ;;  %v13671_v2 = vcombine.low %v1061_v42, %v1065_v44 }
 0x4f7   :  { %11127 = vmatprep.subr.bf16.mxu0 %v13582_v13  ;;  %11660 = vmatprep.subr.bf16.mxu1 %v13584_v14  ;;  %v1028_v13 = vld [vmem:[%s20017_s1 + $0x1f10] sm:$0xff]  ;;  %v1073_v48 = vld [vmem:[%s20017_s1 + $0x2078] sm:$0xff] }
 0x4f8   :  { %v1032_v14 = vld [vmem:[%s20017_s1 + $0x1f30] sm:$0xff] }
 0x4f9   :  { %v13637_v12 = vcombine.low %v1028_v13, %v1032_v14 }
 0x4fa   :  { %11128 = vmatpush1.bf16.msra.mxu0 %v13581_v58  ;;  %11661 = vmatpush1.bf16.msra.mxu1 %v13583_v59  ;;  %v13638_v58 = vcombine.high %v1028_v13, %v1032_v14  ;;  %v13640_v59 = vcombine.high %v1029_v17, %v1033_v53  ;;  %v1077_v13 = vld [vmem:[%s20017_s1 + $0x2098] sm:$0xff]  ;;  %v13679_v53 = vcombine.low %v1069_v61, %v1073_v48 }
 0x4fb   :  { %11129 = vmatprep.subr.bf16.mxu0 %v13590_v36  ;;  %11662 = vmatprep.subr.bf16.mxu1 %v13592_v24  ;;  %v1036_v36 = vld [vmem:[%s20017_s1 + $0x1f50] sm:$0xff]  ;;  %v1081_v14 = vld [vmem:[%s20017_s1 + $0x20b8] sm:$0xff] }
 0x4fc   :  { %v1040_v24 = vld [vmem:[%s20017_s1 + $0x1f70] sm:$0xff] }
 0x4fd   :  { %v13645_v29 = vcombine.low %v1036_v36, %v1040_v24 }
 0x4fe   :  { %11130 = vmatpush1.bf16.msra.mxu0 %v13589_v22  ;;  %11663 = vmatpush1.bf16.msra.mxu1 %v13591_v55  ;;  %v13646_v22 = vcombine.high %v1036_v36, %v1040_v24  ;;  %v13648_v55 = vcombine.high %v1037_v16, %v1041_v26  ;;  %v1089_v36 = vld [vmem:[%s20017_s1 + $0x20f8] sm:$0xff]  ;;  %v13687_v16 = vcombine.low %v1077_v13, %v1081_v14 }
 0x4ff   :  { %11131 = vmatprep.subr.bf16.mxu0 %v13598_v49  ;;  %11664 = vmatprep.subr.bf16.mxu1 %v13600_v15  ;;  %v1044_v49 = vld [vmem:[%s20017_s1 + $0x1f90] sm:$0xff] }
 0x500   :  { %v1048_v15 = vld [vmem:[%s20017_s1 + $0x1fb0] sm:$0xff] }
 0x501   :  { %v13653_v37 = vcombine.low %v1044_v49, %v1048_v15 }
 0x502   :  { %11132 = vmatpush1.bf16.msra.mxu0 %v13597_v33  ;;  %11665 = vmatpush1.bf16.msra.mxu1 %v13599_v34  ;;  %v13654_v33 = vcombine.high %v1044_v49, %v1048_v15  ;;  %v13656_v34 = vcombine.high %v1045_v27, %v1049_v45 }
 0x503   :  { %11133 = vmatprep.subr.bf16.mxu0 %v13606_v1  ;;  %11666 = vmatprep.subr.bf16.mxu1 %v13608_v21  ;;  %v1052_v1 = vld [vmem:[%s20017_s1 + $0x1fd0] sm:$0xff] }
 0x504   :  { %v1056_v21 = vld [vmem:[%s20017_s1 + $0x1ff0] sm:$0xff] }
 0x505   :  { %v13661_v47 = vcombine.low %v1052_v1, %v1056_v21 }
 0x506   :  { %11134 = vmatpush1.bf16.msra.mxu0 %v13605_v19  ;;  %11667 = vmatpush1.bf16.msra.mxu1 %v13607_v40  ;;  %v13662_v19 = vcombine.high %v1052_v1, %v1056_v21  ;;  %v13664_v40 = vcombine.high %v1053_v31, %v1057_v35 }
 0x507   :  { %11135 = vmatprep.subr.bf16.mxu0 %v13614_v41  ;;  %11668 = vmatprep.subr.bf16.mxu1 %v13616_v25  ;;  %v1060_v41 = vld [vmem:[%s20017_s1 + $0x2010] sm:$0xff] }
 0x508   :  { %v1064_v25 = vld [vmem:[%s20017_s1 + $0x2030] sm:$0xff] }
 0x509   :  { %v13669_v0 = vcombine.low %v1060_v41, %v1064_v25 }
 0x50a   :  { %11136 = vmatpush1.bf16.msra.mxu0 %v13613_v30  ;;  %11669 = vmatpush1.bf16.msra.mxu1 %v13615_v18  ;;  %v13670_v30 = vcombine.high %v1060_v41, %v1064_v25  ;;  %v13672_v18 = vcombine.high %v1061_v42, %v1065_v44 }
 0x50b   :  { %11137 = vmatprep.subr.bf16.mxu0 %v13622_v54  ;;  %11670 = vmatprep.subr.bf16.mxu1 %v13624_v56  ;;  %v1068_v54 = vld [vmem:[%s20017_s1 + $0x2050] sm:$0xff] }
 0x50c   :  { %v1072_v56 = vld [vmem:[%s20017_s1 + $0x2070] sm:$0xff] }
 0x50d   :  { %v13677_v17 = vcombine.low %v1068_v54, %v1072_v56 }
 0x50e   :  { %11138 = vmatpush1.bf16.msra.mxu0 %v13621_v6  ;;  %11671 = vmatpush1.bf16.msra.mxu1 %v13623_v7  ;;  %v13678_v6 = vcombine.high %v1068_v54, %v1072_v56  ;;  %v13680_v7 = vcombine.high %v1069_v61, %v1073_v48 }
 0x50f   :  { %11139 = vmatprep.subr.bf16.mxu0 %v13630_v46  ;;  %11672 = vmatprep.subr.bf16.mxu1 %v13632_v11  ;;  %v1076_v46 = vld [vmem:[%s20017_s1 + $0x2090] sm:$0xff] }
 0x510   :  { %v1080_v11 = vld [vmem:[%s20017_s1 + $0x20b0] sm:$0xff] }
 0x511   :  { %v13685_v24 = vcombine.low %v1076_v46, %v1080_v11 }
 0x512   :  { %11140 = vmatpush1.bf16.msra.mxu0 %v13629_v3  ;;  %11673 = vmatpush1.bf16.msra.mxu1 %v13631_v20  ;;  %v13686_v3 = vcombine.high %v1076_v46, %v1080_v11  ;;  %v13688_v20 = vcombine.high %v1077_v13, %v1081_v14 }
 0x513   :  { %11141 = vmatprep.subr.bf16.mxu0 %v13638_v58  ;;  %11674 = vmatprep.subr.bf16.mxu1 %v13640_v59  ;;  %v1084_v58 = vld [vmem:[%s20017_s1 + $0x20d0] sm:$0xff] }
 0x514   :  { %v1088_v59 = vld [vmem:[%s20017_s1 + $0x20f0] sm:$0xff] }
 0x515   :  { %v13694_v26 = vcombine.high %v1084_v58, %v1088_v59  ;;  %v13693_v49 = vcombine.low %v1084_v58, %v1088_v59 }
 0x516   :  { %11142 = vmatpush1.bf16.msra.mxu0 %v13637_v12  ;;  %11675 = vmatpush1.bf16.msra.mxu1 %v13639_v57  ;;  %v1092_v57 = vld [vmem:[%s20017_s1 + $0x2110] sm:$0xff] }
 0x517   :  { %11143 = vmatprep.subr.bf16.mxu0 %v13646_v22  ;;  %11676 = vmatprep.subr.bf16.mxu1 %v13648_v55  ;;  %v1096_v22 = vld [vmem:[%s20017_s1 + $0x2130] sm:$0xff]  ;;  %v1097_v55 = vld [vmem:[%s20017_s1 + $0x2138] sm:$0xff] }
 0x518   :  { %v13702_v27 = vcombine.high %v1092_v57, %v1096_v22  ;;  %v13701_v1 = vcombine.low %v1092_v57, %v1096_v22 }
 0x51a   :  { %11144 = vmatpush1.bf16.msra.mxu0 %v13645_v29  ;;  %11677 = vmatpush1.bf16.msra.mxu1 %v13647_v32  ;;  %v1100_v29 = vld [vmem:[%s20017_s1 + $0x2150] sm:$0xff] }
 0x51b   :  { %11145 = vmatprep.subr.bf16.mxu0 %v13654_v33  ;;  %11678 = vmatprep.subr.bf16.mxu1 %v13656_v34  ;;  %v1104_v32 = vld [vmem:[%s20017_s1 + $0x2170] sm:$0xff]  ;;  %v1101_v33 = vld [vmem:[%s20017_s1 + $0x2158] sm:$0xff] }
 0x51c   :  { %v1105_v34 = vld [vmem:[%s20017_s1 + $0x2178] sm:$0xff]  ;;  %v13710_v31 = vcombine.high %v1100_v29, %v1104_v32  ;;  %v13709_v41 = vcombine.low %v1100_v29, %v1104_v32 }
 0x51d   :  { %v13712_v35 = vcombine.high %v1101_v33, %v1105_v34  ;;  %v13711_v25 = vcombine.low %v1101_v33, %v1105_v34 }
 0x51e   :  { %11146 = vmatpush1.bf16.msra.mxu0 %v13653_v37  ;;  %11679 = vmatpush1.bf16.msra.mxu1 %v13655_v38  ;;  %v1108_v37 = vld [vmem:[%s20017_s1 + $0x2190] sm:$0xff] }
 0x51f   :  { %11147 = vmatprep.subr.bf16.mxu0 %v13662_v19  ;;  %11680 = vmatprep.subr.bf16.mxu1 %v13664_v40  ;;  %v1112_v38 = vld [vmem:[%s20017_s1 + $0x21b0] sm:$0xff]  ;;  %v1109_v19 = vld [vmem:[%s20017_s1 + $0x2198] sm:$0xff] }
 0x520   :  { %v1113_v40 = vld [vmem:[%s20017_s1 + $0x21b8] sm:$0xff]  ;;  %v13718_v42 = vcombine.high %v1108_v37, %v1112_v38  ;;  %v13717_v54 = vcombine.low %v1108_v37, %v1112_v38 }
 0x521   :  { %v13720_v44 = vcombine.high %v1109_v19, %v1113_v40  ;;  %v13719_v56 = vcombine.low %v1109_v19, %v1113_v40 }
 0x522   :  { %11148 = vmatpush1.bf16.msra.mxu0 %v13661_v47  ;;  %11681 = vmatpush1.bf16.msra.mxu1 %v13663_v51  ;;  %v1116_v47 = vld [vmem:[%s20017_s1 + $0x21d0] sm:$0xff] }
 0x523   :  { %11158 = vmatprep.subr.bf16.mxu0 %v13670_v30  ;;  %11691 = vmatprep.subr.bf16.mxu1 %v13672_v18  ;;  %v1120_v51 = vld [vmem:[%s20017_s1 + $0x21f0] sm:$0xff]  ;;  %v1117_v30 = vld [vmem:[%s20017_s1 + $0x21d8] sm:$0xff] }
 0x524   :  { %v1121_v18 = vld [vmem:[%s20017_s1 + $0x21f8] sm:$0xff]  ;;  %v13726_v61 = vcombine.high %v1116_v47, %v1120_v51  ;;  %v13725_v46 = vcombine.low %v1116_v47, %v1120_v51 }
 0x525   :  { %11150 = vmatmul.mubr.bf16.vlgmr.msra.gmra.mrb[4].mxu0 %v16406_v63  ;;  %11683 = vmatmul.mubr.bf16.vlgmr.msra.gmra.mrb[4].mxu1 %v16406_v63  ;;  %v1085_v63 = vld [vmem:[%s20017_s1 + $0x20d8] sm:$0xff]  ;;  %v13728_v48 = vcombine.high %v1117_v30, %v1121_v18  ;;  %v13727_v11 = vcombine.low %v1117_v30, %v1121_v18 }
 0x526   :  { %11159 = vmatpush1.bf16.msra.mxu0 %v13669_v0  ;;  %11692 = vmatpush1.bf16.msra.mxu1 %v13671_v2  ;;  %v13696_v12 = vcombine.high %v1085_v63, %v1089_v36  ;;  %v13695_v15 = vcombine.low %v1085_v63, %v1089_v36  ;;  %v1124_v0 = vld [vmem:[%s20017_s1 + $0x2210] sm:$0xff] }
 0x527   :  { %11160 = vmatprep.subr.bf16.mxu0 %v13678_v6  ;;  %11693 = vmatprep.subr.bf16.mxu1 %v13680_v7  ;;  %v1128_v2 = vld [vmem:[%s20017_s1 + $0x2230] sm:$0xff]  ;;  %v1125_v6 = vld [vmem:[%s20017_s1 + $0x2218] sm:$0xff] }
 0x528   :  { %11190 = vmatprep.mubr.bf16.mxu0 %v16427_v9  ;;  %11723 = vmatprep.mubr.bf16.mxu1 %v16427_v9  ;;  %v1093_v9 = vld [vmem:[%s20017_s1 + $0x2118] sm:$0xff]  ;;  %v13734_v13 = vcombine.high %v1124_v0, %v1128_v2  ;;  %v13733_v58 = vcombine.low %v1124_v0, %v1128_v2 }
 0x529   :  { %v13704_v45 = vcombine.high %v1093_v9, %v1097_v55  ;;  %v13703_v21 = vcombine.low %v1093_v9, %v1097_v55  ;;  %v1129_v7 = vld [vmem:[%s20017_s1 + $0x2238] sm:$0xff] }
 0x52a   :  { %11161 = vmatpush1.bf16.msra.mxu0 %v13677_v17  ;;  %11694 = vmatpush1.bf16.msra.mxu1 %v13679_v53  ;;  %v13736_v14 = vcombine.high %v1125_v6, %v1129_v7  ;;  %v1132_v17 = vld [vmem:[%s20017_s1 + $0x2250] sm:$0xff]  ;;  %v13735_v59 = vcombine.low %v1125_v6, %v1129_v7 }
 0x52b   :  { %11162 = vmatprep.subr.bf16.mxu0 %v13686_v3  ;;  %11695 = vmatprep.subr.bf16.mxu1 %v13688_v20  ;;  %v1136_v53 = vld [vmem:[%s20017_s1 + $0x2270] sm:$0xff]  ;;  %v1133_v3 = vld [vmem:[%s20017_s1 + $0x2258] sm:$0xff] }
 0x52c   :  { %v1137_v20 = vld [vmem:[%s20017_s1 + $0x2278] sm:$0xff]  ;;  %v13742_v63 = vcombine.high %v1132_v17, %v1136_v53  ;;  %v13741_v57 = vcombine.low %v1132_v17, %v1136_v53 }
 0x52d   :  { %v13744_v36 = vcombine.high %v1133_v3, %v1137_v20  ;;  %v13743_v22 = vcombine.low %v1133_v3, %v1137_v20 }
 0x52e   :  { %11163 = vmatpush1.bf16.msra.mxu0 %v13685_v24  ;;  %11696 = vmatpush1.bf16.msra.mxu1 %v13687_v16  ;;  %v1140_v24 = vld [vmem:[%s20017_s1 + $0x2290] sm:$0xff] }
 0x52f   :  { %11164 = vmatprep.subr.bf16.mxu0 %v13694_v26  ;;  %11697 = vmatprep.subr.bf16.mxu1 %v13696_v12  ;;  %v1144_v16 = vld [vmem:[%s20017_s1 + $0x22b0] sm:$0xff]  ;;  %v1141_v26 = vld [vmem:[%s20017_s1 + $0x2298] sm:$0xff] }
 0x530   :  { %v1145_v12 = vld [vmem:[%s20017_s1 + $0x22b8] sm:$0xff]  ;;  %v13750_v9 = vcombine.high %v1140_v24, %v1144_v16  ;;  %v13749_v29 = vcombine.low %v1140_v24, %v1144_v16 }
 0x531   :  { %v13752_v55 = vcombine.high %v1141_v26, %v1145_v12  ;;  %v13751_v32 = vcombine.low %v1141_v26, %v1145_v12 }
 0x532   :  { %11165 = vmatpush1.bf16.msra.mxu0 %v13693_v49  ;;  %11698 = vmatpush1.bf16.msra.mxu1 %v13695_v15  ;;  %v1148_v49 = vld [vmem:[%s20017_s1 + $0x22d0] sm:$0xff] }
 0x533   :  { %11166 = vmatprep.subr.bf16.mxu0 %v13702_v27  ;;  %11699 = vmatprep.subr.bf16.mxu1 %v13704_v45  ;;  %v1152_v15 = vld [vmem:[%s20017_s1 + $0x22f0] sm:$0xff]  ;;  %v1149_v27 = vld [vmem:[%s20017_s1 + $0x22d8] sm:$0xff] }
 0x534   :  { %v1153_v45 = vld [vmem:[%s20017_s1 + $0x22f8] sm:$0xff]  ;;  %v13758_v33 = vcombine.high %v1148_v49, %v1152_v15  ;;  %v13757_v37 = vcombine.low %v1148_v49, %v1152_v15 }
 0x535   :  { %v13760_v34 = vcombine.high %v1149_v27, %v1153_v45  ;;  %v13759_v38 = vcombine.low %v1149_v27, %v1153_v45 }
 0x536   :  { %11167 = vmatpush1.bf16.msra.mxu0 %v13701_v1  ;;  %11700 = vmatpush1.bf16.msra.mxu1 %v13703_v21  ;;  %v1156_v1 = vld [vmem:[%s20017_s1 + $0x2310] sm:$0xff] }
 0x537   :  { %11168 = vmatprep.subr.bf16.mxu0 %v13710_v31  ;;  %11701 = vmatprep.subr.bf16.mxu1 %v13712_v35  ;;  %v1160_v21 = vld [vmem:[%s20017_s1 + $0x2330] sm:$0xff]  ;;  %v1157_v31 = vld [vmem:[%s20017_s1 + $0x2318] sm:$0xff] }
 0x538   :  { %v1161_v35 = vld [vmem:[%s20017_s1 + $0x2338] sm:$0xff]  ;;  %v13766_v19 = vcombine.high %v1156_v1, %v1160_v21  ;;  %v13765_v47 = vcombine.low %v1156_v1, %v1160_v21 }
 0x539   :  { %v13768_v40 = vcombine.high %v1157_v31, %v1161_v35  ;;  %v13767_v51 = vcombine.low %v1157_v31, %v1161_v35 }
 0x53a   :  { %11169 = vmatpush1.bf16.msra.mxu0 %v13709_v41  ;;  %11702 = vmatpush1.bf16.msra.mxu1 %v13711_v25  ;;  %v1164_v41 = vld [vmem:[%s20017_s1 + $0x2350] sm:$0xff] }
 0x53b   :  { %11170 = vmatprep.subr.bf16.mxu0 %v13718_v42  ;;  %11703 = vmatprep.subr.bf16.mxu1 %v13720_v44  ;;  %v1168_v25 = vld [vmem:[%s20017_s1 + $0x2370] sm:$0xff]  ;;  %v1165_v42 = vld [vmem:[%s20017_s1 + $0x2358] sm:$0xff] }
 0x53c   :  { %v1169_v44 = vld [vmem:[%s20017_s1 + $0x2378] sm:$0xff]  ;;  %v13774_v30 = vcombine.high %v1164_v41, %v1168_v25  ;;  %v13773_v0 = vcombine.low %v1164_v41, %v1168_v25 }
 0x53d   :  { %v13776_v18 = vcombine.high %v1165_v42, %v1169_v44  ;;  %v13775_v2 = vcombine.low %v1165_v42, %v1169_v44  ;;  %v1220_v44 = vld [vmem:[%s20017_s1 + $0x2510] sm:$0xff] }
 0x53e   :  { %11171 = vmatpush1.bf16.msra.mxu0 %v13717_v54  ;;  %11704 = vmatpush1.bf16.msra.mxu1 %v13719_v56  ;;  %v1172_v54 = vld [vmem:[%s20017_s1 + $0x2390] sm:$0xff] }
 0x53f   :  { %11172 = vmatprep.subr.bf16.mxu0 %v13726_v61  ;;  %11705 = vmatprep.subr.bf16.mxu1 %v13728_v48  ;;  %v1176_v56 = vld [vmem:[%s20017_s1 + $0x23b0] sm:$0xff]  ;;  %v1173_v61 = vld [vmem:[%s20017_s1 + $0x2398] sm:$0xff] }
 0x540   :  { %v1177_v48 = vld [vmem:[%s20017_s1 + $0x23b8] sm:$0xff]  ;;  %v13782_v6 = vcombine.high %v1172_v54, %v1176_v56  ;;  %v13781_v17 = vcombine.low %v1172_v54, %v1176_v56 }
 0x541   :  { %v13784_v7 = vcombine.high %v1173_v61, %v1177_v48  ;;  %v13783_v53 = vcombine.low %v1173_v61, %v1177_v48  ;;  %v1228_v61 = vld [vmem:[%s20017_s1 + $0x2550] sm:$0xff] }
 0x542   :  { %11173 = vmatpush1.bf16.msra.mxu0 %v13725_v46  ;;  %11706 = vmatpush1.bf16.msra.mxu1 %v13727_v11  ;;  %v1180_v46 = vld [vmem:[%s20017_s1 + $0x23d0] sm:$0xff] }
 0x543   :  { %11174 = vmatprep.subr.bf16.mxu0 %v13734_v13  ;;  %11707 = vmatprep.subr.bf16.mxu1 %v13736_v14  ;;  %v1184_v11 = vld [vmem:[%s20017_s1 + $0x23f0] sm:$0xff]  ;;  %v1181_v13 = vld [vmem:[%s20017_s1 + $0x23d8] sm:$0xff] }
 0x544   :  { %v1185_v14 = vld [vmem:[%s20017_s1 + $0x23f8] sm:$0xff]  ;;  %v13790_v3 = vcombine.high %v1180_v46, %v1184_v11  ;;  %v13789_v24 = vcombine.low %v1180_v46, %v1184_v11  ;;  %v1232_v48 = vld [vmem:[%s20017_s1 + $0x2570] sm:$0xff] }
 0x545   :  { %v13792_v20 = vcombine.high %v1181_v13, %v1185_v14  ;;  %v13791_v16 = vcombine.low %v1181_v13, %v1185_v14  ;;  %v13838_v46 = vcombine.high %v1228_v61, %v1232_v48  ;;  %v1236_v13 = vld [vmem:[%s20017_s1 + $0x2590] sm:$0xff] }
 0x546   :  { %11175 = vmatpush1.bf16.msra.mxu0 %v13733_v58  ;;  %11708 = vmatpush1.bf16.msra.mxu1 %v13735_v59  ;;  %v1188_v58 = vld [vmem:[%s20017_s1 + $0x2410] sm:$0xff] }
 0x547   :  { %11176 = vmatprep.subr.bf16.mxu0 %v13742_v63  ;;  %11709 = vmatprep.subr.bf16.mxu1 %v13744_v36  ;;  %v1192_v59 = vld [vmem:[%s20017_s1 + $0x2430] sm:$0xff]  ;;  %v1189_v63 = vld [vmem:[%s20017_s1 + $0x2418] sm:$0xff] }
 0x548   :  { %v1193_v36 = vld [vmem:[%s20017_s1 + $0x2438] sm:$0xff]  ;;  %v13798_v26 = vcombine.high %v1188_v58, %v1192_v59  ;;  %v13797_v49 = vcombine.low %v1188_v58, %v1192_v59  ;;  %v1240_v14 = vld [vmem:[%s20017_s1 + $0x25b0] sm:$0xff] }
 0x549   :  { %v13800_v12 = vcombine.high %v1189_v63, %v1193_v36  ;;  %v13799_v15 = vcombine.low %v1189_v63, %v1193_v36  ;;  %v13846_v58 = vcombine.high %v1236_v13, %v1240_v14  ;;  %v1244_v63 = vld [vmem:[%s20017_s1 + $0x25d0] sm:$0xff] }
 0x54a   :  { %11177 = vmatpush1.bf16.msra.mxu0 %v13741_v57  ;;  %11710 = vmatpush1.bf16.msra.mxu1 %v13743_v22  ;;  %v1196_v57 = vld [vmem:[%s20017_s1 + $0x2450] sm:$0xff] }
 0x54b   :  { %11178 = vmatprep.subr.bf16.mxu0 %v13750_v9  ;;  %11711 = vmatprep.subr.bf16.mxu1 %v13752_v55  ;;  %v1200_v22 = vld [vmem:[%s20017_s1 + $0x2470] sm:$0xff]  ;;  %v1197_v9 = vld [vmem:[%s20017_s1 + $0x2458] sm:$0xff] }
 0x54c   :  { %v1201_v55 = vld [vmem:[%s20017_s1 + $0x2478] sm:$0xff]  ;;  %v13806_v27 = vcombine.high %v1196_v57, %v1200_v22  ;;  %v13805_v1 = vcombine.low %v1196_v57, %v1200_v22  ;;  %v1248_v36 = vld [vmem:[%s20017_s1 + $0x25f0] sm:$0xff] }
 0x54d   :  { %v13808_v45 = vcombine.high %v1197_v9, %v1201_v55  ;;  %v13807_v21 = vcombine.low %v1197_v9, %v1201_v55  ;;  %v13854_v57 = vcombine.high %v1244_v63, %v1248_v36  ;;  %v1252_v9 = vld [vmem:[%s20017_s1 + $0x2610] sm:$0xff] }
 0x54e   :  { %11179 = vmatpush1.bf16.msra.mxu0 %v13749_v29  ;;  %11712 = vmatpush1.bf16.msra.mxu1 %v13751_v32  ;;  %v1204_v29 = vld [vmem:[%s20017_s1 + $0x2490] sm:$0xff] }
 0x54f   :  { %11180 = vmatprep.subr.bf16.mxu0 %v13758_v33  ;;  %11713 = vmatprep.subr.bf16.mxu1 %v13760_v34  ;;  %v1208_v32 = vld [vmem:[%s20017_s1 + $0x24b0] sm:$0xff]  ;;  %v1205_v33 = vld [vmem:[%s20017_s1 + $0x2498] sm:$0xff] }
 0x550   :  { %v1209_v34 = vld [vmem:[%s20017_s1 + $0x24b8] sm:$0xff]  ;;  %v13814_v31 = vcombine.high %v1204_v29, %v1208_v32  ;;  %v1256_v55 = vld [vmem:[%s20017_s1 + $0x2630] sm:$0xff] }
 0x551   :  { %v13816_v35 = vcombine.high %v1205_v33, %v1209_v34  ;;  %v13815_v41 = vcombine.low %v1205_v33, %v1209_v34  ;;  %v1260_v33 = vld [vmem:[%s20017_s1 + $0x2650] sm:$0xff] }
 0x552   :  { %11181 = vmatpush1.bf16.msra.mxu0 %v13757_v37  ;;  %11714 = vmatpush1.bf16.msra.mxu1 %v13759_v38  ;;  %v1212_v37 = vld [vmem:[%s20017_s1 + $0x24d0] sm:$0xff] }
 0x553   :  { %11182 = vmatprep.subr.bf16.mxu0 %v13766_v19  ;;  %11715 = vmatprep.subr.bf16.mxu1 %v13768_v40  ;;  %v1216_v38 = vld [vmem:[%s20017_s1 + $0x24f0] sm:$0xff]  ;;  %v1217_v19 = vld [vmem:[%s20017_s1 + $0x24f8] sm:$0xff]  ;;  %v13813_v40 = vcombine.low %v1204_v29, %v1208_v32  ;;  %v13862_v29 = vcombine.high %v1252_v9, %v1256_v55 }
 0x554   :  { %v13822_v25 = vcombine.high %v1212_v37, %v1216_v38  ;;  %v1264_v34 = vld [vmem:[%s20017_s1 + $0x2670] sm:$0xff] }
 0x556   :  { %11183 = vmatpush1.bf16.msra.mxu0 %v13765_v47  ;;  %11716 = vmatpush1.bf16.msra.mxu1 %v13767_v51  ;;  %v1224_v47 = vld [vmem:[%s20017_s1 + $0x2530] sm:$0xff]  ;;  %v1225_v51 = vld [vmem:[%s20017_s1 + $0x2538] sm:$0xff] }
 0x557   :  { %11184 = vmatprep.subr.bf16.mxu0 %v13774_v30  ;;  %11717 = vmatprep.subr.bf16.mxu1 %v13776_v18  ;;  %v13821_v30 = vcombine.low %v1212_v37, %v1216_v38  ;;  %v13830_v54 = vcombine.high %v1220_v44, %v1224_v47  ;;  %v13870_v37 = vcombine.high %v1260_v33, %v1264_v34 }
 0x55a   :  { %11185 = vmatpush1.bf16.msra.mxu0 %v13773_v0  ;;  %11718 = vmatpush1.bf16.msra.mxu1 %v13775_v2  ;;  %v1229_v0 = vld [vmem:[%s20017_s1 + $0x2558] sm:$0xff] }
 0x55b   :  { %11186 = vmatprep.subr.bf16.mxu0 %v13782_v6  ;;  %11719 = vmatprep.subr.bf16.mxu1 %v13784_v7  ;;  %v1233_v2 = vld [vmem:[%s20017_s1 + $0x2578] sm:$0xff]  ;;  %v13829_v6 = vcombine.low %v1220_v44, %v1224_v47 }
 0x55c   :  { %v13840_v11 = vcombine.high %v1229_v0, %v1233_v2 }
 0x55e   :  { %11187 = vmatpush1.bf16.msra.mxu0 %v13781_v17  ;;  %11720 = vmatpush1.bf16.msra.mxu1 %v13783_v53  ;;  %v1237_v17 = vld [vmem:[%s20017_s1 + $0x2598] sm:$0xff] }
 0x55f   :  { %11188 = vmatprep.subr.bf16.mxu0 %v13790_v3  ;;  %11721 = vmatprep.subr.bf16.mxu1 %v13792_v20  ;;  %v1241_v53 = vld [vmem:[%s20017_s1 + $0x25b8] sm:$0xff]  ;;  %v13837_v3 = vcombine.low %v1228_v61, %v1232_v48  ;;  %v13839_v20 = vcombine.low %v1229_v0, %v1233_v2  ;;  %v1284_v0 = vld [vmem:[%s20017_s1 + $0x2710] sm:$0xff] }
 0x560   :  { %v13848_v59 = vcombine.high %v1237_v17, %v1241_v53  ;;  %v1288_v2 = vld [vmem:[%s20017_s1 + $0x2730] sm:$0xff] }
 0x562   :  { %11189 = vmatpush1.bf16.msra.mxu0 %v13789_v24  ;;  %11722 = vmatpush1.bf16.msra.mxu1 %v13791_v16  ;;  %v1245_v24 = vld [vmem:[%s20017_s1 + $0x25d8] sm:$0xff] }
 0x563   :  { %11199 = vmatprep.subr.bf16.mxu0 %v13798_v26  ;;  %11732 = vmatprep.subr.bf16.mxu1 %v13800_v12  ;;  %v1249_v16 = vld [vmem:[%s20017_s1 + $0x25f8] sm:$0xff]  ;;  %v13845_v26 = vcombine.low %v1236_v13, %v1240_v14  ;;  %v13847_v12 = vcombine.low %v1237_v17, %v1241_v53  ;;  %v13894_v13 = vcombine.high %v1284_v0, %v1288_v2  ;;  %v1292_v17 = vld [vmem:[%s20017_s1 + $0x2750] sm:$0xff] }
 0x564   :  { %v13856_v22 = vcombine.high %v1245_v24, %v1249_v16  ;;  %v1296_v53 = vld [vmem:[%s20017_s1 + $0x2770] sm:$0xff] }
 0x565   :  { %11191 = vmatmul.mubr.bf16.vlgmr.msra.gmra.mrb[4].mxu0 %v16615_v50  ;;  %11724 = vmatmul.mubr.bf16.vlgmr.msra.gmra.mrb[4].mxu1 %v16615_v50  ;;  %v1213_v50 = vld [vmem:[%s20017_s1 + $0x24d8] sm:$0xff] }
 0x566   :  { %11200 = vmatpush1.bf16.msra.mxu0 %v13797_v49  ;;  %11733 = vmatpush1.bf16.msra.mxu1 %v13799_v15  ;;  %v13824_v42 = vcombine.high %v1213_v50, %v1217_v19  ;;  %v13823_v18 = vcombine.low %v1213_v50, %v1217_v19  ;;  %v1253_v49 = vld [vmem:[%s20017_s1 + $0x2618] sm:$0xff]  ;;  %v1268_v50 = vld [vmem:[%s20017_s1 + $0x2690] sm:$0xff] }
 0x567   :  { %11201 = vmatprep.subr.bf16.mxu0 %v13806_v27  ;;  %11734 = vmatprep.subr.bf16.mxu1 %v13808_v45  ;;  %v1257_v15 = vld [vmem:[%s20017_s1 + $0x2638] sm:$0xff]  ;;  %v13853_v27 = vcombine.low %v1244_v63, %v1248_v36  ;;  %v13855_v45 = vcombine.low %v1245_v24, %v1249_v16  ;;  %v1272_v19 = vld [vmem:[%s20017_s1 + $0x26b0] sm:$0xff]  ;;  %v13902_v63 = vcombine.high %v1292_v17, %v1296_v53 }
 0x568   :  { %11231 = vmatprep.mubr.bf16.mxu0 %v16636_v62  ;;  %11764 = vmatprep.mubr.bf16.mxu1 %v16636_v62  ;;  %v1221_v62 = vld [vmem:[%s20017_s1 + $0x2518] sm:$0xff]  ;;  %v13864_v32 = vcombine.high %v1253_v49, %v1257_v15  ;;  %v13878_v44 = vcombine.high %v1268_v50, %v1272_v19  ;;  %v1300_v24 = vld [vmem:[%s20017_s1 + $0x2790] sm:$0xff] }
 0x569   :  { %v13832_v56 = vcombine.high %v1221_v62, %v1225_v51  ;;  %v13831_v7 = vcombine.low %v1221_v62, %v1225_v51  ;;  %v1276_v62 = vld [vmem:[%s20017_s1 + $0x26d0] sm:$0xff] }
 0x56a   :  { %11202 = vmatpush1.bf16.msra.mxu0 %v13805_v1  ;;  %11735 = vmatpush1.bf16.msra.mxu1 %v13807_v21  ;;  %v1261_v1 = vld [vmem:[%s20017_s1 + $0x2658] sm:$0xff]  ;;  %v1280_v51 = vld [vmem:[%s20017_s1 + $0x26f0] sm:$0xff] }
 0x56b   :  { %11203 = vmatprep.subr.bf16.mxu0 %v13814_v31  ;;  %11736 = vmatprep.subr.bf16.mxu1 %v13816_v35  ;;  %v1265_v21 = vld [vmem:[%s20017_s1 + $0x2678] sm:$0xff]  ;;  %v13861_v31 = vcombine.low %v1252_v9, %v1256_v55  ;;  %v13863_v35 = vcombine.low %v1253_v49, %v1257_v15  ;;  %v13886_v61 = vcombine.high %v1276_v62, %v1280_v51  ;;  %v1304_v16 = vld [vmem:[%s20017_s1 + $0x27b0] sm:$0xff] }
 0x56c   :  { %v13872_v38 = vcombine.high %v1261_v1, %v1265_v21  ;;  %v13910_v9 = vcombine.high %v1300_v24, %v1304_v16  ;;  %v1308_v49 = vld [vmem:[%s20017_s1 + $0x27d0] sm:$0xff] }
 0x56d   :  { %v1312_v15 = vld [vmem:[%s20017_s1 + $0x27f0] sm:$0xff] }
 0x56e   :  { %11204 = vmatpush1.bf16.msra.mxu0 %v13813_v40  ;;  %11737 = vmatpush1.bf16.msra.mxu1 %v13815_v41  ;;  %v1269_v40 = vld [vmem:[%s20017_s1 + $0x2698] sm:$0xff] }
 0x56f   :  { %11205 = vmatprep.subr.bf16.mxu0 %v13822_v25  ;;  %11738 = vmatprep.subr.bf16.mxu1 %v13824_v42  ;;  %v1273_v41 = vld [vmem:[%s20017_s1 + $0x26b8] sm:$0xff]  ;;  %v13869_v25 = vcombine.low %v1260_v33, %v1264_v34  ;;  %v13871_v42 = vcombine.low %v1261_v1, %v1265_v21  ;;  %v13918_v33 = vcombine.high %v1308_v49, %v1312_v15  ;;  %v1316_v1 = vld [vmem:[%s20017_s1 + $0x2810] sm:$0xff] }
 0x570   :  { %v13880_v47 = vcombine.high %v1269_v40, %v1273_v41  ;;  %v1320_v21 = vld [vmem:[%s20017_s1 + $0x2830] sm:$0xff] }
 0x572   :  { %11206 = vmatpush1.bf16.msra.mxu0 %v13821_v30  ;;  %11739 = vmatpush1.bf16.msra.mxu1 %v13823_v18  ;;  %v1277_v30 = vld [vmem:[%s20017_s1 + $0x26d8] sm:$0xff] }
 0x573   :  { %11207 = vmatprep.subr.bf16.mxu0 %v13830_v54  ;;  %11740 = vmatprep.subr.bf16.mxu1 %v13832_v56  ;;  %v1281_v18 = vld [vmem:[%s20017_s1 + $0x26f8] sm:$0xff]  ;;  %v13877_v54 = vcombine.low %v1268_v50, %v1272_v19  ;;  %v13879_v56 = vcombine.low %v1269_v40, %v1273_v41  ;;  %v13926_v50 = vcombine.high %v1316_v1, %v1320_v21  ;;  %v1324_v40 = vld [vmem:[%s20017_s1 + $0x2850] sm:$0xff] }
 0x574   :  { %v13888_v48 = vcombine.high %v1277_v30, %v1281_v18  ;;  %v1328_v41 = vld [vmem:[%s20017_s1 + $0x2870] sm:$0xff] }
 0x576   :  { %11208 = vmatpush1.bf16.msra.mxu0 %v13829_v6  ;;  %11741 = vmatpush1.bf16.msra.mxu1 %v13831_v7  ;;  %v1285_v6 = vld [vmem:[%s20017_s1 + $0x2718] sm:$0xff] }
 0x577   :  { %11209 = vmatprep.subr.bf16.mxu0 %v13838_v46  ;;  %11742 = vmatprep.subr.bf16.mxu1 %v13840_v11  ;;  %v1289_v7 = vld [vmem:[%s20017_s1 + $0x2738] sm:$0xff]  ;;  %v13885_v46 = vcombine.low %v1276_v62, %v1280_v51  ;;  %v13887_v11 = vcombine.low %v1277_v30, %v1281_v18  ;;  %v13934_v62 = vcombine.high %v1324_v40, %v1328_v41  ;;  %v1332_v30 = vld [vmem:[%s20017_s1 + $0x2890] sm:$0xff] }
 0x578   :  { %v13896_v14 = vcombine.high %v1285_v6, %v1289_v7  ;;  %v1336_v18 = vld [vmem:[%s20017_s1 + $0x28b0] sm:$0xff] }
 0x57a   :  { %11210 = vmatpush1.bf16.msra.mxu0 %v13837_v3  ;;  %11743 = vmatpush1.bf16.msra.mxu1 %v13839_v20  ;;  %v1293_v3 = vld [vmem:[%s20017_s1 + $0x2758] sm:$0xff] }
 0x57b   :  { %11211 = vmatprep.subr.bf16.mxu0 %v13846_v58  ;;  %11744 = vmatprep.subr.bf16.mxu1 %v13848_v59  ;;  %v1297_v20 = vld [vmem:[%s20017_s1 + $0x2778] sm:$0xff]  ;;  %v13893_v58 = vcombine.low %v1284_v0, %v1288_v2  ;;  %v13895_v59 = vcombine.low %v1285_v6, %v1289_v7  ;;  %v13942_v0 = vcombine.high %v1332_v30, %v1336_v18  ;;  %v1340_v6 = vld [vmem:[%s20017_s1 + $0x28d0] sm:$0xff] }
 0x57c   :  { %v13904_v36 = vcombine.high %v1293_v3, %v1297_v20  ;;  %v1344_v7 = vld [vmem:[%s20017_s1 + $0x28f0] sm:$0xff] }
 0x57e   :  { %11212 = vmatpush1.bf16.msra.mxu0 %v13845_v26  ;;  %11745 = vmatpush1.bf16.msra.mxu1 %v13847_v12  ;;  %v1301_v26 = vld [vmem:[%s20017_s1 + $0x2798] sm:$0xff] }
 0x57f   :  { %11213 = vmatprep.subr.bf16.mxu0 %v13854_v57  ;;  %11746 = vmatprep.subr.bf16.mxu1 %v13856_v22  ;;  %v1305_v12 = vld [vmem:[%s20017_s1 + $0x27b8] sm:$0xff]  ;;  %v13901_v57 = vcombine.low %v1292_v17, %v1296_v53  ;;  %v13903_v22 = vcombine.low %v1293_v3, %v1297_v20  ;;  %v1348_v53 = vld [vmem:[%s20017_s1 + $0x2910] sm:$0xff] }
 0x580   :  { %v13912_v55 = vcombine.high %v1301_v26, %v1305_v12  ;;  %v1352_v3 = vld [vmem:[%s20017_s1 + $0x2930] sm:$0xff]  ;;  %v1353_v20 = vld [vmem:[%s20017_s1 + $0x2938] sm:$0xff] }
 0x582   :  { %11214 = vmatpush1.bf16.msra.mxu0 %v13853_v27  ;;  %11747 = vmatpush1.bf16.msra.mxu1 %v13855_v45  ;;  %v1309_v27 = vld [vmem:[%s20017_s1 + $0x27d8] sm:$0xff] }
 0x583   :  { %11215 = vmatprep.subr.bf16.mxu0 %v13862_v29  ;;  %11748 = vmatprep.subr.bf16.mxu1 %v13864_v32  ;;  %v1313_v45 = vld [vmem:[%s20017_s1 + $0x27f8] sm:$0xff]  ;;  %v13909_v29 = vcombine.low %v1300_v24, %v1304_v16  ;;  %v13911_v32 = vcombine.low %v1301_v26, %v1305_v12  ;;  %v1356_v24 = vld [vmem:[%s20017_s1 + $0x2950] sm:$0xff] }
 0x584   :  { %v13920_v34 = vcombine.high %v1309_v27, %v1313_v45  ;;  %v1360_v16 = vld [vmem:[%s20017_s1 + $0x2970] sm:$0xff]  ;;  %v1357_v26 = vld [vmem:[%s20017_s1 + $0x2958] sm:$0xff] }
 0x585   :  { %v1361_v12 = vld [vmem:[%s20017_s1 + $0x2978] sm:$0xff] }
 0x586   :  { %11216 = vmatpush1.bf16.msra.mxu0 %v13861_v31  ;;  %11749 = vmatpush1.bf16.msra.mxu1 %v13863_v35  ;;  %v1317_v31 = vld [vmem:[%s20017_s1 + $0x2818] sm:$0xff] }
 0x587   :  { %11217 = vmatprep.subr.bf16.mxu0 %v13870_v37  ;;  %11750 = vmatprep.subr.bf16.mxu1 %v13872_v38  ;;  %v1321_v35 = vld [vmem:[%s20017_s1 + $0x2838] sm:$0xff]  ;;  %v13917_v37 = vcombine.low %v1308_v49, %v1312_v15  ;;  %v13919_v38 = vcombine.low %v1309_v27, %v1313_v45  ;;  %v1364_v49 = vld [vmem:[%s20017_s1 + $0x2990] sm:$0xff] }
 0x588   :  { %v13928_v19 = vcombine.high %v1317_v31, %v1321_v35  ;;  %v1368_v15 = vld [vmem:[%s20017_s1 + $0x29b0] sm:$0xff]  ;;  %v1365_v27 = vld [vmem:[%s20017_s1 + $0x2998] sm:$0xff] }
 0x589   :  { %v1369_v45 = vld [vmem:[%s20017_s1 + $0x29b8] sm:$0xff] }
 0x58a   :  { %11218 = vmatpush1.bf16.msra.mxu0 %v13869_v25  ;;  %11751 = vmatpush1.bf16.msra.mxu1 %v13871_v42  ;;  %v1325_v25 = vld [vmem:[%s20017_s1 + $0x2858] sm:$0xff] }
 0x58b   :  { %11219 = vmatprep.subr.bf16.mxu0 %v13878_v44  ;;  %11752 = vmatprep.subr.bf16.mxu1 %v13880_v47  ;;  %v1329_v42 = vld [vmem:[%s20017_s1 + $0x2878] sm:$0xff]  ;;  %v13925_v44 = vcombine.low %v1316_v1, %v1320_v21  ;;  %v13927_v47 = vcombine.low %v1317_v31, %v1321_v35  ;;  %v1372_v1 = vld [vmem:[%s20017_s1 + $0x29d0] sm:$0xff] }
 0x58c   :  { %v13936_v51 = vcombine.high %v1325_v25, %v1329_v42  ;;  %v1376_v21 = vld [vmem:[%s20017_s1 + $0x29f0] sm:$0xff]  ;;  %v1373_v31 = vld [vmem:[%s20017_s1 + $0x29d8] sm:$0xff] }
 0x58d   :  { %v1377_v35 = vld [vmem:[%s20017_s1 + $0x29f8] sm:$0xff] }
 0x58e   :  { %11220 = vmatpush1.bf16.msra.mxu0 %v13877_v54  ;;  %11753 = vmatpush1.bf16.msra.mxu1 %v13879_v56  ;;  %v1333_v54 = vld [vmem:[%s20017_s1 + $0x2898] sm:$0xff] }
 0x58f   :  { %11221 = vmatprep.subr.bf16.mxu0 %v13886_v61  ;;  %11754 = vmatprep.subr.bf16.mxu1 %v13888_v48  ;;  %v1337_v56 = vld [vmem:[%s20017_s1 + $0x28b8] sm:$0xff]  ;;  %v13933_v61 = vcombine.low %v1324_v40, %v1328_v41  ;;  %v13935_v48 = vcombine.low %v1325_v25, %v1329_v42  ;;  %v1380_v40 = vld [vmem:[%s20017_s1 + $0x2a10] sm:$0xff] }
 0x590   :  { %v13944_v2 = vcombine.high %v1333_v54, %v1337_v56  ;;  %v1384_v41 = vld [vmem:[%s20017_s1 + $0x2a30] sm:$0xff]  ;;  %v1381_v25 = vld [vmem:[%s20017_s1 + $0x2a18] sm:$0xff] }
 0x591   :  { %v1385_v42 = vld [vmem:[%s20017_s1 + $0x2a38] sm:$0xff] }
 0x592   :  { %11222 = vmatpush1.bf16.msra.mxu0 %v13885_v46  ;;  %11755 = vmatpush1.bf16.msra.mxu1 %v13887_v11  ;;  %v1345_v46 = vld [vmem:[%s20017_s1 + $0x28f8] sm:$0xff]  ;;  %v13941_v11 = vcombine.low %v1332_v30, %v1336_v18  ;;  %v1388_v30 = vld [vmem:[%s20017_s1 + $0x2a50] sm:$0xff] }
 0x593   :  { %11223 = vmatprep.subr.bf16.mxu0 %v13894_v13  ;;  %11756 = vmatprep.subr.bf16.mxu1 %v13896_v14  ;;  %v13943_v13 = vcombine.low %v1333_v54, %v1337_v56  ;;  %v13950_v14 = vcombine.high %v1340_v6, %v1344_v7  ;;  %v1392_v18 = vld [vmem:[%s20017_s1 + $0x2a70] sm:$0xff]  ;;  %v1389_v54 = vld [vmem:[%s20017_s1 + $0x2a58] sm:$0xff] }
 0x594   :  { %v1393_v56 = vld [vmem:[%s20017_s1 + $0x2a78] sm:$0xff] }
 0x596   :  { %11224 = vmatpush1.bf16.msra.mxu0 %v13893_v58  ;;  %11757 = vmatpush1.bf16.msra.mxu1 %v13895_v59  ;;  %v13949_v58 = vcombine.low %v1340_v6, %v1344_v7  ;;  %v1400_v6 = vld [vmem:[%s20017_s1 + $0x2ab0] sm:$0xff]  ;;  %v14000_v7 = vcombine.high %v1389_v54, %v1393_v56 }
 0x597   :  { %11225 = vmatprep.subr.bf16.mxu0 %v13902_v63  ;;  %11758 = vmatprep.subr.bf16.mxu1 %v13904_v36  ;;  %v13958_v63 = vcombine.high %v1348_v53, %v1352_v3 }
 0x59a   :  { %11226 = vmatpush1.bf16.msra.mxu0 %v13901_v57  ;;  %11759 = vmatpush1.bf16.msra.mxu1 %v13903_v22  ;;  %v13957_v57 = vcombine.low %v1348_v53, %v1352_v3  ;;  %v1408_v53 = vld [vmem:[%s20017_s1 + $0x2af0] sm:$0xff] }
 0x59b   :  { %11227 = vmatprep.subr.bf16.mxu0 %v13910_v9  ;;  %11760 = vmatprep.subr.bf16.mxu1 %v13912_v55  ;;  %v13966_v9 = vcombine.high %v1356_v24, %v1360_v16  ;;  %v13968_v55 = vcombine.high %v1357_v26, %v1361_v12 }
 0x59e   :  { %11228 = vmatpush1.bf16.msra.mxu0 %v13909_v29  ;;  %11761 = vmatpush1.bf16.msra.mxu1 %v13911_v32  ;;  %v13965_v29 = vcombine.low %v1356_v24, %v1360_v16  ;;  %v13967_v32 = vcombine.low %v1357_v26, %v1361_v12  ;;  %v1416_v24 = vld [vmem:[%s20017_s1 + $0x2b30] sm:$0xff]  ;;  %v1413_v26 = vld [vmem:[%s20017_s1 + $0x2b18] sm:$0xff] }
 0x59f   :  { %11229 = vmatprep.subr.bf16.mxu0 %v13918_v33  ;;  %11762 = vmatprep.subr.bf16.mxu1 %v13920_v34  ;;  %v13974_v33 = vcombine.high %v1364_v49, %v1368_v15  ;;  %v13976_v34 = vcombine.high %v1365_v27, %v1369_v45  ;;  %v1417_v12 = vld [vmem:[%s20017_s1 + $0x2b38] sm:$0xff] }
 0x5a2   :  { %11230 = vmatpush1.bf16.msra.mxu0 %v13917_v37  ;;  %11763 = vmatpush1.bf16.msra.mxu1 %v13919_v38  ;;  %v13973_v37 = vcombine.low %v1364_v49, %v1368_v15  ;;  %v13975_v38 = vcombine.low %v1365_v27, %v1369_v45  ;;  %v1424_v49 = vld [vmem:[%s20017_s1 + $0x2b70] sm:$0xff]  ;;  %v14024_v15 = vcombine.high %v1413_v26, %v1417_v12  ;;  %v1421_v27 = vld [vmem:[%s20017_s1 + $0x2b58] sm:$0xff] }
 0x5a3   :  { %11240 = vmatprep.subr.bf16.mxu0 %v13926_v50  ;;  %11773 = vmatprep.subr.bf16.mxu1 %v13928_v19  ;;  %v13982_v50 = vcombine.high %v1372_v1, %v1376_v21  ;;  %v13984_v19 = vcombine.high %v1373_v31, %v1377_v35  ;;  %v1425_v45 = vld [vmem:[%s20017_s1 + $0x2b78] sm:$0xff] }
 0x5a5   :  { %11232 = vmatmul.mubr.bf16.vlgmr.msra.gmra.mrb[4].mxu0 %v16824_v43  ;;  %11765 = vmatmul.mubr.bf16.vlgmr.msra.gmra.mrb[4].mxu1 %v16824_v43  ;;  %v1341_v43 = vld [vmem:[%s20017_s1 + $0x28d8] sm:$0xff] }
 0x5a6   :  { %11241 = vmatpush1.bf16.msra.mxu0 %v13925_v44  ;;  %11774 = vmatpush1.bf16.msra.mxu1 %v13927_v47  ;;  %v13952_v17 = vcombine.high %v1341_v43, %v1345_v46  ;;  %v13951_v59 = vcombine.low %v1341_v43, %v1345_v46  ;;  %v13981_v44 = vcombine.low %v1372_v1, %v1376_v21  ;;  %v1397_v43 = vld [vmem:[%s20017_s1 + $0x2a98] sm:$0xff]  ;;  %v1432_v1 = vld [vmem:[%s20017_s1 + $0x2bb0] sm:$0xff] }
 0x5a7   :  { %11242 = vmatprep.subr.bf16.mxu0 %v13934_v62  ;;  %11775 = vmatprep.subr.bf16.mxu1 %v13936_v51  ;;  %v13983_v47 = vcombine.low %v1373_v31, %v1377_v35  ;;  %v13990_v62 = vcombine.high %v1380_v40, %v1384_v41  ;;  %v13992_v51 = vcombine.high %v1381_v25, %v1385_v42  ;;  %v1401_v46 = vld [vmem:[%s20017_s1 + $0x2ab8] sm:$0xff] }
 0x5a8   :  { %11272 = vmatprep.mubr.bf16.mxu0 %v16845_v60  ;;  %11805 = vmatprep.mubr.bf16.mxu1 %v16845_v60  ;;  %v1349_v60 = vld [vmem:[%s20017_s1 + $0x2918] sm:$0xff]  ;;  %v14008_v3 = vcombine.high %v1397_v43, %v1401_v46  ;;  %v14032_v21 = vcombine.high %v1421_v27, %v1425_v45 }
 0x5a9   :  { %v13960_v36 = vcombine.high %v1349_v60, %v1353_v20  ;;  %v13959_v22 = vcombine.low %v1349_v60, %v1353_v20  ;;  %v1405_v60 = vld [vmem:[%s20017_s1 + $0x2ad8] sm:$0xff] }
 0x5aa   :  { %11243 = vmatpush1.bf16.msra.mxu0 %v13933_v61  ;;  %11776 = vmatpush1.bf16.msra.mxu1 %v13935_v48  ;;  %v13989_v61 = vcombine.low %v1380_v40, %v1384_v41  ;;  %v13991_v48 = vcombine.low %v1381_v25, %v1385_v42  ;;  %v1409_v20 = vld [vmem:[%s20017_s1 + $0x2af8] sm:$0xff]  ;;  %v1440_v40 = vld [vmem:[%s20017_s1 + $0x2bf0] sm:$0xff] }
 0x5ab   :  { %11244 = vmatprep.subr.bf16.mxu0 %v13942_v0  ;;  %11777 = vmatprep.subr.bf16.mxu1 %v13944_v2  ;;  %v13998_v0 = vcombine.high %v1388_v30, %v1392_v18  ;;  %v1396_v2 = vld [vmem:[%s20017_s1 + $0x2a90] sm:$0xff]  ;;  %v14016_v16 = vcombine.high %v1405_v60, %v1409_v20  ;;  %v1429_v31 = vld [vmem:[%s20017_s1 + $0x2b98] sm:$0xff] }
 0x5ac   :  { %v1433_v35 = vld [vmem:[%s20017_s1 + $0x2bb8] sm:$0xff] }
 0x5ad   :  { %v14040_v41 = vcombine.high %v1429_v31, %v1433_v35  ;;  %v1437_v25 = vld [vmem:[%s20017_s1 + $0x2bd8] sm:$0xff] }
 0x5ae   :  { %11245 = vmatpush1.bf16.msra.mxu0 %v13941_v11  ;;  %11778 = vmatpush1.bf16.msra.mxu1 %v13943_v13  ;;  %v13997_v11 = vcombine.low %v1388_v30, %v1392_v18  ;;  %v1404_v13 = vld [vmem:[%s20017_s1 + $0x2ad0] sm:$0xff]  ;;  %v1441_v42 = vld [vmem:[%s20017_s1 + $0x2bf8] sm:$0xff] }
 0x5af   :  { %11246 = vmatprep.subr.bf16.mxu0 %v13950_v14  ;;  %11779 = vmatprep.subr.bf16.mxu1 %v13952_v17  ;;  %v13999_v14 = vcombine.low %v1389_v54, %v1393_v56  ;;  %v14006_v17 = vcombine.high %v1396_v2, %v1400_v6  ;;  %v1448_v30 = vld [vmem:[%s20017_s1 + $0x2c30] sm:$0xff]  ;;  %v14048_v18 = vcombine.high %v1437_v25, %v1441_v42  ;;  %v1445_v54 = vld [vmem:[%s20017_s1 + $0x2c18] sm:$0xff] }
 0x5b0   :  { %v1449_v56 = vld [vmem:[%s20017_s1 + $0x2c38] sm:$0xff] }
 0x5b2   :  { %11247 = vmatpush1.bf16.msra.mxu0 %v13949_v58  ;;  %11780 = vmatpush1.bf16.msra.mxu1 %v13951_v59  ;;  %v14005_v58 = vcombine.low %v1396_v2, %v1400_v6  ;;  %v1412_v59 = vld [vmem:[%s20017_s1 + $0x2b10] sm:$0xff] }
 0x5b3   :  { %11248 = vmatprep.subr.bf16.mxu0 %v13958_v63  ;;  %11781 = vmatprep.subr.bf16.mxu1 %v13960_v36  ;;  %v14007_v63 = vcombine.low %v1397_v43, %v1401_v46  ;;  %v14014_v36 = vcombine.high %v1404_v13, %v1408_v53  ;;  %v1456_v6 = vld [vmem:[%s20017_s1 + $0x2c70] sm:$0xff]  ;;  %v1453_v43 = vld [vmem:[%s20017_s1 + $0x2c58] sm:$0xff] }
 0x5b4   :  { %v1457_v46 = vld [vmem:[%s20017_s1 + $0x2c78] sm:$0xff] }
 0x5b6   :  { %11249 = vmatpush1.bf16.msra.mxu0 %v13957_v57  ;;  %11782 = vmatpush1.bf16.msra.mxu1 %v13959_v22  ;;  %v14013_v57 = vcombine.low %v1404_v13, %v1408_v53  ;;  %v1420_v22 = vld [vmem:[%s20017_s1 + $0x2b50] sm:$0xff] }
 0x5b7   :  { %11250 = vmatprep.subr.bf16.mxu0 %v13966_v9  ;;  %11783 = vmatprep.subr.bf16.mxu1 %v13968_v55  ;;  %v14015_v9 = vcombine.low %v1405_v60, %v1409_v20  ;;  %v14022_v55 = vcombine.high %v1412_v59, %v1416_v24  ;;  %v1460_v13 = vld [vmem:[%s20017_s1 + $0x2c90] sm:$0xff]  ;;  %v1465_v60 = vld [vmem:[%s20017_s1 + $0x2cb8] sm:$0xff]  ;;  %v14064_v20 = vcombine.high %v1453_v43, %v1457_v46 }
 0x5ba   :  { %11251 = vmatpush1.bf16.msra.mxu0 %v13965_v29  ;;  %11784 = vmatpush1.bf16.msra.mxu1 %v13967_v32  ;;  %v14021_v29 = vcombine.low %v1412_v59, %v1416_v24  ;;  %v1428_v32 = vld [vmem:[%s20017_s1 + $0x2b90] sm:$0xff] }
 0x5bb   :  { %11252 = vmatprep.subr.bf16.mxu0 %v13974_v33  ;;  %11785 = vmatprep.subr.bf16.mxu1 %v13976_v34  ;;  %v14023_v33 = vcombine.low %v1413_v26, %v1417_v12  ;;  %v14030_v34 = vcombine.high %v1420_v22, %v1424_v49  ;;  %v1468_v59 = vld [vmem:[%s20017_s1 + $0x2cd0] sm:$0xff]  ;;  %v1469_v26 = vld [vmem:[%s20017_s1 + $0x2cd8] sm:$0xff] }
 0x5bc   :  { %v1472_v24 = vld [vmem:[%s20017_s1 + $0x2cf0] sm:$0xff] }
 0x5be   :  { %11253 = vmatpush1.bf16.msra.mxu0 %v13973_v37  ;;  %11786 = vmatpush1.bf16.msra.mxu1 %v13975_v38  ;;  %v14029_v37 = vcombine.low %v1420_v22, %v1424_v49  ;;  %v1436_v38 = vld [vmem:[%s20017_s1 + $0x2bd0] sm:$0xff] }
 0x5bf   :  { %11254 = vmatprep.subr.bf16.mxu0 %v13982_v50  ;;  %11787 = vmatprep.subr.bf16.mxu1 %v13984_v19  ;;  %v14031_v50 = vcombine.low %v1421_v27, %v1425_v45  ;;  %v14038_v19 = vcombine.high %v1428_v32, %v1432_v1  ;;  %v14077_v27 = vcombine.low %v1468_v59, %v1472_v24  ;;  %v1484_v45 = vld [vmem:[%s20017_s1 + $0x2d50] sm:$0xff] }
 0x5c2   :  { %11255 = vmatpush1.bf16.msra.mxu0 %v13981_v44  ;;  %11788 = vmatpush1.bf16.msra.mxu1 %v13983_v47  ;;  %v14037_v44 = vcombine.low %v1428_v32, %v1432_v1  ;;  %v1444_v47 = vld [vmem:[%s20017_s1 + $0x2c10] sm:$0xff]  ;;  %v1485_v1 = vld [vmem:[%s20017_s1 + $0x2d58] sm:$0xff] }
 0x5c3   :  { %11256 = vmatprep.subr.bf16.mxu0 %v13990_v62  ;;  %11789 = vmatprep.subr.bf16.mxu1 %v13992_v51  ;;  %v14039_v62 = vcombine.low %v1429_v31, %v1433_v35  ;;  %v14046_v51 = vcombine.high %v1436_v38, %v1440_v40  ;;  %v14054_v2 = vcombine.high %v1444_v47, %v1448_v30  ;;  %v1492_v35 = vld [vmem:[%s20017_s1 + $0x2d90] sm:$0xff] }
 0x5c6   :  { %11257 = vmatpush1.bf16.msra.mxu0 %v13989_v61  ;;  %11790 = vmatpush1.bf16.msra.mxu1 %v13991_v48  ;;  %v14045_v61 = vcombine.low %v1436_v38, %v1440_v40  ;;  %v1452_v48 = vld [vmem:[%s20017_s1 + $0x2c50] sm:$0xff]  ;;  %v1493_v40 = vld [vmem:[%s20017_s1 + $0x2d98] sm:$0xff] }
 0x5c7   :  { %11258 = vmatprep.subr.bf16.mxu0 %v13998_v0  ;;  %11791 = vmatprep.subr.bf16.mxu1 %v14000_v7  ;;  %v14047_v0 = vcombine.low %v1437_v25, %v1441_v42  ;;  %v14056_v7 = vcombine.high %v1445_v54, %v1449_v56  ;;  %v14062_v53 = vcombine.high %v1452_v48, %v1456_v6  ;;  %v1500_v42 = vld [vmem:[%s20017_s1 + $0x2dd0] sm:$0xff] }
 0x5ca   :  { %11259 = vmatpush1.bf16.msra.mxu0 %v13997_v11  ;;  %11792 = vmatpush1.bf16.msra.mxu1 %v13999_v14  ;;  %v14053_v11 = vcombine.low %v1444_v47, %v1448_v30  ;;  %v1464_v14 = vld [vmem:[%s20017_s1 + $0x2cb0] sm:$0xff]  ;;  %v1501_v30 = vld [vmem:[%s20017_s1 + $0x2dd8] sm:$0xff] }
 0x5cb   :  { %11260 = vmatprep.subr.bf16.mxu0 %v14006_v17  ;;  %11793 = vmatprep.subr.bf16.mxu1 %v14008_v3  ;;  %v14055_v17 = vcombine.low %v1445_v54, %v1449_v56  ;;  %v1461_v3 = vld [vmem:[%s20017_s1 + $0x2c98] sm:$0xff]  ;;  %v14069_v12 = vcombine.low %v1460_v13, %v1464_v14  ;;  %v1508_v56 = vld [vmem:[%s20017_s1 + $0x2e10] sm:$0xff] }
 0x5cc   :  { %v14071_v22 = vcombine.low %v1461_v3, %v1465_v60 }
 0x5ce   :  { %11261 = vmatpush1.bf16.msra.mxu0 %v14005_v58  ;;  %11794 = vmatpush1.bf16.msra.mxu1 %v14007_v63  ;;  %v14061_v58 = vcombine.low %v1452_v48, %v1456_v6  ;;  %v14063_v63 = vcombine.low %v1453_v43, %v1457_v46  ;;  %v1513_v6 = vld [vmem:[%s20017_s1 + $0x2e38] sm:$0xff]  ;;  %v1516_v46 = vld [vmem:[%s20017_s1 + $0x2e50] sm:$0xff] }
 0x5cf   :  { %11262 = vmatprep.subr.bf16.mxu0 %v14014_v36  ;;  %11795 = vmatprep.subr.bf16.mxu1 %v14016_v16  ;;  %v14070_v36 = vcombine.high %v1460_v13, %v1464_v14  ;;  %v14072_v16 = vcombine.high %v1461_v3, %v1465_v60  ;;  %v1521_v3 = vld [vmem:[%s20017_s1 + $0x2e78] sm:$0xff] }
 0x5d2   :  { %11263 = vmatpush1.bf16.msra.mxu0 %v14013_v57  ;;  %11796 = vmatpush1.bf16.msra.mxu1 %v14015_v9  ;;  %v1476_v57 = vld [vmem:[%s20017_s1 + $0x2d10] sm:$0xff]  ;;  %v14078_v9 = vcombine.high %v1468_v59, %v1472_v24  ;;  %v1525_v24 = vld [vmem:[%s20017_s1 + $0x2e98] sm:$0xff] }
 0x5d3   :  { %11264 = vmatprep.subr.bf16.mxu0 %v14022_v55  ;;  %11797 = vmatprep.subr.bf16.mxu1 %v14024_v15  ;;  %v1480_v55 = vld [vmem:[%s20017_s1 + $0x2d30] sm:$0xff]  ;;  %v1481_v15 = vld [vmem:[%s20017_s1 + $0x2d38] sm:$0xff] }
 0x5d4   :  { %v14086_v32 = vcombine.high %v1476_v57, %v1480_v55  ;;  %v14085_v31 = vcombine.low %v1476_v57, %v1480_v55  ;;  %v1533_v55 = vld [vmem:[%s20017_s1 + $0x2ed8] sm:$0xff] }
 0x5d6   :  { %11265 = vmatpush1.bf16.msra.mxu0 %v14021_v29  ;;  %11798 = vmatpush1.bf16.msra.mxu1 %v14023_v33  ;;  %v1488_v33 = vld [vmem:[%s20017_s1 + $0x2d70] sm:$0xff] }
 0x5d7   :  { %11266 = vmatprep.subr.bf16.mxu0 %v14030_v34  ;;  %11799 = vmatprep.subr.bf16.mxu1 %v14032_v21  ;;  %v1489_v21 = vld [vmem:[%s20017_s1 + $0x2d78] sm:$0xff]  ;;  %v14094_v38 = vcombine.high %v1484_v45, %v1488_v33  ;;  %v14093_v25 = vcombine.low %v1484_v45, %v1488_v33 }
 0x5d8   :  { %v1541_v33 = vld [vmem:[%s20017_s1 + $0x2f18] sm:$0xff] }
 0x5da   :  { %11267 = vmatpush1.bf16.msra.mxu0 %v14029_v37  ;;  %11800 = vmatpush1.bf16.msra.mxu1 %v14031_v50  ;;  %v1496_v50 = vld [vmem:[%s20017_s1 + $0x2db0] sm:$0xff] }
 0x5db   :  { %11268 = vmatprep.subr.bf16.mxu0 %v14038_v19  ;;  %11801 = vmatprep.subr.bf16.mxu1 %v14040_v41  ;;  %v14096_v19 = vcombine.high %v1485_v1, %v1489_v21  ;;  %v1497_v41 = vld [vmem:[%s20017_s1 + $0x2db8] sm:$0xff]  ;;  %v14102_v47 = vcombine.high %v1492_v35, %v1496_v50  ;;  %v14101_v54 = vcombine.low %v1492_v35, %v1496_v50 }
 0x5dc   :  { %v14103_v48 = vcombine.low %v1493_v40, %v1497_v41  ;;  %v1549_v50 = vld [vmem:[%s20017_s1 + $0x2f58] sm:$0xff] }
 0x5de   :  { %11269 = vmatpush1.bf16.msra.mxu0 %v14037_v44  ;;  %11802 = vmatpush1.bf16.msra.mxu1 %v14039_v62  ;;  %v14095_v44 = vcombine.low %v1485_v1, %v1489_v21  ;;  %v1504_v62 = vld [vmem:[%s20017_s1 + $0x2df0] sm:$0xff] }
 0x5df   :  { %11270 = vmatprep.subr.bf16.mxu0 %v14046_v51  ;;  %11803 = vmatprep.subr.bf16.mxu1 %v14048_v18  ;;  %v14104_v51 = vcombine.high %v1493_v40, %v1497_v41  ;;  %v1505_v18 = vld [vmem:[%s20017_s1 + $0x2df8] sm:$0xff]  ;;  %v14109_v43 = vcombine.low %v1500_v42, %v1504_v62 }
 0x5e0   :  { %v14111_v13 = vcombine.low %v1501_v30, %v1505_v18 }
 0x5e2   :  { %11271 = vmatpush1.bf16.msra.mxu0 %v14045_v61  ;;  %11804 = vmatpush1.bf16.msra.mxu1 %v14047_v0  ;;  %v1512_v61 = vld [vmem:[%s20017_s1 + $0x2e30] sm:$0xff]  ;;  %v14110_v0 = vcombine.high %v1500_v42, %v1504_v62  ;;  %v1557_v62 = vld [vmem:[%s20017_s1 + $0x2f98] sm:$0xff] }
 0x5e3   :  { %11281 = vmatprep.subr.bf16.mxu0 %v14054_v2  ;;  %11814 = vmatprep.subr.bf16.mxu1 %v14056_v7  ;;  %v1509_v2 = vld [vmem:[%s20017_s1 + $0x2e18] sm:$0xff]  ;;  %v14112_v7 = vcombine.high %v1501_v30, %v1505_v18  ;;  %v14118_v14 = vcombine.high %v1508_v56, %v1512_v61  ;;  %v14117_v60 = vcombine.low %v1508_v56, %v1512_v61  ;;  %v1564_v61 = vld [vmem:[%s20017_s1 + $0x2fd0] sm:$0xff] }
 0x5e5   :  { %11273 = vmatmul.mubr.bf16.vlgmr.msra.gmra.mrb[4].mxu0 %v17035_v52  ;;  %11806 = vmatmul.mubr.bf16.vlgmr.msra.gmra.mrb[4].mxu1 %v17035_v52  ;;  %v1473_v52 = vld [vmem:[%s20017_s1 + $0x2cf8] sm:$0xff] }
 0x5e6   :  { %11282 = vmatpush1.bf16.msra.mxu0 %v14053_v11  ;;  %11815 = vmatpush1.bf16.msra.mxu1 %v14055_v17  ;;  %v14080_v49 = vcombine.high %v1469_v26, %v1473_v52  ;;  %v14079_v29 = vcombine.low %v1469_v26, %v1473_v52  ;;  %v1520_v11 = vld [vmem:[%s20017_s1 + $0x2e70] sm:$0xff]  ;;  %v14120_v17 = vcombine.high %v1509_v2, %v1513_v6 }
 0x5e7   :  { %11283 = vmatprep.subr.bf16.mxu0 %v14062_v53  ;;  %11816 = vmatprep.subr.bf16.mxu1 %v14064_v20  ;;  %v1517_v53 = vld [vmem:[%s20017_s1 + $0x2e58] sm:$0xff]  ;;  %v14119_v20 = vcombine.low %v1509_v2, %v1513_v6  ;;  %v14125_v26 = vcombine.low %v1516_v46, %v1520_v11 }
 0x5e8   :  { %11313 = vmatprep.mubr.bf16.mxu0 %v17056_v5  ;;  %11846 = vmatprep.mubr.bf16.mxu1 %v17056_v5  ;;  %v1477_v5 = vld [vmem:[%s20017_s1 + $0x2d18] sm:$0xff]  ;;  %v14128_v59 = vcombine.high %v1517_v53, %v1521_v3  ;;  %v14127_v52 = vcombine.low %v1517_v53, %v1521_v3 }
 0x5e9   :  { %v14088_v34 = vcombine.high %v1477_v5, %v1481_v15  ;;  %v14087_v37 = vcombine.low %v1477_v5, %v1481_v15  ;;  %v1569_v2 = vld [vmem:[%s20017_s1 + $0x2ff8] sm:$0xff] }
 0x5ea   :  { %11284 = vmatpush1.bf16.msra.mxu0 %v14061_v58  ;;  %11817 = vmatpush1.bf16.msra.mxu1 %v14063_v63  ;;  %v14126_v58 = vcombine.high %v1516_v46, %v1520_v11  ;;  %v1524_v63 = vld [vmem:[%s20017_s1 + $0x2e90] sm:$0xff] }
 0x5eb   :  { %11285 = vmatprep.subr.bf16.mxu0 %v14070_v36  ;;  %11818 = vmatprep.subr.bf16.mxu1 %v14072_v16  ;;  %v1528_v36 = vld [vmem:[%s20017_s1 + $0x2eb0] sm:$0xff]  ;;  %v1529_v16 = vld [vmem:[%s20017_s1 + $0x2eb8] sm:$0xff] }
 0x5ec   :  { %v14136_v57 = vcombine.high %v1525_v24, %v1529_v16  ;;  %v14133_v5 = vcombine.low %v1524_v63, %v1528_v36  ;;  %v14135_v15 = vcombine.low %v1525_v24, %v1529_v16  ;;  %v1572_v11 = vld [vmem:[%s20017_s1 + $0x3010] sm:$0xff] }
 0x5ee   :  { %11286 = vmatpush1.bf16.msra.mxu0 %v14069_v12  ;;  %11819 = vmatpush1.bf16.msra.mxu1 %v14071_v22  ;;  %v14134_v12 = vcombine.high %v1524_v63, %v1528_v36  ;;  %v1532_v22 = vld [vmem:[%s20017_s1 + $0x2ed0] sm:$0xff]  ;;  %v1581_v63 = vld [vmem:[%s20017_s1 + $0x3058] sm:$0xff] }
 0x5ef   :  { %11287 = vmatprep.subr.bf16.mxu0 %v14078_v9  ;;  %11820 = vmatprep.subr.bf16.mxu1 %v14080_v49  ;;  %v1536_v9 = vld [vmem:[%s20017_s1 + $0x2ef0] sm:$0xff]  ;;  %v1537_v49 = vld [vmem:[%s20017_s1 + $0x2ef8] sm:$0xff] }
 0x5f0   :  { %v14144_v45 = vcombine.high %v1533_v55, %v1537_v49  ;;  %v14141_v1 = vcombine.low %v1532_v22, %v1536_v9  ;;  %v14143_v21 = vcombine.low %v1533_v55, %v1537_v49  ;;  %v1585_v36 = vld [vmem:[%s20017_s1 + $0x3078] sm:$0xff] }
 0x5f1   :  { %v14191_v49 = vcombine.low %v1581_v63, %v1585_v36 }
 0x5f2   :  { %11288 = vmatpush1.bf16.msra.mxu0 %v14077_v27  ;;  %11821 = vmatpush1.bf16.msra.mxu1 %v14079_v29  ;;  %v14142_v27 = vcombine.high %v1532_v22, %v1536_v9  ;;  %v1540_v29 = vld [vmem:[%s20017_s1 + $0x2f10] sm:$0xff]  ;;  %v1589_v22 = vld [vmem:[%s20017_s1 + $0x3098] sm:$0xff] }
 0x5f3   :  { %11289 = vmatprep.subr.bf16.mxu0 %v14086_v32  ;;  %11822 = vmatprep.subr.bf16.mxu1 %v14088_v34  ;;  %v1544_v32 = vld [vmem:[%s20017_s1 + $0x2f30] sm:$0xff]  ;;  %v1545_v34 = vld [vmem:[%s20017_s1 + $0x2f38] sm:$0xff] }
 0x5f4   :  { %v14152_v35 = vcombine.high %v1541_v33, %v1545_v34  ;;  %v14149_v40 = vcombine.low %v1540_v29, %v1544_v32  ;;  %v14151_v41 = vcombine.low %v1541_v33, %v1545_v34  ;;  %v1593_v9 = vld [vmem:[%s20017_s1 + $0x30b8] sm:$0xff] }
 0x5f5   :  { %v14199_v33 = vcombine.low %v1589_v22, %v1593_v9 }
 0x5f6   :  { %11290 = vmatpush1.bf16.msra.mxu0 %v14085_v31  ;;  %11823 = vmatpush1.bf16.msra.mxu1 %v14087_v37  ;;  %v14150_v31 = vcombine.high %v1540_v29, %v1544_v32  ;;  %v1548_v37 = vld [vmem:[%s20017_s1 + $0x2f50] sm:$0xff]  ;;  %v1601_v29 = vld [vmem:[%s20017_s1 + $0x30f8] sm:$0xff] }
 0x5f7   :  { %11291 = vmatprep.subr.bf16.mxu0 %v14094_v38  ;;  %11824 = vmatprep.subr.bf16.mxu1 %v14096_v19  ;;  %v1552_v38 = vld [vmem:[%s20017_s1 + $0x2f70] sm:$0xff]  ;;  %v1553_v19 = vld [vmem:[%s20017_s1 + $0x2f78] sm:$0xff] }
 0x5f8   :  { %v14160_v42 = vcombine.high %v1549_v50, %v1553_v19  ;;  %v14157_v30 = vcombine.low %v1548_v37, %v1552_v38  ;;  %v14159_v18 = vcombine.low %v1549_v50, %v1553_v19 }
 0x5fa   :  { %11292 = vmatpush1.bf16.msra.mxu0 %v14093_v25  ;;  %11825 = vmatpush1.bf16.msra.mxu1 %v14095_v44  ;;  %v14158_v25 = vcombine.high %v1548_v37, %v1552_v38  ;;  %v1556_v44 = vld [vmem:[%s20017_s1 + $0x2f90] sm:$0xff]  ;;  %v1609_v37 = vld [vmem:[%s20017_s1 + $0x3138] sm:$0xff] }
 0x5fb   :  { %11293 = vmatprep.subr.bf16.mxu0 %v14102_v47  ;;  %11826 = vmatprep.subr.bf16.mxu1 %v14104_v51  ;;  %v1560_v47 = vld [vmem:[%s20017_s1 + $0x2fb0] sm:$0xff]  ;;  %v1561_v51 = vld [vmem:[%s20017_s1 + $0x2fb8] sm:$0xff] }
 0x5fc   :  { %v14168_v56 = vcombine.high %v1557_v62, %v1561_v51  ;;  %v14165_v6 = vcombine.low %v1556_v44, %v1560_v47 }
 0x5fe   :  { %11294 = vmatpush1.bf16.msra.mxu0 %v14101_v54  ;;  %11827 = vmatpush1.bf16.msra.mxu1 %v14103_v48  ;;  %v14166_v54 = vcombine.high %v1556_v44, %v1560_v47  ;;  %v1568_v48 = vld [vmem:[%s20017_s1 + $0x2ff0] sm:$0xff]  ;;  %v1613_v44 = vld [vmem:[%s20017_s1 + $0x3158] sm:$0xff] }
 0x5ff   :  { %11295 = vmatprep.subr.bf16.mxu0 %v14110_v0  ;;  %11828 = vmatprep.subr.bf16.mxu1 %v14112_v7  ;;  %v1565_v0 = vld [vmem:[%s20017_s1 + $0x2fd8] sm:$0xff]  ;;  %v14167_v7 = vcombine.low %v1557_v62, %v1561_v51  ;;  %v14173_v53 = vcombine.low %v1564_v61, %v1568_v48 }
 0x600   :  { %v14176_v46 = vcombine.high %v1565_v0, %v1569_v2  ;;  %v14175_v3 = vcombine.low %v1565_v0, %v1569_v2  ;;  %v1617_v47 = vld [vmem:[%s20017_s1 + $0x3178] sm:$0xff]  ;;  %v19783_v2 = vld [vmem:[%s20020_s2] sm:$0xff] }
 0x601   :  { %v1625_v0 = vld [vmem:[%s20017_s1 + $0x31b8] sm:$0xff] }
 0x602   :  { %11296 = vmatpush1.bf16.msra.mxu0 %v14109_v43  ;;  %11829 = vmatpush1.bf16.msra.mxu1 %v14111_v13  ;;  %v14174_v43 = vcombine.high %v1564_v61, %v1568_v48  ;;  %v1576_v13 = vld [vmem:[%s20017_s1 + $0x3030] sm:$0xff]  ;;  %v1621_v48 = vld [vmem:[%s20017_s1 + $0x3198] sm:$0xff] }
 0x603   :  { %11297 = vmatprep.subr.bf16.mxu0 %v14118_v14  ;;  %11830 = vmatprep.subr.bf16.mxu1 %v14120_v17  ;;  %v1573_v14 = vld [vmem:[%s20017_s1 + $0x3018] sm:$0xff]  ;;  %v14181_v24 = vcombine.low %v1572_v11, %v1576_v13 }
 0x604   :  { %v1577_v17 = vld [vmem:[%s20017_s1 + $0x3038] sm:$0xff] }
 0x605   :  { %v14183_v16 = vcombine.low %v1573_v14, %v1577_v17 }
 0x606   :  { %11298 = vmatpush1.bf16.msra.mxu0 %v14117_v60  ;;  %11831 = vmatpush1.bf16.msra.mxu1 %v14119_v20  ;;  %v14182_v60 = vcombine.high %v1572_v11, %v1576_v13  ;;  %v14184_v20 = vcombine.high %v1573_v14, %v1577_v17  ;;  %v14232_v11 = vcombine.high %v1621_v48, %v1625_v0  ;;  %v1628_v13 = vld [vmem:[%s20017_s1 + $0x31d0] sm:$0xff] }
 0x607   :  { %11299 = vmatprep.subr.bf16.mxu0 %v14126_v58  ;;  %11832 = vmatprep.subr.bf16.mxu1 %v14128_v59  ;;  %v1580_v58 = vld [vmem:[%s20017_s1 + $0x3050] sm:$0xff] }
 0x608   :  { %v1584_v59 = vld [vmem:[%s20017_s1 + $0x3070] sm:$0xff] }
 0x609   :  { %v14189_v55 = vcombine.low %v1580_v58, %v1584_v59  ;;  %v1632_v14 = vld [vmem:[%s20017_s1 + $0x31f0] sm:$0xff] }
 0x60a   :  { %11300 = vmatpush1.bf16.msra.mxu0 %v14125_v26  ;;  %11833 = vmatpush1.bf16.msra.mxu1 %v14127_v52  ;;  %v14190_v26 = vcombine.high %v1580_v58, %v1584_v59  ;;  %v14192_v52 = vcombine.high %v1581_v63, %v1585_v36  ;;  %v14231_v58 = vcombine.low %v1621_v48, %v1625_v0  ;;  %v14652_v0 = vld [vmem:[%s20019_s3 + $0xf8] sm:$0xff]  }
 0x60b   :  { %11301 = vmatprep.subr.bf16.mxu0 %v14134_v12  ;;  %11834 = vmatprep.subr.bf16.mxu1 %v14136_v57  ;;  %v1588_v12 = vld [vmem:[%s20017_s1 + $0x3090] sm:$0xff]  ;;  %v14238_v59 = vcombine.high %v1628_v13, %v1632_v14 }
 0x60c   :  { %v1592_v57 = vld [vmem:[%s20017_s1 + $0x30b0] sm:$0xff] }
 0x60d   :  { %v14197_v32 = vcombine.low %v1588_v12, %v1592_v57 }
 0x60e   :  { %11302 = vmatpush1.bf16.msra.mxu0 %v14133_v5  ;;  %11835 = vmatpush1.bf16.msra.mxu1 %v14135_v15  ;;  %v14198_v5 = vcombine.high %v1588_v12, %v1592_v57  ;;  %v14200_v15 = vcombine.high %v1589_v22, %v1593_v9  ;;  %v14624_v12 = vld [vmem:[%s20019_s3 + $0xc0] sm:$0xff]   ;;  %v14627_v9 = vld [vmem:[%s20019_s3 + $0x48] sm:$0xff]  }
 0x60f   :  { %11303 = vmatprep.subr.bf16.mxu0 %v14142_v27  ;;  %11836 = vmatprep.subr.bf16.mxu1 %v14144_v45  ;;  %v1596_v27 = vld [vmem:[%s20017_s1 + $0x30d0] sm:$0xff] }
 0x610   :  { %v1600_v45 = vld [vmem:[%s20017_s1 + $0x30f0] sm:$0xff] }
 0x611   :  { %v14206_v34 = vcombine.high %v1596_v27, %v1600_v45  ;;  %v14205_v38 = vcombine.low %v1596_v27, %v1600_v45  ;;  %v14629_v27 = vld [vmem:[%s20019_s3 + $0x8] sm:$0xff]  }
 0x612   :  { %11304 = vmatpush1.bf16.msra.mxu0 %v14141_v1  ;;  %11837 = vmatpush1.bf16.msra.mxu1 %v14143_v21  ;;  %v1604_v21 = vld [vmem:[%s20017_s1 + $0x3110] sm:$0xff]  ;;  %v14630_v45 = vld [vmem:[%s20019_s3 + $0x88] sm:$0xff]  }
 0x613   :  { %11305 = vmatprep.subr.bf16.mxu0 %v14150_v31  ;;  %11838 = vmatprep.subr.bf16.mxu1 %v14152_v35  ;;  %v1608_v31 = vld [vmem:[%s20017_s1 + $0x3130] sm:$0xff]  ;;  %v1636_v35 = vlaneseq }
 0x614   :  { %v14214_v19 = vcombine.high %v1604_v21, %v1608_v31  ;;  %v14213_v62 = vcombine.low %v1604_v21, %v1608_v31  ;;  %v14637_v21 = vld [vmem:[%s20019_s3 + $0x18] sm:$0xff]  }
 0x615   :  { %v14638_v31 = vld [vmem:[%s20019_s3 + $0x98] sm:$0xff]  }
 0x616   :  { %11306 = vmatpush1.bf16.msra.mxu0 %v14149_v40  ;;  %11839 = vmatpush1.bf16.msra.mxu1 %v14151_v41  ;;  %v1612_v41 = vld [vmem:[%s20017_s1 + $0x3150] sm:$0xff] }
 0x617   :  { %11307 = vmatprep.subr.bf16.mxu0 %v14158_v25  ;;  %11840 = vmatprep.subr.bf16.mxu1 %v14160_v42  ;;  %v1616_v25 = vld [vmem:[%s20017_s1 + $0x3170] sm:$0xff]  ;;  %v19759_v42 = vshrl.u32 %v1636_v35, 7  ;;  %v14639_v35 = vld [vmem:[%s20019_s3 + $0x60] sm:$0xff]  }
 0x619   :  { %v1642_v61 = vsub.s32 1, %v19759_v42 }
 0x61a   :  { %11308 = vmatpush1.bf16.msra.mxu0 %v14157_v30  ;;  %11841 = vmatpush1.bf16.msra.mxu1 %v14159_v18  ;;  %v14222_v30 = vcombine.high %v1612_v41, %v1616_v25  ;;  %v14224_v18 = vcombine.high %v1613_v44, %v1617_v47 }
 0x61b   :  { %11309 = vmatprep.subr.bf16.mxu0 %v14166_v54  ;;  %11842 = vmatprep.subr.bf16.mxu1 %v14168_v56  ;;  %v1620_v54 = vld [vmem:[%s20017_s1 + $0x3190] sm:$0xff]  ;;  %v1643_v17 = vrot.slane %v19783_v2, %v1642_v61  ;;  %v14651_v61 = vld [vmem:[%s20019_s3 + $0x78] sm:$0xff]  }
 0x61c   :  { %v1624_v56 = vld [vmem:[%s20017_s1 + $0x31b0] sm:$0xff] }
 0x61d   :  { %v14395_v36 = vadd.f32 %v18015_v23, %v1643_v17  ;;  %v14625_v23 = vld [vmem:[%s20019_s3] sm:$0xff]   ;;  %v14659_v17 = vld [vmem:[%s20019_s3 + $0x148] sm:$0xff]  }
 0x61e   :  { %11310 = vmatpush1.bf16.msra.mxu0 %v14165_v6  ;;  %11843 = vmatpush1.bf16.msra.mxu1 %v14167_v7  ;;  %v1650_v6 = vsub.s32 3, %v19759_v42  ;;  %v14221_v7 = vcombine.low %v1612_v41, %v1616_v25  ;;  %v14644_v41 = vld [vmem:[%s20019_s3 + $0xe8] sm:$0xff]  }
 0x61f   :  { %11311 = vmatprep.subr.bf16.mxu0 %v14174_v43  ;;  %11844 = vmatprep.subr.bf16.mxu1 %v14176_v46  ;;  %v14223_v43 = vcombine.low %v1613_v44, %v1617_v47  ;;  %v14230_v46 = vcombine.high %v1620_v54, %v1624_v56  ;;  %v11897_v57 = vmax.f32 %v14395_v36, 0.0  ;;  %v14645_v25 = vld [vmem:[%s20019_s3 + $0x28] sm:$0xff]   ;;  %v14666_v36 = vld [vmem:[%s20019_s3 + $0x190] sm:$0xff]  }
 0x620   :  { %v14646_v47 = vld [vmem:[%s20019_s3 + $0xa8] sm:$0xff]  }
 0x622   :  { %11312 = vmatpush1.bf16.msra.mxu0 %v14173_v53  ;;  %11845 = vmatpush1.bf16.msra.mxu1 %v14175_v3  ;;  %v1629_v53 = vld [vmem:[%s20017_s1 + $0x31d8] sm:$0xff] }
 0x623   :  { %11322 = vmatprep.subr.bf16.mxu0 %v14182_v60  ;;  %11855 = vmatprep.subr.bf16.mxu1 %v14184_v20  ;;  %v1633_v3 = vld [vmem:[%s20017_s1 + $0x31f8] sm:$0xff]  ;;  %v1651_v60 = vrot.slane %v19783_v2, %v1650_v6  ;;  %v14229_v20 = vcombine.low %v1620_v54, %v1624_v56  ;;  %v14650_v56 = vld [vmem:[%s20019_s3 + $0xb0] sm:$0xff]  }
 0x624   :  { %v14240_v63 = vcombine.high %v1629_v53, %v1633_v3 }
 0x625   :  { %11314 = vmatmul.mubr.bf16.vlgmr.msra.gmra.mrb[4].mxu0 %v17244_v8  ;;  %11847 = vmatmul.mubr.bf16.vlgmr.msra.gmra.mrb[4].mxu1 %v17244_v8  ;;  %v1597_v8 = vld [vmem:[%s20017_s1 + $0x30d8] sm:$0xff] }
 0x626   :  { %11323 = vmatpush1.bf16.msra.mxu0 %v14181_v24  ;;  %11856 = vmatpush1.bf16.msra.mxu1 %v14183_v16  ;;  %v14208_v1 = vcombine.high %v1597_v8, %v1601_v29  ;;  %v14207_v50 = vcombine.low %v1597_v8, %v1601_v29  ;;  %v14397_v24 = vadd.f32 %v18023_v10, %v1651_v60  ;;  %v14626_v10 = vld [vmem:[%s20019_s3 + $0x80] sm:$0xff]   ;;  %v14631_v8 = vld [vmem:[%s20019_s3 + $0x50] sm:$0xff]   ;;  %v14661_v60 = vld [vmem:[%s20019_s3 + $0x108] sm:$0xff]  }
 0x627   :  { %11324 = vmatprep.subr.bf16.mxu0 %v14190_v26  ;;  %11857 = vmatprep.subr.bf16.mxu1 %v14192_v52  ;;  %v14237_v16 = vcombine.low %v1628_v13, %v1632_v14  ;;  %v14239_v26 = vcombine.low %v1629_v53, %v1633_v3  ;;  %v14623_v52 = vld [vmem:[%s20019_s3 + $0x40] sm:$0xff]   ;;  %v14632_v29 = vld [vmem:[%s20019_s3 + $0xd0] sm:$0xff]   ;;  %v14660_v3 = vld [vmem:[%s20019_s3 + $0x1c8] sm:$0xff]  }
 0x628   :  { %11354 = vmatprep.mubr.bf16.mxu0 %v14688_v28  ;;  %11887 = vmatprep.mubr.bf16.mxu1 %v14688_v28  ;;  %v1605_v28 = vld [vmem:[%s20017_s1 + $0x3118] sm:$0xff]  ;;  %v11899_v22 = vmax.f32 %v14397_v24, 0.0  ;;  %v14658_v14 = vld [vmem:[%s20019_s3 + $0x180] sm:$0xff]  }
 0x629   :  { %v14216_v40 = vcombine.high %v1605_v28, %v1609_v37  ;;  %v14215_v51 = vcombine.low %v1605_v28, %v1609_v37  ;;  %v14640_v28 = vld [vmem:[%s20019_s3 + $0xe0] sm:$0xff]   ;;  %v14667_v24 = vld [vmem:[%s20019_s3 + $0x158] sm:$0xff]  }
 0x62a   :  { %11325 = vmatpush1.bf16.msra.mxu0 %v14189_v55  ;;  %11858 = vmatpush1.bf16.msra.mxu1 %v14191_v49  ;;  %v11905_v55 = vpack.c.bf16 %v11897_v57, %v11897_v57  ;;  %v14687_v49 = vld [vmem:[%s20018_s0 + $0x60] ss:$0 sps:$4 sm:$0xff]  }
 0x62b   :  { %11326 = vmatprep.subr.bf16.mxu0 %v14198_v5  ;;  %11859 = vmatprep.subr.bf16.mxu1 %v14200_v15  ;;  %v14628_v5 = vld [vmem:[%s20019_s3 + $0xc8] sm:$0xff]   ;;  %v11907_v15 = vpack.c.bf16 %v11899_v22, %v11899_v22  ;;  %v14641_v37 = vld [vmem:[%s20019_s3 + $0x20] sm:$0xff]  }
 0x62c   :  { %v14672_v57 = vld [vmem:[%s20019_s3 + $0x1e0] sm:$0xff]  }
 0x62d   :  { %v14673_v22 = vld [vmem:[%s20019_s3 + $0x120] sm:$0xff]  }
 0x62e   :  { %11327 = vmatpush1.bf16.msra.mxu0 %v14197_v32  ;;  %11860 = vmatpush1.bf16.msra.mxu1 %v14199_v33  ;;  %v14633_v32 = vld [vmem:[%s20019_s3 + $0x10] sm:$0xff]  }
 0x62f   :  { %11328 = vmatprep.subr.bf16.mxu0 %v14206_v34  ;;  %11861 = vmatprep.subr.bf16.mxu1 %v14208_v1  ;;  %v14634_v33 = vld [vmem:[%s20019_s3 + $0x90] sm:$0xff]   ;;  %v14635_v34 = vld [vmem:[%s20019_s3 + $0x58] sm:$0xff]  }
 0x630   :  { %v14636_v1 = vld [vmem:[%s20019_s3 + $0xd8] sm:$0xff]  }
 0x632   :  { %11329 = vmatpush1.bf16.msra.mxu0 %v14205_v38  ;;  %11862 = vmatpush1.bf16.msra.mxu1 %v14207_v50  ;;  %v1638_v38 = vsub.s32 0, %v19759_v42  ;;  %v14642_v50 = vld [vmem:[%s20019_s3 + $0xa0] sm:$0xff]  }
 0x633   :  { %11330 = vmatprep.subr.bf16.mxu0 %v14214_v19  ;;  %11863 = vmatprep.subr.bf16.mxu1 %v14216_v40  ;;  %v14643_v19 = vld [vmem:[%s20019_s3 + $0x68] sm:$0xff]   ;;  %v1646_v40 = vsub.s32 2, %v19759_v42 }
 0x634   :  { %v1639_v44 = vrot.slane %v19783_v2, %v1638_v38 }
 0x636   :  { %11331 = vmatpush1.bf16.msra.mxu0 %v14213_v62  ;;  %11864 = vmatpush1.bf16.msra.mxu1 %v14215_v51  ;;  %v14647_v62 = vld [vmem:[%s20019_s3 + $0x70] sm:$0xff]   ;;  %v1647_v51 = vrot.slane %v19783_v2, %v1646_v40  ;;  %v14394_v54 = vadd.f32 %v18005_v39, %v1639_v44  ;;  %v14653_v39 = vld [vmem:[%s20019_s3 + $0x38] sm:$0xff]  }
 0x637   :  { %11332 = vmatprep.subr.bf16.mxu0 %v14222_v30  ;;  %11865 = vmatprep.subr.bf16.mxu1 %v14224_v18  ;;  %v14648_v30 = vld [vmem:[%s20019_s3 + $0xf0] sm:$0xff]  }
 0x638   :  { %v14649_v18 = vld [vmem:[%s20019_s3 + $0x30] sm:$0xff]   ;;  %v14396_v48 = vadd.f32 %v18013_v4, %v1647_v51  ;;  %v11896_v6 = vmax.f32 %v14394_v54, 0.0  ;;  %v14655_v4 = vld [vmem:[%s20019_s3 + $0x140] sm:$0xff]  }
 0x63a   :  { %11333 = vmatpush1.bf16.msra.mxu0 %v14221_v7  ;;  %11866 = vmatpush1.bf16.msra.mxu1 %v14223_v43  ;;  %v14654_v7 = vld [vmem:[%s20019_s3 + $0xb8] sm:$0xff]   ;;  %v11898_v43 = vmax.f32 %v14396_v48, 0.0  ;;  %v11904_v13 = vpack.c.bf16 %v11896_v6, %v11896_v6 }
 0x63b   :  { %11334 = vmatprep.subr.bf16.mxu0 %v14230_v46  ;;  %11867 = vmatprep.subr.bf16.mxu1 %v14232_v11  ;;  %v14656_v46 = vld [vmem:[%s20019_s3 + $0x1c0] sm:$0xff]  }
 0x63c   :  { %v14657_v11 = vld [vmem:[%s20019_s3 + $0x100] sm:$0xff]   ;;  %v11906_v53 = vpack.c.bf16 %v11898_v43, %v11898_v43 }
 0x63d   :  { %v14241_v43 = vld [vmem:[%s20021_s4] ss:$0 sm:$0xff]  ;;  %s14689_s4 = smov 127  }
 0x63e   :  { %11335 = vmatpush1.bf16.msra.mxu0 %v14229_v20  ;;  %11868 = vmatpush1.bf16.msra.mxu1 %v14231_v58  ;;  %v14662_v20 = vld [vmem:[%s20019_s3 + $0x188] sm:$0xff]   ;;  %v14663_v58 = vld [vmem:[%s20019_s3 + $0x150] sm:$0xff]  }
 0x63f   :  { %11336 = vmatprep.subr.bf16.mxu0 %v14238_v59  ;;  %11869 = vmatprep.subr.bf16.mxu1 %v14240_v63  ;;  %v14664_v59 = vld [vmem:[%s20019_s3 + $0x1d0] sm:$0xff]  }
 0x640   :  { %v14665_v63 = vld [vmem:[%s20019_s3 + $0x110] sm:$0xff]  }
 0x642   :  { %11337 = vmatpush1.bf16.msra.mxu0 %v14237_v16  ;;  %11870 = vmatpush1.bf16.msra.mxu1 %v14239_v26  ;;  %v14668_v16 = vld [vmem:[%s20019_s3 + $0x1d8] sm:$0xff]  }
 0x643   :  { %14306 = vmatprep.subr.bf16.mxu0 %v14623_v52  ;;  %14328 = vmatprep.subr.bf16.mxu1 %v14624_v12  ;;  %v14669_v26 = vld [vmem:[%s20019_s3 + $0x118] sm:$0xff]   ;;  %v14671_v12 = vld [vmem:[%s20019_s3 + $0x160] sm:$0xff]  }
 0x644   :  { %v14670_v52 = vld [vmem:[%s20019_s3 + $0x198] sm:$0xff]  }
 0x645   :  { %11355 = vmatmul.mubr.bf16.vlgmr.msra.gmra.mrb[4].mxu0 %v14687_v49  ;;  %11888 = vmatmul.mubr.bf16.vlgmr.msra.gmra.mrb[4].mxu1 %v14687_v49  ;;  %v14678_v49 = vld [vmem:[%s20019_s3 + $0x1a8] sm:$0xff]  }
 0x646   :  { %14307 = vmatpush3.bf16.msra.mxu0 %v14625_v23  ;;  %12463 = vmatprep.mubr.bf16.mxu0 %v11905_v55  ;;  %v14674_v23 = vld [vmem:[%s20019_s3 + $0x1a0] sm:$0xff]   ;;  %v14677_v55 = vld [vmem:[%s20019_s3 + $0x128] sm:$0xff]  }
 0x647   :  { %14329 = vmatpush3.bf16.msra.mxu1 %v14626_v10  ;;  %12503 = vmatprep.mubr.bf16.mxu1 %v11907_v15  ;;  %v14675_v10 = vld [vmem:[%s20019_s3 + $0x168] sm:$0xff]   ;;  %v14680_v15 = vld [vmem:[%s20019_s3 + $0x1f0] sm:$0xff]  }
 0x648   :  { %14308 = vmatprep.subr.bf16.mxu0 %v14627_v9  ;;  %14330 = vmatprep.subr.bf16.mxu1 %v14628_v5  ;;  %v14676_v9 = vld [vmem:[%s20019_s3 + $0x1e8] sm:$0xff]   ;;  %v14679_v5 = vld [vmem:[%s20019_s3 + $0x170] sm:$0xff]  }
 0x64a   :  { %14309 = vmatpush3.bf16.msra.mxu0 %v14629_v27  ;;  %v14681_v27 = vld [vmem:[%s20019_s3 + $0x130] sm:$0xff]  }
 0x64b   :  { %14331 = vmatpush3.bf16.msra.mxu1 %v14630_v45  ;;  %14310 = vmatprep.subr.bf16.mxu0 %v14631_v8  ;;  %v14682_v45 = vld [vmem:[%s20019_s3 + $0x1b0] sm:$0xff]   ;;  %v14683_v8 = vld [vmem:[%s20019_s3 + $0x178] sm:$0xff]  }
 0x64c   :  { %14332 = vmatprep.subr.bf16.mxu1 %v14632_v29  ;;  %v14684_v29 = vld [vmem:[%s20019_s3 + $0x1f8] sm:$0xff]  }
 0x64e   :  { %14311 = vmatpush3.bf16.msra.mxu0 %v14633_v32  ;;  %v14685_v32 = vld [vmem:[%s20019_s3 + $0x138] sm:$0xff]  }
 0x64f   :  { %14333 = vmatpush3.bf16.msra.mxu1 %v14634_v33  ;;  %14312 = vmatprep.subr.bf16.mxu0 %v14635_v34  ;;  %v14686_v33 = vld [vmem:[%s20019_s3 + $0x1b8] sm:$0xff]   ;;  %v1654_v34 = vsub.s32 4, %v19759_v42 }
 0x650   :  { %14334 = vmatprep.subr.bf16.mxu1 %v14636_v1  ;;  %v1662_v1 = vsub.s32 6, %v19759_v42 }
 0x652   :  { %14313 = vmatpush3.bf16.msra.mxu0 %v14637_v21  ;;  %v1658_v21 = vsub.s32 5, %v19759_v42 }
 0x653   :  { %14335 = vmatpush3.bf16.msra.mxu1 %v14638_v31  ;;  %14314 = vmatprep.subr.bf16.mxu0 %v14639_v35  ;;  %v1666_v31 = vsub.s32 7, %v19759_v42  ;;  %v1655_v35 = vrot.slane %v19783_v2, %v1654_v34 }
 0x654   :  { %14336 = vmatprep.subr.bf16.mxu1 %v14640_v28  ;;  %v1663_v28 = vrot.slane %v19783_v2, %v1662_v1 }
 0x655   :  { %v1667_v38 = vrot.slane %v19783_v2, %v1666_v31 }
 0x656   :  { %14315 = vmatpush3.bf16.msra.mxu0 %v14641_v37  ;;  %v1659_v37 = vrot.slane %v19783_v2, %v1658_v21 }
 0x657   :  { %14337 = vmatpush3.bf16.msra.mxu1 %v14642_v50  ;;  %14316 = vmatprep.subr.bf16.mxu0 %v14643_v19 }
 0x658   :  { %14338 = vmatprep.subr.bf16.mxu1 %v14644_v41 }
 0x65a   :  { %14317 = vmatpush3.bf16.msra.mxu0 %v14645_v25 }
 0x65b   :  { %14339 = vmatpush3.bf16.msra.mxu1 %v14646_v47  ;;  %14318 = vmatprep.subr.bf16.mxu0 %v14647_v62 }
 0x65c   :  { %14340 = vmatprep.subr.bf16.mxu1 %v14648_v30 }
 0x65e   :  { %14319 = vmatpush3.bf16.msra.mxu0 %v14649_v18 }
 0x65f   :  { %14341 = vmatpush3.bf16.msra.mxu1 %v14650_v56  ;;  %14320 = vmatprep.subr.bf16.mxu0 %v14651_v61 }
 0x660   :  { %14342 = vmatprep.subr.bf16.mxu1 %v14652_v0 }
 0x662   :  { %14321 = vmatpush3.bf16.msra.mxu0 %v14653_v39 }
 0x663   :  { %14343 = vmatpush3.bf16.msra.mxu1 %v14654_v7  ;;  %14350 = vmatprep.subr.bf16.mxu0 %v14655_v4 }
 0x664   :  { %14372 = vmatprep.subr.bf16.mxu1 %v14656_v46 }
 0x665   :  { %12464 = vmatmul.mubr.bf16.vlgmr.msra.gmra.mrb[8].mxu0 %v11904_v13 }
 0x666   :  { %12504 = vmatmul.mubr.bf16.vlgmr.msra.gmra.mrb[8].mxu1 %v11906_v53  ;;  %14351 = vmatpush3.bf16.msra.mxu0 %v14657_v11 }
 0x667   :  { %14373 = vmatpush3.bf16.msra.mxu1 %v14658_v14  ;;  %14352 = vmatprep.subr.bf16.mxu0 %v14659_v17 }
 0x668   :  { %14374 = vmatprep.subr.bf16.mxu1 %v14660_v3 }
 0x66a   :  { %14353 = vmatpush3.bf16.msra.mxu0 %v14661_v60 }
 0x66b   :  { %14375 = vmatpush3.bf16.msra.mxu1 %v14662_v20  ;;  %14354 = vmatprep.subr.bf16.mxu0 %v14663_v58 }
 0x66c   :  { %14376 = vmatprep.subr.bf16.mxu1 %v14664_v59 }
 0x66e   :  { %14355 = vmatpush3.bf16.msra.mxu0 %v14665_v63 }
 0x66f   :  { %14377 = vmatpush3.bf16.msra.mxu1 %v14666_v36  ;;  %14356 = vmatprep.subr.bf16.mxu0 %v14667_v24 }
 0x670   :  { %14378 = vmatprep.subr.bf16.mxu1 %v14668_v16 }
 0x672   :  { %14357 = vmatpush3.bf16.msra.mxu0 %v14669_v26 }
 0x673   :  { %14379 = vmatpush3.bf16.msra.mxu1 %v14670_v52  ;;  %14358 = vmatprep.subr.bf16.mxu0 %v14671_v12 }
 0x674   :  { %14380 = vmatprep.subr.bf16.mxu1 %v14672_v57 }
 0x676   :  { %14359 = vmatpush3.bf16.msra.mxu0 %v14673_v22 }
 0x677   :  { %14381 = vmatpush3.bf16.msra.mxu1 %v14674_v23  ;;  %14360 = vmatprep.subr.bf16.mxu0 %v14675_v10 }
 0x678   :  { %14382 = vmatprep.subr.bf16.mxu1 %v14676_v9 }
 0x67a   :  { %14361 = vmatpush3.bf16.msra.mxu0 %v14677_v55 }
 0x67b   :  { %14383 = vmatpush3.bf16.msra.mxu1 %v14678_v49  ;;  %14362 = vmatprep.subr.bf16.mxu0 %v14679_v5 }
 0x67c   :  { %14384 = vmatprep.subr.bf16.mxu1 %v14680_v15 }
 0x67e   :  { %14363 = vmatpush3.bf16.msra.mxu0 %v14681_v27 }
 0x67f   :  { %14385 = vmatpush3.bf16.msra.mxu1 %v14682_v45  ;;  %14364 = vmatprep.subr.bf16.mxu0 %v14683_v8 }
 0x680   :  { %14386 = vmatprep.subr.bf16.mxu1 %v14684_v29 }
 0x682   :  { %14365 = vmatpush3.bf16.msra.mxu0 %v14685_v32 }
 0x683   :  { %14387 = vmatpush3.bf16.msra.mxu1 %v14686_v33 }
 0x718   :  { %v11356_v50 = vpop.f32.mrb[4].mxu0  ;;  %v11889_v40 = vpop.f32.mrb[4].mxu1 }
 0x719   :  { %v14398_v19 = vadd.f32 %v11356_v50, %v1655_v35  ;;  %v11358_v41 = vpop.f32.mrb[5].mxu0  ;;  %v14400_v25 = vadd.f32 %v11889_v40, %v1663_v28  ;;  %v11891_v47 = vpop.f32.mrb[5].mxu1 }
 0x71a   :  { %v14399_v44 = vadd.f32 %v11358_v41, %v1659_v37  ;;  %v11360_v62 = vpop.f32.mrb[6].mxu0  ;;  %v14401_v30 = vadd.f32 %v11891_v47, %v1667_v38  ;;  %v11893_v18 = vpop.f32.mrb[6].mxu1 }
 0x71b   :  { %v11900_v51 = vmax.f32 %v14398_v19, 0.0  ;;  %v11361_v42 = vpop.f32.mrb[7].mxu0  ;;  %v11902_v54 = vmax.f32 %v14400_v25, 0.0  ;;  %v11894_v61 = vpop.f32.mrb[7].mxu1 }
 0x71c   :  { %v11901_v56 = vmax.f32 %v14399_v44, 0.0  ;;  %v11903_v48 = vmax.f32 %v14401_v30, 0.0 }
 0x71d   :  { %v11908_v39 = vpack.c.bf16 %v11900_v51, %v11900_v51  ;;  %v11910_v2 = vpack.c.bf16 %v11902_v54, %v11902_v54 }
 0x71e   :  { %v11909_v0 = vpack.c.bf16 %v11901_v56, %v11901_v56  ;;  %v11911_v6 = vpack.c.bf16 %v11903_v48, %v11903_v48 }
 0x720   :  { %12543 = vmatprep.mubr.bf16.mxu0 %v11909_v0  ;;  %12583 = vmatprep.mubr.bf16.mxu1 %v11911_v6 }
 0x721   :  { %12544 = vmatmul.mubr.bf16.vlgmr.msra.gmra.mrb[12].mxu0 %v11908_v39  ;;  %12584 = vmatmul.mubr.bf16.vlgmr.msra.gmra.mrb[12].mxu1 %v11910_v2 }
 0x738   :  { %v14322_v7 = vpop.f32.mrb[8].mxu0 }
 0x739   :  { %v14344_v4 = vpop.f32.mrb[8].mxu1  ;;  %v14323_v46 = vpop.f32.mrb[9].mxu0 }
 0x73a   :  { %v14324_v11 = vadd.f32 %v14323_v46, %v14322_v7  ;;  %v14345_v13 = vpop.f32.mrb[9].mxu1  ;;  %v14325_v14 = vpop.f32.mrb[10].mxu0 }
 0x73b   :  { %v14346_v17 = vadd.f32 %v14345_v13, %v14344_v4  ;;  %v14347_v53 = vpop.f32.mrb[10].mxu1  ;;  %v14326_v3 = vpop.f32.mrb[11].mxu0 }
 0x73c   :  { %v12466_v60 = vadd.f32 %v14324_v11, %v14241_v43  ;;  %v14348_v20 = vpop.f32.mrb[11].mxu1 }
 0x73e   :  { %v12506_v58 = vadd.f32 %v14346_v17, %v12466_v60 }
 0x7f4   :  { %v14366_v59 = vpop.f32.mrb[12].mxu0  ;;  %v14388_v63 = vpop.f32.mrb[12].mxu1 }
 0x7f5   :  { %v14367_v36 = vpop.f32.mrb[13].mxu0  ;;  %v14389_v16 = vpop.f32.mrb[13].mxu1 }
 0x7f6   :  { %v14368_v24 = vadd.f32 %v14367_v36, %v14366_v59  ;;  %v14369_v26 = vpop.f32.mrb[14].mxu0  ;;  %v14390_v52 = vadd.f32 %v14389_v16, %v14388_v63  ;;  %v14391_v12 = vpop.f32.mrb[14].mxu1 }
 0x7f7   :  { %v14370_v57 = vpop.f32.mrb[15].mxu0  ;;  %v14392_v23 = vpop.f32.mrb[15].mxu1 }
 0x7f8   :  { %v12546_v22 = vadd.f32 %v14368_v24, %v12506_v58 }
 0x7fa   :  { %v12586_v10 = vadd.f32 %v14390_v52, %v12546_v22 }
 0x7fc   :  { %12602 = vperm.xlu1 %14596, %v12586_v10   ;;  %12592 = vrot.lane.b32.xlu0 %v12586_v10, %s14689_s4 }
 0x86e   :  { %v12593_v9 = vpop.permute.xlu0 %12592 }
 0x86f   :  { %v12596_v55 = vsel %vm12595_vm0, %v12593_v9, 0.0 }
 0x870   :  { %12597 = vadd.xlane.f32.xlu0 %v12596_v55 }
 0x87b   :  { %v12603_v49 = vpop.permute.xlu1 %12602 }
 0x87c   :  { %v12605_v15 = vadd.f32 %v12603_v49, %v12586_v10 }
 0x8fd   :  { %v12598_v5 = vpop.xlane.xlu0 %12597 }
 0x8fe   :  { %v12600_v27 = vmul.f32 0.16666667, %v12598_v5 }
 0x900   :  { %v12606_v45 = vsub.f32 %v12605_v15, %v12600_v27 }
 0x902   :  { %12608 = vrot.lane.b32.xlu1 %v12606_v45, %s14689_s4 }
 0x974   :  { %v12609_v8 = vpop.permute.xlu1 %12608 }
 0x975   :  { %12611 = vst.msk [vmem:[%s20022_s5] sm:$0xff] %vm12595_vm0, %v12609_v8 }

</bundles_post_ra>
